<compile_context>
chip_gen: v5e
topology: v5e:2x2
jax: 0.10.0
libtpu: 0.0.40
codegen_flags: <defaults>
</compile_context>

<pallas_src>
import functools

import jax
import jax.numpy as jnp
from jax.experimental import pallas as pl
from jax.experimental.pallas import tpu as pltpu


def _center_encoder_kernel(xpad_ref, w1_ref, b1_ref, w2_ref, b2_ref,
                           wfc_ref, bfc_ref, out_ref, h1pad_ref,
                           *, B, H, W, Wp, Cin, C1, C2):
    # xpad_ref : (B, H+2, W+2, Cin)   zero-padded input block
    # w1_ref   : (9*Cin, C1)          conv1 weight, row = (ky*3+kx)*Cin + c
    # b1_ref   : (1, C1)
    # w2_ref   : (9*C1, C2)           conv2 weight, same row ordering
    # b2_ref   : (1, C2)
    # wfc_ref  : (C2, L)              transposed Linear weight
    # bfc_ref  : (1, L)
    # out_ref  : (B, L)
    # h1pad_ref: (B, H+2, Wp, C1)     VMEM scratch, Wp = roundup(W+2, 8)
    M = B * H * W
    xpad = xpad_ref[...]

    # ---- conv1 (3x3, padding=1): one fused im2col matmul, K = 9*Cin ----
    cols1 = []
    for ky in range(3):
        for kx in range(3):
            cols1.append(xpad[:, ky:ky + H, kx:kx + W, :].reshape(M, Cin))
    im2col1 = jnp.concatenate(cols1, axis=1)                     # (M, 9*Cin)
    h1 = jnp.dot(im2col1, w1_ref[...],
                 preferred_element_type=jnp.float32) + b1_ref[...]
    h1 = jnp.maximum(h1, 0.0)                                    # (M, C1)

    # ---- zero only the 1-wide spatial border of the scratch; the interior
    # is fully rewritten every step, so no full-scratch re-zeroing needed.
    h1pad_ref[:, 0:1, :, :] = jnp.zeros((B, 1, Wp, C1), jnp.float32)
    h1pad_ref[:, H + 1:H + 2, :, :] = jnp.zeros((B, 1, Wp, C1), jnp.float32)
    h1pad_ref[:, :, 0:1, :] = jnp.zeros((B, H + 2, 1, C1), jnp.float32)
    h1pad_ref[:, :, W + 1:W + 2, :] = jnp.zeros((B, H + 2, 1, C1), jnp.float32)
    h1pad_ref[:, 1:H + 1, 1:W + 1, :] = h1.reshape(B, H, W, C1)
    h1pad = h1pad_ref[...]

    # ---- conv2 (3x3, padding=1): one fused im2col matmul, K = 9*C1 ----
    cols2 = []
    for ky in range(3):
        for kx in range(3):
            cols2.append(h1pad[:, ky:ky + H, kx:kx + W, :].reshape(M, C1))
    im2col2 = jnp.concatenate(cols2, axis=1)                     # (M, 9*C1)
    h2 = jnp.dot(im2col2, w2_ref[...],
                 preferred_element_type=jnp.float32) + b2_ref[...]
    h2 = jnp.maximum(h2, 0.0)                                    # (M, C2)

    # ---- AdaptiveAvgPool2d((1,1)) == per-sample mean over H*W ----
    pooled = jnp.mean(h2.reshape(B, H * W, C2), axis=1)          # (B, C2)

    # ---- fc: Linear(C2 -> latent_dim) ----
    out_ref[...] = (jnp.dot(pooled, wfc_ref[...],
                            preferred_element_type=jnp.float32)
                    + bfc_ref[...])


def center_encoder_forward(x_nchw, params, *, block_b=8):
    """x_nchw: (N, Cin, H, W) float32 -> (N, latent_dim) float32."""
    N, Cin, H, W = x_nchw.shape
    C1 = params["w1"].shape[0]     # 32
    C2 = params["w2"].shape[0]     # 64
    L = params["wfc"].shape[0]     # latent_dim

    B = min(block_b, N)            # samples per grid step
    n_blocks = pl.cdiv(N, B)
    Npad = n_blocks * B
    Wp = ((W + 2 + 7) // 8) * 8    # scratch width padded to sublane multiple

    # Glue: NCHW -> NHWC + SAME zero padding + batch padding to a B multiple.
    # TODO(synk): for large images, mask borders inside the kernel instead of
    # materializing a padded input copy in HBM.
    x_nhwc = jnp.transpose(x_nchw, (0, 2, 3, 1)).astype(jnp.float32)
    xpad = jnp.pad(x_nhwc, ((0, Npad - N), (1, 1), (1, 1), (0, 0)))

    # Conv weights (O, I, kH, kW) -> (9*I, O) with row = (ky*3+kx)*I + c,
    # matching the im2col column ordering; Linear (L, C2) -> (C2, L).
    w1 = jnp.transpose(params["w1"], (2, 3, 1, 0)).reshape(9 * Cin, C1)
    w2 = jnp.transpose(params["w2"], (2, 3, 1, 0)).reshape(9 * C1, C2)
    b1 = params["b1"].reshape(1, C1)
    b2 = params["b2"].reshape(1, C2)
    wfc = jnp.transpose(params["wfc"], (1, 0))
    bfc = params["bfc"].reshape(1, L)

    kernel = functools.partial(_center_encoder_kernel, B=B, H=H, W=W, Wp=Wp,
                               Cin=Cin, C1=C1, C2=C2)

    out = pl.pallas_call(
        kernel,
        out_shape=jax.ShapeDtypeStruct((Npad, L), jnp.float32),
        grid_spec=pltpu.PrefetchScalarGridSpec(
            num_scalar_prefetch=0,
            grid=(n_blocks,),
            in_specs=[
                pl.BlockSpec((B, H + 2, W + 2, Cin), lambda n: (n, 0, 0, 0)),
                pl.BlockSpec((9 * Cin, C1), lambda n: (0, 0)),
                pl.BlockSpec((1, C1), lambda n: (0, 0)),
                pl.BlockSpec((9 * C1, C2), lambda n: (0, 0)),
                pl.BlockSpec((1, C2), lambda n: (0, 0)),
                pl.BlockSpec((C2, L), lambda n: (0, 0)),
                pl.BlockSpec((1, L), lambda n: (0, 0)),
            ],
            out_specs=pl.BlockSpec((B, L), lambda n: (n, 0)),
            scratch_shapes=[pltpu.VMEM((B, H + 2, Wp, C1), jnp.float32)],
        ),
        compiler_params=pltpu.CompilerParams(
            dimension_semantics=("parallel",)),
    )(xpad, w1, b1, w2, b2, wfc, bfc)
    return out[:N]


def _init_params(key, in_channels=1, latent_dim=64):
    ks = jax.random.split(key, 6)
    scale = 0.1
    return {
        "w1": scale * jax.random.normal(ks[0], (32, in_channels, 3, 3), jnp.float32),
        "b1": scale * jax.random.normal(ks[1], (32,), jnp.float32),
        "w2": scale * jax.random.normal(ks[2], (64, 32, 3, 3), jnp.float32),
        "b2": scale * jax.random.normal(ks[3], (64,), jnp.float32),
        "wfc": scale * jax.random.normal(ks[4], (latent_dim, 64), jnp.float32),
        "bfc": scale * jax.random.normal(ks[5], (latent_dim,), jnp.float32),
    }


def _reference_forward(x_nchw, p):
    """Pure-JAX reference mirroring the PyTorch forward (NCHW)."""
    dn = ("NCHW", "OIHW", "NCHW")
    y = jax.lax.conv_general_dilated(x_nchw, p["w1"], (1, 1), "SAME",
                                     dimension_numbers=dn)
    y = jax.nn.relu(y + p["b1"][None, :, None, None])
    y = jax.lax.conv_general_dilated(y, p["w2"], (1, 1), "SAME",
                                     dimension_numbers=dn)
    y = jax.nn.relu(y + p["b2"][None, :, None, None])
    feat = jnp.mean(y, axis=(2, 3))          # AdaptiveAvgPool2d((1,1)) + view
    return feat @ p["wfc"].T + p["bfc"]


if __name__ == "__main__":
    key = jax.random.PRNGKey(0)
    kx, kp = jax.random.split(key)

    N, Cin, H, W = 2, 1, 16, 16
    latent_dim = 64

    x = jax.random.normal(kx, (N, Cin, H, W), jnp.float32)
    params = _init_params(kp, in_channels=Cin, latent_dim=latent_dim)

    out = center_encoder_forward(x, params)
    out = jax.block_until_ready(out)

    ref = jax.block_until_ready(_reference_forward(x, params))
    assert out.shape == (N, latent_dim)
    assert jnp.allclose(out, ref, atol=1e-4, rtol=1e-4), (
        f"max abs err {jnp.max(jnp.abs(out - ref))}")

    print("KERNEL_OK")
</pallas_src>

<mosaic_0001>
module attributes {stable_mosaic.version = 11 : i64} {
  func.func @_center_encoder_kernel(%arg0: i32, %arg1: memref<2x18x18x1xf32, #tpu.memory_space<vmem>>, %arg2: memref<9x32xf32, #tpu.memory_space<vmem>>, %arg3: memref<1x32xf32, #tpu.memory_space<vmem>>, %arg4: memref<288x64xf32, #tpu.memory_space<vmem>>, %arg5: memref<1x64xf32, #tpu.memory_space<vmem>>, %arg6: memref<64x64xf32, #tpu.memory_space<vmem>>, %arg7: memref<1x64xf32, #tpu.memory_space<vmem>>, %arg8: memref<2x64xf32, #tpu.memory_space<vmem>>, %arg9: memref<2x18x24x32xf32, #tpu.memory_space<vmem>>) attributes {dimension_semantics = [#tpu.dimension_semantics<parallel>], iteration_bounds = array<i64: 1>, scalar_prefetch = 0 : i64, scratch_operands = 1 : i64, tpu.core_type = #tpu.core_type<tc>, window_params = [{transform_indices = @transform_0, window_bounds = array<i64: 2, 18, 18, 1>}, {pipeline_mode = #tpu.pipeline_mode<synchronous>, transform_indices = @transform_1, window_bounds = array<i64: 9, 32>}, {pipeline_mode = #tpu.pipeline_mode<synchronous>, transform_indices = @transform_2, window_bounds = array<i64: 1, 32>}, {pipeline_mode = #tpu.pipeline_mode<synchronous>, transform_indices = @transform_3, window_bounds = array<i64: 288, 64>}, {pipeline_mode = #tpu.pipeline_mode<synchronous>, transform_indices = @transform_4, window_bounds = array<i64: 1, 64>}, {pipeline_mode = #tpu.pipeline_mode<synchronous>, transform_indices = @transform_5, window_bounds = array<i64: 64, 64>}, {pipeline_mode = #tpu.pipeline_mode<synchronous>, transform_indices = @transform_6, window_bounds = array<i64: 1, 64>}, {transform_indices = @transform_7, window_bounds = array<i64: 2, 64>}]} {
    %c0 = arith.constant 0 : index
    %c0_0 = arith.constant 0 : index
    %c0_1 = arith.constant 0 : index
    %c0_2 = arith.constant 0 : index
    %0 = vector.load %arg1[%c0, %c0_0, %c0_1, %c0_2] : memref<2x18x18x1xf32, #tpu.memory_space<vmem>>, vector<2x18x18x1xf32>
    %1 = vector.extract_strided_slice %0 {offsets = [0, 0, 0, 0], sizes = [2, 16, 16, 1], strides = [1, 1, 1, 1]} : vector<2x18x18x1xf32> to vector<2x16x16x1xf32>
    %2 = vector.shape_cast %1 : vector<2x16x16x1xf32> to vector<512x1xf32>
    %3 = vector.extract_strided_slice %0 {offsets = [0, 0, 1, 0], sizes = [2, 16, 16, 1], strides = [1, 1, 1, 1]} : vector<2x18x18x1xf32> to vector<2x16x16x1xf32>
    %4 = vector.shape_cast %3 : vector<2x16x16x1xf32> to vector<512x1xf32>
    %5 = vector.extract_strided_slice %0 {offsets = [0, 0, 2, 0], sizes = [2, 16, 16, 1], strides = [1, 1, 1, 1]} : vector<2x18x18x1xf32> to vector<2x16x16x1xf32>
    %6 = vector.shape_cast %5 : vector<2x16x16x1xf32> to vector<512x1xf32>
    %7 = vector.extract_strided_slice %0 {offsets = [0, 1, 0, 0], sizes = [2, 16, 16, 1], strides = [1, 1, 1, 1]} : vector<2x18x18x1xf32> to vector<2x16x16x1xf32>
    %8 = vector.shape_cast %7 : vector<2x16x16x1xf32> to vector<512x1xf32>
    %9 = vector.extract_strided_slice %0 {offsets = [0, 1, 1, 0], sizes = [2, 16, 16, 1], strides = [1, 1, 1, 1]} : vector<2x18x18x1xf32> to vector<2x16x16x1xf32>
    %10 = vector.shape_cast %9 : vector<2x16x16x1xf32> to vector<512x1xf32>
    %11 = vector.extract_strided_slice %0 {offsets = [0, 1, 2, 0], sizes = [2, 16, 16, 1], strides = [1, 1, 1, 1]} : vector<2x18x18x1xf32> to vector<2x16x16x1xf32>
    %12 = vector.shape_cast %11 : vector<2x16x16x1xf32> to vector<512x1xf32>
    %13 = vector.extract_strided_slice %0 {offsets = [0, 2, 0, 0], sizes = [2, 16, 16, 1], strides = [1, 1, 1, 1]} : vector<2x18x18x1xf32> to vector<2x16x16x1xf32>
    %14 = vector.shape_cast %13 : vector<2x16x16x1xf32> to vector<512x1xf32>
    %15 = vector.extract_strided_slice %0 {offsets = [0, 2, 1, 0], sizes = [2, 16, 16, 1], strides = [1, 1, 1, 1]} : vector<2x18x18x1xf32> to vector<2x16x16x1xf32>
    %16 = vector.shape_cast %15 : vector<2x16x16x1xf32> to vector<512x1xf32>
    %17 = vector.extract_strided_slice %0 {offsets = [0, 2, 2, 0], sizes = [2, 16, 16, 1], strides = [1, 1, 1, 1]} : vector<2x18x18x1xf32> to vector<2x16x16x1xf32>
    %18 = vector.shape_cast %17 : vector<2x16x16x1xf32> to vector<512x1xf32>
    %19 = tpu.concatenate %2, %4, %6, %8, %10, %12, %14, %16, %18 in 1 : vector<512x1xf32>, vector<512x1xf32>, vector<512x1xf32>, vector<512x1xf32>, vector<512x1xf32>, vector<512x1xf32>, vector<512x1xf32>, vector<512x1xf32>, vector<512x1xf32> -> vector<512x9xf32>
    %c0_3 = arith.constant 0 : index
    %c0_4 = arith.constant 0 : index
    %20 = vector.load %arg2[%c0_3, %c0_4] : memref<9x32xf32, #tpu.memory_space<vmem>>, vector<9x32xf32>
    %cst = arith.constant dense<0.000000e+00> : vector<512x32xf32>
    %21 = tpu.matmul %19, %20, %cst {dimension_numbers = #tpu.dot_dimension_numbers<[1], [0], [0], [1], [0, 0, 1, 1], [], []>} : vector<512x9xf32>, vector<9x32xf32>, vector<512x32xf32> -> vector<512x32xf32>
    %c0_5 = arith.constant 0 : index
    %c0_6 = arith.constant 0 : index
    %22 = vector.load %arg3[%c0_5, %c0_6] : memref<1x32xf32, #tpu.memory_space<vmem>>, vector<1x32xf32>
    %23 = vector.broadcast %22 : vector<1x32xf32> to vector<512x32xf32>
    %24 = arith.addf %21, %23 : vector<512x32xf32>
    %cst_7 = arith.constant 0.000000e+00 : f32
    %25 = vector.broadcast %cst_7 : f32 to vector<512x32xf32>
    %26 = arith.maximumf %24, %25 : vector<512x32xf32>
    %cst_8 = arith.constant 0.000000e+00 : f32
    %27 = vector.broadcast %cst_8 : f32 to vector<2x1x24x32xf32>
    %c0_9 = arith.constant 0 : index
    %c0_10 = arith.constant 0 : index
    %c0_11 = arith.constant 0 : index
    %c0_12 = arith.constant 0 : index
    %28 = vector.load %arg9[%c0_9, %c0_10, %c0_11, %c0_12] : memref<2x18x24x32xf32, #tpu.memory_space<vmem>>, vector<2x1x24x32xf32>
    tpu.vector_store %arg9[%c0_9, %c0_10, %c0_11, %c0_12], %27 {strides = array<i32>} : memref<2x18x24x32xf32, #tpu.memory_space<vmem>>, vector<2x1x24x32xf32>,
    %cst_13 = arith.constant 0.000000e+00 : f32
    %29 = vector.broadcast %cst_13 : f32 to vector<2x1x24x32xf32>
    %c0_14 = arith.constant 0 : index
    %c17 = arith.constant 17 : index
    %c0_15 = arith.constant 0 : index
    %c0_16 = arith.constant 0 : index
    %30 = vector.load %arg9[%c0_14, %c17, %c0_15, %c0_16] : memref<2x18x24x32xf32, #tpu.memory_space<vmem>>, vector<2x1x24x32xf32>
    tpu.vector_store %arg9[%c0_14, %c17, %c0_15, %c0_16], %29 {strides = array<i32>} : memref<2x18x24x32xf32, #tpu.memory_space<vmem>>, vector<2x1x24x32xf32>,
    %cst_17 = arith.constant 0.000000e+00 : f32
    %31 = vector.broadcast %cst_17 : f32 to vector<2x18x1x32xf32>
    %c0_18 = arith.constant 0 : index
    %c0_19 = arith.constant 0 : index
    %c0_20 = arith.constant 0 : index
    %c0_21 = arith.constant 0 : index
    %32 = vector.load %arg9[%c0_18, %c0_19, %c0_20, %c0_21] : memref<2x18x24x32xf32, #tpu.memory_space<vmem>>, vector<2x18x1x32xf32>
    tpu.vector_store %arg9[%c0_18, %c0_19, %c0_20, %c0_21], %31 {strides = array<i32>} : memref<2x18x24x32xf32, #tpu.memory_space<vmem>>, vector<2x18x1x32xf32>,
    %cst_22 = arith.constant 0.000000e+00 : f32
    %33 = vector.broadcast %cst_22 : f32 to vector<2x18x1x32xf32>
    %c0_23 = arith.constant 0 : index
    %c0_24 = arith.constant 0 : index
    %c17_25 = arith.constant 17 : index
    %c0_26 = arith.constant 0 : index
    %34 = vector.load %arg9[%c0_23, %c0_24, %c17_25, %c0_26] : memref<2x18x24x32xf32, #tpu.memory_space<vmem>>, vector<2x18x1x32xf32>
    tpu.vector_store %arg9[%c0_23, %c0_24, %c17_25, %c0_26], %33 {strides = array<i32>} : memref<2x18x24x32xf32, #tpu.memory_space<vmem>>, vector<2x18x1x32xf32>,
    %35 = vector.shape_cast %26 : vector<512x32xf32> to vector<2x16x16x32xf32>
    %c0_27 = arith.constant 0 : index
    %c1 = arith.constant 1 : index
    %c1_28 = arith.constant 1 : index
    %c0_29 = arith.constant 0 : index
    %36 = vector.load %arg9[%c0_27, %c1, %c1_28, %c0_29] : memref<2x18x24x32xf32, #tpu.memory_space<vmem>>, vector<2x16x16x32xf32>
    tpu.vector_store %arg9[%c0_27, %c1, %c1_28, %c0_29], %35 {strides = array<i32>} : memref<2x18x24x32xf32, #tpu.memory_space<vmem>>, vector<2x16x16x32xf32>,
    %c0_30 = arith.constant 0 : index
    %c0_31 = arith.constant 0 : index
    %c0_32 = arith.constant 0 : index
    %c0_33 = arith.constant 0 : index
    %37 = vector.load %arg9[%c0_30, %c0_31, %c0_32, %c0_33] : memref<2x18x24x32xf32, #tpu.memory_space<vmem>>, vector<2x18x24x32xf32>
    %38 = vector.extract_strided_slice %37 {offsets = [0, 0, 0, 0], sizes = [2, 16, 16, 32], strides = [1, 1, 1, 1]} : vector<2x18x24x32xf32> to vector<2x16x16x32xf32>
    %39 = vector.shape_cast %38 : vector<2x16x16x32xf32> to vector<512x32xf32>
    %40 = vector.extract_strided_slice %37 {offsets = [0, 0, 1, 0], sizes = [2, 16, 16, 32], strides = [1, 1, 1, 1]} : vector<2x18x24x32xf32> to vector<2x16x16x32xf32>
    %41 = vector.shape_cast %40 : vector<2x16x16x32xf32> to vector<512x32xf32>
    %42 = vector.extract_strided_slice %37 {offsets = [0, 0, 2, 0], sizes = [2, 16, 16, 32], strides = [1, 1, 1, 1]} : vector<2x18x24x32xf32> to vector<2x16x16x32xf32>
    %43 = vector.shape_cast %42 : vector<2x16x16x32xf32> to vector<512x32xf32>
    %44 = vector.extract_strided_slice %37 {offsets = [0, 1, 0, 0], sizes = [2, 16, 16, 32], strides = [1, 1, 1, 1]} : vector<2x18x24x32xf32> to vector<2x16x16x32xf32>
    %45 = vector.shape_cast %44 : vector<2x16x16x32xf32> to vector<512x32xf32>
    %46 = vector.extract_strided_slice %37 {offsets = [0, 1, 1, 0], sizes = [2, 16, 16, 32], strides = [1, 1, 1, 1]} : vector<2x18x24x32xf32> to vector<2x16x16x32xf32>
    %47 = vector.shape_cast %46 : vector<2x16x16x32xf32> to vector<512x32xf32>
    %48 = vector.extract_strided_slice %37 {offsets = [0, 1, 2, 0], sizes = [2, 16, 16, 32], strides = [1, 1, 1, 1]} : vector<2x18x24x32xf32> to vector<2x16x16x32xf32>
    %49 = vector.shape_cast %48 : vector<2x16x16x32xf32> to vector<512x32xf32>
    %50 = vector.extract_strided_slice %37 {offsets = [0, 2, 0, 0], sizes = [2, 16, 16, 32], strides = [1, 1, 1, 1]} : vector<2x18x24x32xf32> to vector<2x16x16x32xf32>
    %51 = vector.shape_cast %50 : vector<2x16x16x32xf32> to vector<512x32xf32>
    %52 = vector.extract_strided_slice %37 {offsets = [0, 2, 1, 0], sizes = [2, 16, 16, 32], strides = [1, 1, 1, 1]} : vector<2x18x24x32xf32> to vector<2x16x16x32xf32>
    %53 = vector.shape_cast %52 : vector<2x16x16x32xf32> to vector<512x32xf32>
    %54 = vector.extract_strided_slice %37 {offsets = [0, 2, 2, 0], sizes = [2, 16, 16, 32], strides = [1, 1, 1, 1]} : vector<2x18x24x32xf32> to vector<2x16x16x32xf32>
    %55 = vector.shape_cast %54 : vector<2x16x16x32xf32> to vector<512x32xf32>
    %56 = tpu.concatenate %39, %41, %43, %45, %47, %49, %51, %53, %55 in 1 : vector<512x32xf32>, vector<512x32xf32>, vector<512x32xf32>, vector<512x32xf32>, vector<512x32xf32>, vector<512x32xf32>, vector<512x32xf32>, vector<512x32xf32>, vector<512x32xf32> -> vector<512x288xf32>
    %c0_34 = arith.constant 0 : index
    %c0_35 = arith.constant 0 : index
    %57 = vector.load %arg4[%c0_34, %c0_35] : memref<288x64xf32, #tpu.memory_space<vmem>>, vector<288x64xf32>
    %cst_36 = arith.constant dense<0.000000e+00> : vector<512x64xf32>
    %58 = tpu.matmul %56, %57, %cst_36 {dimension_numbers = #tpu.dot_dimension_numbers<[1], [0], [0], [1], [0, 0, 1, 1], [], []>} : vector<512x288xf32>, vector<288x64xf32>, vector<512x64xf32> -> vector<512x64xf32>
    %c0_37 = arith.constant 0 : index
    %c0_38 = arith.constant 0 : index
    %59 = vector.load %arg5[%c0_37, %c0_38] : memref<1x64xf32, #tpu.memory_space<vmem>>, vector<1x64xf32>
    %60 = vector.broadcast %59 : vector<1x64xf32> to vector<512x64xf32>
    %61 = arith.addf %58, %60 : vector<512x64xf32>
    %cst_39 = arith.constant 0.000000e+00 : f32
    %62 = vector.broadcast %cst_39 : f32 to vector<512x64xf32>
    %63 = arith.maximumf %61, %62 : vector<512x64xf32>
    %64 = vector.shape_cast %63 : vector<512x64xf32> to vector<2x256x64xf32>
    %cst_40 = arith.constant dense<0.000000e+00> : vector<2x64xf32>
    %65 = vector.multi_reduction <add>, %64, %cst_40 [1] : vector<2x256x64xf32> to vector<2x64xf32>
    %cst_41 = arith.constant 2.560000e+02 : f32
    %66 = vector.broadcast %cst_41 : f32 to vector<2x64xf32>
    %67 = arith.divf %65, %66 : vector<2x64xf32>
    %c0_42 = arith.constant 0 : index
    %c0_43 = arith.constant 0 : index
    %68 = vector.load %arg6[%c0_42, %c0_43] : memref<64x64xf32, #tpu.memory_space<vmem>>, vector<64x64xf32>
    %cst_44 = arith.constant dense<0.000000e+00> : vector<2x64xf32>
    %69 = tpu.matmul %67, %68, %cst_44 {dimension_numbers = #tpu.dot_dimension_numbers<[1], [0], [0], [1], [0, 0, 1, 1], [], []>} : vector<2x64xf32>, vector<64x64xf32>, vector<2x64xf32> -> vector<2x64xf32>
    %c0_45 = arith.constant 0 : index
    %c0_46 = arith.constant 0 : index
    %70 = vector.load %arg7[%c0_45, %c0_46] : memref<1x64xf32, #tpu.memory_space<vmem>>, vector<1x64xf32>
    %71 = vector.broadcast %70 : vector<1x64xf32> to vector<2x64xf32>
    %72 = arith.addf %69, %71 : vector<2x64xf32>
    %c0_47 = arith.constant 0 : index
    %c0_48 = arith.constant 0 : index
    %73 = vector.load %arg8[%c0_47, %c0_48] : memref<2x64xf32, #tpu.memory_space<vmem>>, vector<2x64xf32>
    tpu.vector_store %arg8[%c0_47, %c0_48], %72 {strides = array<i32>} : memref<2x64xf32, #tpu.memory_space<vmem>>, vector<2x64xf32>,
    return
  }
  func.func @transform_0(%arg0: i32) -> (i32, i32, i32, i32) {
    %c0_i32 = arith.constant 0 : i32
    %c0_i32_0 = arith.constant 0 : i32
    %c0_i32_1 = arith.constant 0 : i32
    %c0_i32_2 = arith.constant 0 : i32
    return %arg0, %c0_i32, %c0_i32_0, %c0_i32_1 : i32, i32, i32, i32
  }
  func.func @transform_1(%arg0: i32) -> (i32, i32) {
    %c0_i32 = arith.constant 0 : i32
    %c0_i32_0 = arith.constant 0 : i32
    %c0_i32_1 = arith.constant 0 : i32
    return %c0_i32, %c0_i32_0 : i32, i32
  }
  func.func @transform_2(%arg0: i32) -> (i32, i32) {
    %c0_i32 = arith.constant 0 : i32
    %c0_i32_0 = arith.constant 0 : i32
    %c0_i32_1 = arith.constant 0 : i32
    return %c0_i32, %c0_i32_0 : i32, i32
  }
  func.func @transform_3(%arg0: i32) -> (i32, i32) {
    %c0_i32 = arith.constant 0 : i32
    %c0_i32_0 = arith.constant 0 : i32
    %c0_i32_1 = arith.constant 0 : i32
    return %c0_i32, %c0_i32_0 : i32, i32
  }
  func.func @transform_4(%arg0: i32) -> (i32, i32) {
    %c0_i32 = arith.constant 0 : i32
    %c0_i32_0 = arith.constant 0 : i32
    %c0_i32_1 = arith.constant 0 : i32
    return %c0_i32, %c0_i32_0 : i32, i32
  }
  func.func @transform_5(%arg0: i32) -> (i32, i32) {
    %c0_i32 = arith.constant 0 : i32
    %c0_i32_0 = arith.constant 0 : i32
    %c0_i32_1 = arith.constant 0 : i32
    return %c0_i32, %c0_i32_0 : i32, i32
  }
  func.func @transform_6(%arg0: i32) -> (i32, i32) {
    %c0_i32 = arith.constant 0 : i32
    %c0_i32_0 = arith.constant 0 : i32
    %c0_i32_1 = arith.constant 0 : i32
    return %c0_i32, %c0_i32_0 : i32, i32
  }
  func.func @transform_7(%arg0: i32) -> (i32, i32) {
    %c0_i32 = arith.constant 0 : i32
    %c0_i32_0 = arith.constant 0 : i32
    return %arg0, %c0_i32 : i32, i32
  }
}

</mosaic_0001>

<bundles_post_ra>
// kernel: tpu_custom_call.1
= control target key start
LH: loop header
LB: loop body
LE: loop exit
PB: predicated region body
PF: predicated region fallthrough
CT: control target
= control target key end

     0   :  { %vm231_vm0 = vcmask 1046528   ;;  %s7909_s19 = smov 1   ;;  %s15185_s0 = inlined_call_operand.vmem [shape: f32[2,18,18,1], index: 0, kind: input, shape index: {}]   ;;  %s15186_s1 = inlined_call_operand.vmem [shape: f32[9,32], index: 1, kind: input, shape index: {}]   ;;  %s15187_s2 = inlined_call_operand.vmem [shape: f32[1,32], index: 2, kind: input, shape index: {}]   ;;  %s15188_s3 = inlined_call_operand.vmem [shape: f32[288,64], index: 3, kind: input, shape index: {}]   ;;  %s15189_s4 = inlined_call_operand.vmem [shape: f32[1,64], index: 4, kind: input, shape index: {}]   ;;  %s15190_s5 = inlined_call_operand.vmem [shape: f32[64,64], index: 5, kind: input, shape index: {}]   ;;  %s15191_s6 = inlined_call_operand.vmem [shape: f32[1,64], index: 6, kind: input, shape index: {}]   ;;  %s15192_s7 = inlined_call_operand.hbm [shape: f32[2,64], index: 7, kind: output, shape index: {}]  }
   0x1   :  { %v7966_v0 = vld [vmem:[%s15185_s0 + $0x30] sm:$0xff]  ;;  %v7971_v1 = vld [vmem:[%s15185_s0 + $0x38] sm:$0xff]  ;;  %v7983_v5 = vld [vmem:[%s15185_s0 + $0x20] sm:$0xff] }
   0x2   :  { %v7976_v2 = vld [vmem:[%s15185_s0 + $0x18] sm:$0xff]  ;;  %v242_v3 = vrot.slane %v7966_v0, 1  ;;  %v243_v4 = vrot.slane %v7971_v1, 1  ;;  %v7989_v7 = vld [vmem:[%s15185_s0] sm:$0xff]  ;;  %v7994_v8 = vld [vmem:[%s15185_s0 + $0x8] sm:$0xff]  ;;  %v238_v9 = vrot.slane %v7983_v5, 1 }
   0x3   :  { %v237_v6 = vrot.slane %v7976_v2, 1  ;;  %v232_v10 = vrot.slane %v7989_v7, 1  ;;  %v233_v11 = vrot.slane %v7994_v8, 1  ;;  %v8002_v12 = vld [vmem:[%s15185_s0 + $0x40] sm:$0x3]  ;;  %v8044_v25 = vld [vmem:[%s15185_s0 + $0x68] sm:$0xff] }
   0x4   :  { %v8005_v13 = vsel %vm231_vm0, %v242_v3, %v243_v4  ;;  %v8010_v14 = vld [vmem:[%s15185_s0 + $0x28] sm:$0x3]  ;;  %v8015_v15 = vld [vmem:[%s15185_s0 + $0x10] sm:$0x3]  ;;  %v245_v18 = vrot.slane %v8002_v12, 1  ;;  %v8039_v24 = vld [vmem:[%s15185_s0 + $0x60] sm:$0xff] }
   0x5   :  { %15651 = vst [vmem:[#allocation6_spill] sm:$0xff] %v8005_v13  ;;  %613 = vrot.lane.b32.xlu2 %v8005_v13, %s7909_s19  ;;  %v8020_v16 = vsel %vm231_vm0, %v237_v6, %v238_v9  ;;  %v234_v17 = vsel %vm231_vm0, %v232_v10, %v233_v11  ;;  %v240_v19 = vrot.slane %v8010_v14, 1  ;;  %v235_v20 = vrot.slane %v8015_v15, 1  ;;  %v8049_v26 = vld [vmem:[%s15185_s0 + $0x50] sm:$0xff]  ;;  %v8054_v27 = vld [vmem:[%s15185_s0 + $0x58] sm:$0x3] }
   0x6   :  { %15652 = vst [vmem:[#allocation7_spill] sm:$0xff] %v8020_v16  ;;  %609 = vrot.lane.b32.xlu1 %v8020_v16, %s7909_s19  ;;  %605 = vrot.lane.b32.xlu0 %v234_v17, %s7909_s19  ;;  %v8030_v21 = vsel %vm231_vm0, %v243_v4, %v245_v18  ;;  %v8059_v28 = vld [vmem:[%s15185_s0 + $0x48] sm:$0xff] }
   0x7   :  { %15653 = vst [vmem:[#allocation8_spill] sm:$0xff] %v8030_v21  ;;  %v8033_v22 = vsel %vm231_vm0, %v238_v9, %v240_v19  ;;  %v236_v23 = vsel %vm231_vm0, %v233_v11, %v235_v20 }
   0x8   :  { %15654 = vst [vmem:[#allocation9_spill] sm:$0xff] %v8033_v22 }
   0xd   :  { %615 = vrot.lane.b32.xlu2 %v8030_v21, %s7909_s19 }
   0xe   :  { %12 = vsyncpa [#allocation4], 0  ;;  %611 = vrot.lane.b32.xlu1 %v8033_v22, %s7909_s19  ;;  %607 = vrot.lane.b32.xlu0 %v236_v23, %s7909_s19  ;;  %v252_v29 = vrot.slane %v8039_v24, 1  ;;  %v253_v30 = vrot.slane %v8044_v25, 1  ;;  %v248_v31 = vrot.slane %v8049_v26, 1  ;;  %v250_v32 = vrot.slane %v8054_v27, 1 }
   0xf   :  { %v247_v33 = vrot.slane %v8059_v28, 1  ;;  %v8083_v37 = vld [vmem:[%s15185_s0 + $0x80] sm:$0xff]  ;;  %v8088_v38 = vld [vmem:[%s15185_s0 + $0x88] sm:$0x3]  ;;  %v8093_v39 = vld [vmem:[%s15185_s0 + $0x78] sm:$0xff]  ;;  %vm392_vm1 = vcmask 1045504  }
  0x10   :  { %v8072_v34 = vsel %vm231_vm0, %v252_v29, %v253_v30  ;;  %v8075_v35 = vsel %vm231_vm0, %v248_v31, %v250_v32  ;;  %v8098_v40 = vld [vmem:[%s15185_s0 + $0x70] sm:$0x3]  ;;  %v258_v41 = vrot.slane %v8083_v37, 1  ;;  %v260_v42 = vrot.slane %v8088_v38, 1  ;;  %v8122_v48 = vld [vmem:[%s15185_s0 + $0xa8] sm:$0xff]  ;;  %v8132_v50 = vld [vmem:[%s15185_s0 + $0x98] sm:$0xff] }
  0x11   :  { %15655 = vst [vmem:[#allocation10_spill] sm:$0xff] %v8072_v34  ;;  %v8078_v36 = vsel %vm231_vm0, %v247_v33, %v248_v31  ;;  %v257_v43 = vrot.slane %v8093_v39, 1  ;;  %v255_v44 = vrot.slane %v8098_v40, 1  ;;  %v8127_v49 = vld [vmem:[%s15185_s0 + $0xb0] sm:$0xff]  ;;  %v8137_v51 = vld [vmem:[%s15185_s0 + $0xa0] sm:$0x3] }
  0x12   :  { %15656 = vst [vmem:[#allocation11_spill] sm:$0xff] %v8075_v35  ;;  %v8111_v45 = vsel %vm231_vm0, %v258_v41, %v260_v42  ;;  %v8142_v52 = vld [vmem:[%s15185_s0 + $0x90] sm:$0xff]  ;;  %v267_v53 = vrot.slane %v8122_v48, 1  ;;  %v268_v54 = vrot.slane %v8127_v49, 1  ;;  %v263_v55 = vrot.slane %v8132_v50, 1  ;;  %v8167_v61 = vld [vmem:[%s15185_s0 + $0xc8] sm:$0xff] }
  0x13   :  { %15657 = vst [vmem:[#allocation12_spill] sm:$0xff] %v8078_v36  ;;  %v8114_v46 = vsel %vm231_vm0, %v257_v43, %v258_v41  ;;  %v8117_v47 = vsel %vm231_vm0, %v253_v30, %v255_v44  ;;  %v265_v56 = vrot.slane %v8137_v51, 1  ;;  %v262_v57 = vrot.slane %v8142_v52, 1  ;;  %v8172_v62 = vld [vmem:[%s15185_s0 + $0xd0] sm:$0x3]  ;;  %v8177_v63 = vld [vmem:[%s15185_s0 + $0xc0] sm:$0xff] }
  0x14   :  { %15658 = vst [vmem:[#allocation13_spill] sm:$0xff] %v8111_v45  ;;  %v8156_v58 = vsel %vm231_vm0, %v267_v53, %v268_v54  ;;  %v8182_v3 = vld [vmem:[%s15185_s0 + $0xb8] sm:$0x3]  ;;  %v273_v4 = vrot.slane %v8167_v61, 1  ;;  %v275_v6 = vrot.slane %v8172_v62, 1  ;;  %v272_v9 = vrot.slane %v8177_v63, 1 }
  0x15   :  { %621 = vrot.lane.b32.xlu2 %v8072_v34, %s7909_s19  ;;  %15659 = vst [vmem:[#allocation14_spill] sm:$0xff] %v8114_v46  ;;  %v8159_v59 = vsel %vm231_vm0, %v263_v55, %v265_v56  ;;  %v8162_v60 = vsel %vm231_vm0, %v262_v57, %v263_v55  ;;  %v270_v10 = vrot.slane %v8182_v3, 1  ;;  %v8206_v19 = vld [vmem:[%s15185_s0 + $0xf0] sm:$0xff]  ;;  %v8211_v20 = vld [vmem:[%s15185_s0 + $0xf8] sm:$0xff]  ;;  %v8216_v23 = vld [vmem:[%s15185_s0 + $0xe0] sm:$0xff]  ;;  %s7910_s17 = smov 2  }
  0x16   :  { %619 = vrot.lane.b32.xlu1 %v8075_v35, %s7909_s19  ;;  %617 = vrot.lane.b32.xlu0 %v8078_v36, %s7909_s19  ;;  %15660 = vst [vmem:[#allocation15_spill] sm:$0xff] %v8117_v47  ;;  %v8195_v11 = vsel %vm231_vm0, %v273_v4, %v275_v6  ;;  %v8198_v17 = vsel %vm231_vm0, %v272_v9, %v273_v4  ;;  %v8221_v29 = vld [vmem:[%s15185_s0 + $0xe8] sm:$0x3]  ;;  %v8226_v30 = vld [vmem:[%s15185_s0 + $0xd8] sm:$0xff]  ;;  %v282_v31 = vrot.slane %v8206_v19, 1  ;;  %v283_v32 = vrot.slane %v8211_v20, 1 }
  0x17   :  { %15661 = vst [vmem:[#allocation16_spill] sm:$0xff] %v8156_v58  ;;  %v8201_v18 = vsel %vm231_vm0, %v268_v54, %v270_v10  ;;  %v278_v33 = vrot.slane %v8216_v23, 1  ;;  %v280_v41 = vrot.slane %v8221_v29, 1  ;;  %v277_v42 = vrot.slane %v8226_v30, 1  ;;  %v8251_v54 = vld [vmem:[%s15185_s0 + $0x110] sm:$0xff]  ;;  %v8261_v56 = vld [vmem:[%s15185_s0 + $0x108] sm:$0xff] }
  0x18   :  { %15662 = vst [vmem:[#allocation17_spill] sm:$0xff] %v8159_v59  ;;  %v8240_v43 = vsel %vm231_vm0, %v282_v31, %v283_v32  ;;  %v8256_v55 = vld [vmem:[%s15185_s0 + $0x118] sm:$0x3]  ;;  %v8266_v57 = vld [vmem:[%s15185_s0 + $0x100] sm:$0x3]  ;;  %v288_v4 = vrot.slane %v8251_v54, 1 }
  0x19   :  { %15663 = vst [vmem:[#allocation18_spill] sm:$0xff] %v8162_v60  ;;  %v8243_v44 = vsel %vm231_vm0, %v278_v33, %v280_v41  ;;  %v8246_v53 = vsel %vm231_vm0, %v277_v42, %v278_v33  ;;  %v290_v6 = vrot.slane %v8256_v55, 1  ;;  %v287_v9 = vrot.slane %v8261_v56, 1  ;;  %v8290_v42 = vld [vmem:[%s15185_s0 + $0x138] sm:$0xff]  ;;  %s7911_s20 = smov 3   ;;  %s7912_s16 = smov 4  }
  0x1a   :  { %15664 = vst [vmem:[#allocation19_spill] sm:$0xff] %v8195_v11  ;;  %v285_v10 = vrot.slane %v8266_v57, 1  ;;  %v8422_v36 = vld [vmem:[%s15185_s0 + $0x1d8] sm:$0x3]  ;;  %s7913_s21 = smov 5   ;;  %s7914_s22 = smov 6  }
  0x1b   :  { %15665 = vst [vmem:[#allocation20_spill] sm:$0xff] %v8198_v17  ;;  %v8279_v31 = vsel %vm231_vm0, %v288_v4, %v290_v6  ;;  %v8282_v33 = vsel %vm231_vm0, %v287_v9, %v288_v4  ;;  %v8300_v6 = vld [vmem:[%s15185_s0 + $0x128] sm:$0xff]  ;;  %v8310_v4 = vld [vmem:[%s15185_s0 + $0x120] sm:$0xff]  ;;  %v297_v9 = vrot.slane %v8290_v42, 1  ;;  %s7915_s29 = smov 7   ;;  %s7916_s10 = smov 8  }
  0x1c   :  { %15666 = vst [vmem:[#allocation21_spill] sm:$0xff] %v8201_v18  ;;  %v8285_v41 = vsel %vm231_vm0, %v283_v32, %v285_v10  ;;  %v8305_v32 = vld [vmem:[%s15185_s0 + $0x130] sm:$0x3]  ;;  %vm2860_vm2 = vcmask 1040384   ;;  %vm2141_vm3 = vcmask 7168   ;;  %vm2271_vm4 = vcmask 23552  }
  0x1d   :  { %627 = vrot.lane.b32.xlu2 %v8111_v45, %s7909_s19  ;;  %15667 = vst [vmem:[#allocation22_spill] sm:$0xff] %v8240_v43  ;;  %vm2206_vm5 = vcmask 15360   ;;  %vm2336_vm6 = vcmask 31744   ;;  %vm2466_vm7 = vcmask 48128   ;;  %vm2401_vm8 = vcmask 39936   ;;  %s7918_s11 = smov 32  }
  0x1e   :  { %625 = vrot.lane.b32.xlu1 %v8114_v46, %s7909_s19  ;;  %623 = vrot.lane.b32.xlu0 %v8117_v47, %s7909_s19  ;;  %15668 = vst [vmem:[#allocation23_spill] sm:$0xff] %v8243_v44  ;;  %vm2531_vm9 = vcmask 56320   ;;  %vm2667_vm10 = vcmask 72704   ;;  %vm2596_vm11 = vcmask 64512   ;;  %vm3151_vm12 = vcmask 253952  }
  0x1f   :  { %15669 = vst [vmem:[#allocation24_spill] sm:$0xff] %v8246_v53  ;;  %vm3137_vm13 = vcmask 261120   ;;  %vm5145_vm14 = vcmask 523264   ;;  %vm5210_vm15 = vcmask 785408  }
  0x20   :  { %15670 = vst [vmem:[#allocation25_spill] sm:$0xff] %v8279_v31 }
  0x21   :  { %15671 = vst [vmem:[#allocation26_spill] sm:$0xff] %v8282_v33 }
  0x22   :  { %15672 = vst [vmem:[#allocation27_spill] sm:$0xff] %v8285_v41 }
  0x23   :  { %15684 = vst [vmem:[#allocation39_spill] sm:$0xff] %v8422_v36 }
  0x25   :  { %633 = vrot.lane.b32.xlu2 %v8156_v58, %s7909_s19 }
  0x26   :  { %631 = vrot.lane.b32.xlu1 %v8159_v59, %s7909_s19  ;;  %629 = vrot.lane.b32.xlu0 %v8162_v60, %s7909_s19 }
  0x2d   :  { %639 = vrot.lane.b32.xlu2 %v8195_v11, %s7909_s19  ;;  %v293_v11 = vrot.slane %v8300_v6, 1 }
  0x2e   :  { %637 = vrot.lane.b32.xlu1 %v8198_v17, %s7909_s19  ;;  %635 = vrot.lane.b32.xlu0 %v8201_v18, %s7909_s19  ;;  %v8340_v18 = vld [vmem:[%s15185_s0 + $0x160] sm:$0x3] }
  0x35   :  { %645 = vrot.lane.b32.xlu2 %v8240_v43, %s7909_s19  ;;  %v8295_v43 = vld [vmem:[%s15185_s0 + $0x140] sm:$0xff] }
  0x36   :  { %643 = vrot.lane.b32.xlu1 %v8243_v44, %s7909_s19  ;;  %641 = vrot.lane.b32.xlu0 %v8246_v53, %s7909_s19  ;;  %v298_v10 = vrot.slane %v8295_v43, 1  ;;  %v295_v53 = vrot.slane %v8305_v32, 1  ;;  %v292_v44 = vrot.slane %v8310_v4, 1 }
  0x38   :  { %v8324_v58 = vsel %vm231_vm0, %v297_v9, %v298_v10  ;;  %v8345_v9 = vld [vmem:[%s15185_s0 + $0x150] sm:$0xff] }
  0x39   :  { %15673 = vst [vmem:[#allocation28_spill] sm:$0xff] %v8324_v58  ;;  %v302_v17 = vrot.slane %v8345_v9, 1 }
  0x3d   :  { %651 = vrot.lane.b32.xlu2 %v8279_v31, %s7909_s19  ;;  %v8327_v31 = vsel %vm231_vm0, %v293_v11, %v295_v53  ;;  %v305_v53 = vrot.slane %v8340_v18, 1 }
  0x3e   :  { %649 = vrot.lane.b32.xlu1 %v8282_v33, %s7909_s19  ;;  %647 = vrot.lane.b32.xlu0 %v8285_v41, %s7909_s19  ;;  %15674 = vst [vmem:[#allocation29_spill] sm:$0xff] %v8327_v31  ;;  %v8330_v33 = vsel %vm231_vm0, %v292_v44, %v293_v11  ;;  %v8335_v41 = vld [vmem:[%s15185_s0 + $0x158] sm:$0xff]  ;;  %v8350_v11 = vld [vmem:[%s15185_s0 + $0x148] sm:$0x3] }
  0x3f   :  { %15675 = vst [vmem:[#allocation30_spill] sm:$0xff] %v8330_v33  ;;  %v303_v44 = vrot.slane %v8335_v41, 1  ;;  %v300_v45 = vrot.slane %v8350_v11, 1 }
  0x41   :  { %v8363_v60 = vsel %vm231_vm0, %v303_v44, %v305_v53  ;;  %v8366_v59 = vsel %vm231_vm0, %v302_v17, %v303_v44  ;;  %v8384_v53 = vld [vmem:[%s15185_s0 + $0x170] sm:$0xff]  ;;  %v8394_v17 = vld [vmem:[%s15185_s0 + $0x168] sm:$0xff] }
  0x42   :  { %15676 = vst [vmem:[#allocation31_spill] sm:$0xff] %v8363_v60  ;;  %v308_v34 = vrot.slane %v8384_v53, 1  ;;  %v307_v46 = vrot.slane %v8394_v17, 1 }
  0x43   :  { %15677 = vst [vmem:[#allocation32_spill] sm:$0xff] %v8366_v59 }
  0x45   :  { %657 = vrot.lane.b32.xlu2 %v8324_v58, %s7909_s19  ;;  %v8369_v58 = vsel %vm231_vm0, %v298_v10, %v300_v45  ;;  %v8389_v45 = vld [vmem:[%s15185_s0 + $0x178] sm:$0x3] }
  0x46   :  { %655 = vrot.lane.b32.xlu1 %v8327_v31, %s7909_s19  ;;  %653 = vrot.lane.b32.xlu0 %v8330_v33, %s7909_s19  ;;  %15678 = vst [vmem:[#allocation33_spill] sm:$0xff] %v8369_v58  ;;  %v8374_v33 = vld [vmem:[%s15185_s0 + $0x1b0] sm:$0xff]  ;;  %v8379_v31 = vld [vmem:[%s15185_s0 + $0x1b8] sm:$0xff]  ;;  %v310_v47 = vrot.slane %v8389_v45, 1 }
  0x47   :  { %15679 = vst [vmem:[#allocation34_spill] sm:$0xff] %v8374_v33  ;;  %v312_v10 = vrot.slane %v8374_v33, 1  ;;  %v313_v44 = vrot.slane %v8379_v31, 1 }
  0x48   :  { %15680 = vst [vmem:[#allocation35_spill] sm:$0xff] %v8379_v31 }
  0x49   :  { %v314_v21 = vsel %vm231_vm0, %v312_v10, %v313_v44  ;;  %v8427_v10 = vld [vmem:[%s15185_s0 + $0x1c8] sm:$0xff] }
  0x4a   :  { %v317_v35 = vrot.slane %v8427_v10, 1 }
  0x4d   :  { %663 = vrot.lane.b32.xlu2 %v8363_v60, %s7909_s19  ;;  %v8409_v60 = vsel %vm231_vm0, %v308_v34, %v310_v47  ;;  %v320_v47 = vrot.slane %v8422_v36, 1 }
  0x4e   :  { %661 = vrot.lane.b32.xlu1 %v8366_v59, %s7909_s19  ;;  %659 = vrot.lane.b32.xlu0 %v8369_v58, %s7909_s19  ;;  %15681 = vst [vmem:[#allocation36_spill] sm:$0xff] %v8409_v60  ;;  %v8412_v59 = vsel %vm231_vm0, %v307_v46, %v308_v34  ;;  %v8417_v58 = vld [vmem:[%s15185_s0 + $0x1d0] sm:$0xff]  ;;  %v8432_v34 = vld [vmem:[%s15185_s0 + $0x1c0] sm:$0x3] }
  0x4f   :  { %15682 = vst [vmem:[#allocation37_spill] sm:$0xff] %v8412_v59  ;;  %v318_v46 = vrot.slane %v8417_v58, 1  ;;  %v315_v16 = vrot.slane %v8432_v34, 1 }
  0x50   :  { %15683 = vst [vmem:[#allocation38_spill] sm:$0xff] %v8417_v58 }
  0x51   :  { %15685 = vst [vmem:[#allocation40_spill] sm:$0xff] %v8432_v34  ;;  %v8444_v22 = vsel %vm231_vm0, %v318_v46, %v320_v47  ;;  %v8447_v13 = vsel %vm231_vm0, %v317_v35, %v318_v46  ;;  %v8463_v47 = vld [vmem:[%s15185_s0 + $0x1e8] sm:$0xff]  ;;  %v8468_v35 = vld [vmem:[%s15185_s0 + $0x1f0] sm:$0x3] }
  0x52   :  { %15686 = vst [vmem:[#allocation41_spill] sm:$0xff] %v8444_v22  ;;  %v323_v33 = vrot.slane %v8463_v47, 1  ;;  %v325_v34 = vrot.slane %v8468_v35, 1 }
  0x53   :  { %15687 = vst [vmem:[#allocation42_spill] sm:$0xff] %v8447_v13 }
  0x54   :  { %15690 = vst [vmem:[#allocation45_spill] sm:$0xff] %v8463_v47 }
  0x55   :  { %669 = vrot.lane.b32.xlu2 %v314_v21, %s7909_s19  ;;  %v316_v21 = vsel %vm231_vm0, %v313_v44, %v315_v16  ;;  %15691 = vst [vmem:[#allocation46_spill] sm:$0xff] %v8468_v35  ;;  %v8473_v16 = vld [vmem:[%s15185_s0 + $0x1e0] sm:$0xff] }
  0x56   :  { %667 = vrot.lane.b32.xlu1 %v8409_v60, %s7909_s19  ;;  %665 = vrot.lane.b32.xlu0 %v8412_v59, %s7909_s19  ;;  %v8453_v59 = vld [vmem:[%s15185_s0 + $0x1f8] sm:$0xff]  ;;  %v8458_v60 = vld [vmem:[%s15185_s0 + $0x200] sm:$0xff]  ;;  %15692 = vst [vmem:[#allocation47_spill] sm:$0xff] %v8473_v16  ;;  %v322_v31 = vrot.slane %v8473_v16, 1 }
  0x57   :  { %15688 = vst [vmem:[#allocation43_spill] sm:$0xff] %v8453_v59  ;;  %v327_v44 = vrot.slane %v8453_v59, 1  ;;  %v328_v46 = vrot.slane %v8458_v60, 1 }
  0x58   :  { %15689 = vst [vmem:[#allocation44_spill] sm:$0xff] %v8458_v60 }
  0x59   :  { %v8488_v58 = vsel %vm231_vm0, %v327_v44, %v328_v46  ;;  %v8509_v44 = vld [vmem:[%s15185_s0 + $0x210] sm:$0xff] }
  0x5a   :  { %15694 = vst [vmem:[#allocation49_spill] sm:$0xff] %v8488_v58  ;;  %v332_v60 = vrot.slane %v8509_v44, 1 }
  0x5b   :  { %15699 = vst [vmem:[#allocation54_spill] sm:$0xff] %v8509_v44 }
  0x5d   :  { %675 = vrot.lane.b32.xlu2 %v8444_v22, %s7909_s19  ;;  %v8491_v22 = vsel %vm231_vm0, %v323_v33, %v325_v34 }
  0x5e   :  { %673 = vrot.lane.b32.xlu1 %v8447_v13, %s7909_s19  ;;  %671 = vrot.lane.b32.xlu0 %v316_v21, %s7909_s19  ;;  %15695 = vst [vmem:[#allocation50_spill] sm:$0xff] %v8491_v22  ;;  %v8494_v21 = vsel %vm231_vm0, %v322_v31, %v323_v33  ;;  %v8499_v13 = vld [vmem:[%s15185_s0 + $0x218] sm:$0xff]  ;;  %v8514_v31 = vld [vmem:[%s15185_s0 + $0x208] sm:$0x3] }
  0x5f   :  { %v8482_v36 = vpop.permute.xlu2 %613  ;;  %15696 = vst [vmem:[#allocation51_spill] sm:$0xff] %v8494_v21  ;;  %v333_v33 = vrot.slane %v8499_v13, 1  ;;  %v330_v16 = vrot.slane %v8514_v31, 1 }
  0x60   :  { %15693 = vst [vmem:[#allocation48_spill] sm:$0xff] %v8482_v36  ;;  %v8504_v36 = vld [vmem:[%s15185_s0 + $0x220] sm:$0x3] }
  0x61   :  { %15697 = vst [vmem:[#allocation52_spill] sm:$0xff] %v8499_v13  ;;  %v335_v34 = vrot.slane %v8504_v36, 1 }
  0x62   :  { %15698 = vst [vmem:[#allocation53_spill] sm:$0xff] %v8504_v36 }
  0x63   :  { %15700 = vst [vmem:[#allocation55_spill] sm:$0xff] %v8514_v31  ;;  %v8529_v35 = vsel %vm231_vm0, %v333_v33, %v335_v34  ;;  %v8550_v34 = vld [vmem:[%s15185_s0 + $0x230] sm:$0xff] }
  0x64   :  { %15702 = vst [vmem:[#allocation57_spill] sm:$0xff] %v8529_v35  ;;  %v338_v31 = vrot.slane %v8550_v34, 1 }
  0x65   :  { %681 = vrot.lane.b32.xlu2 %v8488_v58, %s7909_s19  ;;  %v8532_v58 = vsel %vm231_vm0, %v332_v60, %v333_v33  ;;  %15707 = vst [vmem:[#allocation62_spill] sm:$0xff] %v8550_v34  ;;  %v8555_v60 = vld [vmem:[%s15185_s0 + $0x238] sm:$0x3] }
  0x66   :  { %679 = vrot.lane.b32.xlu1 %v8491_v22, %s7909_s19  ;;  %677 = vrot.lane.b32.xlu0 %v8494_v21, %s7909_s19  ;;  %15703 = vst [vmem:[#allocation58_spill] sm:$0xff] %v8532_v58  ;;  %v8535_v22 = vsel %vm231_vm0, %v328_v46, %v330_v16  ;;  %v8540_v21 = vld [vmem:[%s15185_s0 + $0x240] sm:$0xff]  ;;  %v8560_v16 = vld [vmem:[%s15185_s0 + $0x228] sm:$0xff]  ;;  %v340_v13 = vrot.slane %v8555_v60, 1 }
  0x67   :  { %v8524_v59 = vpop.permute.xlu2 %615  ;;  %15704 = vst [vmem:[#allocation59_spill] sm:$0xff] %v8535_v22  ;;  %v342_v46 = vrot.slane %v8540_v21, 1  ;;  %v337_v44 = vrot.slane %v8560_v16, 1 }
  0x68   :  { %15701 = vst [vmem:[#allocation56_spill] sm:$0xff] %v8524_v59  ;;  %v8545_v59 = vld [vmem:[%s15185_s0 + $0x248] sm:$0xff] }
  0x69   :  { %15705 = vst [vmem:[#allocation60_spill] sm:$0xff] %v8540_v21  ;;  %v343_v33 = vrot.slane %v8545_v59, 1  ;;  %v8587_v21 = vld [vmem:[%s15185_s0 + $0x260] sm:$0xff] }
  0x6a   :  { %15706 = vst [vmem:[#allocation61_spill] sm:$0xff] %v8545_v59 }
  0x6b   :  { %15708 = vst [vmem:[#allocation63_spill] sm:$0xff] %v8555_v60 }
  0x6c   :  { %15709 = vst [vmem:[#allocation64_spill] sm:$0xff] %v8560_v16 }
  0x6d   :  { %687 = vrot.lane.b32.xlu2 %v8529_v35, %s7909_s19  ;;  %v8576_v35 = vsel %vm231_vm0, %v342_v46, %v343_v33  ;;  %15714 = vst [vmem:[#allocation69_spill] sm:$0xff] %v8587_v21  ;;  %v8597_v46 = vld [vmem:[%s15185_s0 + $0x258] sm:$0xff] }
  0x6e   :  { %685 = vrot.lane.b32.xlu1 %v8532_v58, %s7909_s19  ;;  %683 = vrot.lane.b32.xlu0 %v8535_v22, %s7909_s19  ;;  %15711 = vst [vmem:[#allocation66_spill] sm:$0xff] %v8576_v35  ;;  %v8579_v58 = vsel %vm231_vm0, %v338_v31, %v340_v13  ;;  %v8582_v22 = vsel %vm231_vm0, %v337_v44, %v338_v31  ;;  %v8602_v13 = vld [vmem:[%s15185_s0 + $0x250] sm:$0x3]  ;;  %v348_v44 = vrot.slane %v8587_v21, 1  ;;  %v347_v16 = vrot.slane %v8597_v46, 1 }
  0x6f   :  { %v8570_v36 = vpop.permute.xlu2 %621  ;;  %15712 = vst [vmem:[#allocation67_spill] sm:$0xff] %v8579_v58  ;;  %v345_v60 = vrot.slane %v8602_v13, 1 }
  0x70   :  { %15710 = vst [vmem:[#allocation65_spill] sm:$0xff] %v8570_v36  ;;  %v8592_v36 = vld [vmem:[%s15185_s0 + $0x268] sm:$0x3] }
  0x71   :  { %15713 = vst [vmem:[#allocation68_spill] sm:$0xff] %v8582_v22  ;;  %v350_v31 = vrot.slane %v8592_v36, 1 }
  0x72   :  { %15715 = vst [vmem:[#allocation70_spill] sm:$0xff] %v8592_v36 }
  0x73   :  { %15716 = vst [vmem:[#allocation71_spill] sm:$0xff] %v8597_v46 }
  0x74   :  { %15717 = vst [vmem:[#allocation72_spill] sm:$0xff] %v8602_v13 }
  0x75   :  { %693 = vrot.lane.b32.xlu2 %v8576_v35, %s7909_s19  ;;  %v8621_v35 = vsel %vm231_vm0, %v348_v44, %v350_v31  ;;  %v8642_v31 = vld [vmem:[%s15185_s0 + $0x278] sm:$0xff] }
  0x76   :  { %691 = vrot.lane.b32.xlu1 %v8579_v58, %s7909_s19  ;;  %689 = vrot.lane.b32.xlu0 %v8582_v22, %s7909_s19  ;;  %15721 = vst [vmem:[#allocation76_spill] sm:$0xff] %v8621_v35  ;;  %v8624_v58 = vsel %vm231_vm0, %v347_v16, %v348_v44  ;;  %v8627_v22 = vsel %vm231_vm0, %v343_v33, %v345_v60  ;;  %v8647_v60 = vld [vmem:[%s15185_s0 + $0x280] sm:$0x3]  ;;  %v8652_v16 = vld [vmem:[%s15185_s0 + $0x270] sm:$0xff]  ;;  %v353_v36 = vrot.slane %v8642_v31, 1 }
  0x77   :  { %v8612_v59 = vpop.permute.xlu2 %627  ;;  %15722 = vst [vmem:[#allocation77_spill] sm:$0xff] %v8624_v58  ;;  %v355_v13 = vrot.slane %v8647_v60, 1  ;;  %v352_v21 = vrot.slane %v8652_v16, 1 }
  0x78   :  { %15718 = vst [vmem:[#allocation73_spill] sm:$0xff] %v8612_v59  ;;  %v8616_v34 = vpop.permute.xlu1 %609  ;;  %v8618_v47 = vpop.permute.xlu0 %605  ;;  %v8632_v59 = vld [vmem:[%s15185_s0 + $0x288] sm:$0xff] }
  0x79   :  { %15719 = vst [vmem:[#allocation74_spill] sm:$0xff] %v8616_v34  ;;  %v8637_v34 = vld [vmem:[%s15185_s0 + $0x290] sm:$0xff]  ;;  %v357_v33 = vrot.slane %v8632_v59, 1 }
  0x7a   :  { %15720 = vst [vmem:[#allocation75_spill] sm:$0xff] %v8618_v47  ;;  %v358_v44 = vrot.slane %v8637_v34, 1 }
  0x7b   :  { %15723 = vst [vmem:[#allocation78_spill] sm:$0xff] %v8627_v22 }
  0x7c   :  { %15724 = vst [vmem:[#allocation79_spill] sm:$0xff] %v8632_v59  ;;  %v8678_v59 = vsel %vm231_vm0, %v352_v21, %v353_v36 }
  0x7d   :  { %15725 = vst [vmem:[#allocation80_spill] sm:$0xff] %v8637_v34  ;;  %699 = vrot.lane.b32.xlu2 %v8621_v35, %s7909_s19 }
  0x7e   :  { %15726 = vst [vmem:[#allocation81_spill] sm:$0xff] %v8642_v31  ;;  %697 = vrot.lane.b32.xlu1 %v8624_v58, %s7909_s19  ;;  %695 = vrot.lane.b32.xlu0 %v8627_v22, %s7909_s19  ;;  %v8672_v58 = vsel %vm231_vm0, %v357_v33, %v358_v44  ;;  %v8675_v22 = vsel %vm231_vm0, %v353_v36, %v355_v13  ;;  %v8693_v33 = vld [vmem:[%s15185_s0 + $0x2a0] sm:$0xff]  ;;  %v8698_v36 = vld [vmem:[%s15185_s0 + $0x298] sm:$0x3] }
  0x7f   :  { %15727 = vst [vmem:[#allocation82_spill] sm:$0xff] %v8647_v60  ;;  %v8662_v47 = vpop.permute.xlu2 %633  ;;  %v362_v34 = vrot.slane %v8693_v33, 1 }
  0x80   :  { %15728 = vst [vmem:[#allocation83_spill] sm:$0xff] %v8652_v16  ;;  %v8667_v46 = vpop.permute.xlu1 %611  ;;  %v8669_v35 = vpop.permute.xlu0 %607  ;;  %v360_v16 = vrot.slane %v8698_v36, 1 }
  0x81   :  { %15729 = vst [vmem:[#allocation84_spill] sm:$0xff] %v8662_v47  ;;  %v8683_v47 = vld [vmem:[%s15185_s0 + $0x2a8] sm:$0xff] }
  0x82   :  { %15730 = vst [vmem:[#allocation85_spill] sm:$0xff] %v8667_v46  ;;  %v8688_v46 = vld [vmem:[%s15185_s0 + $0x2b0] sm:$0x3]  ;;  %v363_v21 = vrot.slane %v8683_v47, 1 }
  0x83   :  { %15731 = vst [vmem:[#allocation86_spill] sm:$0xff] %v8669_v35  ;;  %v365_v13 = vrot.slane %v8688_v46, 1 }
  0x84   :  { %15732 = vst [vmem:[#allocation87_spill] sm:$0xff] %v8672_v58 }
  0x85   :  { %15733 = vst [vmem:[#allocation88_spill] sm:$0xff] %v8675_v22  ;;  %705 = vrot.lane.b32.xlu2 %v8672_v58, %s7909_s19  ;;  %v8717_v58 = vsel %vm231_vm0, %v363_v21, %v365_v13  ;;  %v8738_v13 = vld [vmem:[%s15185_s0 + $0x2c0] sm:$0xff] }
  0x86   :  { %15734 = vst [vmem:[#allocation89_spill] sm:$0xff] %v8678_v59  ;;  %703 = vrot.lane.b32.xlu1 %v8675_v22, %s7909_s19  ;;  %701 = vrot.lane.b32.xlu0 %v8678_v59, %s7909_s19  ;;  %v8720_v22 = vsel %vm231_vm0, %v362_v34, %v363_v21  ;;  %v8723_v59 = vsel %vm231_vm0, %v358_v44, %v360_v16  ;;  %v8743_v34 = vld [vmem:[%s15185_s0 + $0x2c8] sm:$0x3]  ;;  %v8748_v16 = vld [vmem:[%s15185_s0 + $0x2b8] sm:$0xff] }
  0x87   :  { %15735 = vst [vmem:[#allocation90_spill] sm:$0xff] %v8683_v47  ;;  %v8708_v35 = vpop.permute.xlu2 %639  ;;  %v367_v47 = vrot.slane %v8748_v16, 1 }
  0x88   :  { %15736 = vst [vmem:[#allocation91_spill] sm:$0xff] %v8688_v46  ;;  %v8712_v60 = vpop.permute.xlu1 %619  ;;  %v8714_v31 = vpop.permute.xlu0 %617  ;;  %v368_v46 = vrot.slane %v8738_v13, 1 }
  0x89   :  { %15737 = vst [vmem:[#allocation92_spill] sm:$0xff] %v8693_v33 }
  0x8a   :  { %15738 = vst [vmem:[#allocation93_spill] sm:$0xff] %v8698_v36  ;;  %v370_v36 = vrot.slane %v8743_v34, 1 }
  0x8b   :  { %15739 = vst [vmem:[#allocation94_spill] sm:$0xff] %v8708_v35  ;;  %v8728_v35 = vld [vmem:[%s15185_s0 + $0x2d0] sm:$0xff] }
  0x8c   :  { %15740 = vst [vmem:[#allocation95_spill] sm:$0xff] %v8712_v60  ;;  %v8733_v60 = vld [vmem:[%s15185_s0 + $0x2d8] sm:$0xff]  ;;  %v372_v44 = vrot.slane %v8728_v35, 1 }
  0x8d   :  { %15741 = vst [vmem:[#allocation96_spill] sm:$0xff] %v8714_v31  ;;  %711 = vrot.lane.b32.xlu2 %v8717_v58, %s7909_s19  ;;  %v373_v21 = vrot.slane %v8733_v60, 1 }
  0x8e   :  { %15742 = vst [vmem:[#allocation97_spill] sm:$0xff] %v8717_v58  ;;  %709 = vrot.lane.b32.xlu1 %v8720_v22, %s7909_s19  ;;  %707 = vrot.lane.b32.xlu0 %v8723_v59, %s7909_s19 }
  0x8f   :  { %15743 = vst [vmem:[#allocation98_spill] sm:$0xff] %v8720_v22  ;;  %v8758_v31 = vpop.permute.xlu2 %645  ;;  %v8768_v22 = vsel %vm231_vm0, %v372_v44, %v373_v21  ;;  %v8789_v44 = vld [vmem:[%s15185_s0 + $0x2e8] sm:$0xff] }
  0x90   :  { %15744 = vst [vmem:[#allocation99_spill] sm:$0xff] %v8723_v59  ;;  %v8763_v33 = vpop.permute.xlu1 %625  ;;  %v8765_v58 = vpop.permute.xlu0 %623  ;;  %v8771_v59 = vsel %vm231_vm0, %v368_v46, %v370_v36 }
  0x91   :  { %15745 = vst [vmem:[#allocation100_spill] sm:$0xff] %v8728_v35  ;;  %v8774_v35 = vsel %vm231_vm0, %v367_v47, %v368_v46  ;;  %v8794_v47 = vld [vmem:[%s15185_s0 + $0x2e0] sm:$0x3] }
  0x92   :  { %15746 = vst [vmem:[#allocation101_spill] sm:$0xff] %v8733_v60  ;;  %v377_v60 = vrot.slane %v8789_v44, 1 }
  0x93   :  { %15747 = vst [vmem:[#allocation102_spill] sm:$0xff] %v8738_v13 }
  0x94   :  { %15748 = vst [vmem:[#allocation103_spill] sm:$0xff] %v8743_v34 }
  0x95   :  { %15749 = vst [vmem:[#allocation104_spill] sm:$0xff] %v8748_v16  ;;  %717 = vrot.lane.b32.xlu2 %v8768_v22, %s7909_s19  ;;  %v375_v16 = vrot.slane %v8794_v47, 1 }
  0x96   :  { %15750 = vst [vmem:[#allocation105_spill] sm:$0xff] %v8758_v31  ;;  %v8779_v31 = vld [vmem:[%s15185_s0 + $0x2f0] sm:$0xff]  ;;  %715 = vrot.lane.b32.xlu1 %v8771_v59, %s7909_s19  ;;  %713 = vrot.lane.b32.xlu0 %v8774_v35, %s7909_s19 }
  0x97   :  { %15751 = vst [vmem:[#allocation106_spill] sm:$0xff] %v8763_v33  ;;  %v8784_v33 = vld [vmem:[%s15185_s0 + $0x2f8] sm:$0x3]  ;;  %v378_v46 = vrot.slane %v8779_v31, 1 }
  0x98   :  { %15752 = vst [vmem:[#allocation107_spill] sm:$0xff] %v8765_v58  ;;  %v380_v36 = vrot.slane %v8784_v33, 1  ;;  %v8804_v58 = vpop.permute.xlu2 %651  ;;  %v8808_v34 = vpop.permute.xlu1 %631 }
  0x99   :  { %15753 = vst [vmem:[#allocation108_spill] sm:$0xff] %v8768_v22  ;;  %v8810_v13 = vpop.permute.xlu0 %629 }
  0x9a   :  { %15754 = vst [vmem:[#allocation109_spill] sm:$0xff] %v8771_v59  ;;  %v8813_v22 = vsel %vm231_vm0, %v378_v46, %v380_v36  ;;  %v8816_v59 = vsel %vm231_vm0, %v377_v60, %v378_v46  ;;  %v8834_v36 = vld [vmem:[%s15185_s0 + $0x308] sm:$0xff]  ;;  %v8839_v60 = vld [vmem:[%s15185_s0 + $0x310] sm:$0x3] }
  0x9b   :  { %15755 = vst [vmem:[#allocation110_spill] sm:$0xff] %v8774_v35  ;;  %v8819_v35 = vsel %vm231_vm0, %v373_v21, %v375_v16  ;;  %v8844_v16 = vld [vmem:[%s15185_s0 + $0x300] sm:$0xff] }
  0x9c   :  { %15756 = vst [vmem:[#allocation111_spill] sm:$0xff] %v8779_v31  ;;  %v382_v31 = vrot.slane %v8844_v16, 1 }
  0x9d   :  { %15757 = vst [vmem:[#allocation112_spill] sm:$0xff] %v8784_v33  ;;  %723 = vrot.lane.b32.xlu2 %v8813_v22, %s7909_s19  ;;  %v383_v33 = vrot.slane %v8834_v36, 1 }
  0x9e   :  { %15758 = vst [vmem:[#allocation113_spill] sm:$0xff] %v8789_v44  ;;  %721 = vrot.lane.b32.xlu1 %v8816_v59, %s7909_s19  ;;  %719 = vrot.lane.b32.xlu0 %v8819_v35, %s7909_s19 }
  0x9f   :  { %15759 = vst [vmem:[#allocation114_spill] sm:$0xff] %v8794_v47  ;;  %v385_v47 = vrot.slane %v8839_v60, 1 }
  0xa0   :  { %15760 = vst [vmem:[#allocation115_spill] sm:$0xff] %v8804_v58  ;;  %v8824_v58 = vld [vmem:[%s15185_s0 + $0x318] sm:$0xff]  ;;  %v8859_v44 = vpop.permute.xlu1 %637 }
  0xa1   :  { %15761 = vst [vmem:[#allocation116_spill] sm:$0xff] %v8808_v34  ;;  %v8829_v34 = vld [vmem:[%s15185_s0 + $0x320] sm:$0xff]  ;;  %v387_v21 = vrot.slane %v8824_v58, 1 }
  0xa2   :  { %15762 = vst [vmem:[#allocation117_spill] sm:$0xff] %v8810_v13  ;;  %v388_v46 = vrot.slane %v8829_v34, 1  ;;  %v8854_v13 = vpop.permute.xlu2 %657 }
  0xa3   :  { %15763 = vst [vmem:[#allocation118_spill] sm:$0xff] %v8813_v22  ;;  %v8861_v22 = vpop.permute.xlu0 %635 }
  0xa4   :  { %15764 = vst [vmem:[#allocation119_spill] sm:$0xff] %v8816_v59  ;;  %v8864_v59 = vsel %vm231_vm0, %v387_v21, %v388_v46  ;;  %v396_v21 = vrot.slane %v8015_v15, 2 }
  0xa5   :  { %15765 = vst [vmem:[#allocation120_spill] sm:$0xff] %v8819_v35  ;;  %v8867_v35 = vsel %vm231_vm0, %v383_v33, %v385_v47  ;;  %729 = vrot.lane.b32.xlu2 %v8864_v59, %s7909_s19  ;;  %v394_v47 = vrot.slane %v7994_v8, 2  ;;  %v404_v8 = vrot.slane %v7971_v1, 2  ;;  %v409_v1 = vrot.slane %v8049_v26, 2 }
  0xa6   :  { %15766 = vst [vmem:[#allocation121_spill] sm:$0xff] %v8824_v58  ;;  %v8870_v58 = vsel %vm231_vm0, %v382_v31, %v383_v33  ;;  %727 = vrot.lane.b32.xlu1 %v8867_v35, %s7909_s19  ;;  %v393_v33 = vrot.slane %v7989_v7, 2  ;;  %v403_v7 = vrot.slane %v7966_v0, 2 }
  0xa7   :  { %15767 = vst [vmem:[#allocation122_spill] sm:$0xff] %v8829_v34  ;;  %725 = vrot.lane.b32.xlu0 %v8870_v58, %s7909_s19 }
  0xa8   :  { %15768 = vst [vmem:[#allocation123_spill] sm:$0xff] %v8854_v13  ;;  %v8875_v13 = vld [vmem:[%s15185_s0 + $0x328] sm:$0x3]  ;;  %v395_v34 = vsel %vm392_vm1, %v393_v33, %v394_v47 }
  0xa9   :  { %15769 = vst [vmem:[#allocation124_spill] sm:$0xff] %v8859_v44  ;;  %v390_v44 = vrot.slane %v8875_v13, 1 }
  0xaa   :  { %15770 = vst [vmem:[#allocation125_spill] sm:$0xff] %v8861_v22  ;;  %v8885_v31 = vpop.permute.xlu2 %663  ;;  %v8889_v22 = vpop.permute.xlu1 %643 }
  0xab   :  { %15771 = vst [vmem:[#allocation126_spill] sm:$0xff] %v8864_v59  ;;  %v8891_v59 = vpop.permute.xlu0 %641 }
  0xac   :  { %15772 = vst [vmem:[#allocation127_spill] sm:$0xff] %v8867_v35  ;;  %v397_v35 = vsel %vm392_vm1, %v394_v47, %v396_v21  ;;  %v399_v21 = vrot.slane %v7983_v5, 2  ;;  %v401_v47 = vrot.slane %v8010_v14, 2  ;;  %v408_v14 = vrot.slane %v8059_v28, 2 }
  0xad   :  { %15773 = vst [vmem:[#allocation128_spill] sm:$0xff] %v8870_v58  ;;  %v8896_v58 = vsel %vm231_vm0, %v388_v46, %v390_v44  ;;  %799 = vrot.lane.b32.xlu2 %v397_v35, %s7910_s17  ;;  %v398_v44 = vrot.slane %v7976_v2, 2  ;;  %v411_v2 = vrot.slane %v8054_v27, 2  ;;  %v419_v27 = vrot.slane %v8083_v37, 2 }
  0xae   :  { %15774 = vst [vmem:[#allocation129_spill] sm:$0xff] %v8885_v31  ;;  %797 = vrot.lane.b32.xlu1 %v395_v34, %s7910_s17  ;;  %v8914_v34 = vsel %vm392_vm1, %v403_v7, %v404_v8  ;;  %v8917_v33 = vsel %vm392_vm1, %v399_v21, %v401_v47  ;;  %v406_v7 = vrot.slane %v8002_v12, 2  ;;  %v418_v12 = vrot.slane %v8093_v39, 2 }
  0xaf   :  { %15775 = vst [vmem:[#allocation130_spill] sm:$0xff] %v8889_v22  ;;  %731 = vrot.lane.b32.xlu0 %v8896_v58, %s7909_s19  ;;  %v8920_v0 = vsel %vm392_vm1, %v398_v44, %v399_v21  ;;  %v8939_v44 = vsel %vm392_vm1, %v409_v1, %v411_v2  ;;  %v413_v2 = vrot.slane %v8039_v24, 2  ;;  %v424_v24 = vrot.slane %v8132_v50, 2 }
  0xb0   :  { %15776 = vst [vmem:[#allocation131_spill] sm:$0xff] %v8891_v59  ;;  %v8945_v26 = vsel %vm392_vm1, %v404_v8, %v406_v7  ;;  %v416_v8 = vrot.slane %v8098_v40, 2  ;;  %v423_v40 = vrot.slane %v8142_v52, 2 }
  0xb2   :  { %v8904_v15 = vpop.permute.xlu2 %669  ;;  %v8909_v46 = vpop.permute.xlu1 %649 }
  0xb3   :  { %15777 = vst [vmem:[#allocation132_spill] sm:$0xff] %v8904_v15  ;;  %v8911_v35 = vpop.permute.xlu0 %647  ;;  %v8942_v15 = vsel %vm392_vm1, %v408_v14, %v409_v1  ;;  %v414_v1 = vrot.slane %v8044_v25, 2  ;;  %v426_v25 = vrot.slane %v8137_v51, 2  ;;  %v434_v51 = vrot.slane %v8167_v61, 2 }
  0xb4   :  { %15778 = vst [vmem:[#allocation133_spill] sm:$0xff] %v8909_v46 }
  0xb5   :  { %15779 = vst [vmem:[#allocation134_spill] sm:$0xff] %v8911_v35  ;;  %805 = vrot.lane.b32.xlu2 %v8914_v34, %s7910_s17  ;;  %v8968_v31 = vsel %vm392_vm1, %v414_v1, %v416_v8  ;;  %v8971_v37 = vsel %vm392_vm1, %v413_v2, %v414_v1  ;;  %v8990_v2 = vsel %vm392_vm1, %v424_v24, %v426_v25  ;;  %v428_v25 = vrot.slane %v8122_v48, 2 }
  0xb6   :  { %803 = vrot.lane.b32.xlu1 %v8917_v33, %s7910_s17  ;;  %v439_v48 = vrot.slane %v8216_v23, 2 }
  0xb7   :  { %801 = vrot.lane.b32.xlu0 %v8920_v0, %s7910_s17 }
  0xba   :  { %v8930_v5 = vpop.permute.xlu2 %675  ;;  %v8934_v21 = vpop.permute.xlu1 %655 }
  0xbb   :  { %15780 = vst [vmem:[#allocation135_spill] sm:$0xff] %v8930_v5  ;;  %v8936_v47 = vpop.permute.xlu0 %653  ;;  %v8965_v5 = vsel %vm392_vm1, %v418_v12, %v419_v27  ;;  %v421_v12 = vrot.slane %v8088_v38, 2  ;;  %v433_v38 = vrot.slane %v8177_v63, 2 }
  0xbc   :  { %15781 = vst [vmem:[#allocation136_spill] sm:$0xff] %v8934_v21 }
  0xbd   :  { %15782 = vst [vmem:[#allocation137_spill] sm:$0xff] %v8936_v47  ;;  %811 = vrot.lane.b32.xlu2 %v8939_v44, %s7910_s17  ;;  %v8996_v50 = vsel %vm392_vm1, %v419_v27, %v421_v12  ;;  %v431_v27 = vrot.slane %v8182_v3, 2  ;;  %v438_v3 = vrot.slane %v8226_v30, 2  ;;  %v15851_v47 = vld [vmem:[#allocation72_spill] sm:$0xff] }
  0xbe   :  { %809 = vrot.lane.b32.xlu1 %v8942_v15, %s7910_s17 }
  0xbf   :  { %807 = vrot.lane.b32.xlu0 %v8945_v26, %s7910_s17 }
  0xc2   :  { %v8955_v28 = vpop.permute.xlu2 %681  ;;  %v8960_v14 = vpop.permute.xlu1 %661 }
  0xc3   :  { %15783 = vst [vmem:[#allocation138_spill] sm:$0xff] %v8955_v28  ;;  %v8962_v7 = vpop.permute.xlu0 %659  ;;  %v8993_v28 = vsel %vm392_vm1, %v423_v40, %v424_v24  ;;  %v429_v24 = vrot.slane %v8127_v49, 2  ;;  %v441_v49 = vrot.slane %v8221_v29, 2  ;;  %v449_v29 = vrot.slane %v8251_v54, 2 }
  0xc4   :  { %15784 = vst [vmem:[#allocation139_spill] sm:$0xff] %v8960_v14 }
  0xc5   :  { %15785 = vst [vmem:[#allocation140_spill] sm:$0xff] %v8962_v7  ;;  %817 = vrot.lane.b32.xlu2 %v8965_v5, %s7910_s17  ;;  %v9022_v61 = vsel %vm392_vm1, %v428_v25, %v429_v24  ;;  %v9041_v25 = vsel %vm392_vm1, %v439_v48, %v441_v49  ;;  %v443_v49 = vrot.slane %v8206_v19, 2  ;;  %v454_v19 = vrot.slane %v8300_v6, 2 }
  0xc6   :  { %815 = vrot.lane.b32.xlu1 %v8968_v31, %s7910_s17 }
  0xc7   :  { %813 = vrot.lane.b32.xlu0 %v8971_v37, %s7910_s17 }
  0xca   :  { %v8981_v39 = vpop.permute.xlu2 %687  ;;  %v8985_v1 = vpop.permute.xlu1 %667 }
  0xcb   :  { %15786 = vst [vmem:[#allocation141_spill] sm:$0xff] %v8981_v39  ;;  %v8987_v8 = vpop.permute.xlu0 %665  ;;  %v9016_v39 = vsel %vm392_vm1, %v433_v38, %v434_v51  ;;  %v436_v38 = vrot.slane %v8172_v62, 2  ;;  %v448_v62 = vrot.slane %v8261_v56, 2 }
  0xcc   :  { %15787 = vst [vmem:[#allocation142_spill] sm:$0xff] %v8985_v1  ;;  %v9019_v1 = vsel %vm392_vm1, %v429_v24, %v431_v27 }
  0xcd   :  { %15788 = vst [vmem:[#allocation143_spill] sm:$0xff] %v8987_v8  ;;  %823 = vrot.lane.b32.xlu2 %v8990_v2, %s7910_s17  ;;  %v9047_v23 = vsel %vm392_vm1, %v434_v51, %v436_v38  ;;  %v446_v51 = vrot.slane %v8266_v57, 2  ;;  %v453_v57 = vrot.slane %v8310_v4, 2 }
  0xce   :  { %821 = vrot.lane.b32.xlu1 %v8993_v28, %s7910_s17 }
  0xcf   :  { %819 = vrot.lane.b32.xlu0 %v8996_v50, %s7910_s17 }
  0xd2   :  { %v9006_v52 = vpop.permute.xlu2 %693  ;;  %v9011_v40 = vpop.permute.xlu1 %673 }
  0xd3   :  { %15789 = vst [vmem:[#allocation144_spill] sm:$0xff] %v9006_v52  ;;  %v9013_v12 = vpop.permute.xlu0 %671  ;;  %v9044_v52 = vsel %vm392_vm1, %v438_v3, %v439_v48  ;;  %v444_v48 = vrot.slane %v8211_v20, 2  ;;  %v456_v20 = vrot.slane %v8305_v32, 2  ;;  %v464_v32 = vrot.slane %v8335_v41, 2 }
  0xd4   :  { %15790 = vst [vmem:[#allocation145_spill] sm:$0xff] %v9011_v40 }
  0xd5   :  { %15791 = vst [vmem:[#allocation146_spill] sm:$0xff] %v9013_v12  ;;  %829 = vrot.lane.b32.xlu2 %v9016_v39, %s7910_s17  ;;  %v9073_v54 = vsel %vm392_vm1, %v443_v49, %v444_v48  ;;  %v9092_v49 = vsel %vm392_vm1, %v454_v19, %v456_v20  ;;  %v458_v20 = vrot.slane %v8290_v42, 2  ;;  %v471_v42 = vrot.slane %v8389_v45, 2  ;;  %v15808_v45 = vld [vmem:[#allocation38_spill] sm:$0xff] }
  0xd6   :  { %827 = vrot.lane.b32.xlu1 %v9019_v1, %s7910_s17 }
  0xd7   :  { %825 = vrot.lane.b32.xlu0 %v9022_v61, %s7910_s17 }
  0xda   :  { %v9032_v63 = vpop.permute.xlu2 %699  ;;  %v9036_v24 = vpop.permute.xlu1 %679 }
  0xdb   :  { %15792 = vst [vmem:[#allocation147_spill] sm:$0xff] %v9032_v63  ;;  %v9038_v27 = vpop.permute.xlu0 %677  ;;  %v9067_v63 = vsel %vm392_vm1, %v448_v62, %v449_v29  ;;  %v451_v62 = vrot.slane %v8256_v55, 2  ;;  %v463_v55 = vrot.slane %v8345_v9, 2 }
  0xdc   :  { %15793 = vst [vmem:[#allocation148_spill] sm:$0xff] %v9036_v24  ;;  %v9070_v24 = vsel %vm392_vm1, %v444_v48, %v446_v51 }
  0xdd   :  { %15794 = vst [vmem:[#allocation149_spill] sm:$0xff] %v9038_v27  ;;  %835 = vrot.lane.b32.xlu2 %v9041_v25, %s7910_s17  ;;  %v9098_v6 = vsel %vm392_vm1, %v449_v29, %v451_v62  ;;  %v461_v29 = vrot.slane %v8350_v11, 2  ;;  %v468_v11 = vrot.slane %v8394_v17, 2  ;;  %v479_v17 = vrot.slane %v15808_v45, 2 }
  0xde   :  { %833 = vrot.lane.b32.xlu1 %v9044_v52, %s7910_s17 }
  0xdf   :  { %831 = vrot.lane.b32.xlu0 %v9047_v23, %s7910_s17 }
  0xe2   :  { %v9057_v30 = vpop.permute.xlu2 %705  ;;  %v9062_v3 = vpop.permute.xlu1 %685 }
  0xe3   :  { %15795 = vst [vmem:[#allocation150_spill] sm:$0xff] %v9057_v30  ;;  %v9064_v38 = vpop.permute.xlu0 %683  ;;  %v9095_v30 = vsel %vm392_vm1, %v453_v57, %v454_v19  ;;  %v459_v19 = vrot.slane %v8295_v43, 2  ;;  %v469_v43 = vrot.slane %v8384_v53, 2 }
  0xe4   :  { %15796 = vst [vmem:[#allocation151_spill] sm:$0xff] %v9062_v3 }
  0xe5   :  { %15797 = vst [vmem:[#allocation152_spill] sm:$0xff] %v9064_v38  ;;  %841 = vrot.lane.b32.xlu2 %v9067_v63, %s7910_s17  ;;  %v9124_v41 = vsel %vm392_vm1, %v458_v20, %v459_v19  ;;  %v9143_v20 = vsel %vm392_vm1, %v469_v43, %v471_v42 }
  0xe6   :  { %839 = vrot.lane.b32.xlu1 %v9070_v24, %s7910_s17 }
  0xe7   :  { %837 = vrot.lane.b32.xlu0 %v9073_v54, %s7910_s17 }
  0xea   :  { %v9083_v56 = vpop.permute.xlu2 %711  ;;  %v9087_v48 = vpop.permute.xlu1 %691 }
  0xeb   :  { %15798 = vst [vmem:[#allocation153_spill] sm:$0xff] %v9083_v56  ;;  %v9089_v51 = vpop.permute.xlu0 %689  ;;  %v9118_v56 = vsel %vm392_vm1, %v463_v55, %v464_v32  ;;  %v466_v55 = vrot.slane %v8340_v18, 2  ;;  %v478_v18 = vrot.slane %v8427_v10, 2 }
  0xec   :  { %15799 = vst [vmem:[#allocation154_spill] sm:$0xff] %v9087_v48  ;;  %v9121_v48 = vsel %vm392_vm1, %v459_v19, %v461_v29 }
  0xed   :  { %15800 = vst [vmem:[#allocation155_spill] sm:$0xff] %v9089_v51  ;;  %847 = vrot.lane.b32.xlu2 %v9092_v49, %s7910_s17  ;;  %v9149_v53 = vsel %vm392_vm1, %v464_v32, %v466_v55  ;;  %v15812_v55 = vld [vmem:[#allocation34_spill] sm:$0xff] }
  0xee   :  { %845 = vrot.lane.b32.xlu1 %v9095_v30, %s7910_s17 }
  0xef   :  { %843 = vrot.lane.b32.xlu0 %v9098_v6, %s7910_s17 }
  0xf2   :  { %v9108_v4 = vpop.permute.xlu2 %717  ;;  %v9113_v57 = vpop.permute.xlu1 %697 }
  0xf3   :  { %15801 = vst [vmem:[#allocation156_spill] sm:$0xff] %v9108_v4  ;;  %v9115_v62 = vpop.permute.xlu0 %695  ;;  %v9146_v4 = vsel %vm392_vm1, %v468_v11, %v469_v43  ;;  %v15810_v43 = vld [vmem:[#allocation35_spill] sm:$0xff] }
  0xf4   :  { %15802 = vst [vmem:[#allocation157_spill] sm:$0xff] %v9113_v57  ;;  %v474_v11 = vrot.slane %v15810_v43, 2  ;;  %v15817_v43 = vld [vmem:[#allocation46_spill] sm:$0xff] }
  0xf5   :  { %15803 = vst [vmem:[#allocation158_spill] sm:$0xff] %v9115_v62  ;;  %853 = vrot.lane.b32.xlu2 %v9118_v56, %s7910_s17  ;;  %v9169_v62 = vsel %vm392_vm1, %v478_v18, %v479_v17 }
  0xf6   :  { %851 = vrot.lane.b32.xlu1 %v9121_v48, %s7910_s17  ;;  %15807 = vst [vmem:[#allocation162_spill] sm:$0xff] %v9146_v4 }
  0xf7   :  { %849 = vrot.lane.b32.xlu0 %v9124_v41, %s7910_s17  ;;  %15815 = vst [vmem:[#allocation34_spill] sm:$0xff] %v9169_v62 }
  0xfa   :  { %v9134_v9 = vpop.permute.xlu2 %723  ;;  %v9138_v19 = vpop.permute.xlu1 %703 }
  0xfb   :  { %15804 = vst [vmem:[#allocation159_spill] sm:$0xff] %v9134_v9  ;;  %v9140_v29 = vpop.permute.xlu0 %701  ;;  %v15811_v9 = vld [vmem:[#allocation40_spill] sm:$0xff] }
  0xfc   :  { %15805 = vst [vmem:[#allocation160_spill] sm:$0xff] %v9138_v19  ;;  %v476_v32 = vrot.slane %v15811_v9, 2  ;;  %v473_v19 = vrot.slane %v15812_v55, 2  ;;  %v15816_v9 = vld [vmem:[#allocation45_spill] sm:$0xff]  ;;  %v486_v55 = vrot.slane %v15817_v43, 2 }
  0xfd   :  { %15806 = vst [vmem:[#allocation161_spill] sm:$0xff] %v9140_v29  ;;  %859 = vrot.lane.b32.xlu2 %v9143_v20, %s7910_s17  ;;  %v484_v45 = vrot.slane %v15816_v9, 2  ;;  %v15827_v9 = vld [vmem:[#allocation52_spill] sm:$0xff] }
  0xfe   :  { %857 = vrot.lane.b32.xlu1 %v9146_v4, %s7910_s17  ;;  %v477_v51 = vsel %vm392_vm1, %v474_v11, %v476_v32  ;;  %v475_v10 = vsel %vm392_vm1, %v473_v19, %v474_v11  ;;  %v494_v43 = vrot.slane %v15827_v9, 2 }
  0xff   :  { %855 = vrot.lane.b32.xlu0 %v9149_v53, %s7910_s17  ;;  %v9188_v11 = vsel %vm392_vm1, %v484_v45, %v486_v55 }
 0x102   :  { %v9159_v42 = vpop.permute.xlu2 %729  ;;  %v9164_v29 = vpop.permute.xlu1 %709 }
 0x103   :  { %15809 = vst [vmem:[#allocation38_spill] sm:$0xff] %v9159_v42  ;;  %v9166_v57 = vpop.permute.xlu0 %707 }
 0x104   :  { %15813 = vst [vmem:[#allocation35_spill] sm:$0xff] %v9164_v29  ;;  %v15819_v29 = vld [vmem:[#allocation47_spill] sm:$0xff] }
 0x105   :  { %15814 = vst [vmem:[#allocation40_spill] sm:$0xff] %v9166_v57  ;;  %865 = vrot.lane.b32.xlu2 %v9169_v62, %s7910_s17  ;;  %v483_v18 = vrot.slane %v15819_v29, 2  ;;  %v15820_v57 = vld [vmem:[#allocation39_spill] sm:$0xff] }
 0x106   :  { %863 = vrot.lane.b32.xlu1 %v477_v51, %s7910_s17  ;;  %v481_v3 = vrot.slane %v15820_v57, 2  ;;  %15823 = vst [vmem:[#allocation39_spill] sm:$0xff] %v9188_v11  ;;  %v15826_v57 = vld [vmem:[#allocation54_spill] sm:$0xff] }
 0x107   :  { %861 = vrot.lane.b32.xlu0 %v475_v10, %s7910_s17  ;;  %v9191_v51 = vsel %vm392_vm1, %v483_v18, %v484_v45  ;;  %v493_v29 = vrot.slane %v15826_v57, 2  ;;  %v15829_v45 = vld [vmem:[#allocation44_spill] sm:$0xff] }
 0x108   :  { %15824 = vst [vmem:[#allocation163_spill] sm:$0xff] %v9191_v51  ;;  %v9194_v10 = vsel %vm392_vm1, %v479_v17, %v481_v3  ;;  %v489_v18 = vrot.slane %v15829_v45, 2  ;;  %v15831_v17 = vld [vmem:[#allocation43_spill] sm:$0xff] }
 0x109   :  { %15825 = vst [vmem:[#allocation164_spill] sm:$0xff] %v9194_v10  ;;  %v9214_v40 = vsel %vm392_vm1, %v493_v29, %v494_v43  ;;  %v15838_v45 = vld [vmem:[#allocation63_spill] sm:$0xff] }
 0x10a   :  { %v9179_v42 = vpop.permute.xlu2 %799  ;;  %v9183_v32 = vpop.permute.xlu1 %715  ;;  %v501_v29 = vrot.slane %v15838_v45, 2 }
 0x10b   :  { %15818 = vst [vmem:[#allocation45_spill] sm:$0xff] %v9179_v42  ;;  %v9185_v19 = vpop.permute.xlu0 %713 }
 0x10c   :  { %15821 = vst [vmem:[#allocation46_spill] sm:$0xff] %v9183_v32  ;;  %v15830_v32 = vld [vmem:[#allocation55_spill] sm:$0xff] }
 0x10d   :  { %15822 = vst [vmem:[#allocation47_spill] sm:$0xff] %v9185_v19  ;;  %871 = vrot.lane.b32.xlu2 %v9188_v11, %s7910_s17  ;;  %v491_v3 = vrot.slane %v15830_v32, 2  ;;  %v488_v19 = vrot.slane %v15831_v17, 2  ;;  %v15837_v32 = vld [vmem:[#allocation62_spill] sm:$0xff] }
 0x10e   :  { %869 = vrot.lane.b32.xlu1 %v9191_v51, %s7910_s17  ;;  %15834 = vst [vmem:[#allocation55_spill] sm:$0xff] %v9214_v40  ;;  %v499_v9 = vrot.slane %v15837_v32, 2 }
 0x10f   :  { %867 = vrot.lane.b32.xlu0 %v9194_v10, %s7910_s17  ;;  %v9217_v12 = vsel %vm392_vm1, %v489_v18, %v491_v3  ;;  %v9220_v57 = vsel %vm392_vm1, %v488_v19, %v489_v18  ;;  %v15840_v3 = vld [vmem:[#allocation64_spill] sm:$0xff] }
 0x110   :  { %15835 = vst [vmem:[#allocation43_spill] sm:$0xff] %v9217_v12  ;;  %v9239_v14 = vsel %vm392_vm1, %v499_v9, %v501_v29 }
 0x111   :  { %15836 = vst [vmem:[#allocation165_spill] sm:$0xff] %v9220_v57 }
 0x112   :  { %v9204_v55 = vpop.permute.xlu2 %805  ;;  %v9209_v38 = vpop.permute.xlu1 %721 }
 0x113   :  { %15828 = vst [vmem:[#allocation54_spill] sm:$0xff] %v9204_v55  ;;  %v9211_v27 = vpop.permute.xlu0 %719 }
 0x114   :  { %15832 = vst [vmem:[#allocation52_spill] sm:$0xff] %v9209_v38  ;;  %v498_v38 = vrot.slane %v15840_v3, 2 }
 0x115   :  { %15833 = vst [vmem:[#allocation44_spill] sm:$0xff] %v9211_v27  ;;  %877 = vrot.lane.b32.xlu2 %v9214_v40, %s7910_s17  ;;  %v15841_v27 = vld [vmem:[#allocation53_spill] sm:$0xff] }
 0x116   :  { %875 = vrot.lane.b32.xlu1 %v9217_v12, %s7910_s17  ;;  %v496_v19 = vrot.slane %v15841_v27, 2  ;;  %15844 = vst [vmem:[#allocation53_spill] sm:$0xff] %v9239_v14  ;;  %v9242_v7 = vsel %vm392_vm1, %v498_v38, %v499_v9  ;;  %v15847_v27 = vld [vmem:[#allocation71_spill] sm:$0xff]  ;;  %v15850_v38 = vld [vmem:[#allocation61_spill] sm:$0xff] }
 0x117   :  { %873 = vrot.lane.b32.xlu0 %v9220_v57, %s7910_s17  ;;  %15845 = vst [vmem:[#allocation166_spill] sm:$0xff] %v9242_v7  ;;  %v508_v45 = vrot.slane %v15847_v27, 2  ;;  %v504_v9 = vrot.slane %v15850_v38, 2  ;;  %v15883_v57 = vld [vmem:[#allocation91_spill] sm:$0xff] }
 0x118   :  { %v9245_v21 = vsel %vm392_vm1, %v494_v43, %v496_v19  ;;  %v506_v43 = vrot.slane %v15851_v47, 2  ;;  %v15852_v19 = vld [vmem:[#allocation60_spill] sm:$0xff]  ;;  %v15858_v47 = vld [vmem:[#allocation81_spill] sm:$0xff] }
 0x119   :  { %15846 = vst [vmem:[#allocation167_spill] sm:$0xff] %v9245_v21  ;;  %v503_v46 = vrot.slane %v15852_v19, 2  ;;  %v514_v38 = vrot.slane %v15858_v47, 2 }
 0x11a   :  { %v9230_v17 = vpop.permute.xlu2 %811  ;;  %v9234_v18 = vpop.permute.xlu1 %727 }
 0x11b   :  { %15839 = vst [vmem:[#allocation62_spill] sm:$0xff] %v9230_v17  ;;  %v9236_v8 = vpop.permute.xlu0 %725  ;;  %v9268_v17 = vsel %vm392_vm1, %v504_v9, %v506_v43  ;;  %v9271_v55 = vsel %vm392_vm1, %v503_v46, %v504_v9  ;;  %v15861_v43 = vld [vmem:[#allocation83_spill] sm:$0xff] }
 0x11c   :  { %15842 = vst [vmem:[#allocation63_spill] sm:$0xff] %v9234_v18  ;;  %v15848_v18 = vld [vmem:[#allocation69_spill] sm:$0xff]  ;;  %v513_v42 = vrot.slane %v15861_v43, 2 }
 0x11d   :  { %15843 = vst [vmem:[#allocation64_spill] sm:$0xff] %v9236_v8  ;;  %883 = vrot.lane.b32.xlu2 %v9239_v14, %s7910_s17  ;;  %v509_v29 = vrot.slane %v15848_v18, 2 }
 0x11e   :  { %881 = vrot.lane.b32.xlu1 %v9242_v7, %s7910_s17  ;;  %15856 = vst [vmem:[#allocation60_spill] sm:$0xff] %v9268_v17 }
 0x11f   :  { %879 = vrot.lane.b32.xlu0 %v9245_v21, %s7910_s17  ;;  %v9265_v59 = vsel %vm392_vm1, %v508_v45, %v509_v29  ;;  %15857 = vst [vmem:[#allocation168_spill] sm:$0xff] %v9271_v55 }
 0x120   :  { %15855 = vst [vmem:[#allocation72_spill] sm:$0xff] %v9265_v59 }
 0x122   :  { %v9255_v8 = vpop.permute.xlu2 %817  ;;  %v9260_v35 = vpop.permute.xlu1 %797 }
 0x123   :  { %15849 = vst [vmem:[#allocation71_spill] sm:$0xff] %v9255_v8  ;;  %v9262_v22 = vpop.permute.xlu0 %731 }
 0x124   :  { %15853 = vst [vmem:[#allocation69_spill] sm:$0xff] %v9260_v35  ;;  %v15862_v35 = vld [vmem:[#allocation70_spill] sm:$0xff] }
 0x125   :  { %15854 = vst [vmem:[#allocation61_spill] sm:$0xff] %v9262_v22  ;;  %889 = vrot.lane.b32.xlu2 %v9265_v59, %s7910_s17  ;;  %v15859_v22 = vld [vmem:[#allocation82_spill] sm:$0xff]  ;;  %v511_v46 = vrot.slane %v15862_v35, 2 }
 0x126   :  { %887 = vrot.lane.b32.xlu1 %v9268_v17, %s7910_s17  ;;  %v516_v45 = vrot.slane %v15859_v22, 2  ;;  %v9293_v17 = vsel %vm392_vm1, %v513_v42, %v514_v38  ;;  %v15868_v22 = vld [vmem:[#allocation92_spill] sm:$0xff] }
 0x127   :  { %885 = vrot.lane.b32.xlu0 %v9271_v55, %s7910_s17  ;;  %15866 = vst [vmem:[#allocation169_spill] sm:$0xff] %v9293_v17  ;;  %v9296_v55 = vsel %vm392_vm1, %v509_v29, %v511_v46  ;;  %v523_v35 = vrot.slane %v15868_v22, 2  ;;  %v15871_v42 = vld [vmem:[#allocation80_spill] sm:$0xff]  ;;  %v15873_v46 = vld [vmem:[#allocation79_spill] sm:$0xff] }
 0x128   :  { %v9290_v59 = vsel %vm392_vm1, %v514_v38, %v516_v45  ;;  %15867 = vst [vmem:[#allocation170_spill] sm:$0xff] %v9296_v55  ;;  %v519_v38 = vrot.slane %v15871_v42, 2  ;;  %v518_v40 = vrot.slane %v15873_v46, 2 }
 0x129   :  { %15865 = vst [vmem:[#allocation70_spill] sm:$0xff] %v9290_v59 }
 0x12a   :  { %v9281_v8 = vpop.permute.xlu2 %823  ;;  %v9285_v9 = vpop.permute.xlu1 %803  ;;  %v9322_v7 = vsel %vm392_vm1, %v518_v40, %v519_v38  ;;  %v526_v40 = vrot.slane %v15883_v57, 2 }
 0x12b   :  { %15860 = vst [vmem:[#allocation81_spill] sm:$0xff] %v9281_v8  ;;  %v9287_v14 = vpop.permute.xlu0 %801  ;;  %v15869_v8 = vld [vmem:[#allocation90_spill] sm:$0xff] }
 0x12c   :  { %15863 = vst [vmem:[#allocation82_spill] sm:$0xff] %v9285_v9  ;;  %v524_v45 = vrot.slane %v15869_v8, 2 }
 0x12d   :  { %15864 = vst [vmem:[#allocation83_spill] sm:$0xff] %v9287_v14  ;;  %895 = vrot.lane.b32.xlu2 %v9290_v59, %s7910_s17  ;;  %v15872_v14 = vld [vmem:[#allocation93_spill] sm:$0xff] }
 0x12e   :  { %893 = vrot.lane.b32.xlu1 %v9293_v17, %s7910_s17  ;;  %v521_v29 = vrot.slane %v15872_v14, 2  ;;  %v9316_v17 = vsel %vm392_vm1, %v523_v35, %v524_v45  ;;  %15878 = vst [vmem:[#allocation171_spill] sm:$0xff] %v9322_v7  ;;  %v15879_v14 = vld [vmem:[#allocation102_spill] sm:$0xff] }
 0x12f   :  { %891 = vrot.lane.b32.xlu0 %v9296_v55, %s7910_s17  ;;  %15876 = vst [vmem:[#allocation93_spill] sm:$0xff] %v9316_v17 }
 0x130   :  { %v9319_v55 = vsel %vm392_vm1, %v519_v38, %v521_v29  ;;  %v15882_v29 = vld [vmem:[#allocation104_spill] sm:$0xff] }
 0x131   :  { %15877 = vst [vmem:[#allocation79_spill] sm:$0xff] %v9319_v55  ;;  %v528_v11 = vrot.slane %v15882_v29, 2 }
 0x132   :  { %v9306_v9 = vpop.permute.xlu2 %829  ;;  %v9311_v21 = vpop.permute.xlu1 %809 }
 0x133   :  { %15870 = vst [vmem:[#allocation92_spill] sm:$0xff] %v9306_v9  ;;  %v9313_v59 = vpop.permute.xlu0 %807  ;;  %v529_v9 = vrot.slane %v15879_v14, 2 }
 0x134   :  { %15874 = vst [vmem:[#allocation90_spill] sm:$0xff] %v9311_v21  ;;  %v15880_v21 = vld [vmem:[#allocation103_spill] sm:$0xff] }
 0x135   :  { %15875 = vst [vmem:[#allocation80_spill] sm:$0xff] %v9313_v59  ;;  %901 = vrot.lane.b32.xlu2 %v9316_v17, %s7910_s17  ;;  %v531_v35 = vrot.slane %v15880_v21, 2  ;;  %v15889_v21 = vld [vmem:[#allocation113_spill] sm:$0xff] }
 0x136   :  { %899 = vrot.lane.b32.xlu1 %v9319_v55, %s7910_s17  ;;  %v9344_v55 = vsel %vm392_vm1, %v528_v11, %v529_v9  ;;  %v538_v57 = vrot.slane %v15889_v21, 2  ;;  %v15892_v11 = vld [vmem:[#allocation101_spill] sm:$0xff] }
 0x137   :  { %897 = vrot.lane.b32.xlu0 %v9322_v7, %s7910_s17  ;;  %v9341_v17 = vsel %vm392_vm1, %v529_v9, %v531_v35  ;;  %15887 = vst [vmem:[#allocation172_spill] sm:$0xff] %v9344_v55  ;;  %v9347_v7 = vsel %vm392_vm1, %v524_v45, %v526_v40  ;;  %v534_v9 = vrot.slane %v15892_v11, 2  ;;  %v15894_v40 = vld [vmem:[#allocation100_spill] sm:$0xff] }
 0x138   :  { %15886 = vst [vmem:[#allocation91_spill] sm:$0xff] %v9341_v17  ;;  %v533_v62 = vrot.slane %v15894_v40, 2 }
 0x139   :  { %15888 = vst [vmem:[#allocation173_spill] sm:$0xff] %v9347_v7 }
 0x13a   :  { %v9332_v59 = vpop.permute.xlu2 %835  ;;  %v9336_v38 = vpop.permute.xlu1 %815  ;;  %v9373_v51 = vsel %vm392_vm1, %v533_v62, %v534_v9 }
 0x13b   :  { %15881 = vst [vmem:[#allocation102_spill] sm:$0xff] %v9332_v59  ;;  %v9338_v12 = vpop.permute.xlu0 %813  ;;  %v15890_v59 = vld [vmem:[#allocation111_spill] sm:$0xff] }
 0x13c   :  { %15884 = vst [vmem:[#allocation103_spill] sm:$0xff] %v9336_v38  ;;  %v539_v35 = vrot.slane %v15890_v59, 2 }
 0x13d   :  { %15885 = vst [vmem:[#allocation104_spill] sm:$0xff] %v9338_v12  ;;  %907 = vrot.lane.b32.xlu2 %v9341_v17, %s7910_s17  ;;  %v15893_v12 = vld [vmem:[#allocation114_spill] sm:$0xff] }
 0x13e   :  { %905 = vrot.lane.b32.xlu1 %v9344_v55, %s7910_s17  ;;  %v536_v45 = vrot.slane %v15893_v12, 2  ;;  %v9367_v55 = vsel %vm392_vm1, %v538_v57, %v539_v35  ;;  %15899 = vst [vmem:[#allocation174_spill] sm:$0xff] %v9373_v51  ;;  %v544_v12 = vrot.slane %v8834_v36, 2  ;;  %v546_v57 = vrot.slane %v8839_v60, 2 }
 0x13f   :  { %903 = vrot.lane.b32.xlu0 %v9347_v7, %s7910_s17  ;;  %15897 = vst [vmem:[#allocation114_spill] sm:$0xff] %v9367_v55 }
 0x140   :  { %v9370_v7 = vsel %vm392_vm1, %v534_v9, %v536_v45  ;;  %v543_v45 = vrot.slane %v8844_v16, 2 }
 0x141   :  { %15898 = vst [vmem:[#allocation100_spill] sm:$0xff] %v9370_v7 }
 0x142   :  { %v9357_v38 = vpop.permute.xlu2 %841  ;;  %v9362_v10 = vpop.permute.xlu1 %821 }
 0x143   :  { %15891 = vst [vmem:[#allocation113_spill] sm:$0xff] %v9357_v38  ;;  %v9364_v17 = vpop.permute.xlu0 %819 }
 0x144   :  { %15895 = vst [vmem:[#allocation111_spill] sm:$0xff] %v9362_v10  ;;  %v15901_v10 = vld [vmem:[#allocation112_spill] sm:$0xff] }
 0x145   :  { %15896 = vst [vmem:[#allocation101_spill] sm:$0xff] %v9364_v17  ;;  %913 = vrot.lane.b32.xlu2 %v9367_v55, %s7910_s17  ;;  %v541_v62 = vrot.slane %v15901_v10, 2  ;;  %v9392_v55 = vsel %vm392_vm1, %v544_v12, %v546_v57  ;;  %v15907_v10 = vld [vmem:[#allocation122_spill] sm:$0xff] }
 0x146   :  { %911 = vrot.lane.b32.xlu1 %v9370_v7, %s7910_s17  ;;  %15904 = vst [vmem:[#allocation177_spill] sm:$0xff] %v9392_v55  ;;  %v9395_v7 = vsel %vm392_vm1, %v543_v45, %v544_v12  ;;  %v549_v57 = vrot.slane %v15907_v10, 2  ;;  %v15908_v12 = vld [vmem:[#allocation121_spill] sm:$0xff] }
 0x147   :  { %909 = vrot.lane.b32.xlu0 %v9373_v51, %s7910_s17  ;;  %15905 = vst [vmem:[#allocation178_spill] sm:$0xff] %v9395_v7  ;;  %v9398_v51 = vsel %vm392_vm1, %v539_v35, %v541_v62  ;;  %v548_v45 = vrot.slane %v15908_v12, 2 }
 0x14a   :  { %v9383_v38 = vpop.permute.xlu2 %847  ;;  %v9387_v9 = vpop.permute.xlu1 %827 }
 0x14b   :  { %15900 = vst [vmem:[#allocation175_spill] sm:$0xff] %v9383_v38  ;;  %v9389_v17 = vpop.permute.xlu0 %825  ;;  %v551_v38 = vrot.slane %v8875_v13, 2 }
 0x14c   :  { %15902 = vst [vmem:[#allocation112_spill] sm:$0xff] %v9387_v9 }
 0x14d   :  { %15903 = vst [vmem:[#allocation176_spill] sm:$0xff] %v9389_v17  ;;  %919 = vrot.lane.b32.xlu2 %v9392_v55, %s7910_s17  ;;  %v9416_v62 = vsel %vm392_vm1, %v549_v57, %v551_v38  ;;  %v9419_v17 = vsel %vm392_vm1, %v548_v45, %v549_v57  ;;  %v9438_v57 = vld [vmem:[%s15185_s0 + $0x38] sm:$0xff]  ;;  %v7636_v45 = vld [vmem:[%s15185_s0 + $0x20] sm:$0xff] }
 0x14e   :  { %917 = vrot.lane.b32.xlu1 %v9395_v7, %s7910_s17  ;;  %15911 = vst [vmem:[#allocation180_spill] sm:$0xff] %v9416_v62  ;;  %v9726_v55 = vld [vmem:[%s15185_s0 + $0x1f8] sm:$0xff] }
 0x14f   :  { %915 = vrot.lane.b32.xlu0 %v9398_v51, %s7910_s17  ;;  %15912 = vst [vmem:[#allocation181_spill] sm:$0xff] %v9419_v17 }
 0x150   :  { %15916 = vst [vmem:[#allocation185_spill] sm:$0xff] %v9438_v57 }
 0x151   :  { %15977 = vst [vmem:[#allocation246_spill] sm:$0xff] %v9726_v55 }
 0x152   :  { %v9406_v60 = vpop.permute.xlu2 %853  ;;  %v9411_v9 = vpop.permute.xlu1 %833 }
 0x153   :  { %15906 = vst [vmem:[#allocation179_spill] sm:$0xff] %v9406_v60  ;;  %v9413_v35 = vpop.permute.xlu0 %831  ;;  %v7633_v60 = vld [vmem:[%s15185_s0 + $0x18] sm:$0xff] }
 0x154   :  { %15909 = vst [vmem:[#allocation122_spill] sm:$0xff] %v9411_v9 }
 0x155   :  { %15910 = vst [vmem:[#allocation121_spill] sm:$0xff] %v9413_v35  ;;  %989 = vrot.lane.b32.xlu2 %v7633_v60, %s7911_s20  ;;  %v9445_v60 = vld [vmem:[%s15185_s0 + $0x30] sm:$0xff]  ;;  %v9462_v35 = vld [vmem:[%s15185_s0 + $0x60] sm:$0xff] }
 0x156   :  { %923 = vrot.lane.b32.xlu1 %v9416_v62, %s7910_s17  ;;  %15917 = vst [vmem:[#allocation186_spill] sm:$0xff] %v9445_v60 }
 0x157   :  { %921 = vrot.lane.b32.xlu0 %v9419_v17, %s7910_s17  ;;  %15921 = vst [vmem:[#allocation190_spill] sm:$0xff] %v9462_v35 }
 0x15a   :  { %v9429_v13 = vpop.permute.xlu2 %859  ;;  %v9431_v38 = vpop.permute.xlu1 %839 }
 0x15b   :  { %15913 = vst [vmem:[#allocation182_spill] sm:$0xff] %v9429_v13  ;;  %v9433_v9 = vpop.permute.xlu0 %837 }
 0x15c   :  { %15914 = vst [vmem:[#allocation183_spill] sm:$0xff] %v9431_v38 }
 0x15d   :  { %15915 = vst [vmem:[#allocation184_spill] sm:$0xff] %v9433_v9  ;;  %995 = vrot.lane.b32.xlu2 %v9438_v57, %s7911_s20  ;;  %v9469_v57 = vld [vmem:[%s15185_s0 + $0x50] sm:$0xff] }
 0x15e   :  { %993 = vrot.lane.b32.xlu1 %v9445_v60, %s7911_s20  ;;  %15922 = vst [vmem:[#allocation191_spill] sm:$0xff] %v9469_v57  ;;  %v9705_v60 = vld [vmem:[%s15185_s0 + $0x188] sm:$0xff] }
 0x15f   :  { %991 = vrot.lane.b32.xlu0 %v7636_v45, %s7911_s20  ;;  %v9476_v45 = vld [vmem:[%s15185_s0 + $0x48] sm:$0xff] }
 0x160   :  { %15923 = vst [vmem:[#allocation192_spill] sm:$0xff] %v9476_v45 }
 0x162   :  { %v9453_v13 = vpop.permute.xlu2 %865  ;;  %v9455_v38 = vpop.permute.xlu1 %845 }
 0x163   :  { %15918 = vst [vmem:[#allocation187_spill] sm:$0xff] %v9453_v13  ;;  %v9457_v9 = vpop.permute.xlu0 %843 }
 0x164   :  { %15919 = vst [vmem:[#allocation188_spill] sm:$0xff] %v9455_v38 }
 0x165   :  { %15920 = vst [vmem:[#allocation189_spill] sm:$0xff] %v9457_v9  ;;  %1001 = vrot.lane.b32.xlu2 %v9462_v35, %s7911_s20  ;;  %v9489_v35 = vld [vmem:[%s15185_s0 + $0x80] sm:$0xff] }
 0x166   :  { %999 = vrot.lane.b32.xlu1 %v9469_v57, %s7911_s20  ;;  %15927 = vst [vmem:[#allocation196_spill] sm:$0xff] %v9489_v35  ;;  %v9496_v57 = vld [vmem:[%s15185_s0 + $0x78] sm:$0xff] }
 0x167   :  { %997 = vrot.lane.b32.xlu0 %v9476_v45, %s7911_s20  ;;  %15928 = vst [vmem:[#allocation197_spill] sm:$0xff] %v9496_v57  ;;  %v9516_v45 = vld [vmem:[%s15185_s0 + $0xa8] sm:$0xff] }
 0x168   :  { %15933 = vst [vmem:[#allocation202_spill] sm:$0xff] %v9516_v45 }
 0x16a   :  { %v9480_v13 = vpop.permute.xlu2 %871  ;;  %v9482_v38 = vpop.permute.xlu1 %851 }
 0x16b   :  { %15924 = vst [vmem:[#allocation193_spill] sm:$0xff] %v9480_v13  ;;  %v9484_v9 = vpop.permute.xlu0 %849  ;;  %v9503_v13 = vld [vmem:[%s15185_s0 + $0x68] sm:$0xff] }
 0x16c   :  { %15925 = vst [vmem:[#allocation194_spill] sm:$0xff] %v9482_v38 }
 0x16d   :  { %15926 = vst [vmem:[#allocation195_spill] sm:$0xff] %v9484_v9  ;;  %1007 = vrot.lane.b32.xlu2 %v9489_v35, %s7911_s20 }
 0x16e   :  { %1005 = vrot.lane.b32.xlu1 %v9496_v57, %s7911_s20  ;;  %15929 = vst [vmem:[#allocation198_spill] sm:$0xff] %v9503_v13  ;;  %v9523_v57 = vld [vmem:[%s15185_s0 + $0x98] sm:$0xff] }
 0x16f   :  { %1003 = vrot.lane.b32.xlu0 %v9503_v13, %s7911_s20  ;;  %15934 = vst [vmem:[#allocation203_spill] sm:$0xff] %v9523_v57  ;;  %v9543_v13 = vld [vmem:[%s15185_s0 + $0xc8] sm:$0xff] }
 0x170   :  { %15939 = vst [vmem:[#allocation208_spill] sm:$0xff] %v9543_v13 }
 0x172   :  { %v9507_v38 = vpop.permute.xlu2 %877  ;;  %v9509_v9 = vpop.permute.xlu1 %857 }
 0x173   :  { %15930 = vst [vmem:[#allocation199_spill] sm:$0xff] %v9507_v38  ;;  %v9511_v35 = vpop.permute.xlu0 %855  ;;  %v9530_v38 = vld [vmem:[%s15185_s0 + $0x90] sm:$0xff] }
 0x174   :  { %15931 = vst [vmem:[#allocation200_spill] sm:$0xff] %v9509_v9 }
 0x175   :  { %15932 = vst [vmem:[#allocation201_spill] sm:$0xff] %v9511_v35  ;;  %1013 = vrot.lane.b32.xlu2 %v9516_v45, %s7911_s20 }
 0x176   :  { %1011 = vrot.lane.b32.xlu1 %v9523_v57, %s7911_s20  ;;  %15935 = vst [vmem:[#allocation204_spill] sm:$0xff] %v9530_v38  ;;  %v9550_v57 = vld [vmem:[%s15185_s0 + $0xc0] sm:$0xff] }
 0x177   :  { %1009 = vrot.lane.b32.xlu0 %v9530_v38, %s7911_s20  ;;  %15940 = vst [vmem:[#allocation209_spill] sm:$0xff] %v9550_v57  ;;  %v9570_v38 = vld [vmem:[%s15185_s0 + $0xf0] sm:$0xff] }
 0x178   :  { %15945 = vst [vmem:[#allocation214_spill] sm:$0xff] %v9570_v38 }
 0x17a   :  { %v9534_v9 = vpop.permute.xlu2 %883  ;;  %v9536_v35 = vpop.permute.xlu1 %863 }
 0x17b   :  { %15936 = vst [vmem:[#allocation205_spill] sm:$0xff] %v9534_v9  ;;  %v9538_v45 = vpop.permute.xlu0 %861  ;;  %v9557_v9 = vld [vmem:[%s15185_s0 + $0xb0] sm:$0xff] }
 0x17c   :  { %15937 = vst [vmem:[#allocation206_spill] sm:$0xff] %v9536_v35 }
 0x17d   :  { %15938 = vst [vmem:[#allocation207_spill] sm:$0xff] %v9538_v45  ;;  %1019 = vrot.lane.b32.xlu2 %v9543_v13, %s7911_s20 }
 0x17e   :  { %1017 = vrot.lane.b32.xlu1 %v9550_v57, %s7911_s20  ;;  %15941 = vst [vmem:[#allocation210_spill] sm:$0xff] %v9557_v9  ;;  %v9577_v57 = vld [vmem:[%s15185_s0 + $0xe0] sm:$0xff] }
 0x17f   :  { %1015 = vrot.lane.b32.xlu0 %v9557_v9, %s7911_s20  ;;  %15946 = vst [vmem:[#allocation215_spill] sm:$0xff] %v9577_v57  ;;  %v9597_v9 = vld [vmem:[%s15185_s0 + $0x110] sm:$0xff] }
 0x180   :  { %15951 = vst [vmem:[#allocation220_spill] sm:$0xff] %v9597_v9 }
 0x182   :  { %v9561_v35 = vpop.permute.xlu2 %889  ;;  %v9563_v45 = vpop.permute.xlu1 %869 }
 0x183   :  { %15942 = vst [vmem:[#allocation211_spill] sm:$0xff] %v9561_v35  ;;  %v9565_v13 = vpop.permute.xlu0 %867  ;;  %v9584_v35 = vld [vmem:[%s15185_s0 + $0xd8] sm:$0xff] }
 0x184   :  { %15943 = vst [vmem:[#allocation212_spill] sm:$0xff] %v9563_v45 }
 0x185   :  { %15944 = vst [vmem:[#allocation213_spill] sm:$0xff] %v9565_v13  ;;  %1025 = vrot.lane.b32.xlu2 %v9570_v38, %s7911_s20 }
 0x186   :  { %1023 = vrot.lane.b32.xlu1 %v9577_v57, %s7911_s20  ;;  %15947 = vst [vmem:[#allocation216_spill] sm:$0xff] %v9584_v35  ;;  %v9604_v57 = vld [vmem:[%s15185_s0 + $0x108] sm:$0xff] }
 0x187   :  { %1021 = vrot.lane.b32.xlu0 %v9584_v35, %s7911_s20  ;;  %15952 = vst [vmem:[#allocation221_spill] sm:$0xff] %v9604_v57  ;;  %v9624_v35 = vld [vmem:[%s15185_s0 + $0x138] sm:$0xff] }
 0x188   :  { %15957 = vst [vmem:[#allocation226_spill] sm:$0xff] %v9624_v35 }
 0x18a   :  { %v9588_v45 = vpop.permute.xlu2 %895  ;;  %v9590_v13 = vpop.permute.xlu1 %875 }
 0x18b   :  { %15948 = vst [vmem:[#allocation217_spill] sm:$0xff] %v9588_v45  ;;  %v9592_v38 = vpop.permute.xlu0 %873  ;;  %v9611_v45 = vld [vmem:[%s15185_s0 + $0xf8] sm:$0xff] }
 0x18c   :  { %15949 = vst [vmem:[#allocation218_spill] sm:$0xff] %v9590_v13 }
 0x18d   :  { %15950 = vst [vmem:[#allocation219_spill] sm:$0xff] %v9592_v38  ;;  %1031 = vrot.lane.b32.xlu2 %v9597_v9, %s7911_s20 }
 0x18e   :  { %1029 = vrot.lane.b32.xlu1 %v9604_v57, %s7911_s20  ;;  %15953 = vst [vmem:[#allocation222_spill] sm:$0xff] %v9611_v45  ;;  %v9631_v57 = vld [vmem:[%s15185_s0 + $0x128] sm:$0xff] }
 0x18f   :  { %1027 = vrot.lane.b32.xlu0 %v9611_v45, %s7911_s20  ;;  %15958 = vst [vmem:[#allocation227_spill] sm:$0xff] %v9631_v57  ;;  %v9651_v45 = vld [vmem:[%s15185_s0 + $0x158] sm:$0xff] }
 0x190   :  { %15963 = vst [vmem:[#allocation232_spill] sm:$0xff] %v9651_v45 }
 0x192   :  { %v9615_v13 = vpop.permute.xlu2 %901  ;;  %v9617_v38 = vpop.permute.xlu1 %881 }
 0x193   :  { %15954 = vst [vmem:[#allocation223_spill] sm:$0xff] %v9615_v13  ;;  %v9619_v9 = vpop.permute.xlu0 %879  ;;  %v9638_v13 = vld [vmem:[%s15185_s0 + $0x120] sm:$0xff] }
 0x194   :  { %15955 = vst [vmem:[#allocation224_spill] sm:$0xff] %v9617_v38 }
 0x195   :  { %15956 = vst [vmem:[#allocation225_spill] sm:$0xff] %v9619_v9  ;;  %1037 = vrot.lane.b32.xlu2 %v9624_v35, %s7911_s20 }
 0x196   :  { %1035 = vrot.lane.b32.xlu1 %v9631_v57, %s7911_s20  ;;  %15959 = vst [vmem:[#allocation228_spill] sm:$0xff] %v9638_v13  ;;  %v9658_v57 = vld [vmem:[%s15185_s0 + $0x150] sm:$0xff] }
 0x197   :  { %1033 = vrot.lane.b32.xlu0 %v9638_v13, %s7911_s20  ;;  %15964 = vst [vmem:[#allocation233_spill] sm:$0xff] %v9658_v57  ;;  %v9678_v13 = vld [vmem:[%s15185_s0 + $0x180] sm:$0xff] }
 0x19a   :  { %v9642_v38 = vpop.permute.xlu2 %907  ;;  %v9644_v9 = vpop.permute.xlu1 %887 }
 0x19b   :  { %15960 = vst [vmem:[#allocation229_spill] sm:$0xff] %v9642_v38  ;;  %v9646_v35 = vpop.permute.xlu0 %885  ;;  %v9665_v38 = vld [vmem:[%s15185_s0 + $0x140] sm:$0xff] }
 0x19c   :  { %15961 = vst [vmem:[#allocation230_spill] sm:$0xff] %v9644_v9 }
 0x19d   :  { %15962 = vst [vmem:[#allocation231_spill] sm:$0xff] %v9646_v35  ;;  %1043 = vrot.lane.b32.xlu2 %v9651_v45, %s7911_s20 }
 0x19e   :  { %1041 = vrot.lane.b32.xlu1 %v9658_v57, %s7911_s20  ;;  %15965 = vst [vmem:[#allocation234_spill] sm:$0xff] %v9665_v38  ;;  %v9685_v57 = vld [vmem:[%s15185_s0 + $0x170] sm:$0xff] }
 0x19f   :  { %1039 = vrot.lane.b32.xlu0 %v9665_v38, %s7911_s20  ;;  %15969 = vst [vmem:[#allocation238_spill] sm:$0xff] %v9685_v57 }
 0x1a2   :  { %v9669_v9 = vpop.permute.xlu2 %913  ;;  %v9671_v35 = vpop.permute.xlu1 %893 }
 0x1a3   :  { %15966 = vst [vmem:[#allocation235_spill] sm:$0xff] %v9669_v9  ;;  %v9673_v45 = vpop.permute.xlu0 %891  ;;  %v9692_v9 = vld [vmem:[%s15185_s0 + $0x168] sm:$0xff] }
 0x1a4   :  { %15967 = vst [vmem:[#allocation236_spill] sm:$0xff] %v9671_v35 }
 0x1a5   :  { %15968 = vst [vmem:[#allocation237_spill] sm:$0xff] %v9673_v45  ;;  %1049 = vrot.lane.b32.xlu2 %v9678_v13, %s7911_s20 }
 0x1a6   :  { %1047 = vrot.lane.b32.xlu1 %v9685_v57, %s7911_s20  ;;  %15970 = vst [vmem:[#allocation239_spill] sm:$0xff] %v9692_v9  ;;  %v7663_v57 = vld [vmem:[%s15185_s0 + $0x1d0] sm:$0xff] }
 0x1a7   :  { %1045 = vrot.lane.b32.xlu0 %v9692_v9, %s7911_s20  ;;  %v7664_v9 = vld [vmem:[%s15185_s0 + $0x1c8] sm:$0xff] }
 0x1aa   :  { %v9696_v35 = vpop.permute.xlu2 %919  ;;  %v9698_v45 = vpop.permute.xlu1 %899 }
 0x1ab   :  { %15971 = vst [vmem:[#allocation240_spill] sm:$0xff] %v9696_v35  ;;  %v9700_v38 = vpop.permute.xlu0 %897 }
 0x1ac   :  { %15972 = vst [vmem:[#allocation241_spill] sm:$0xff] %v9698_v45 }
 0x1ad   :  { %15973 = vst [vmem:[#allocation242_spill] sm:$0xff] %v9700_v38  ;;  %1055 = vrot.lane.b32.xlu2 %v7663_v57, %s7911_s20  ;;  %v9740_v57 = vld [vmem:[%s15185_s0 + $0x1e0] sm:$0xff] }
 0x1ae   :  { %1053 = vrot.lane.b32.xlu1 %v7664_v9, %s7911_s20  ;;  %v9733_v9 = vld [vmem:[%s15185_s0 + $0x1e8] sm:$0xff]  ;;  %15979 = vst [vmem:[#allocation248_spill] sm:$0xff] %v9740_v57 }
 0x1af   :  { %1051 = vrot.lane.b32.xlu0 %v9705_v60, %s7911_s20  ;;  %15978 = vst [vmem:[#allocation247_spill] sm:$0xff] %v9733_v9 }
 0x1b2   :  { %v9717_v35 = vpop.permute.xlu2 %989  ;;  %v9719_v45 = vpop.permute.xlu1 %905 }
 0x1b3   :  { %15974 = vst [vmem:[#allocation243_spill] sm:$0xff] %v9717_v35  ;;  %v9721_v38 = vpop.permute.xlu0 %903 }
 0x1b4   :  { %15975 = vst [vmem:[#allocation244_spill] sm:$0xff] %v9719_v45 }
 0x1b5   :  { %15976 = vst [vmem:[#allocation245_spill] sm:$0xff] %v9721_v38  ;;  %1061 = vrot.lane.b32.xlu2 %v9726_v55, %s7911_s20  ;;  %v9753_v55 = vld [vmem:[%s15185_s0 + $0x218] sm:$0xff] }
 0x1b6   :  { %1059 = vrot.lane.b32.xlu1 %v9733_v9, %s7911_s20  ;;  %15983 = vst [vmem:[#allocation252_spill] sm:$0xff] %v9753_v55  ;;  %v9760_v9 = vld [vmem:[%s15185_s0 + $0x210] sm:$0xff] }
 0x1b7   :  { %1057 = vrot.lane.b32.xlu0 %v9740_v57, %s7911_s20  ;;  %15984 = vst [vmem:[#allocation253_spill] sm:$0xff] %v9760_v9 }
 0x1ba   :  { %v9744_v45 = vpop.permute.xlu2 %995  ;;  %v9746_v38 = vpop.permute.xlu1 %911 }
 0x1bb   :  { %15980 = vst [vmem:[#allocation249_spill] sm:$0xff] %v9744_v45  ;;  %v9748_v35 = vpop.permute.xlu0 %909 }
 0x1bc   :  { %15981 = vst [vmem:[#allocation250_spill] sm:$0xff] %v9746_v38  ;;  %v9767_v38 = vld [vmem:[%s15185_s0 + $0x200] sm:$0xff] }
 0x1bd   :  { %15982 = vst [vmem:[#allocation251_spill] sm:$0xff] %v9748_v35  ;;  %1067 = vrot.lane.b32.xlu2 %v9753_v55, %s7911_s20 }
 0x1be   :  { %1065 = vrot.lane.b32.xlu1 %v9760_v9, %s7911_s20  ;;  %15985 = vst [vmem:[#allocation254_spill] sm:$0xff] %v9767_v38 }
 0x1bf   :  { %1063 = vrot.lane.b32.xlu0 %v9767_v38, %s7911_s20 }
 0x1c2   :  { %v9771_v35 = vpop.permute.xlu2 %1001  ;;  %v9773_v45 = vpop.permute.xlu1 %917 }
 0x1c3   :  { %15986 = vst [vmem:[#allocation255_spill] sm:$0xff] %v9771_v35  ;;  %v9775_v55 = vpop.permute.xlu0 %915 }
 0x1c4   :  { %15987 = vst [vmem:[#allocation256_spill] sm:$0xff] %v9773_v45  ;;  %v9869_v45 = vld [vmem:[%s15185_s0 + $0x338] sm:$0xff] }
 0x1c5   :  { %15988 = vst [vmem:[#allocation257_spill] sm:$0xff] %v9775_v55  ;;  %1073 = vrot.lane.b32.xlu2 %v15852_v19, %s7911_s20  ;;  %v9796_v19 = vld [vmem:[%s15185_s0 + $0x248] sm:$0xff] }
 0x1c6   :  { %1071 = vrot.lane.b32.xlu1 %v15837_v32, %s7911_s20 }
 0x1c7   :  { %1069 = vrot.lane.b32.xlu0 %v15840_v3, %s7911_s20 }
 0x1ca   :  { %v9783_v9 = vpop.permute.xlu2 %1007  ;;  %v9785_v57 = vpop.permute.xlu1 %923 }
 0x1cb   :  { %15989 = vst [vmem:[#allocation258_spill] sm:$0xff] %v9783_v9  ;;  %v9787_v38 = vpop.permute.xlu0 %921 }
 0x1cc   :  { %15990 = vst [vmem:[#allocation259_spill] sm:$0xff] %v9785_v57 }
 0x1cd   :  { %15991 = vst [vmem:[#allocation260_spill] sm:$0xff] %v9787_v38  ;;  %1079 = vrot.lane.b32.xlu2 %v15848_v18, %s7911_s20 }
 0x1ce   :  { %1077 = vrot.lane.b32.xlu1 %v15847_v27, %s7911_s20 }
 0x1cf   :  { %1075 = vrot.lane.b32.xlu0 %v9796_v19, %s7911_s20 }
 0x1d2   :  { %v9800_v32 = vpop.permute.xlu2 %1013  ;;  %v9802_v3 = vpop.permute.xlu1 %993 }
 0x1d3   :  { %15992 = vst [vmem:[#allocation261_spill] sm:$0xff] %v9800_v32  ;;  %v9804_v57 = vpop.permute.xlu0 %991 }
 0x1d4   :  { %15993 = vst [vmem:[#allocation262_spill] sm:$0xff] %v9802_v3 }
 0x1d5   :  { %15994 = vst [vmem:[#allocation263_spill] sm:$0xff] %v9804_v57  ;;  %1085 = vrot.lane.b32.xlu2 %v15873_v46, %s7911_s20 }
 0x1d6   :  { %1083 = vrot.lane.b32.xlu1 %v15858_v47, %s7911_s20 }
 0x1d7   :  { %1081 = vrot.lane.b32.xlu0 %v15861_v43, %s7911_s20 }
 0x1da   :  { %v9812_v18 = vpop.permute.xlu2 %1019  ;;  %v9814_v27 = vpop.permute.xlu1 %999 }
 0x1db   :  { %15995 = vst [vmem:[#allocation264_spill] sm:$0xff] %v9812_v18  ;;  %v9816_v38 = vpop.permute.xlu0 %997 }
 0x1dc   :  { %15996 = vst [vmem:[#allocation265_spill] sm:$0xff] %v9814_v27 }
 0x1dd   :  { %15997 = vst [vmem:[#allocation266_spill] sm:$0xff] %v9816_v38  ;;  %1091 = vrot.lane.b32.xlu2 %v15869_v8, %s7911_s20 }
 0x1de   :  { %1089 = vrot.lane.b32.xlu1 %v15868_v22, %s7911_s20 }
 0x1df   :  { %1087 = vrot.lane.b32.xlu0 %v15871_v42, %s7911_s20 }
 0x1e2   :  { %v9824_v46 = vpop.permute.xlu2 %1025  ;;  %v9826_v47 = vpop.permute.xlu1 %1005 }
 0x1e3   :  { %15998 = vst [vmem:[#allocation267_spill] sm:$0xff] %v9824_v46  ;;  %v9828_v43 = vpop.permute.xlu0 %1003 }
 0x1e4   :  { %15999 = vst [vmem:[#allocation268_spill] sm:$0xff] %v9826_v47 }
 0x1e5   :  { %16000 = vst [vmem:[#allocation269_spill] sm:$0xff] %v9828_v43  ;;  %1097 = vrot.lane.b32.xlu2 %v15894_v40, %s7911_s20 }
 0x1e6   :  { %1095 = vrot.lane.b32.xlu1 %v15879_v14, %s7911_s20 }
 0x1e7   :  { %1093 = vrot.lane.b32.xlu0 %v15882_v29, %s7911_s20 }
 0x1ea   :  { %v9836_v8 = vpop.permute.xlu2 %1031  ;;  %v9838_v22 = vpop.permute.xlu1 %1011 }
 0x1eb   :  { %16001 = vst [vmem:[#allocation270_spill] sm:$0xff] %v9836_v8  ;;  %v9840_v42 = vpop.permute.xlu0 %1009  ;;  %v16015_v8 = vld [vmem:[#allocation7_spill] sm:$0xff] }
 0x1ec   :  { %16002 = vst [vmem:[#allocation271_spill] sm:$0xff] %v9838_v22 }
 0x1ed   :  { %16003 = vst [vmem:[#allocation272_spill] sm:$0xff] %v9840_v42  ;;  %1103 = vrot.lane.b32.xlu2 %v15890_v59, %s7911_s20 }
 0x1ee   :  { %1101 = vrot.lane.b32.xlu1 %v15889_v21, %s7911_s20 }
 0x1ef   :  { %1099 = vrot.lane.b32.xlu0 %v15892_v11, %s7911_s20 }
 0x1f2   :  { %v9848_v40 = vpop.permute.xlu2 %1037  ;;  %v9850_v14 = vpop.permute.xlu1 %1017 }
 0x1f3   :  { %16004 = vst [vmem:[#allocation273_spill] sm:$0xff] %v9848_v40  ;;  %v9852_v29 = vpop.permute.xlu0 %1015  ;;  %v16014_v40 = vld [vmem:[#allocation9_spill] sm:$0xff] }
 0x1f4   :  { %16005 = vst [vmem:[#allocation274_spill] sm:$0xff] %v9850_v14 }
 0x1f5   :  { %16006 = vst [vmem:[#allocation275_spill] sm:$0xff] %v9852_v29  ;;  %1109 = vrot.lane.b32.xlu2 %v15908_v12, %s7911_s20  ;;  %v9874_v12 = vld [vmem:[%s15185_s0 + $0x330] sm:$0xff] }
 0x1f6   :  { %1107 = vrot.lane.b32.xlu1 %v8834_v36, %s7911_s20 }
 0x1f7   :  { %1105 = vrot.lane.b32.xlu0 %v8844_v16, %s7911_s20 }
 0x1fa   :  { %v9860_v59 = vpop.permute.xlu2 %1043  ;;  %v9862_v21 = vpop.permute.xlu1 %1023 }
 0x1fb   :  { %16007 = vst [vmem:[#allocation276_spill] sm:$0xff] %v9860_v59  ;;  %v9864_v11 = vpop.permute.xlu0 %1021  ;;  %v16013_v59 = vld [vmem:[#allocation6_spill] sm:$0xff] }
 0x1fc   :  { %16008 = vst [vmem:[#allocation277_spill] sm:$0xff] %v9862_v21 }
 0x1fd   :  { %16009 = vst [vmem:[#allocation278_spill] sm:$0xff] %v9864_v11  ;;  %1115 = vrot.lane.b32.xlu2 %v9869_v45, %s7911_s20 }
 0x1fe   :  { %1113 = vrot.lane.b32.xlu1 %v9874_v12, %s7911_s20 }
 0x1ff   :  { %1111 = vrot.lane.b32.xlu0 %v15907_v10, %s7911_s20 }
 0x202   :  { %v9882_v36 = vpop.permute.xlu2 %1049  ;;  %v9884_v16 = vpop.permute.xlu1 %1029 }
 0x203   :  { %16010 = vst [vmem:[#allocation279_spill] sm:$0xff] %v9882_v36  ;;  %v9886_v55 = vpop.permute.xlu0 %1027  ;;  %v16019_v36 = vld [vmem:[#allocation11_spill] sm:$0xff] }
 0x204   :  { %16011 = vst [vmem:[#allocation280_spill] sm:$0xff] %v9884_v16  ;;  %v16020_v16 = vld [vmem:[#allocation12_spill] sm:$0xff] }
 0x205   :  { %16012 = vst [vmem:[#allocation281_spill] sm:$0xff] %v9886_v55  ;;  %1185 = vrot.lane.b32.xlu2 %v16013_v59, %s7912_s16  ;;  %v16021_v55 = vld [vmem:[#allocation8_spill] sm:$0xff] }
 0x206   :  { %1183 = vrot.lane.b32.xlu1 %v16014_v40, %s7912_s16 }
 0x207   :  { %1181 = vrot.lane.b32.xlu0 %v16015_v8, %s7912_s16 }
 0x20a   :  { %v9894_v46 = vpop.permute.xlu2 %1055  ;;  %v9896_v21 = vpop.permute.xlu1 %1035 }
 0x20b   :  { %16016 = vst [vmem:[#allocation6_spill] sm:$0xff] %v9894_v46  ;;  %v9898_v10 = vpop.permute.xlu0 %1033  ;;  %v16025_v46 = vld [vmem:[#allocation14_spill] sm:$0xff] }
 0x20c   :  { %16017 = vst [vmem:[#allocation9_spill] sm:$0xff] %v9896_v21  ;;  %v16026_v21 = vld [vmem:[#allocation15_spill] sm:$0xff] }
 0x20d   :  { %16018 = vst [vmem:[#allocation7_spill] sm:$0xff] %v9898_v10  ;;  %1191 = vrot.lane.b32.xlu2 %v16019_v36, %s7912_s16  ;;  %v16027_v10 = vld [vmem:[#allocation10_spill] sm:$0xff] }
 0x20e   :  { %1189 = vrot.lane.b32.xlu1 %v16020_v16, %s7912_s16 }
 0x20f   :  { %1187 = vrot.lane.b32.xlu0 %v16021_v55, %s7912_s16 }
 0x212   :  { %v9906_v11 = vpop.permute.xlu2 %1061  ;;  %v9908_v40 = vpop.permute.xlu1 %1041 }
 0x213   :  { %16022 = vst [vmem:[#allocation11_spill] sm:$0xff] %v9906_v11  ;;  %v9910_v8 = vpop.permute.xlu0 %1039  ;;  %v16031_v11 = vld [vmem:[#allocation17_spill] sm:$0xff] }
 0x214   :  { %16023 = vst [vmem:[#allocation12_spill] sm:$0xff] %v9908_v40  ;;  %v16032_v40 = vld [vmem:[#allocation18_spill] sm:$0xff] }
 0x215   :  { %16024 = vst [vmem:[#allocation8_spill] sm:$0xff] %v9910_v8  ;;  %1197 = vrot.lane.b32.xlu2 %v16025_v46, %s7912_s16  ;;  %v16033_v8 = vld [vmem:[#allocation13_spill] sm:$0xff] }
 0x216   :  { %1195 = vrot.lane.b32.xlu1 %v16026_v21, %s7912_s16 }
 0x217   :  { %1193 = vrot.lane.b32.xlu0 %v16027_v10, %s7912_s16 }
 0x21a   :  { %v9918_v18 = vpop.permute.xlu2 %1067  ;;  %v9920_v14 = vpop.permute.xlu1 %1047 }
 0x21b   :  { %16028 = vst [vmem:[#allocation14_spill] sm:$0xff] %v9918_v18  ;;  %v9922_v29 = vpop.permute.xlu0 %1045  ;;  %v16037_v18 = vld [vmem:[#allocation20_spill] sm:$0xff] }
 0x21c   :  { %16029 = vst [vmem:[#allocation15_spill] sm:$0xff] %v9920_v14  ;;  %v16038_v14 = vld [vmem:[#allocation21_spill] sm:$0xff] }
 0x21d   :  { %16030 = vst [vmem:[#allocation10_spill] sm:$0xff] %v9922_v29  ;;  %1203 = vrot.lane.b32.xlu2 %v16031_v11, %s7912_s16  ;;  %v16039_v29 = vld [vmem:[#allocation16_spill] sm:$0xff] }
 0x21e   :  { %1201 = vrot.lane.b32.xlu1 %v16032_v40, %s7912_s16 }
 0x21f   :  { %1199 = vrot.lane.b32.xlu0 %v16033_v8, %s7912_s16 }
 0x222   :  { %v9930_v32 = vpop.permute.xlu2 %1073  ;;  %v9932_v22 = vpop.permute.xlu1 %1053 }
 0x223   :  { %16034 = vst [vmem:[#allocation17_spill] sm:$0xff] %v9930_v32  ;;  %v9934_v42 = vpop.permute.xlu0 %1051  ;;  %v16043_v32 = vld [vmem:[#allocation23_spill] sm:$0xff] }
 0x224   :  { %16035 = vst [vmem:[#allocation18_spill] sm:$0xff] %v9932_v22  ;;  %v16044_v22 = vld [vmem:[#allocation24_spill] sm:$0xff] }
 0x225   :  { %16036 = vst [vmem:[#allocation13_spill] sm:$0xff] %v9934_v42  ;;  %1209 = vrot.lane.b32.xlu2 %v16037_v18, %s7912_s16  ;;  %v16045_v42 = vld [vmem:[#allocation19_spill] sm:$0xff] }
 0x226   :  { %1207 = vrot.lane.b32.xlu1 %v16038_v14, %s7912_s16 }
 0x227   :  { %1205 = vrot.lane.b32.xlu0 %v16039_v29, %s7912_s16 }
 0x22a   :  { %v9942_v9 = vpop.permute.xlu2 %1079  ;;  %v9944_v47 = vpop.permute.xlu1 %1059 }
 0x22b   :  { %16040 = vst [vmem:[#allocation21_spill] sm:$0xff] %v9942_v9  ;;  %v9946_v43 = vpop.permute.xlu0 %1057  ;;  %v16049_v9 = vld [vmem:[#allocation26_spill] sm:$0xff] }
 0x22c   :  { %16041 = vst [vmem:[#allocation16_spill] sm:$0xff] %v9944_v47  ;;  %v16050_v47 = vld [vmem:[#allocation27_spill] sm:$0xff] }
 0x22d   :  { %16042 = vst [vmem:[#allocation282_spill] sm:$0xff] %v9946_v43  ;;  %1215 = vrot.lane.b32.xlu2 %v16043_v32, %s7912_s16  ;;  %v16051_v43 = vld [vmem:[#allocation22_spill] sm:$0xff] }
 0x22e   :  { %1213 = vrot.lane.b32.xlu1 %v16044_v22, %s7912_s16 }
 0x22f   :  { %1211 = vrot.lane.b32.xlu0 %v16045_v42, %s7912_s16 }
 0x232   :  { %v9954_v35 = vpop.permute.xlu2 %1085  ;;  %v9956_v27 = vpop.permute.xlu1 %1065 }
 0x233   :  { %16046 = vst [vmem:[#allocation24_spill] sm:$0xff] %v9954_v35  ;;  %v9958_v38 = vpop.permute.xlu0 %1063  ;;  %v16055_v35 = vld [vmem:[#allocation29_spill] sm:$0xff] }
 0x234   :  { %16047 = vst [vmem:[#allocation19_spill] sm:$0xff] %v9956_v27  ;;  %v16056_v27 = vld [vmem:[#allocation30_spill] sm:$0xff] }
 0x235   :  { %16048 = vst [vmem:[#allocation283_spill] sm:$0xff] %v9958_v38  ;;  %1221 = vrot.lane.b32.xlu2 %v16049_v9, %s7912_s16  ;;  %v16057_v38 = vld [vmem:[#allocation25_spill] sm:$0xff] }
 0x236   :  { %1219 = vrot.lane.b32.xlu1 %v16050_v47, %s7912_s16 }
 0x237   :  { %1217 = vrot.lane.b32.xlu0 %v16051_v43, %s7912_s16 }
 0x23a   :  { %v9966_v3 = vpop.permute.xlu2 %1091  ;;  %v9968_v57 = vpop.permute.xlu1 %1071 }
 0x23b   :  { %16052 = vst [vmem:[#allocation284_spill] sm:$0xff] %v9966_v3  ;;  %v9970_v32 = vpop.permute.xlu0 %1069  ;;  %v16061_v3 = vld [vmem:[#allocation32_spill] sm:$0xff] }
 0x23c   :  { %16053 = vst [vmem:[#allocation285_spill] sm:$0xff] %v9968_v57  ;;  %v16062_v57 = vld [vmem:[#allocation33_spill] sm:$0xff] }
 0x23d   :  { %16054 = vst [vmem:[#allocation286_spill] sm:$0xff] %v9970_v32  ;;  %1227 = vrot.lane.b32.xlu2 %v16055_v35, %s7912_s16  ;;  %v16063_v32 = vld [vmem:[#allocation28_spill] sm:$0xff] }
 0x23e   :  { %1225 = vrot.lane.b32.xlu1 %v16056_v27, %s7912_s16 }
 0x23f   :  { %1223 = vrot.lane.b32.xlu0 %v16057_v38, %s7912_s16 }
 0x242   :  { %v9978_v9 = vpop.permute.xlu2 %1097  ;;  %v9980_v47 = vpop.permute.xlu1 %1077 }
 0x243   :  { %16058 = vst [vmem:[#allocation287_spill] sm:$0xff] %v9978_v9  ;;  %v9982_v43 = vpop.permute.xlu0 %1075  ;;  %v9999_v9 = vld [vmem:[%s15185_s0 + $0x190] sm:$0x3] }
 0x244   :  { %16059 = vst [vmem:[#allocation288_spill] sm:$0xff] %v9980_v47  ;;  %v16067_v47 = vld [vmem:[#allocation36_spill] sm:$0xff] }
 0x245   :  { %16060 = vst [vmem:[#allocation289_spill] sm:$0xff] %v9982_v43  ;;  %1233 = vrot.lane.b32.xlu2 %v16061_v3, %s7912_s16  ;;  %v16068_v43 = vld [vmem:[#allocation37_spill] sm:$0xff]  ;;  %v16069_v3 = vld [vmem:[#allocation31_spill] sm:$0xff] }
 0x246   :  { %1231 = vrot.lane.b32.xlu1 %v16062_v57, %s7912_s16 }
 0x247   :  { %1229 = vrot.lane.b32.xlu0 %v16063_v32, %s7912_s16 }
 0x24a   :  { %v9990_v35 = vpop.permute.xlu2 %1103  ;;  %v9992_v27 = vpop.permute.xlu1 %1083 }
 0x24b   :  { %16064 = vst [vmem:[#allocation290_spill] sm:$0xff] %v9990_v35  ;;  %v9994_v38 = vpop.permute.xlu0 %1081  ;;  %v559_v35 = vrot.slane %v9678_v13, 1 }
 0x24c   :  { %16065 = vst [vmem:[#allocation291_spill] sm:$0xff] %v9992_v27  ;;  %v560_v27 = vrot.slane %v9705_v60, 1 }
 0x24d   :  { %16066 = vst [vmem:[#allocation292_spill] sm:$0xff] %v9994_v38  ;;  %1239 = vrot.lane.b32.xlu2 %v16067_v47, %s7912_s16  ;;  %v562_v38 = vrot.slane %v9999_v9, 1 }
 0x24e   :  { %1237 = vrot.lane.b32.xlu1 %v16068_v43, %s7912_s16  ;;  %v10020_v43 = vsel %vm231_vm0, %v559_v35, %v560_v27  ;;  %v16080_v35 = vld [vmem:[#allocation51_spill] sm:$0xff] }
 0x24f   :  { %1235 = vrot.lane.b32.xlu0 %v16069_v3, %s7912_s16  ;;  %v10017_v47 = vsel %vm231_vm0, %v560_v27, %v562_v38  ;;  %16074 = vst [vmem:[#allocation297_spill] sm:$0xff] %v10020_v43  ;;  %v16075_v3 = vld [vmem:[#allocation42_spill] sm:$0xff] }
 0x250   :  { %16073 = vst [vmem:[#allocation296_spill] sm:$0xff] %v10017_v47  ;;  %v16079_v38 = vld [vmem:[#allocation50_spill] sm:$0xff] }
 0x252   :  { %v10009_v32 = vpop.permute.xlu2 %1109  ;;  %v10012_v57 = vpop.permute.xlu1 %1089 }
 0x253   :  { %16070 = vst [vmem:[#allocation293_spill] sm:$0xff] %v10009_v32  ;;  %v10014_v18 = vpop.permute.xlu0 %1087 }
 0x254   :  { %16071 = vst [vmem:[#allocation294_spill] sm:$0xff] %v10012_v57 }
 0x255   :  { %16072 = vst [vmem:[#allocation295_spill] sm:$0xff] %v10014_v18  ;;  %1245 = vrot.lane.b32.xlu2 %v16075_v3, %s7912_s16  ;;  %v16081_v3 = vld [vmem:[#allocation41_spill] sm:$0xff] }
 0x256   :  { %1243 = vrot.lane.b32.xlu1 %v10017_v47, %s7912_s16 }
 0x257   :  { %1241 = vrot.lane.b32.xlu0 %v10020_v43, %s7912_s16 }
 0x25a   :  { %v10028_v32 = vpop.permute.xlu2 %1115  ;;  %v10030_v57 = vpop.permute.xlu1 %1095 }
 0x25b   :  { %16076 = vst [vmem:[#allocation42_spill] sm:$0xff] %v10028_v32  ;;  %v10032_v18 = vpop.permute.xlu0 %1093  ;;  %v16085_v32 = vld [vmem:[#allocation58_spill] sm:$0xff] }
 0x25c   :  { %16077 = vst [vmem:[#allocation298_spill] sm:$0xff] %v10030_v57  ;;  %v16086_v57 = vld [vmem:[#allocation59_spill] sm:$0xff] }
 0x25d   :  { %16078 = vst [vmem:[#allocation299_spill] sm:$0xff] %v10032_v18  ;;  %1251 = vrot.lane.b32.xlu2 %v16079_v38, %s7912_s16  ;;  %v16087_v18 = vld [vmem:[#allocation49_spill] sm:$0xff] }
 0x25e   :  { %1249 = vrot.lane.b32.xlu1 %v16080_v35, %s7912_s16 }
 0x25f   :  { %1247 = vrot.lane.b32.xlu0 %v16081_v3, %s7912_s16 }
 0x262   :  { %v10040_v27 = vpop.permute.xlu2 %1185  ;;  %v10042_v47 = vpop.permute.xlu1 %1101 }
 0x263   :  { %16082 = vst [vmem:[#allocation41_spill] sm:$0xff] %v10040_v27  ;;  %v10044_v43 = vpop.permute.xlu0 %1099  ;;  %v16091_v27 = vld [vmem:[#allocation67_spill] sm:$0xff] }
 0x264   :  { %16083 = vst [vmem:[#allocation300_spill] sm:$0xff] %v10042_v47  ;;  %v16092_v47 = vld [vmem:[#allocation68_spill] sm:$0xff] }
 0x265   :  { %16084 = vst [vmem:[#allocation301_spill] sm:$0xff] %v10044_v43  ;;  %1257 = vrot.lane.b32.xlu2 %v16085_v32, %s7912_s16  ;;  %v16093_v43 = vld [vmem:[#allocation57_spill] sm:$0xff] }
 0x266   :  { %1255 = vrot.lane.b32.xlu1 %v16086_v57, %s7912_s16 }
 0x267   :  { %1253 = vrot.lane.b32.xlu0 %v16087_v18, %s7912_s16 }
 0x26a   :  { %v10052_v38 = vpop.permute.xlu2 %1191  ;;  %v10054_v35 = vpop.permute.xlu1 %1107 }
 0x26b   :  { %16088 = vst [vmem:[#allocation302_spill] sm:$0xff] %v10052_v38  ;;  %v10056_v3 = vpop.permute.xlu0 %1105  ;;  %v16097_v38 = vld [vmem:[#allocation77_spill] sm:$0xff] }
 0x26c   :  { %16089 = vst [vmem:[#allocation303_spill] sm:$0xff] %v10054_v35  ;;  %v16098_v35 = vld [vmem:[#allocation78_spill] sm:$0xff] }
 0x26d   :  { %16090 = vst [vmem:[#allocation304_spill] sm:$0xff] %v10056_v3  ;;  %1263 = vrot.lane.b32.xlu2 %v16091_v27, %s7912_s16  ;;  %v16099_v3 = vld [vmem:[#allocation66_spill] sm:$0xff] }
 0x26e   :  { %1261 = vrot.lane.b32.xlu1 %v16092_v47, %s7912_s16 }
 0x26f   :  { %1259 = vrot.lane.b32.xlu0 %v16093_v43, %s7912_s16 }
 0x272   :  { %v10064_v32 = vpop.permute.xlu2 %1197  ;;  %v10066_v57 = vpop.permute.xlu1 %1113 }
 0x273   :  { %16094 = vst [vmem:[#allocation305_spill] sm:$0xff] %v10064_v32  ;;  %v10068_v18 = vpop.permute.xlu0 %1111  ;;  %v16103_v32 = vld [vmem:[#allocation88_spill] sm:$0xff] }
 0x274   :  { %16095 = vst [vmem:[#allocation306_spill] sm:$0xff] %v10066_v57  ;;  %v16104_v57 = vld [vmem:[#allocation89_spill] sm:$0xff] }
 0x275   :  { %16096 = vst [vmem:[#allocation307_spill] sm:$0xff] %v10068_v18  ;;  %1269 = vrot.lane.b32.xlu2 %v16097_v38, %s7912_s16  ;;  %v16105_v18 = vld [vmem:[#allocation76_spill] sm:$0xff] }
 0x276   :  { %1267 = vrot.lane.b32.xlu1 %v16098_v35, %s7912_s16 }
 0x277   :  { %1265 = vrot.lane.b32.xlu0 %v16099_v3, %s7912_s16 }
 0x27a   :  { %v10076_v27 = vpop.permute.xlu2 %1203  ;;  %v10078_v47 = vpop.permute.xlu1 %1183 }
 0x27b   :  { %16100 = vst [vmem:[#allocation308_spill] sm:$0xff] %v10076_v27  ;;  %v10080_v43 = vpop.permute.xlu0 %1181  ;;  %v16109_v27 = vld [vmem:[#allocation98_spill] sm:$0xff] }
 0x27c   :  { %16101 = vst [vmem:[#allocation309_spill] sm:$0xff] %v10078_v47  ;;  %v16110_v47 = vld [vmem:[#allocation99_spill] sm:$0xff] }
 0x27d   :  { %16102 = vst [vmem:[#allocation310_spill] sm:$0xff] %v10080_v43  ;;  %1275 = vrot.lane.b32.xlu2 %v16103_v32, %s7912_s16  ;;  %v16111_v43 = vld [vmem:[#allocation87_spill] sm:$0xff] }
 0x27e   :  { %1273 = vrot.lane.b32.xlu1 %v16104_v57, %s7912_s16 }
 0x27f   :  { %1271 = vrot.lane.b32.xlu0 %v16105_v18, %s7912_s16 }
 0x282   :  { %v10088_v38 = vpop.permute.xlu2 %1209  ;;  %v10090_v35 = vpop.permute.xlu1 %1189 }
 0x283   :  { %16106 = vst [vmem:[#allocation311_spill] sm:$0xff] %v10088_v38  ;;  %v10092_v3 = vpop.permute.xlu0 %1187  ;;  %v16115_v38 = vld [vmem:[#allocation109_spill] sm:$0xff] }
 0x284   :  { %16107 = vst [vmem:[#allocation312_spill] sm:$0xff] %v10090_v35  ;;  %v16116_v35 = vld [vmem:[#allocation110_spill] sm:$0xff] }
 0x285   :  { %16108 = vst [vmem:[#allocation313_spill] sm:$0xff] %v10092_v3  ;;  %1281 = vrot.lane.b32.xlu2 %v16109_v27, %s7912_s16  ;;  %v16117_v3 = vld [vmem:[#allocation97_spill] sm:$0xff] }
 0x286   :  { %1279 = vrot.lane.b32.xlu1 %v16110_v47, %s7912_s16 }
 0x287   :  { %1277 = vrot.lane.b32.xlu0 %v16111_v43, %s7912_s16 }
 0x28a   :  { %v10100_v32 = vpop.permute.xlu2 %1215  ;;  %v10102_v57 = vpop.permute.xlu1 %1195 }
 0x28b   :  { %16112 = vst [vmem:[#allocation314_spill] sm:$0xff] %v10100_v32  ;;  %v10104_v18 = vpop.permute.xlu0 %1193  ;;  %v16121_v32 = vld [vmem:[#allocation119_spill] sm:$0xff] }
 0x28c   :  { %16113 = vst [vmem:[#allocation315_spill] sm:$0xff] %v10102_v57  ;;  %v16122_v57 = vld [vmem:[#allocation120_spill] sm:$0xff] }
 0x28d   :  { %16114 = vst [vmem:[#allocation316_spill] sm:$0xff] %v10104_v18  ;;  %1287 = vrot.lane.b32.xlu2 %v16115_v38, %s7912_s16  ;;  %v16123_v18 = vld [vmem:[#allocation108_spill] sm:$0xff] }
 0x28e   :  { %1285 = vrot.lane.b32.xlu1 %v16116_v35, %s7912_s16 }
 0x28f   :  { %1283 = vrot.lane.b32.xlu0 %v16117_v3, %s7912_s16 }
 0x292   :  { %v10112_v27 = vpop.permute.xlu2 %1221  ;;  %v10114_v47 = vpop.permute.xlu1 %1201 }
 0x293   :  { %16118 = vst [vmem:[#allocation317_spill] sm:$0xff] %v10112_v27  ;;  %v10116_v43 = vpop.permute.xlu0 %1199  ;;  %v16127_v27 = vld [vmem:[#allocation127_spill] sm:$0xff] }
 0x294   :  { %16119 = vst [vmem:[#allocation318_spill] sm:$0xff] %v10114_v47  ;;  %v565_v47 = vrot.slane %v9869_v45, 1 }
 0x295   :  { %16120 = vst [vmem:[#allocation319_spill] sm:$0xff] %v10116_v43  ;;  %1293 = vrot.lane.b32.xlu2 %v16121_v32, %s7912_s16  ;;  %v564_v43 = vrot.slane %v9874_v12, 1  ;;  %v16128_v32 = vld [vmem:[#allocation128_spill] sm:$0xff] }
 0x296   :  { %1291 = vrot.lane.b32.xlu1 %v16122_v57, %s7912_s16  ;;  %v16129_v57 = vld [vmem:[#allocation118_spill] sm:$0xff] }
 0x297   :  { %1289 = vrot.lane.b32.xlu0 %v16123_v18, %s7912_s16 }
 0x29a   :  { %v10124_v38 = vpop.permute.xlu2 %1227  ;;  %v10126_v35 = vpop.permute.xlu1 %1207 }
 0x29b   :  { %16124 = vst [vmem:[#allocation320_spill] sm:$0xff] %v10124_v38  ;;  %v10128_v3 = vpop.permute.xlu0 %1205 }
 0x29c   :  { %16125 = vst [vmem:[#allocation321_spill] sm:$0xff] %v10126_v35 }
 0x29d   :  { %16126 = vst [vmem:[#allocation322_spill] sm:$0xff] %v10128_v3  ;;  %1299 = vrot.lane.b32.xlu2 %v16127_v27, %s7912_s16  ;;  %v10145_v3 = vsel %vm231_vm0, %v564_v43, %v565_v47  ;;  %v10150_v27 = vld [vmem:[%s15185_s0 + $0x340] sm:$0x3] }
 0x29e   :  { %1297 = vrot.lane.b32.xlu1 %v16128_v32, %s7912_s16  ;;  %16133 = vst [vmem:[#allocation326_spill] sm:$0xff] %v10145_v3 }
 0x29f   :  { %1295 = vrot.lane.b32.xlu0 %v16129_v57, %s7912_s16 }
 0x2a2   :  { %v10138_v18 = vpop.permute.xlu2 %1233  ;;  %v10140_v38 = vpop.permute.xlu1 %1213 }
 0x2a3   :  { %16130 = vst [vmem:[#allocation323_spill] sm:$0xff] %v10138_v18  ;;  %v10142_v35 = vpop.permute.xlu0 %1211  ;;  %v16134_v18 = vld [vmem:[#allocation126_spill] sm:$0xff] }
 0x2a4   :  { %16131 = vst [vmem:[#allocation324_spill] sm:$0xff] %v10140_v38 }
 0x2a5   :  { %16132 = vst [vmem:[#allocation325_spill] sm:$0xff] %v10142_v35  ;;  %1305 = vrot.lane.b32.xlu2 %v10145_v3, %s7912_s16  ;;  %v567_v35 = vrot.slane %v10150_v27, 1 }
 0x2a6   :  { %1303 = vrot.lane.b32.xlu1 %v8896_v58, %s7912_s16 }
 0x2a7   :  { %1301 = vrot.lane.b32.xlu0 %v16134_v18, %s7912_s16  ;;  %v10166_v32 = vsel %vm231_vm0, %v565_v47, %v567_v35 }
 0x2aa   :  { %v10158_v38 = vpop.permute.xlu2 %1239  ;;  %v10161_v43 = vpop.permute.xlu1 %1219 }
 0x2ab   :  { %16135 = vst [vmem:[#allocation126_spill] sm:$0xff] %v10158_v38  ;;  %v10163_v57 = vpop.permute.xlu0 %1217 }
 0x2ac   :  { %16136 = vst [vmem:[#allocation327_spill] sm:$0xff] %v10161_v43 }
 0x2ad   :  { %16137 = vst [vmem:[#allocation328_spill] sm:$0xff] %v10163_v57  ;;  %1375 = vrot.lane.b32.xlu2 %v8917_v33, %s7913_s21 }
 0x2ae   :  { %1373 = vrot.lane.b32.xlu1 %v8920_v0, %s7913_s21 }
 0x2af   :  { %1307 = vrot.lane.b32.xlu0 %v10166_v32, %s7912_s16  ;;  %s7920_s16 = smov 96  }
 0x2b2   :  { %v10174_v38 = vpop.permute.xlu2 %1245  ;;  %v10176_v3 = vpop.permute.xlu1 %1225 }
 0x2b3   :  { %16138 = vst [vmem:[#allocation329_spill] sm:$0xff] %v10174_v38  ;;  %v10178_v43 = vpop.permute.xlu0 %1223 }
 0x2b4   :  { %16139 = vst [vmem:[#allocation330_spill] sm:$0xff] %v10176_v3 }
 0x2b5   :  { %16140 = vst [vmem:[#allocation331_spill] sm:$0xff] %v10178_v43  ;;  %1381 = vrot.lane.b32.xlu2 %v8942_v15, %s7913_s21 }
 0x2b6   :  { %1379 = vrot.lane.b32.xlu1 %v8945_v26, %s7913_s21 }
 0x2b7   :  { %1377 = vrot.lane.b32.xlu0 %v8914_v34, %s7913_s21 }
 0x2ba   :  { %v10186_v33 = vpop.permute.xlu2 %1251  ;;  %v10188_v0 = vpop.permute.xlu1 %1231 }
 0x2bb   :  { %16141 = vst [vmem:[#allocation332_spill] sm:$0xff] %v10186_v33  ;;  %v10190_v47 = vpop.permute.xlu0 %1229 }
 0x2bc   :  { %16142 = vst [vmem:[#allocation333_spill] sm:$0xff] %v10188_v0 }
 0x2bd   :  { %16143 = vst [vmem:[#allocation334_spill] sm:$0xff] %v10190_v47  ;;  %1387 = vrot.lane.b32.xlu2 %v8968_v31, %s7913_s21 }
 0x2be   :  { %1385 = vrot.lane.b32.xlu1 %v8971_v37, %s7913_s21 }
 0x2bf   :  { %1383 = vrot.lane.b32.xlu0 %v8939_v44, %s7913_s21 }
 0x2c2   :  { %v10198_v35 = vpop.permute.xlu2 %1257  ;;  %v10200_v38 = vpop.permute.xlu1 %1237 }
 0x2c3   :  { %16144 = vst [vmem:[#allocation335_spill] sm:$0xff] %v10198_v35  ;;  %v10202_v3 = vpop.permute.xlu0 %1235 }
 0x2c4   :  { %16145 = vst [vmem:[#allocation336_spill] sm:$0xff] %v10200_v38 }
 0x2c5   :  { %16146 = vst [vmem:[#allocation337_spill] sm:$0xff] %v10202_v3  ;;  %1393 = vrot.lane.b32.xlu2 %v8993_v28, %s7913_s21 }
 0x2c6   :  { %1391 = vrot.lane.b32.xlu1 %v8996_v50, %s7913_s21 }
 0x2c7   :  { %1389 = vrot.lane.b32.xlu0 %v8965_v5, %s7913_s21 }
 0x2ca   :  { %v10210_v33 = vpop.permute.xlu2 %1263  ;;  %v10212_v0 = vpop.permute.xlu1 %1243 }
 0x2cb   :  { %16147 = vst [vmem:[#allocation338_spill] sm:$0xff] %v10210_v33  ;;  %v10214_v47 = vpop.permute.xlu0 %1241 }
 0x2cc   :  { %16148 = vst [vmem:[#allocation339_spill] sm:$0xff] %v10212_v0 }
 0x2cd   :  { %16149 = vst [vmem:[#allocation340_spill] sm:$0xff] %v10214_v47  ;;  %1399 = vrot.lane.b32.xlu2 %v9019_v1, %s7913_s21 }
 0x2ce   :  { %1397 = vrot.lane.b32.xlu1 %v9022_v61, %s7913_s21 }
 0x2cf   :  { %1395 = vrot.lane.b32.xlu0 %v8990_v2, %s7913_s21 }
 0x2d2   :  { %v10222_v35 = vpop.permute.xlu2 %1269  ;;  %v10224_v38 = vpop.permute.xlu1 %1249 }
 0x2d3   :  { %16150 = vst [vmem:[#allocation341_spill] sm:$0xff] %v10222_v35  ;;  %v10226_v3 = vpop.permute.xlu0 %1247 }
 0x2d4   :  { %16151 = vst [vmem:[#allocation342_spill] sm:$0xff] %v10224_v38 }
 0x2d5   :  { %16152 = vst [vmem:[#allocation343_spill] sm:$0xff] %v10226_v3  ;;  %1405 = vrot.lane.b32.xlu2 %v9044_v52, %s7913_s21 }
 0x2d6   :  { %1403 = vrot.lane.b32.xlu1 %v9047_v23, %s7913_s21 }
 0x2d7   :  { %1401 = vrot.lane.b32.xlu0 %v9016_v39, %s7913_s21 }
 0x2da   :  { %v10234_v33 = vpop.permute.xlu2 %1275  ;;  %v10236_v0 = vpop.permute.xlu1 %1255 }
 0x2db   :  { %16153 = vst [vmem:[#allocation344_spill] sm:$0xff] %v10234_v33  ;;  %v10238_v47 = vpop.permute.xlu0 %1253 }
 0x2dc   :  { %16154 = vst [vmem:[#allocation345_spill] sm:$0xff] %v10236_v0 }
 0x2dd   :  { %16155 = vst [vmem:[#allocation346_spill] sm:$0xff] %v10238_v47  ;;  %1411 = vrot.lane.b32.xlu2 %v9070_v24, %s7913_s21 }
 0x2de   :  { %1409 = vrot.lane.b32.xlu1 %v9073_v54, %s7913_s21 }
 0x2df   :  { %1407 = vrot.lane.b32.xlu0 %v9041_v25, %s7913_s21 }
 0x2e2   :  { %v10246_v35 = vpop.permute.xlu2 %1281  ;;  %v10248_v38 = vpop.permute.xlu1 %1261 }
 0x2e3   :  { %16156 = vst [vmem:[#allocation347_spill] sm:$0xff] %v10246_v35  ;;  %v10250_v3 = vpop.permute.xlu0 %1259 }
 0x2e4   :  { %16157 = vst [vmem:[#allocation348_spill] sm:$0xff] %v10248_v38 }
 0x2e5   :  { %16158 = vst [vmem:[#allocation349_spill] sm:$0xff] %v10250_v3  ;;  %1417 = vrot.lane.b32.xlu2 %v9095_v30, %s7913_s21 }
 0x2e6   :  { %1415 = vrot.lane.b32.xlu1 %v9098_v6, %s7913_s21 }
 0x2e7   :  { %1413 = vrot.lane.b32.xlu0 %v9067_v63, %s7913_s21 }
 0x2ea   :  { %v10258_v33 = vpop.permute.xlu2 %1287  ;;  %v10260_v0 = vpop.permute.xlu1 %1267 }
 0x2eb   :  { %16159 = vst [vmem:[#allocation350_spill] sm:$0xff] %v10258_v33  ;;  %v10262_v47 = vpop.permute.xlu0 %1265  ;;  %v570_v33 = vrot.slane %v9705_v60, 2 }
 0x2ec   :  { %16160 = vst [vmem:[#allocation351_spill] sm:$0xff] %v10260_v0  ;;  %v572_v0 = vrot.slane %v9999_v9, 2 }
 0x2ed   :  { %16161 = vst [vmem:[#allocation352_spill] sm:$0xff] %v10262_v47  ;;  %1423 = vrot.lane.b32.xlu2 %v9121_v48, %s7913_s21  ;;  %v569_v47 = vrot.slane %v9678_v13, 2 }
 0x2ee   :  { %1421 = vrot.lane.b32.xlu1 %v9124_v41, %s7913_s21  ;;  %v10292_v43 = vsel %vm392_vm1, %v570_v33, %v572_v0  ;;  %v16172_v0 = vld [vmem:[#allocation163_spill] sm:$0xff] }
 0x2ef   :  { %1419 = vrot.lane.b32.xlu0 %v9092_v49, %s7913_s21  ;;  %16168 = vst [vmem:[#allocation359_spill] sm:$0xff] %v10292_v43  ;;  %v10295_v57 = vsel %vm392_vm1, %v569_v47, %v570_v33  ;;  %v16173_v33 = vld [vmem:[#allocation164_spill] sm:$0xff]  ;;  %v16174_v47 = vld [vmem:[#allocation34_spill] sm:$0xff] }
 0x2f2   :  { %v10270_v35 = vpop.permute.xlu2 %1293  ;;  %v10272_v38 = vpop.permute.xlu1 %1273 }
 0x2f3   :  { %16162 = vst [vmem:[#allocation353_spill] sm:$0xff] %v10270_v35  ;;  %v10274_v3 = vpop.permute.xlu0 %1271 }
 0x2f4   :  { %16163 = vst [vmem:[#allocation354_spill] sm:$0xff] %v10272_v38 }
 0x2f5   :  { %16164 = vst [vmem:[#allocation355_spill] sm:$0xff] %v10274_v3  ;;  %1429 = vrot.lane.b32.xlu2 %v9146_v4, %s7913_s21 }
 0x2f6   :  { %1427 = vrot.lane.b32.xlu1 %v9149_v53, %s7913_s21 }
 0x2f7   :  { %1425 = vrot.lane.b32.xlu0 %v9118_v56, %s7913_s21 }
 0x2fa   :  { %v10285_v35 = vpop.permute.xlu2 %1299  ;;  %v10287_v38 = vpop.permute.xlu1 %1279 }
 0x2fb   :  { %16165 = vst [vmem:[#allocation356_spill] sm:$0xff] %v10285_v35  ;;  %v10289_v3 = vpop.permute.xlu0 %1277 }
 0x2fc   :  { %16166 = vst [vmem:[#allocation357_spill] sm:$0xff] %v10287_v38 }
 0x2fd   :  { %16167 = vst [vmem:[#allocation358_spill] sm:$0xff] %v10289_v3  ;;  %1435 = vrot.lane.b32.xlu2 %v10292_v43, %s7913_s21 }
 0x2fe   :  { %1433 = vrot.lane.b32.xlu1 %v10295_v57, %s7913_s21 }
 0x2ff   :  { %1431 = vrot.lane.b32.xlu0 %v9143_v20, %s7913_s21 }
 0x302   :  { %v10303_v9 = vpop.permute.xlu2 %1305  ;;  %v10305_v35 = vpop.permute.xlu1 %1285 }
 0x303   :  { %16169 = vst [vmem:[#allocation360_spill] sm:$0xff] %v10303_v9  ;;  %v10307_v38 = vpop.permute.xlu0 %1283  ;;  %v16178_v9 = vld [vmem:[#allocation43_spill] sm:$0xff] }
 0x304   :  { %16170 = vst [vmem:[#allocation361_spill] sm:$0xff] %v10305_v35  ;;  %v16179_v35 = vld [vmem:[#allocation165_spill] sm:$0xff] }
 0x305   :  { %16171 = vst [vmem:[#allocation362_spill] sm:$0xff] %v10307_v38  ;;  %1441 = vrot.lane.b32.xlu2 %v16172_v0, %s7913_s21  ;;  %v16180_v38 = vld [vmem:[#allocation39_spill] sm:$0xff] }
 0x306   :  { %1439 = vrot.lane.b32.xlu1 %v16173_v33, %s7913_s21 }
 0x307   :  { %1437 = vrot.lane.b32.xlu0 %v16174_v47, %s7913_s21 }
 0x30a   :  { %v10315_v3 = vpop.permute.xlu2 %1375  ;;  %v10317_v43 = vpop.permute.xlu1 %1291 }
 0x30b   :  { %16175 = vst [vmem:[#allocation164_spill] sm:$0xff] %v10315_v3  ;;  %v10319_v4 = vpop.permute.xlu0 %1289  ;;  %v16184_v3 = vld [vmem:[#allocation166_spill] sm:$0xff] }
 0x30c   :  { %16176 = vst [vmem:[#allocation34_spill] sm:$0xff] %v10317_v43  ;;  %v16185_v43 = vld [vmem:[#allocation167_spill] sm:$0xff] }
 0x30d   :  { %16177 = vst [vmem:[#allocation363_spill] sm:$0xff] %v10319_v4  ;;  %1447 = vrot.lane.b32.xlu2 %v16178_v9, %s7913_s21  ;;  %v16186_v4 = vld [vmem:[#allocation55_spill] sm:$0xff] }
 0x30e   :  { %1445 = vrot.lane.b32.xlu1 %v16179_v35, %s7913_s21 }
 0x30f   :  { %1443 = vrot.lane.b32.xlu0 %v16180_v38, %s7913_s21 }
 0x312   :  { %v10327_v0 = vpop.permute.xlu2 %1381  ;;  %v10329_v33 = vpop.permute.xlu1 %1297 }
 0x313   :  { %16181 = vst [vmem:[#allocation364_spill] sm:$0xff] %v10327_v0  ;;  %v10331_v47 = vpop.permute.xlu0 %1295  ;;  %v16190_v0 = vld [vmem:[#allocation60_spill] sm:$0xff] }
 0x314   :  { %16182 = vst [vmem:[#allocation365_spill] sm:$0xff] %v10329_v33  ;;  %v16191_v33 = vld [vmem:[#allocation168_spill] sm:$0xff] }
 0x315   :  { %16183 = vst [vmem:[#allocation366_spill] sm:$0xff] %v10331_v47  ;;  %1453 = vrot.lane.b32.xlu2 %v16184_v3, %s7913_s21  ;;  %v16192_v47 = vld [vmem:[#allocation53_spill] sm:$0xff] }
 0x316   :  { %1451 = vrot.lane.b32.xlu1 %v16185_v43, %s7913_s21 }
 0x317   :  { %1449 = vrot.lane.b32.xlu0 %v16186_v4, %s7913_s21 }
 0x31a   :  { %v10339_v9 = vpop.permute.xlu2 %1387  ;;  %v10341_v35 = vpop.permute.xlu1 %1303 }
 0x31b   :  { %16187 = vst [vmem:[#allocation367_spill] sm:$0xff] %v10339_v9  ;;  %v10343_v38 = vpop.permute.xlu0 %1301  ;;  %v16196_v9 = vld [vmem:[#allocation169_spill] sm:$0xff] }
 0x31c   :  { %16188 = vst [vmem:[#allocation368_spill] sm:$0xff] %v10341_v35  ;;  %v16197_v35 = vld [vmem:[#allocation170_spill] sm:$0xff] }
 0x31d   :  { %16189 = vst [vmem:[#allocation369_spill] sm:$0xff] %v10343_v38  ;;  %1459 = vrot.lane.b32.xlu2 %v16190_v0, %s7913_s21  ;;  %v16198_v38 = vld [vmem:[#allocation72_spill] sm:$0xff] }
 0x31e   :  { %1457 = vrot.lane.b32.xlu1 %v16191_v33, %s7913_s21 }
 0x31f   :  { %1455 = vrot.lane.b32.xlu0 %v16192_v47, %s7913_s21 }
 0x322   :  { %v10351_v3 = vpop.permute.xlu2 %1393  ;;  %v10353_v43 = vpop.permute.xlu1 %1373 }
 0x323   :  { %16193 = vst [vmem:[#allocation370_spill] sm:$0xff] %v10351_v3  ;;  %v10355_v4 = vpop.permute.xlu0 %1307  ;;  %v16202_v3 = vld [vmem:[#allocation79_spill] sm:$0xff] }
 0x324   :  { %16194 = vst [vmem:[#allocation371_spill] sm:$0xff] %v10353_v43 }
 0x325   :  { %16195 = vst [vmem:[#allocation372_spill] sm:$0xff] %v10355_v4  ;;  %1465 = vrot.lane.b32.xlu2 %v16196_v9, %s7913_s21  ;;  %v16203_v4 = vld [vmem:[#allocation171_spill] sm:$0xff]  ;;  %v16204_v9 = vld [vmem:[#allocation70_spill] sm:$0xff] }
 0x326   :  { %1463 = vrot.lane.b32.xlu1 %v16197_v35, %s7913_s21 }
 0x327   :  { %1461 = vrot.lane.b32.xlu0 %v16198_v38, %s7913_s21 }
 0x32a   :  { %v10363_v0 = vpop.permute.xlu2 %1399  ;;  %v10365_v33 = vpop.permute.xlu1 %1379 }
 0x32b   :  { %16199 = vst [vmem:[#allocation373_spill] sm:$0xff] %v10363_v0  ;;  %v10367_v47 = vpop.permute.xlu0 %1377  ;;  %v16208_v0 = vld [vmem:[#allocation172_spill] sm:$0xff] }
 0x32c   :  { %16200 = vst [vmem:[#allocation374_spill] sm:$0xff] %v10365_v33  ;;  %v16209_v33 = vld [vmem:[#allocation173_spill] sm:$0xff] }
 0x32d   :  { %16201 = vst [vmem:[#allocation375_spill] sm:$0xff] %v10367_v47  ;;  %1471 = vrot.lane.b32.xlu2 %v16202_v3, %s7913_s21  ;;  %v16210_v3 = vld [vmem:[#allocation93_spill] sm:$0xff] }
 0x32e   :  { %1469 = vrot.lane.b32.xlu1 %v16203_v4, %s7913_s21 }
 0x32f   :  { %1467 = vrot.lane.b32.xlu0 %v16204_v9, %s7913_s21 }
 0x332   :  { %v10375_v43 = vpop.permute.xlu2 %1405  ;;  %v10377_v35 = vpop.permute.xlu1 %1385 }
 0x333   :  { %16205 = vst [vmem:[#allocation376_spill] sm:$0xff] %v10375_v43  ;;  %v10379_v38 = vpop.permute.xlu0 %1383  ;;  %v16214_v43 = vld [vmem:[#allocation100_spill] sm:$0xff] }
 0x334   :  { %16206 = vst [vmem:[#allocation377_spill] sm:$0xff] %v10377_v35  ;;  %v16215_v35 = vld [vmem:[#allocation174_spill] sm:$0xff] }
 0x335   :  { %16207 = vst [vmem:[#allocation378_spill] sm:$0xff] %v10379_v38  ;;  %1477 = vrot.lane.b32.xlu2 %v16208_v0, %s7913_s21  ;;  %v16216_v38 = vld [vmem:[#allocation91_spill] sm:$0xff] }
 0x336   :  { %1475 = vrot.lane.b32.xlu1 %v16209_v33, %s7913_s21 }
 0x337   :  { %1473 = vrot.lane.b32.xlu0 %v16210_v3, %s7913_s21 }
 0x33a   :  { %v10387_v47 = vpop.permute.xlu2 %1411  ;;  %v10389_v4 = vpop.permute.xlu1 %1391 }
 0x33b   :  { %16211 = vst [vmem:[#allocation379_spill] sm:$0xff] %v10387_v47  ;;  %v10391_v9 = vpop.permute.xlu0 %1389  ;;  %v16220_v47 = vld [vmem:[#allocation114_spill] sm:$0xff] }
 0x33c   :  { %16212 = vst [vmem:[#allocation380_spill] sm:$0xff] %v10389_v4 }
 0x33d   :  { %16213 = vst [vmem:[#allocation381_spill] sm:$0xff] %v10391_v9  ;;  %1483 = vrot.lane.b32.xlu2 %v16214_v43, %s7913_s21 }
 0x33e   :  { %1481 = vrot.lane.b32.xlu1 %v16215_v35, %s7913_s21 }
 0x33f   :  { %1479 = vrot.lane.b32.xlu0 %v16216_v38, %s7913_s21 }
 0x342   :  { %v10399_v0 = vpop.permute.xlu2 %1417  ;;  %v10401_v33 = vpop.permute.xlu1 %1397 }
 0x343   :  { %16217 = vst [vmem:[#allocation174_spill] sm:$0xff] %v10399_v0  ;;  %v10403_v3 = vpop.permute.xlu0 %1395  ;;  %v16224_v0 = vld [vmem:[#allocation177_spill] sm:$0xff] }
 0x344   :  { %16218 = vst [vmem:[#allocation91_spill] sm:$0xff] %v10401_v33  ;;  %v575_v33 = vrot.slane %v9869_v45, 2 }
 0x345   :  { %16219 = vst [vmem:[#allocation382_spill] sm:$0xff] %v10403_v3  ;;  %1489 = vrot.lane.b32.xlu2 %v9395_v7, %s7913_s21  ;;  %v574_v3 = vrot.slane %v9874_v12, 2 }
 0x346   :  { %1487 = vrot.lane.b32.xlu1 %v9398_v51, %s7913_s21 }
 0x347   :  { %1485 = vrot.lane.b32.xlu0 %v16220_v47, %s7913_s21 }
 0x34a   :  { %v10411_v4 = vpop.permute.xlu2 %1423  ;;  %v10413_v9 = vpop.permute.xlu1 %1403 }
 0x34b   :  { %16221 = vst [vmem:[#allocation114_spill] sm:$0xff] %v10411_v4  ;;  %v10415_v43 = vpop.permute.xlu0 %1401  ;;  %v577_v4 = vrot.slane %v10150_v27, 2 }
 0x34c   :  { %16222 = vst [vmem:[#allocation383_spill] sm:$0xff] %v10413_v9 }
 0x34d   :  { %16223 = vst [vmem:[#allocation384_spill] sm:$0xff] %v10415_v43  ;;  %1495 = vrot.lane.b32.xlu2 %v9416_v62, %s7913_s21  ;;  %v10433_v62 = vsel %vm392_vm1, %v575_v33, %v577_v4  ;;  %v16234_v4 = vld [vmem:[#allocation191_spill] sm:$0xff] }
 0x34e   :  { %1493 = vrot.lane.b32.xlu1 %v9419_v17, %s7913_s21  ;;  %16228 = vst [vmem:[#allocation388_spill] sm:$0xff] %v10433_v62  ;;  %v10436_v17 = vsel %vm392_vm1, %v574_v3, %v575_v33  ;;  %v16235_v3 = vld [vmem:[#allocation192_spill] sm:$0xff] }
 0x34f   :  { %1491 = vrot.lane.b32.xlu0 %v16224_v0, %s7913_s21  ;;  %16229 = vst [vmem:[#allocation389_spill] sm:$0xff] %v10436_v17  ;;  %v16230_v0 = vld [vmem:[#allocation186_spill] sm:$0xff] }
 0x352   :  { %v10425_v7 = vpop.permute.xlu2 %1429  ;;  %v10428_v9 = vpop.permute.xlu1 %1409 }
 0x353   :  { %16225 = vst [vmem:[#allocation385_spill] sm:$0xff] %v10425_v7  ;;  %v10430_v43 = vpop.permute.xlu0 %1407 }
 0x354   :  { %16226 = vst [vmem:[#allocation386_spill] sm:$0xff] %v10428_v9 }
 0x355   :  { %16227 = vst [vmem:[#allocation387_spill] sm:$0xff] %v10430_v43  ;;  %1565 = vrot.lane.b32.xlu2 %v16230_v0, %s7914_s22  ;;  %v16236_v0 = vld [vmem:[#allocation185_spill] sm:$0xff] }
 0x356   :  { %1499 = vrot.lane.b32.xlu1 %v10433_v62, %s7913_s21 }
 0x357   :  { %1497 = vrot.lane.b32.xlu0 %v10436_v17, %s7913_s21 }
 0x35a   :  { %v10444_v27 = vpop.permute.xlu2 %1435  ;;  %v10446_v7 = vpop.permute.xlu1 %1415 }
 0x35b   :  { %16231 = vst [vmem:[#allocation186_spill] sm:$0xff] %v10444_v27  ;;  %v10448_v9 = vpop.permute.xlu0 %1413  ;;  %v16240_v27 = vld [vmem:[#allocation197_spill] sm:$0xff] }
 0x35c   :  { %16232 = vst [vmem:[#allocation390_spill] sm:$0xff] %v10446_v7  ;;  %v16241_v7 = vld [vmem:[#allocation198_spill] sm:$0xff] }
 0x35d   :  { %16233 = vst [vmem:[#allocation391_spill] sm:$0xff] %v10448_v9  ;;  %1571 = vrot.lane.b32.xlu2 %v16234_v4, %s7914_s22  ;;  %v16242_v4 = vld [vmem:[#allocation190_spill] sm:$0xff] }
 0x35e   :  { %1569 = vrot.lane.b32.xlu1 %v16235_v3, %s7914_s22 }
 0x35f   :  { %1567 = vrot.lane.b32.xlu0 %v16236_v0, %s7914_s22 }
 0x362   :  { %v10456_v33 = vpop.permute.xlu2 %1441  ;;  %v10458_v43 = vpop.permute.xlu1 %1421 }
 0x363   :  { %16237 = vst [vmem:[#allocation191_spill] sm:$0xff] %v10456_v33  ;;  %v10460_v17 = vpop.permute.xlu0 %1419  ;;  %v16246_v33 = vld [vmem:[#allocation203_spill] sm:$0xff] }
 0x364   :  { %16238 = vst [vmem:[#allocation192_spill] sm:$0xff] %v10458_v43  ;;  %v16247_v43 = vld [vmem:[#allocation204_spill] sm:$0xff] }
 0x365   :  { %16239 = vst [vmem:[#allocation185_spill] sm:$0xff] %v10460_v17  ;;  %1577 = vrot.lane.b32.xlu2 %v16240_v27, %s7914_s22  ;;  %v16248_v27 = vld [vmem:[#allocation196_spill] sm:$0xff] }
 0x366   :  { %1575 = vrot.lane.b32.xlu1 %v16241_v7, %s7914_s22 }
 0x367   :  { %1573 = vrot.lane.b32.xlu0 %v16242_v4, %s7914_s22 }
 0x36a   :  { %v10468_v9 = vpop.permute.xlu2 %1447  ;;  %v10470_v3 = vpop.permute.xlu1 %1427 }
 0x36b   :  { %16243 = vst [vmem:[#allocation197_spill] sm:$0xff] %v10468_v9  ;;  %v10472_v0 = vpop.permute.xlu0 %1425  ;;  %v16252_v9 = vld [vmem:[#allocation209_spill] sm:$0xff] }
 0x36c   :  { %16244 = vst [vmem:[#allocation198_spill] sm:$0xff] %v10470_v3  ;;  %v16253_v3 = vld [vmem:[#allocation210_spill] sm:$0xff] }
 0x36d   :  { %16245 = vst [vmem:[#allocation190_spill] sm:$0xff] %v10472_v0  ;;  %1583 = vrot.lane.b32.xlu2 %v16246_v33, %s7914_s22  ;;  %v16254_v33 = vld [vmem:[#allocation202_spill] sm:$0xff] }
 0x36e   :  { %1581 = vrot.lane.b32.xlu1 %v16247_v43, %s7914_s22 }
 0x36f   :  { %1579 = vrot.lane.b32.xlu0 %v16248_v27, %s7914_s22 }
 0x372   :  { %v10480_v17 = vpop.permute.xlu2 %1453  ;;  %v10482_v7 = vpop.permute.xlu1 %1433 }
 0x373   :  { %16249 = vst [vmem:[#allocation203_spill] sm:$0xff] %v10480_v17  ;;  %v10484_v4 = vpop.permute.xlu0 %1431  ;;  %v16258_v17 = vld [vmem:[#allocation215_spill] sm:$0xff] }
 0x374   :  { %16250 = vst [vmem:[#allocation204_spill] sm:$0xff] %v10482_v7  ;;  %v16259_v7 = vld [vmem:[#allocation216_spill] sm:$0xff] }
 0x375   :  { %16251 = vst [vmem:[#allocation196_spill] sm:$0xff] %v10484_v4  ;;  %1589 = vrot.lane.b32.xlu2 %v16252_v9, %s7914_s22  ;;  %v16260_v9 = vld [vmem:[#allocation208_spill] sm:$0xff] }
 0x376   :  { %1587 = vrot.lane.b32.xlu1 %v16253_v3, %s7914_s22 }
 0x377   :  { %1585 = vrot.lane.b32.xlu0 %v16254_v33, %s7914_s22 }
 0x37a   :  { %v10492_v0 = vpop.permute.xlu2 %1459  ;;  %v10494_v43 = vpop.permute.xlu1 %1439 }
 0x37b   :  { %16255 = vst [vmem:[#allocation209_spill] sm:$0xff] %v10492_v0  ;;  %v10496_v27 = vpop.permute.xlu0 %1437  ;;  %v16264_v0 = vld [vmem:[#allocation221_spill] sm:$0xff] }
 0x37c   :  { %16256 = vst [vmem:[#allocation210_spill] sm:$0xff] %v10494_v43  ;;  %v16265_v43 = vld [vmem:[#allocation222_spill] sm:$0xff] }
 0x37d   :  { %16257 = vst [vmem:[#allocation202_spill] sm:$0xff] %v10496_v27  ;;  %1595 = vrot.lane.b32.xlu2 %v16258_v17, %s7914_s22  ;;  %v16266_v17 = vld [vmem:[#allocation214_spill] sm:$0xff] }
 0x37e   :  { %1593 = vrot.lane.b32.xlu1 %v16259_v7, %s7914_s22 }
 0x37f   :  { %1591 = vrot.lane.b32.xlu0 %v16260_v9, %s7914_s22 }
 0x382   :  { %v10504_v4 = vpop.permute.xlu2 %1465  ;;  %v10506_v3 = vpop.permute.xlu1 %1445 }
 0x383   :  { %16261 = vst [vmem:[#allocation215_spill] sm:$0xff] %v10504_v4  ;;  %v10508_v33 = vpop.permute.xlu0 %1443  ;;  %v16270_v4 = vld [vmem:[#allocation227_spill] sm:$0xff] }
 0x384   :  { %16262 = vst [vmem:[#allocation216_spill] sm:$0xff] %v10506_v3  ;;  %v16271_v3 = vld [vmem:[#allocation228_spill] sm:$0xff] }
 0x385   :  { %16263 = vst [vmem:[#allocation208_spill] sm:$0xff] %v10508_v33  ;;  %1601 = vrot.lane.b32.xlu2 %v16264_v0, %s7914_s22  ;;  %v16272_v0 = vld [vmem:[#allocation220_spill] sm:$0xff] }
 0x386   :  { %1599 = vrot.lane.b32.xlu1 %v16265_v43, %s7914_s22 }
 0x387   :  { %1597 = vrot.lane.b32.xlu0 %v16266_v17, %s7914_s22 }
 0x38a   :  { %v10516_v27 = vpop.permute.xlu2 %1471  ;;  %v10518_v7 = vpop.permute.xlu1 %1451 }
 0x38b   :  { %16267 = vst [vmem:[#allocation221_spill] sm:$0xff] %v10516_v27  ;;  %v10520_v9 = vpop.permute.xlu0 %1449  ;;  %v16276_v27 = vld [vmem:[#allocation233_spill] sm:$0xff] }
 0x38c   :  { %16268 = vst [vmem:[#allocation222_spill] sm:$0xff] %v10518_v7  ;;  %v16277_v7 = vld [vmem:[#allocation234_spill] sm:$0xff] }
 0x38d   :  { %16269 = vst [vmem:[#allocation214_spill] sm:$0xff] %v10520_v9  ;;  %1607 = vrot.lane.b32.xlu2 %v16270_v4, %s7914_s22  ;;  %v16278_v4 = vld [vmem:[#allocation226_spill] sm:$0xff] }
 0x38e   :  { %1605 = vrot.lane.b32.xlu1 %v16271_v3, %s7914_s22 }
 0x38f   :  { %1603 = vrot.lane.b32.xlu0 %v16272_v0, %s7914_s22 }
 0x392   :  { %v10528_v33 = vpop.permute.xlu2 %1477  ;;  %v10530_v43 = vpop.permute.xlu1 %1457 }
 0x393   :  { %16273 = vst [vmem:[#allocation227_spill] sm:$0xff] %v10528_v33  ;;  %v10532_v17 = vpop.permute.xlu0 %1455  ;;  %v16282_v33 = vld [vmem:[#allocation238_spill] sm:$0xff] }
 0x394   :  { %16274 = vst [vmem:[#allocation228_spill] sm:$0xff] %v10530_v43  ;;  %v16283_v43 = vld [vmem:[#allocation239_spill] sm:$0xff] }
 0x395   :  { %16275 = vst [vmem:[#allocation220_spill] sm:$0xff] %v10532_v17  ;;  %1613 = vrot.lane.b32.xlu2 %v16276_v27, %s7914_s22  ;;  %v16284_v27 = vld [vmem:[#allocation232_spill] sm:$0xff] }
 0x396   :  { %1611 = vrot.lane.b32.xlu1 %v16277_v7, %s7914_s22 }
 0x397   :  { %1609 = vrot.lane.b32.xlu0 %v16278_v4, %s7914_s22 }
 0x39a   :  { %v10540_v9 = vpop.permute.xlu2 %1483  ;;  %v10542_v3 = vpop.permute.xlu1 %1463 }
 0x39b   :  { %16279 = vst [vmem:[#allocation233_spill] sm:$0xff] %v10540_v9  ;;  %v10544_v0 = vpop.permute.xlu0 %1461  ;;  %v10561_v9 = vld [vmem:[%s15185_s0 + $0x198] sm:$0xff] }
 0x39c   :  { %16280 = vst [vmem:[#allocation234_spill] sm:$0xff] %v10542_v3 }
 0x39d   :  { %16281 = vst [vmem:[#allocation226_spill] sm:$0xff] %v10544_v0  ;;  %1619 = vrot.lane.b32.xlu2 %v16282_v33, %s7914_s22 }
 0x39e   :  { %1617 = vrot.lane.b32.xlu1 %v16283_v43, %s7914_s22 }
 0x39f   :  { %1615 = vrot.lane.b32.xlu0 %v16284_v27, %s7914_s22 }
 0x3a2   :  { %v10552_v17 = vpop.permute.xlu2 %1489  ;;  %v10554_v7 = vpop.permute.xlu1 %1469 }
 0x3a3   :  { %16285 = vst [vmem:[#allocation238_spill] sm:$0xff] %v10552_v17  ;;  %v10556_v4 = vpop.permute.xlu0 %1467  ;;  %v10578_v17 = vld [vmem:[%s15185_s0 + $0x1a0] sm:$0xff] }
 0x3a4   :  { %16286 = vst [vmem:[#allocation239_spill] sm:$0xff] %v10554_v7  ;;  %v16291_v7 = vld [vmem:[#allocation247_spill] sm:$0xff] }
 0x3a5   :  { %16287 = vst [vmem:[#allocation232_spill] sm:$0xff] %v10556_v4  ;;  %1625 = vrot.lane.b32.xlu2 %v10561_v9, %s7914_s22  ;;  %v16292_v4 = vld [vmem:[#allocation248_spill] sm:$0xff] }
 0x3a6   :  { %1623 = vrot.lane.b32.xlu1 %v9705_v60, %s7914_s22 }
 0x3a7   :  { %1621 = vrot.lane.b32.xlu0 %v9678_v13, %s7914_s22 }
 0x3aa   :  { %v10569_v33 = vpop.permute.xlu2 %1495  ;;  %v10571_v43 = vpop.permute.xlu1 %1475 }
 0x3ab   :  { %16288 = vst [vmem:[#allocation392_spill] sm:$0xff] %v10569_v33  ;;  %v10573_v27 = vpop.permute.xlu0 %1473 }
 0x3ac   :  { %16289 = vst [vmem:[#allocation393_spill] sm:$0xff] %v10571_v43  ;;  %v16295_v43 = vld [vmem:[#allocation253_spill] sm:$0xff] }
 0x3ad   :  { %16290 = vst [vmem:[#allocation394_spill] sm:$0xff] %v10573_v27  ;;  %1631 = vrot.lane.b32.xlu2 %v16291_v7, %s7914_s22  ;;  %v16296_v27 = vld [vmem:[#allocation254_spill] sm:$0xff] }
 0x3ae   :  { %1629 = vrot.lane.b32.xlu1 %v16292_v4, %s7914_s22  ;;  %v16297_v7 = vld [vmem:[#allocation246_spill] sm:$0xff] }
 0x3af   :  { %1627 = vrot.lane.b32.xlu0 %v10578_v17, %s7914_s22 }
 0x3b2   :  { %v10586_v13 = vpop.permute.xlu2 %1565  ;;  %v10588_v60 = vpop.permute.xlu1 %1481 }
 0x3b3   :  { %16293 = vst [vmem:[#allocation247_spill] sm:$0xff] %v10588_v60  ;;  %v10590_v33 = vpop.permute.xlu0 %1479  ;;  %v7672_v60 = vld [vmem:[%s15185_s0 + $0x230] sm:$0xff] }
 0x3b4   :  { %16294 = vst [vmem:[#allocation248_spill] sm:$0xff] %v10590_v33  ;;  %v7674_v33 = vld [vmem:[%s15185_s0 + $0x258] sm:$0xff] }
 0x3b5   :  { %1637 = vrot.lane.b32.xlu2 %v16295_v43, %s7914_s22  ;;  %v7673_v43 = vld [vmem:[%s15185_s0 + $0x228] sm:$0xff] }
 0x3b6   :  { %1635 = vrot.lane.b32.xlu1 %v16296_v27, %s7914_s22  ;;  %v16300_v27 = vld [vmem:[#allocation252_spill] sm:$0xff] }
 0x3b7   :  { %1633 = vrot.lane.b32.xlu0 %v16297_v7, %s7914_s22 }
 0x3ba   :  { %v10598_v3 = vpop.permute.xlu2 %1571  ;;  %v10600_v4 = vpop.permute.xlu1 %1487 }
 0x3bb   :  { %16298 = vst [vmem:[#allocation253_spill] sm:$0xff] %v10600_v4  ;;  %v10602_v0 = vpop.permute.xlu0 %1485 }
 0x3bc   :  { %16299 = vst [vmem:[#allocation254_spill] sm:$0xff] %v10602_v0 }
 0x3bd   :  { %1643 = vrot.lane.b32.xlu2 %v7672_v60, %s7914_s22  ;;  %v7675_v60 = vld [vmem:[%s15185_s0 + $0x240] sm:$0xff] }
 0x3be   :  { %1641 = vrot.lane.b32.xlu1 %v7673_v43, %s7914_s22 }
 0x3bf   :  { %1639 = vrot.lane.b32.xlu0 %v16300_v27, %s7914_s22 }
 0x3c2   :  { %v10614_v7 = vpop.permute.xlu2 %1577  ;;  %v10616_v4 = vpop.permute.xlu1 %1493 }
 0x3c3   :  { %16301 = vst [vmem:[#allocation246_spill] sm:$0xff] %v10614_v7  ;;  %v10618_v0 = vpop.permute.xlu0 %1491 }
 0x3c4   :  { %16302 = vst [vmem:[#allocation252_spill] sm:$0xff] %v10616_v4 }
 0x3c5   :  { %16303 = vst [vmem:[#allocation395_spill] sm:$0xff] %v10618_v0  ;;  %1649 = vrot.lane.b32.xlu2 %v7674_v33, %s7914_s22  ;;  %v7676_v0 = vld [vmem:[%s15185_s0 + $0x278] sm:$0xff]  ;;  %v7678_v33 = vld [vmem:[%s15185_s0 + $0x260] sm:$0xff] }
 0x3c6   :  { %1647 = vrot.lane.b32.xlu1 %v9796_v19, %s7914_s22  ;;  %v7677_v19 = vld [vmem:[%s15185_s0 + $0x270] sm:$0xff] }
 0x3c7   :  { %1645 = vrot.lane.b32.xlu0 %v7675_v60, %s7914_s22 }
 0x3ca   :  { %v10630_v43 = vpop.permute.xlu2 %1583  ;;  %v10632_v27 = vpop.permute.xlu1 %1499 }
 0x3cb   :  { %16304 = vst [vmem:[#allocation396_spill] sm:$0xff] %v10630_v43  ;;  %v10634_v4 = vpop.permute.xlu0 %1497 }
 0x3cc   :  { %16305 = vst [vmem:[#allocation397_spill] sm:$0xff] %v10632_v27 }
 0x3cd   :  { %16306 = vst [vmem:[#allocation398_spill] sm:$0xff] %v10634_v4  ;;  %1655 = vrot.lane.b32.xlu2 %v7676_v0, %s7914_s22  ;;  %v7679_v0 = vld [vmem:[%s15185_s0 + $0x2a0] sm:$0xff] }
 0x3ce   :  { %1653 = vrot.lane.b32.xlu1 %v7677_v19, %s7914_s22  ;;  %v7680_v19 = vld [vmem:[%s15185_s0 + $0x290] sm:$0xff] }
 0x3cf   :  { %1651 = vrot.lane.b32.xlu0 %v7678_v33, %s7914_s22  ;;  %v7681_v33 = vld [vmem:[%s15185_s0 + $0x288] sm:$0xff] }
 0x3d2   :  { %v10648_v60 = vpop.permute.xlu2 %1589  ;;  %v10650_v27 = vpop.permute.xlu1 %1569 }
 0x3d3   :  { %16307 = vst [vmem:[#allocation399_spill] sm:$0xff] %v10648_v60  ;;  %v10652_v4 = vpop.permute.xlu0 %1567 }
 0x3d5   :  { %1661 = vrot.lane.b32.xlu2 %v7679_v0, %s7914_s22  ;;  %v7682_v0 = vld [vmem:[%s15185_s0 + $0x2c0] sm:$0xff] }
 0x3d6   :  { %1659 = vrot.lane.b32.xlu1 %v7680_v19, %s7914_s22  ;;  %v7683_v19 = vld [vmem:[%s15185_s0 + $0x2b8] sm:$0xff] }
 0x3d7   :  { %1657 = vrot.lane.b32.xlu0 %v7681_v33, %s7914_s22  ;;  %v7684_v33 = vld [vmem:[%s15185_s0 + $0x2a8] sm:$0xff] }
 0x3da   :  { %v10666_v60 = vpop.permute.xlu2 %1595  ;;  %v10668_v43 = vpop.permute.xlu1 %1575 }
 0x3db   :  { %16308 = vst [vmem:[#allocation400_spill] sm:$0xff] %v10666_v60  ;;  %v10670_v7 = vpop.permute.xlu0 %1573 }
 0x3dc   :  { %16309 = vst [vmem:[#allocation401_spill] sm:$0xff] %v10668_v43 }
 0x3dd   :  { %1667 = vrot.lane.b32.xlu2 %v7682_v0, %s7914_s22  ;;  %v7685_v0 = vld [vmem:[%s15185_s0 + $0x2e8] sm:$0xff] }
 0x3de   :  { %1665 = vrot.lane.b32.xlu1 %v7683_v19, %s7914_s22  ;;  %v7686_v19 = vld [vmem:[%s15185_s0 + $0x2d8] sm:$0xff] }
 0x3df   :  { %1663 = vrot.lane.b32.xlu0 %v7684_v33, %s7914_s22  ;;  %v7687_v33 = vld [vmem:[%s15185_s0 + $0x2d0] sm:$0xff] }
 0x3e2   :  { %v10684_v60 = vpop.permute.xlu2 %1601  ;;  %v10686_v62 = vpop.permute.xlu1 %1581 }
 0x3e3   :  { %16310 = vst [vmem:[#allocation402_spill] sm:$0xff] %v10684_v60  ;;  %v10688_v43 = vpop.permute.xlu0 %1579 }
 0x3e4   :  { %16311 = vst [vmem:[#allocation403_spill] sm:$0xff] %v10686_v62 }
 0x3e5   :  { %16312 = vst [vmem:[#allocation404_spill] sm:$0xff] %v10688_v43  ;;  %1673 = vrot.lane.b32.xlu2 %v7685_v0, %s7914_s22  ;;  %v7688_v0 = vld [vmem:[%s15185_s0 + $0x308] sm:$0xff] }
 0x3e6   :  { %1671 = vrot.lane.b32.xlu1 %v7686_v19, %s7914_s22  ;;  %v7689_v19 = vld [vmem:[%s15185_s0 + $0x300] sm:$0xff] }
 0x3e7   :  { %1669 = vrot.lane.b32.xlu0 %v7687_v33, %s7914_s22  ;;  %v7690_v33 = vld [vmem:[%s15185_s0 + $0x2f0] sm:$0xff] }
 0x3ea   :  { %v10702_v60 = vpop.permute.xlu2 %1607  ;;  %v10704_v62 = vpop.permute.xlu1 %1587 }
 0x3eb   :  { %16313 = vst [vmem:[#allocation405_spill] sm:$0xff] %v10702_v60  ;;  %v10706_v43 = vpop.permute.xlu0 %1585 }
 0x3ec   :  { %16314 = vst [vmem:[#allocation406_spill] sm:$0xff] %v10704_v62 }
 0x3ed   :  { %16315 = vst [vmem:[#allocation407_spill] sm:$0xff] %v10706_v43  ;;  %1679 = vrot.lane.b32.xlu2 %v7688_v0, %s7914_s22  ;;  %v7691_v0 = vld [vmem:[%s15185_s0 + $0x320] sm:$0xff] }
 0x3ee   :  { %1677 = vrot.lane.b32.xlu1 %v7689_v19, %s7914_s22  ;;  %v7692_v19 = vld [vmem:[%s15185_s0 + $0x318] sm:$0xff] }
 0x3ef   :  { %1675 = vrot.lane.b32.xlu0 %v7690_v33, %s7914_s22 }
 0x3f2   :  { %v10720_v60 = vpop.permute.xlu2 %1613  ;;  %v10722_v62 = vpop.permute.xlu1 %1593 }
 0x3f3   :  { %16316 = vst [vmem:[#allocation408_spill] sm:$0xff] %v10720_v60  ;;  %v10724_v43 = vpop.permute.xlu0 %1591 }
 0x3f4   :  { %16317 = vst [vmem:[#allocation409_spill] sm:$0xff] %v10722_v62 }
 0x3f5   :  { %16318 = vst [vmem:[#allocation410_spill] sm:$0xff] %v10724_v43  ;;  %1685 = vrot.lane.b32.xlu2 %v9874_v12, %s7914_s22  ;;  %v10745_v12 = vld [vmem:[%s15185_s0 + $0x350] sm:$0xff] }
 0x3f6   :  { %1683 = vrot.lane.b32.xlu1 %v7691_v0, %s7914_s22  ;;  %v10750_v0 = vld [vmem:[%s15185_s0 + $0x348] sm:$0xff] }
 0x3f7   :  { %1681 = vrot.lane.b32.xlu0 %v7692_v19, %s7914_s22 }
 0x3fa   :  { %v10736_v33 = vpop.permute.xlu2 %1619  ;;  %v10738_v60 = vpop.permute.xlu1 %1599 }
 0x3fb   :  { %16319 = vst [vmem:[#allocation411_spill] sm:$0xff] %v10736_v33  ;;  %v10740_v62 = vpop.permute.xlu0 %1597 }
 0x3fc   :  { %16320 = vst [vmem:[#allocation412_spill] sm:$0xff] %v10738_v60 }
 0x3fd   :  { %16321 = vst [vmem:[#allocation413_spill] sm:$0xff] %v10740_v62  ;;  %1691 = vrot.lane.b32.xlu2 %v10745_v12, %s7914_s22 }
 0x3fe   :  { %1689 = vrot.lane.b32.xlu1 %v10750_v0, %s7914_s22 }
 0x3ff   :  { %1687 = vrot.lane.b32.xlu0 %v9869_v45, %s7914_s22 }
 0x402   :  { %v10758_v19 = vpop.permute.xlu2 %1625  ;;  %v10760_v33 = vpop.permute.xlu1 %1605 }
 0x403   :  { %16322 = vst [vmem:[#allocation414_spill] sm:$0xff] %v10758_v19  ;;  %v10762_v60 = vpop.permute.xlu0 %1603  ;;  %v16371_v19 = vld [vmem:[#allocation51_spill] sm:$0xff] }
 0x404   :  { %16323 = vst [vmem:[#allocation415_spill] sm:$0xff] %v10760_v33 }
 0x405   :  { %16324 = vst [vmem:[#allocation416_spill] sm:$0xff] %v10762_v60  ;;  %1761 = vrot.lane.b32.xlu2 %v16020_v16, %s7915_s29  ;;  %v16403_v60 = vld [vmem:[#allocation120_spill] sm:$0xff] }
 0x406   :  { %1759 = vrot.lane.b32.xlu1 %v16021_v55, %s7915_s29 }
 0x407   :  { %1757 = vrot.lane.b32.xlu0 %v16013_v59, %s7915_s29 }
 0x40a   :  { %v10770_v62 = vpop.permute.xlu2 %1631  ;;  %v10772_v43 = vpop.permute.xlu1 %1611 }
 0x40b   :  { %16325 = vst [vmem:[#allocation417_spill] sm:$0xff] %v10770_v62  ;;  %v10774_v45 = vpop.permute.xlu0 %1609 }
 0x40c   :  { %16326 = vst [vmem:[#allocation418_spill] sm:$0xff] %v10772_v43  ;;  %v16399_v43 = vld [vmem:[#allocation110_spill] sm:$0xff] }
 0x40d   :  { %16327 = vst [vmem:[#allocation419_spill] sm:$0xff] %v10774_v45  ;;  %1767 = vrot.lane.b32.xlu2 %v16026_v21, %s7915_s29  ;;  %v16400_v45 = vld [vmem:[#allocation97_spill] sm:$0xff] }
 0x40e   :  { %1765 = vrot.lane.b32.xlu1 %v16027_v10, %s7915_s29 }
 0x40f   :  { %1763 = vrot.lane.b32.xlu0 %v16019_v36, %s7915_s29 }
 0x412   :  { %v10782_v16 = vpop.permute.xlu2 %1637  ;;  %v10784_v55 = vpop.permute.xlu1 %1617 }
 0x413   :  { %16328 = vst [vmem:[#allocation420_spill] sm:$0xff] %v10782_v16  ;;  %v10786_v59 = vpop.permute.xlu0 %1615  ;;  %v16342_v16 = vld [vmem:[#allocation22_spill] sm:$0xff] }
 0x414   :  { %16329 = vst [vmem:[#allocation421_spill] sm:$0xff] %v10784_v55 }
 0x415   :  { %16330 = vst [vmem:[#allocation422_spill] sm:$0xff] %v10786_v59  ;;  %1773 = vrot.lane.b32.xlu2 %v16032_v40, %s7915_s29 }
 0x416   :  { %1771 = vrot.lane.b32.xlu1 %v16033_v8, %s7915_s29 }
 0x417   :  { %1769 = vrot.lane.b32.xlu0 %v16025_v46, %s7915_s29 }
 0x41a   :  { %v10794_v21 = vpop.permute.xlu2 %1643  ;;  %v10796_v10 = vpop.permute.xlu1 %1623 }
 0x41b   :  { %16331 = vst [vmem:[#allocation423_spill] sm:$0xff] %v10794_v21  ;;  %v10798_v36 = vpop.permute.xlu0 %1621 }
 0x41c   :  { %16332 = vst [vmem:[#allocation424_spill] sm:$0xff] %v10796_v10  ;;  %v591_v10 = vrot.slane %v10745_v12, 1 }
 0x41d   :  { %16333 = vst [vmem:[#allocation425_spill] sm:$0xff] %v10798_v36  ;;  %1779 = vrot.lane.b32.xlu2 %v16038_v14, %s7915_s29  ;;  %v16337_v14 = vld [vmem:[#allocation20_spill] sm:$0xff] }
 0x41e   :  { %1777 = vrot.lane.b32.xlu1 %v16039_v29, %s7915_s29 }
 0x41f   :  { %1775 = vrot.lane.b32.xlu0 %v16031_v11, %s7915_s29 }
 0x422   :  { %v10806_v40 = vpop.permute.xlu2 %1649  ;;  %v10808_v8 = vpop.permute.xlu1 %1629 }
 0x423   :  { %16334 = vst [vmem:[#allocation426_spill] sm:$0xff] %v10806_v40  ;;  %v10810_v46 = vpop.permute.xlu0 %1627  ;;  %v16341_v40 = vld [vmem:[#allocation27_spill] sm:$0xff] }
 0x424   :  { %16335 = vst [vmem:[#allocation427_spill] sm:$0xff] %v10808_v8  ;;  %v16353_v8 = vld [vmem:[#allocation33_spill] sm:$0xff] }
 0x425   :  { %16336 = vst [vmem:[#allocation428_spill] sm:$0xff] %v10810_v46  ;;  %1785 = vrot.lane.b32.xlu2 %v16044_v22, %s7915_s29  ;;  %v16343_v22 = vld [vmem:[#allocation23_spill] sm:$0xff]  ;;  %v16354_v46 = vld [vmem:[#allocation28_spill] sm:$0xff] }
 0x426   :  { %1783 = vrot.lane.b32.xlu1 %v16045_v42, %s7915_s29 }
 0x427   :  { %1781 = vrot.lane.b32.xlu0 %v16337_v14, %s7915_s29 }
 0x42a   :  { %v10818_v21 = vpop.permute.xlu2 %1655  ;;  %v10820_v29 = vpop.permute.xlu1 %1635 }
 0x42b   :  { %16338 = vst [vmem:[#allocation20_spill] sm:$0xff] %v10818_v21  ;;  %v10822_v11 = vpop.permute.xlu0 %1633  ;;  %v585_v21 = vrot.slane %v10561_v9, 1 }
 0x42c   :  { %16339 = vst [vmem:[#allocation429_spill] sm:$0xff] %v10820_v29  ;;  %v586_v29 = vrot.slane %v10578_v17, 1 }
 0x42d   :  { %16340 = vst [vmem:[#allocation430_spill] sm:$0xff] %v10822_v11  ;;  %1791 = vrot.lane.b32.xlu2 %v16341_v40, %s7915_s29  ;;  %v16347_v11 = vld [vmem:[#allocation30_spill] sm:$0xff] }
 0x42e   :  { %1789 = vrot.lane.b32.xlu1 %v16342_v16, %s7915_s29  ;;  %v587_v40 = vsel %vm231_vm0, %v585_v21, %v586_v29  ;;  %v16348_v16 = vld [vmem:[#allocation25_spill] sm:$0xff] }
 0x42f   :  { %1787 = vrot.lane.b32.xlu0 %v16343_v22, %s7915_s29  ;;  %v16349_v22 = vld [vmem:[#allocation26_spill] sm:$0xff]  ;;  %v16355_v21 = vld [vmem:[#allocation29_spill] sm:$0xff] }
 0x432   :  { %v10830_v62 = vpop.permute.xlu2 %1661  ;;  %v10832_v42 = vpop.permute.xlu1 %1641 }
 0x433   :  { %16344 = vst [vmem:[#allocation27_spill] sm:$0xff] %v10830_v62  ;;  %v10834_v14 = vpop.permute.xlu0 %1639 }
 0x434   :  { %16345 = vst [vmem:[#allocation22_spill] sm:$0xff] %v10832_v42 }
 0x435   :  { %16346 = vst [vmem:[#allocation23_spill] sm:$0xff] %v10834_v14  ;;  %1797 = vrot.lane.b32.xlu2 %v16347_v11, %s7915_s29 }
 0x436   :  { %1795 = vrot.lane.b32.xlu1 %v16348_v16, %s7915_s29 }
 0x437   :  { %1793 = vrot.lane.b32.xlu0 %v16349_v22, %s7915_s29 }
 0x43a   :  { %v10845_v62 = vpop.permute.xlu2 %1667  ;;  %v10847_v42 = vpop.permute.xlu1 %1647 }
 0x43b   :  { %16350 = vst [vmem:[#allocation30_spill] sm:$0xff] %v10845_v62  ;;  %v10849_v14 = vpop.permute.xlu0 %1645  ;;  %v16359_v62 = vld [vmem:[#allocation37_spill] sm:$0xff] }
 0x43c   :  { %16351 = vst [vmem:[#allocation25_spill] sm:$0xff] %v10847_v42  ;;  %v16360_v42 = vld [vmem:[#allocation31_spill] sm:$0xff] }
 0x43d   :  { %16352 = vst [vmem:[#allocation26_spill] sm:$0xff] %v10849_v14  ;;  %1803 = vrot.lane.b32.xlu2 %v16353_v8, %s7915_s29  ;;  %v16361_v8 = vld [vmem:[#allocation32_spill] sm:$0xff] }
 0x43e   :  { %1801 = vrot.lane.b32.xlu1 %v16354_v46, %s7915_s29 }
 0x43f   :  { %1799 = vrot.lane.b32.xlu0 %v16355_v21, %s7915_s29 }
 0x442   :  { %v10857_v11 = vpop.permute.xlu2 %1673  ;;  %v10859_v16 = vpop.permute.xlu1 %1653 }
 0x443   :  { %16356 = vst [vmem:[#allocation33_spill] sm:$0xff] %v10857_v11  ;;  %v10861_v22 = vpop.permute.xlu0 %1651  ;;  %v10878_v11 = vld [vmem:[%s15185_s0 + $0x1a8] sm:$0x3] }
 0x444   :  { %16357 = vst [vmem:[#allocation28_spill] sm:$0xff] %v10859_v16  ;;  %v16365_v16 = vld [vmem:[#allocation296_spill] sm:$0xff] }
 0x445   :  { %16358 = vst [vmem:[#allocation29_spill] sm:$0xff] %v10861_v22  ;;  %1809 = vrot.lane.b32.xlu2 %v16359_v62, %s7915_s29  ;;  %v16366_v62 = vld [vmem:[#allocation297_spill] sm:$0xff] }
 0x446   :  { %1807 = vrot.lane.b32.xlu1 %v16360_v42, %s7915_s29  ;;  %v16367_v42 = vld [vmem:[#allocation36_spill] sm:$0xff] }
 0x447   :  { %1805 = vrot.lane.b32.xlu0 %v16361_v8, %s7915_s29 }
 0x44a   :  { %v10869_v14 = vpop.permute.xlu2 %1679  ;;  %v10871_v46 = vpop.permute.xlu1 %1659 }
 0x44b   :  { %16362 = vst [vmem:[#allocation37_spill] sm:$0xff] %v10869_v14  ;;  %v10873_v21 = vpop.permute.xlu0 %1657  ;;  %v588_v14 = vrot.slane %v10878_v11, 1 }
 0x44c   :  { %16363 = vst [vmem:[#allocation31_spill] sm:$0xff] %v10871_v46 }
 0x44d   :  { %16364 = vst [vmem:[#allocation32_spill] sm:$0xff] %v10873_v21  ;;  %1815 = vrot.lane.b32.xlu2 %v16365_v16, %s7915_s29  ;;  %v589_v22 = vsel %vm231_vm0, %v586_v29, %v588_v14  ;;  %v16377_v29 = vld [vmem:[#allocation50_spill] sm:$0xff] }
 0x44e   :  { %1813 = vrot.lane.b32.xlu1 %v16366_v62, %s7915_s29 }
 0x44f   :  { %1811 = vrot.lane.b32.xlu0 %v16367_v42, %s7915_s29 }
 0x452   :  { %v10886_v8 = vpop.permute.xlu2 %1685  ;;  %v10889_v46 = vpop.permute.xlu1 %1665 }
 0x453   :  { %16368 = vst [vmem:[#allocation296_spill] sm:$0xff] %v10886_v8  ;;  %v10891_v21 = vpop.permute.xlu0 %1663  ;;  %v16375_v8 = vld [vmem:[#allocation59_spill] sm:$0xff] }
 0x454   :  { %16369 = vst [vmem:[#allocation297_spill] sm:$0xff] %v10889_v46  ;;  %v16376_v46 = vld [vmem:[#allocation49_spill] sm:$0xff] }
 0x455   :  { %16370 = vst [vmem:[#allocation36_spill] sm:$0xff] %v10891_v21  ;;  %1821 = vrot.lane.b32.xlu2 %v16371_v19, %s7915_s29  ;;  %v16391_v21 = vld [vmem:[#allocation89_spill] sm:$0xff] }
 0x456   :  { %1819 = vrot.lane.b32.xlu1 %v589_v22, %s7915_s29  ;;  %v16380_v22 = vld [vmem:[#allocation68_spill] sm:$0xff] }
 0x457   :  { %1817 = vrot.lane.b32.xlu0 %v587_v40, %s7915_s29 }
 0x45a   :  { %v10898_v16 = vpop.permute.xlu2 %1691  ;;  %v10900_v62 = vpop.permute.xlu1 %1671 }
 0x45b   :  { %16372 = vst [vmem:[#allocation51_spill] sm:$0xff] %v10898_v16  ;;  %v10902_v42 = vpop.permute.xlu0 %1669  ;;  %v16381_v16 = vld [vmem:[#allocation57_spill] sm:$0xff] }
 0x45c   :  { %16373 = vst [vmem:[#allocation431_spill] sm:$0xff] %v10900_v62 }
 0x45d   :  { %16374 = vst [vmem:[#allocation432_spill] sm:$0xff] %v10902_v42  ;;  %1827 = vrot.lane.b32.xlu2 %v16375_v8, %s7915_s29  ;;  %v16382_v8 = vld [vmem:[#allocation58_spill] sm:$0xff] }
 0x45e   :  { %1825 = vrot.lane.b32.xlu1 %v16376_v46, %s7915_s29  ;;  %v16385_v42 = vld [vmem:[#allocation78_spill] sm:$0xff] }
 0x45f   :  { %1823 = vrot.lane.b32.xlu0 %v16377_v29, %s7915_s29 }
 0x462   :  { %v10910_v19 = vpop.permute.xlu2 %1761  ;;  %v10912_v14 = vpop.permute.xlu1 %1677 }
 0x463   :  { %16378 = vst [vmem:[#allocation59_spill] sm:$0xff] %v10912_v14  ;;  %v10914_v40 = vpop.permute.xlu0 %1675  ;;  %v16386_v14 = vld [vmem:[#allocation66_spill] sm:$0xff] }
 0x464   :  { %16379 = vst [vmem:[#allocation49_spill] sm:$0xff] %v10914_v40 }
 0x465   :  { %1833 = vrot.lane.b32.xlu2 %v16380_v22, %s7915_s29  ;;  %v16387_v22 = vld [vmem:[#allocation67_spill] sm:$0xff] }
 0x466   :  { %1831 = vrot.lane.b32.xlu1 %v16381_v16, %s7915_s29 }
 0x467   :  { %1829 = vrot.lane.b32.xlu0 %v16382_v8, %s7915_s29 }
 0x46a   :  { %v10922_v62 = vpop.permute.xlu2 %1767  ;;  %v10924_v46 = vpop.permute.xlu1 %1683 }
 0x46b   :  { %16383 = vst [vmem:[#allocation50_spill] sm:$0xff] %v10924_v46  ;;  %v10926_v29 = vpop.permute.xlu0 %1681  ;;  %v16392_v46 = vld [vmem:[#allocation76_spill] sm:$0xff] }
 0x46c   :  { %16384 = vst [vmem:[#allocation68_spill] sm:$0xff] %v10926_v29 }
 0x46d   :  { %1839 = vrot.lane.b32.xlu2 %v16385_v42, %s7915_s29  ;;  %v16393_v42 = vld [vmem:[#allocation77_spill] sm:$0xff] }
 0x46e   :  { %1837 = vrot.lane.b32.xlu1 %v16386_v14, %s7915_s29 }
 0x46f   :  { %1835 = vrot.lane.b32.xlu0 %v16387_v22, %s7915_s29 }
 0x472   :  { %v10934_v40 = vpop.permute.xlu2 %1773  ;;  %v10936_v16 = vpop.permute.xlu1 %1689 }
 0x473   :  { %16388 = vst [vmem:[#allocation57_spill] sm:$0xff] %v10934_v40  ;;  %v10938_v8 = vpop.permute.xlu0 %1687 }
 0x474   :  { %16389 = vst [vmem:[#allocation58_spill] sm:$0xff] %v10936_v16  ;;  %v590_v16 = vrot.slane %v10750_v0, 1 }
 0x475   :  { %16390 = vst [vmem:[#allocation78_spill] sm:$0xff] %v10938_v8  ;;  %1845 = vrot.lane.b32.xlu2 %v16391_v21, %s7915_s29  ;;  %v16395_v8 = vld [vmem:[#allocation99_spill] sm:$0xff] }
 0x476   :  { %1843 = vrot.lane.b32.xlu1 %v16392_v46, %s7915_s29  ;;  %v16396_v21 = vld [vmem:[#allocation87_spill] sm:$0xff]  ;;  %v16397_v46 = vld [vmem:[#allocation88_spill] sm:$0xff]  ;;  %v592_v59 = vsel %vm231_vm0, %v590_v16, %v591_v10 }
 0x477   :  { %1841 = vrot.lane.b32.xlu0 %v16393_v42, %s7915_s29  ;;  %v16404_v16 = vld [vmem:[#allocation108_spill] sm:$0xff] }
 0x47a   :  { %v10946_v29 = vpop.permute.xlu2 %1779  ;;  %v10948_v14 = vpop.permute.xlu1 %1759 }
 0x47b   :  { %16394 = vst [vmem:[#allocation66_spill] sm:$0xff] %v10946_v29  ;;  %v10950_v22 = vpop.permute.xlu0 %1757  ;;  %v16408_v29 = vld [vmem:[#allocation118_spill] sm:$0xff] }
 0x47d   :  { %1851 = vrot.lane.b32.xlu2 %v16395_v8, %s7915_s29  ;;  %v16401_v8 = vld [vmem:[#allocation98_spill] sm:$0xff] }
 0x47e   :  { %1849 = vrot.lane.b32.xlu1 %v16396_v21, %s7915_s29 }
 0x47f   :  { %1847 = vrot.lane.b32.xlu0 %v16397_v46, %s7915_s29 }
 0x482   :  { %v10960_v42 = vpop.permute.xlu2 %1785  ;;  %v10962_v36 = vpop.permute.xlu1 %1765 }
 0x483   :  { %16398 = vst [vmem:[#allocation67_spill] sm:$0xff] %v10960_v42  ;;  %v10964_v55 = vpop.permute.xlu0 %1763 }
 0x485   :  { %1857 = vrot.lane.b32.xlu2 %v16399_v43, %s7915_s29  ;;  %v16405_v43 = vld [vmem:[#allocation109_spill] sm:$0xff] }
 0x486   :  { %1855 = vrot.lane.b32.xlu1 %v16400_v45, %s7915_s29 }
 0x487   :  { %1853 = vrot.lane.b32.xlu0 %v16401_v8, %s7915_s29 }
 0x48a   :  { %v10973_v21 = vpop.permute.xlu2 %1791  ;;  %v10975_v46 = vpop.permute.xlu1 %1771 }
 0x48b   :  { %16402 = vst [vmem:[#allocation89_spill] sm:$0xff] %v10973_v21  ;;  %v10977_v33 = vpop.permute.xlu0 %1769  ;;  %v16407_v21 = vld [vmem:[#allocation128_spill] sm:$0xff] }
 0x48d   :  { %1863 = vrot.lane.b32.xlu2 %v16403_v60, %s7915_s29  ;;  %v16409_v60 = vld [vmem:[#allocation119_spill] sm:$0xff] }
 0x48e   :  { %1861 = vrot.lane.b32.xlu1 %v16404_v16, %s7915_s29 }
 0x48f   :  { %1859 = vrot.lane.b32.xlu0 %v16405_v43, %s7915_s29 }
 0x492   :  { %v10985_v42 = vpop.permute.xlu2 %1797  ;;  %v10987_v45 = vpop.permute.xlu1 %1777 }
 0x493   :  { %16406 = vst [vmem:[#allocation76_spill] sm:$0xff] %v10985_v42  ;;  %v10989_v8 = vpop.permute.xlu0 %1775 }
 0x495   :  { %1869 = vrot.lane.b32.xlu2 %v16407_v21, %s7915_s29  ;;  %v16412_v21 = vld [vmem:[#allocation127_spill] sm:$0xff] }
 0x496   :  { %1867 = vrot.lane.b32.xlu1 %v16408_v29, %s7915_s29 }
 0x497   :  { %1865 = vrot.lane.b32.xlu0 %v16409_v60, %s7915_s29 }
 0x49a   :  { %v10997_v40 = vpop.permute.xlu1 %1783  ;;  %v11001_v43 = vpop.permute.xlu2 %1803 }
 0x49b   :  { %16410 = vst [vmem:[#allocation77_spill] sm:$0xff] %v10997_v40  ;;  %v10999_v16 = vpop.permute.xlu0 %1781  ;;  %v11018_v40 = vld [vmem:[%s15185_s0 + $0x358] sm:$0x3] }
 0x49c   :  { %16411 = vst [vmem:[#allocation99_spill] sm:$0xff] %v11001_v43 }
 0x49d   :  { %1875 = vrot.lane.b32.xlu2 %v8896_v58, %s7915_s29  ;;  %v16415_v58 = vld [vmem:[#allocation326_spill] sm:$0xff] }
 0x49e   :  { %1873 = vrot.lane.b32.xlu1 %v16134_v18, %s7915_s29  ;;  %v593_v18 = vrot.slane %v11018_v40, 1 }
 0x49f   :  { %1871 = vrot.lane.b32.xlu0 %v16412_v21, %s7915_s29 }
 0x4a2   :  { %v11009_v42 = vpop.permute.xlu1 %1789  ;;  %v11013_v60 = vpop.permute.xlu2 %1809 }
 0x4a3   :  { %16413 = vst [vmem:[#allocation87_spill] sm:$0xff] %v11009_v42  ;;  %v11011_v29 = vpop.permute.xlu0 %1787 }
 0x4a4   :  { %16414 = vst [vmem:[#allocation88_spill] sm:$0xff] %v11013_v60  ;;  %v594_v60 = vsel %vm231_vm0, %v591_v10, %v593_v18 }
 0x4a5   :  { %1881 = vrot.lane.b32.xlu2 %v592_v59, %s7915_s29 }
 0x4a6   :  { %1879 = vrot.lane.b32.xlu1 %v10166_v32, %s7915_s29 }
 0x4a7   :  { %1877 = vrot.lane.b32.xlu0 %v16415_v58, %s7915_s29 }
 0x4aa   :  { %v11026_v21 = vpop.permute.xlu1 %1795  ;;  %v11031_v42 = vpop.permute.xlu2 %1815 }
 0x4ab   :  { %v11028_v43 = vpop.permute.xlu0 %1793 }
 0x4ad   :  { %1951 = vrot.lane.b32.xlu2 %v8945_v26, %s7916_s10 }
 0x4ae   :  { %1949 = vrot.lane.b32.xlu1 %v8914_v34, %s7916_s10 }
 0x4af   :  { %1883 = vrot.lane.b32.xlu0 %v594_v60, %s7915_s29  ;;  %v596_v60 = vrot.slane %v10578_v17, 2 }
 0x4b2   :  { %v11038_v32 = vpop.permute.xlu1 %1801  ;;  %v11048_v10 = vpop.permute.xlu2 %1821 }
 0x4b3   :  { %v11040_v59 = vpop.permute.xlu0 %1799 }
 0x4b5   :  { %1957 = vrot.lane.b32.xlu2 %v8971_v37, %s7916_s10 }
 0x4b6   :  { %1955 = vrot.lane.b32.xlu1 %v8939_v44, %s7916_s10 }
 0x4b7   :  { %1953 = vrot.lane.b32.xlu0 %v8942_v15, %s7916_s10 }
 0x4ba   :  { %v11050_v26 = vpop.permute.xlu1 %1807  ;;  %v11064_v15 = vpop.permute.xlu2 %1827 }
 0x4bb   :  { %v11052_v34 = vpop.permute.xlu0 %1805 }
 0x4bd   :  { %1963 = vrot.lane.b32.xlu2 %v8996_v50, %s7916_s10 }
 0x4be   :  { %1961 = vrot.lane.b32.xlu1 %v8965_v5, %s7916_s10 }
 0x4bf   :  { %1959 = vrot.lane.b32.xlu0 %v8968_v31, %s7916_s10 }
 0x4c2   :  { %v11060_v37 = vpop.permute.xlu1 %1813  ;;  %v11076_v31 = vpop.permute.xlu2 %1833 }
 0x4c3   :  { %v11062_v44 = vpop.permute.xlu0 %1811 }
 0x4c5   :  { %1969 = vrot.lane.b32.xlu2 %v9022_v61, %s7916_s10 }
 0x4c6   :  { %1967 = vrot.lane.b32.xlu1 %v8990_v2, %s7916_s10 }
 0x4c7   :  { %1965 = vrot.lane.b32.xlu0 %v8993_v28, %s7916_s10 }
 0x4ca   :  { %v11072_v50 = vpop.permute.xlu1 %1819  ;;  %v11088_v28 = vpop.permute.xlu2 %1839 }
 0x4cb   :  { %v11074_v5 = vpop.permute.xlu0 %1817 }
 0x4cd   :  { %1975 = vrot.lane.b32.xlu2 %v9047_v23, %s7916_s10 }
 0x4ce   :  { %1973 = vrot.lane.b32.xlu1 %v9016_v39, %s7916_s10 }
 0x4cf   :  { %1971 = vrot.lane.b32.xlu0 %v9019_v1, %s7916_s10  ;;  %v595_v1 = vrot.slane %v10561_v9, 2 }
 0x4d1   :  { %v597_v58 = vsel %vm392_vm1, %v595_v1, %v596_v60 }
 0x4d2   :  { %v11084_v61 = vpop.permute.xlu1 %1825 }
 0x4d3   :  { %v11086_v2 = vpop.permute.xlu0 %1823 }
 0x4d5   :  { %1981 = vrot.lane.b32.xlu2 %v9073_v54, %s7916_s10 }
 0x4d6   :  { %1979 = vrot.lane.b32.xlu1 %v9041_v25, %s7916_s10 }
 0x4d7   :  { %1977 = vrot.lane.b32.xlu0 %v9044_v52, %s7916_s10  ;;  %v11109_v52 = vpop.permute.xlu2 %1845 }
 0x4da   :  { %v11096_v23 = vpop.permute.xlu1 %1831 }
 0x4db   :  { %v11098_v39 = vpop.permute.xlu0 %1829 }
 0x4dd   :  { %1987 = vrot.lane.b32.xlu2 %v9098_v6, %s7916_s10 }
 0x4de   :  { %1985 = vrot.lane.b32.xlu1 %v9067_v63, %s7916_s10 }
 0x4df   :  { %1983 = vrot.lane.b32.xlu0 %v9070_v24, %s7916_s10  ;;  %v11125_v24 = vpop.permute.xlu2 %1851 }
 0x4e2   :  { %v11111_v25 = vpop.permute.xlu1 %1837 }
 0x4e3   :  { %v11113_v54 = vpop.permute.xlu0 %1835 }
 0x4e5   :  { %1993 = vrot.lane.b32.xlu2 %v9124_v41, %s7916_s10 }
 0x4e6   :  { %1991 = vrot.lane.b32.xlu1 %v9092_v49, %s7916_s10 }
 0x4e7   :  { %1989 = vrot.lane.b32.xlu0 %v9095_v30, %s7916_s10  ;;  %v11137_v30 = vpop.permute.xlu2 %1857 }
 0x4e8   :  { %16416 = vst [vmem:[#allocation110_spill] sm:$0xff] %v11137_v30 }
 0x4ea   :  { %v11121_v6 = vpop.permute.xlu1 %1843 }
 0x4eb   :  { %v11123_v63 = vpop.permute.xlu0 %1841 }
 0x4ed   :  { %1999 = vrot.lane.b32.xlu2 %v9149_v53, %s7916_s10  ;;  %v16417_v53 = vld [vmem:[#allocation162_spill] sm:$0xff] }
 0x4ee   :  { %1997 = vrot.lane.b32.xlu1 %v9118_v56, %s7916_s10  ;;  %v598_v56 = vrot.slane %v10878_v11, 2 }
 0x4ef   :  { %1995 = vrot.lane.b32.xlu0 %v9121_v48, %s7916_s10  ;;  %v11151_v18 = vpop.permute.xlu2 %1863 }
 0x4f0   :  { %v599_v17 = vsel %vm392_vm1, %v596_v60, %v598_v56  ;;  %16419 = vst [vmem:[#allocation98_spill] sm:$0xff] %v11151_v18  ;;  %v2661_v60 = vld [vmem:[%s15186_s1] sm:$0xff]  ;;  %v16425_v56 = vld [vmem:[#allocation163_spill] sm:$0xff] }
 0x4f1   :  { %v16429_v18 = vld [vmem:[#allocation167_spill] sm:$0xff] }
 0x4f2   :  { %v11133_v41 = vpop.permute.xlu1 %1849 }
 0x4f3   :  { %v11135_v49 = vpop.permute.xlu0 %1847 }
 0x4f5   :  { %2005 = vrot.lane.b32.xlu2 %v10295_v57, %s7916_s10  ;;  %v16420_v57 = vld [vmem:[#allocation359_spill] sm:$0xff] }
 0x4f6   :  { %2003 = vrot.lane.b32.xlu1 %v9143_v20, %s7916_s10  ;;  %v2662_v20 = vld [vmem:[%s15186_s1 + $0x8] sm:$0x1] }
 0x4f7   :  { %2001 = vrot.lane.b32.xlu0 %v16417_v53, %s7916_s10  ;;  %6529 = vmatpush.msk.msra.mxu0 %vm2860_vm2, %v2662_v20  ;;  %v16424_v53 = vld [vmem:[#allocation39_spill] sm:$0xff]  ;;  %vm6511_vm2 = vcmask 517120  }
 0x4f9   :  { %2879 = vmatpush.msra.mxu0 %v2661_v60  ;;  %v16430_v60 = vld [vmem:[#allocation55_spill] sm:$0xff] }
 0x4fa   :  { %v11146_v9 = vpop.permute.xlu1 %1855 }
 0x4fb   :  { %16418 = vst [vmem:[#allocation97_spill] sm:$0xff] %v11146_v9  ;;  %v11148_v48 = vpop.permute.xlu0 %1853  ;;  %v16445_v9 = vld [vmem:[#allocation170_spill] sm:$0xff] }
 0x4fd   :  { %2011 = vrot.lane.b32.xlu2 %v599_v17, %s7916_s10  ;;  %v11173_v17 = vpop.permute.xlu2 %1869 }
 0x4fe   :  { %2009 = vrot.lane.b32.xlu1 %v597_v58, %s7916_s10  ;;  %v16423_v58 = vld [vmem:[#allocation165_spill] sm:$0xff]  ;;  %16426 = vst [vmem:[#allocation109_spill] sm:$0xff] %v11173_v17  ;;  %v16435_v17 = vld [vmem:[#allocation168_spill] sm:$0xff] }
 0x4ff   :  { %2007 = vrot.lane.b32.xlu0 %v16420_v57, %s7916_s10 }
 0x502   :  { %v11160_v11 = vpop.permute.xlu1 %1861 }
 0x503   :  { %16421 = vst [vmem:[#allocation120_spill] sm:$0xff] %v11160_v11  ;;  %v11162_v1 = vpop.permute.xlu0 %1859 }
 0x504   :  { %16422 = vst [vmem:[#allocation108_spill] sm:$0xff] %v11162_v1  ;;  %v16444_v1 = vld [vmem:[#allocation310_spill] sm:$0xff] }
 0x505   :  { %2017 = vrot.lane.b32.xlu2 %v16423_v58, %s7916_s10  ;;  %v16431_v58 = vld [vmem:[#allocation43_spill] sm:$0xff] }
 0x506   :  { %2015 = vrot.lane.b32.xlu1 %v16424_v53, %s7916_s10 }
 0x507   :  { %2013 = vrot.lane.b32.xlu0 %v16425_v56, %s7916_s10  ;;  %v11189_v56 = vpop.permute.xlu2 %1875 }
 0x508   :  { %16434 = vst [vmem:[#allocation326_spill] sm:$0xff] %v11189_v56 }
 0x50a   :  { %v11175_v57 = vpop.permute.xlu1 %1867 }
 0x50b   :  { %16427 = vst [vmem:[#allocation128_spill] sm:$0xff] %v11175_v57  ;;  %v11177_v20 = vpop.permute.xlu0 %1865  ;;  %v16436_v57 = vld [vmem:[#allocation53_spill] sm:$0xff] }
 0x50c   :  { %16428 = vst [vmem:[#allocation118_spill] sm:$0xff] %v11177_v20 }
 0x50d   :  { %2023 = vrot.lane.b32.xlu2 %v16429_v18, %s7916_s10  ;;  %v16437_v18 = vld [vmem:[#allocation166_spill] sm:$0xff] }
 0x50e   :  { %2021 = vrot.lane.b32.xlu1 %v16430_v60, %s7916_s10  ;;  %v7693_v60 = vld [vmem:[%s15185_s0] sm:$0xff] }
 0x50f   :  { %2019 = vrot.lane.b32.xlu0 %v16431_v58, %s7916_s10  ;;  %v16439_v58 = vld [vmem:[#allocation75_spill] sm:$0xff] }
 0x510   :  { %v2142_v56 = vsel %vm2141_vm3, %v7693_v60, %v16439_v58  ;;  %v16446_v60 = vld [vmem:[#allocation371_spill] sm:$0xff] }
 0x512   :  { %v11185_v11 = vpop.permute.xlu1 %1873 }
 0x513   :  { %16432 = vst [vmem:[#allocation119_spill] sm:$0xff] %v11185_v11  ;;  %v11187_v53 = vpop.permute.xlu0 %1871 }
 0x514   :  { %16433 = vst [vmem:[#allocation127_spill] sm:$0xff] %v11187_v53  ;;  %v16442_v53 = vld [vmem:[#allocation243_spill] sm:$0xff] }
 0x515   :  { %2029 = vrot.lane.b32.xlu2 %v16435_v17, %s7916_s10  ;;  %v16441_v17 = vld [vmem:[#allocation69_spill] sm:$0xff] }
 0x516   :  { %2027 = vrot.lane.b32.xlu1 %v16436_v57, %s7916_s10  ;;  %v2207_v57 = vsel %vm2206_vm5, %v2142_v56, %v16441_v17  ;;  %v16448_v56 = vld [vmem:[#allocation60_spill] sm:$0xff] }
 0x517   :  { %2025 = vrot.lane.b32.xlu0 %v16437_v18, %s7916_s10  ;;  %v2272_v18 = vsel %vm2271_vm4, %v2207_v57, %v16442_v53 }
 0x518   :  { %v2337_v30 = vsel %vm2336_vm6, %v2272_v18, %v16444_v1  ;;  %v16450_v18 = vld [vmem:[#allocation45_spill] sm:$0xff] }
 0x519   :  { %v2402_v58 = vsel %vm2401_vm8, %v2337_v30, %v16446_v60  ;;  %v7694_v30 = vld [vmem:[%s15185_s0 + $0x8] sm:$0xff] }
 0x51a   :  { %v11197_v20 = vpop.permute.xlu1 %1879  ;;  %v2467_v53 = vsel %vm2466_vm7, %v2402_v58, %v10586_v13  ;;  %v16451_v60 = vld [vmem:[#allocation263_spill] sm:$0xff] }
 0x51b   :  { %16438 = vst [vmem:[#allocation162_spill] sm:$0xff] %v11197_v20  ;;  %v11204_v11 = vpop.permute.xlu0 %1877  ;;  %v11210_v20 = vpop.permute.xlu2 %1881  ;;  %v2532_v1 = vsel %vm2531_vm9, %v2467_v53, %v10950_v22 }
 0x51c   :  { %16440 = vst [vmem:[#allocation359_spill] sm:$0xff] %v11204_v11  ;;  %v16447_v11 = vld [vmem:[#allocation72_spill] sm:$0xff] }
 0x51d   :  { %16443 = vst [vmem:[#allocation165_spill] sm:$0xff] %v11210_v20  ;;  %2035 = vrot.lane.b32.xlu2 %v16445_v9, %s7916_s10 }
 0x51e   :  { %2033 = vrot.lane.b32.xlu1 %v16447_v11, %s7916_s10  ;;  %v16449_v11 = vld [vmem:[#allocation86_spill] sm:$0xff] }
 0x51f   :  { %2031 = vrot.lane.b32.xlu0 %v16448_v56, %s7916_s10  ;;  %v2143_v57 = vsel %vm2141_vm3, %v7694_v30, %v16449_v11  ;;  %v16452_v56 = vld [vmem:[#allocation309_spill] sm:$0xff] }
 0x520   :  { %v2208_v13 = vsel %vm2206_vm5, %v2143_v57, %v16450_v18  ;;  %v16456_v11 = vld [vmem:[#allocation169_spill] sm:$0xff] }
 0x521   :  { %v2273_v58 = vsel %vm2271_vm4, %v2208_v13, %v16451_v60  ;;  %v7695_v60 = vld [vmem:[%s15185_s0 + $0x18] sm:$0xff] }
 0x522   :  { %v1950_v17 = vpop.permute.xlu1 %1949  ;;  %v2338_v53 = vsel %vm2336_vm6, %v2273_v58, %v16452_v56  ;;  %v16457_v58 = vld [vmem:[#allocation74_spill] sm:$0xff] }
 0x523   :  { %v2597_v9 = vsel %vm2596_vm11, %v2532_v1, %v1950_v17  ;;  %v11237_v22 = vpop.permute.xlu0 %1883  ;;  %v16453_v1 = vld [vmem:[#allocation171_spill] sm:$0xff]  ;;  %v16454_v17 = vld [vmem:[#allocation164_spill] sm:$0xff]  ;;  %v1952_v30 = vpop.permute.xlu2 %1951  ;;  %v2144_v56 = vsel %vm2141_vm3, %v7695_v60, %v16457_v58 }
 0x524   :  { %6530 = vmatmul.msk.f32.vlgmr.msra.gmra.mxu0 %vm2667_vm10, %v2597_v9  ;;  %v2403_v20 = vsel %vm2401_vm8, %v2338_v53, %v16454_v17  ;;  %v16455_v9 = vld [vmem:[#allocation70_spill] sm:$0xff]  ;;  %v16458_v53 = vld [vmem:[#allocation83_spill] sm:$0xff] }
 0x525   :  { %2041 = vrot.lane.b32.xlu2 %v16453_v1, %s7916_s10  ;;  %v2468_v57 = vsel %vm2466_vm7, %v2403_v20, %v10652_v4  ;;  %v2209_v1 = vsel %vm2206_vm5, %v2144_v56, %v16458_v53  ;;  %v16459_v17 = vld [vmem:[#allocation262_spill] sm:$0xff]  ;;  %v16460_v20 = vld [vmem:[#allocation41_spill] sm:$0xff]  ;;  %v601_v56 = vrot.slane %v10745_v12, 2  ;;  %v600_v53 = vrot.slane %v10750_v0, 2 }
 0x526   :  { %2039 = vrot.lane.b32.xlu1 %v16455_v9, %s7916_s10  ;;  %v2533_v18 = vsel %vm2531_vm9, %v2468_v57, %v10948_v14  ;;  %v2274_v4 = vsel %vm2271_vm4, %v2209_v1, %v16459_v17  ;;  %v16462_v9 = vld [vmem:[#allocation375_spill] sm:$0xff]  ;;  %v7696_v17 = vld [vmem:[%s15185_s0 + $0x20] sm:$0xff] }
 0x527   :  { %2037 = vrot.lane.b32.xlu0 %v16456_v11, %s7916_s10  ;;  %v2598_v13 = vsel %vm2596_vm11, %v2533_v18, %v1952_v30  ;;  %v2339_v14 = vsel %vm2336_vm6, %v2274_v4, %v16460_v20  ;;  %v16461_v30 = vld [vmem:[#allocation173_spill] sm:$0xff] }
 0x528   :  { %v2404_v11 = vsel %vm2401_vm8, %v2339_v14, %v16462_v9  ;;  %v16463_v18 = vld [vmem:[#allocation93_spill] sm:$0xff]  ;;  %v16466_v14 = vld [vmem:[#allocation82_spill] sm:$0xff] }
 0x529   :  { %v2469_v60 = vsel %vm2466_vm7, %v2404_v11, %v10650_v27  ;;  %v16465_v4 = vld [vmem:[#allocation85_spill] sm:$0xff]  ;;  %v602_v11 = vsel %vm392_vm1, %v600_v53, %v601_v56  ;;  %v7697_v53 = vld [vmem:[%s15185_s0 + $0x30] sm:$0xff] }
 0x52a   :  { %v2534_v58 = vsel %vm2531_vm9, %v2469_v60, %v10910_v19  ;;  %v2145_v20 = vsel %vm2141_vm3, %v7696_v17, %v16465_v4  ;;  %v16468_v9 = vld [vmem:[#allocation313_spill] sm:$0xff]  ;;  %v16470_v60 = vld [vmem:[#allocation172_spill] sm:$0xff] }
 0x52b   :  { %v1954_v57 = vpop.permute.xlu0 %1953  ;;  %v2210_v27 = vsel %vm2206_vm5, %v2145_v20, %v16466_v14  ;;  %v16471_v17 = vld [vmem:[#allocation48_spill] sm:$0xff]  ;;  %v16473_v14 = vld [vmem:[#allocation266_spill] sm:$0xff] }
 0x52c   :  { %6531 = vmatmul.msk.f32.gmra.mxu0 %vm2667_vm10, %v2598_v13  ;;  %v16464_v13 = vld [vmem:[#allocation79_spill] sm:$0xff]  ;;  %v2599_v1 = vsel %vm2596_vm11, %v2534_v58, %v1954_v57  ;;  %v16469_v57 = vld [vmem:[#allocation374_spill] sm:$0xff]  ;;  %v2146_v4 = vsel %vm2141_vm3, %v7697_v53, %v16471_v17  ;;  %v16481_v17 = vld [vmem:[#allocation181_spill] sm:$0xff] }
 0x52d   :  { %2047 = vrot.lane.b32.xlu2 %v16461_v30, %s7916_s10  ;;  %v16467_v30 = vld [vmem:[#allocation249_spill] sm:$0xff]  ;;  %v16480_v53 = vld [vmem:[#allocation302_spill] sm:$0xff] }
 0x52e   :  { %2045 = vrot.lane.b32.xlu1 %v16463_v18, %s7916_s10  ;;  %v2275_v19 = vsel %vm2271_vm4, %v2210_v27, %v16467_v30  ;;  %v16474_v27 = vld [vmem:[#allocation312_spill] sm:$0xff] }
 0x52f   :  { %2043 = vrot.lane.b32.xlu0 %v16464_v13, %s7916_s10  ;;  %v2340_v0 = vsel %vm2336_vm6, %v2275_v19, %v16468_v9  ;;  %v1956_v13 = vpop.permute.xlu1 %1955  ;;  %v16475_v30 = vld [vmem:[#allocation364_spill] sm:$0xff]  ;;  %v1958_v9 = vpop.permute.xlu2 %1957 }
 0x530   :  { %v2405_v18 = vsel %vm2401_vm8, %v2340_v0, %v16469_v57  ;;  %v16476_v0 = vld [vmem:[#allocation100_spill] sm:$0xff] }
 0x531   :  { %v2470_v58 = vsel %vm2466_vm7, %v2405_v18, %v10598_v3 }
 0x534   :  { %6532 = vmatmul.msk.f32.gmra.mxu0 %vm2667_vm10, %v2599_v1 }
 0x535   :  { %2053 = vrot.lane.b32.xlu2 %v16215_v35, %s7916_s10  ;;  %v2535_v35 = vsel %vm2531_vm9, %v2470_v58, %v10964_v55 }
 0x536   :  { %2051 = vrot.lane.b32.xlu1 %v16216_v38, %s7916_s10  ;;  %v2600_v1 = vsel %vm2596_vm11, %v2535_v35, %v1956_v13  ;;  %v16472_v38 = vld [vmem:[#allocation54_spill] sm:$0xff] }
 0x537   :  { %2049 = vrot.lane.b32.xlu0 %v16470_v60, %s7916_s10  ;;  %v2211_v20 = vsel %vm2206_vm5, %v2146_v4, %v16472_v38  ;;  %v16477_v60 = vld [vmem:[#allocation56_spill] sm:$0xff]  ;;  %v16482_v4 = vld [vmem:[#allocation378_spill] sm:$0xff] }
 0x538   :  { %v2276_v3 = vsel %vm2271_vm4, %v2211_v20, %v16473_v14  ;;  %v1960_v20 = vpop.permute.xlu0 %1959  ;;  %v16483_v14 = vld [vmem:[#allocation177_spill] sm:$0xff] }
 0x539   :  { %v2341_v55 = vsel %vm2336_vm6, %v2276_v3, %v16474_v27  ;;  %v16484_v3 = vld [vmem:[#allocation178_spill] sm:$0xff]  ;;  %v16485_v27 = vld [vmem:[#allocation401_spill] sm:$0xff] }
 0x53a   :  { %v2406_v19 = vsel %vm2401_vm8, %v2341_v55, %v16475_v30 }
 0x53b   :  { %v2471_v57 = vsel %vm2466_vm7, %v2406_v19, %v10670_v7 }
 0x53c   :  { %6533 = vmatmul.msk.f32.gmra.mxu0 %vm2667_vm10, %v2600_v1  ;;  %v2536_v18 = vsel %vm2531_vm9, %v2471_v57, %v10962_v36  ;;  %v16479_v1 = vld [vmem:[#allocation265_spill] sm:$0xff] }
 0x53d   :  { %2059 = vrot.lane.b32.xlu2 %v9398_v51, %s7916_s10  ;;  %v2601_v13 = vsel %vm2596_vm11, %v2536_v18, %v1958_v9  ;;  %v7698_v51 = vld [vmem:[%s15185_s0 + $0x38] sm:$0xff]  ;;  %v7699_v9 = vld [vmem:[%s15185_s0 + $0x48] sm:$0xff] }
 0x53e   :  { %2057 = vrot.lane.b32.xlu1 %v16220_v47, %s7916_s10  ;;  %v2147_v58 = vsel %vm2141_vm3, %v7698_v51, %v16477_v60  ;;  %v16478_v47 = vld [vmem:[#allocation80_spill] sm:$0xff]  ;;  %v16487_v18 = vld [vmem:[#allocation90_spill] sm:$0xff]  ;;  %v16488_v51 = vld [vmem:[#allocation255_spill] sm:$0xff] }
 0x53f   :  { %2055 = vrot.lane.b32.xlu0 %v16476_v0, %s7916_s10  ;;  %v2212_v35 = vsel %vm2206_vm5, %v2147_v58, %v16478_v47  ;;  %v16486_v0 = vld [vmem:[#allocation96_spill] sm:$0xff] }
 0x540   :  { %v2277_v7 = vsel %vm2271_vm4, %v2212_v35, %v16479_v1  ;;  %v2148_v57 = vsel %vm2141_vm3, %v7699_v9, %v16486_v0  ;;  %v16489_v58 = vld [vmem:[#allocation316_spill] sm:$0xff]  ;;  %v16491_v35 = vld [vmem:[#allocation377_spill] sm:$0xff]  ;;  %v16498_v0 = vld [vmem:[#allocation315_spill] sm:$0xff] }
 0x541   :  { %v2342_v36 = vsel %vm2336_vm6, %v2277_v7, %v16480_v53  ;;  %v16490_v47 = vld [vmem:[#allocation388_spill] sm:$0xff]  ;;  %v1962_v7 = vpop.permute.xlu1 %1961  ;;  %v16492_v53 = vld [vmem:[#allocation389_spill] sm:$0xff] }
 0x542   :  { %v2407_v38 = vsel %vm2401_vm8, %v2342_v36, %v16482_v4  ;;  %v16493_v36 = vld [vmem:[#allocation180_spill] sm:$0xff]  ;;  %v16497_v9 = vld [vmem:[#allocation269_spill] sm:$0xff] }
 0x543   :  { %v2472_v55 = vsel %vm2466_vm7, %v2407_v38, %v16485_v27  ;;  %v603_v38 = vrot.slane %v11018_v40, 2  ;;  %v16495_v27 = vld [vmem:[#allocation95_spill] sm:$0xff] }
 0x544   :  { %6534 = vmatmul.msk.f32.gmra.mxu0 %vm2667_vm10, %v2601_v13  ;;  %v2537_v30 = vsel %vm2531_vm9, %v2472_v55, %v10922_v62  ;;  %v2213_v13 = vsel %vm2206_vm5, %v2148_v57, %v16487_v18  ;;  %v16499_v18 = vld [vmem:[#allocation367_spill] sm:$0xff] }
 0x545   :  { %2065 = vrot.lane.b32.xlu2 %v16481_v17, %s7916_s10  ;;  %v2602_v19 = vsel %vm2596_vm11, %v2537_v30, %v1960_v20  ;;  %v2278_v60 = vsel %vm2271_vm4, %v2213_v13, %v16488_v51  ;;  %v16494_v17 = vld [vmem:[#allocation246_spill] sm:$0xff]  ;;  %v604_v40 = vsel %vm392_vm1, %v601_v56, %v603_v38  ;;  %v1964_v51 = vpop.permute.xlu2 %1963  ;;  %v1966_v38 = vpop.permute.xlu0 %1965 }
 0x546   :  { %2063 = vrot.lane.b32.xlu1 %v16483_v14, %s7916_s10  ;;  %v2343_v62 = vsel %vm2336_vm6, %v2278_v60, %v16489_v58  ;;  %v16496_v30 = vld [vmem:[#allocation62_spill] sm:$0xff]  ;;  %v16500_v60 = vld [vmem:[#allocation404_spill] sm:$0xff] }
 0x547   :  { %2061 = vrot.lane.b32.xlu0 %v16484_v3, %s7916_s10  ;;  %v2408_v1 = vsel %vm2401_vm8, %v2343_v62, %v16491_v35  ;;  %v7700_v3 = vld [vmem:[%s15185_s0 + $0x50] sm:$0xff]  ;;  %v7701_v62 = vld [vmem:[%s15185_s0 + $0x60] sm:$0xff] }
 0x548   :  { %v2473_v4 = vsel %vm2466_vm7, %v2408_v1, %v16494_v17  ;;  %v2149_v55 = vsel %vm2141_vm3, %v7700_v3, %v16495_v27  ;;  %v16502_v1 = vld [vmem:[#allocation104_spill] sm:$0xff]  ;;  %v16505_v17 = vld [vmem:[#allocation381_spill] sm:$0xff] }
 0x549   :  { %v2538_v20 = vsel %vm2531_vm9, %v2473_v4, %v10977_v33  ;;  %v16507_v3 = vld [vmem:[#allocation57_spill] sm:$0xff] }
 0x54a   :  { %v2603_v14 = vsel %vm2596_vm11, %v2538_v20, %v1962_v7  ;;  %v16503_v7 = vld [vmem:[#allocation268_spill] sm:$0xff]  ;;  %v16506_v20 = vld [vmem:[#allocation403_spill] sm:$0xff] }
 0x54c   :  { %6535 = vmatmul.msk.f32.gmra.mxu0 %vm2667_vm10, %v2602_v19  ;;  %v2214_v19 = vsel %vm2206_vm5, %v2149_v55, %v16496_v30  ;;  %v7702_v30 = vld [vmem:[%s15185_s0 + $0x68] sm:$0xff] }
 0x54d   :  { %2071 = vrot.lane.b32.xlu2 %v16490_v47, %s7916_s10  ;;  %v2279_v33 = vsel %vm2271_vm4, %v2214_v19, %v16497_v9  ;;  %v16501_v47 = vld [vmem:[#allocation65_spill] sm:$0xff]  ;;  %v16508_v19 = vld [vmem:[#allocation107_spill] sm:$0xff] }
 0x54e   :  { %2069 = vrot.lane.b32.xlu1 %v16492_v53, %s7916_s10  ;;  %v2344_v57 = vsel %vm2336_vm6, %v2279_v33, %v16498_v0  ;;  %v2150_v35 = vsel %vm2141_vm3, %v7701_v62, %v16501_v47  ;;  %v16509_v9 = vld [vmem:[#allocation103_spill] sm:$0xff]  ;;  %v16510_v0 = vld [vmem:[#allocation258_spill] sm:$0xff] }
 0x54f   :  { %2067 = vrot.lane.b32.xlu0 %v16493_v36, %s7916_s10  ;;  %v2409_v13 = vsel %vm2401_vm8, %v2344_v57, %v16499_v18  ;;  %v16504_v36 = vld [vmem:[#allocation305_spill] sm:$0xff]  ;;  %v16511_v18 = vld [vmem:[#allocation319_spill] sm:$0xff] }
 0x550   :  { %v2474_v58 = vsel %vm2466_vm7, %v2409_v13, %v16500_v60 }
 0x551   :  { %v2539_v12 = vsel %vm2531_vm9, %v2474_v58, %v10975_v46  ;;  %v1968_v58 = vpop.permute.xlu1 %1967 }
 0x552   :  { %v2604_v56 = vsel %vm2596_vm11, %v2539_v12, %v1964_v51  ;;  %v16512_v51 = vld [vmem:[#allocation380_spill] sm:$0xff] }
 0x553   :  { %v16513_v12 = vld [vmem:[#allocation396_spill] sm:$0xff] }
 0x554   :  { %6536 = vmatmul.msk.f32.gmra.mxu0 %vm2667_vm10, %v2603_v14 }
 0x556   :  { %2075 = vrot.lane.b32.xlu1 %v604_v40, %s7916_s10  ;;  %v2151_v40 = vsel %vm2141_vm3, %v7702_v30, %v16508_v19  ;;  %v7704_v30 = vld [vmem:[%s15185_s0 + $0x80] sm:$0xff] }
 0x557   :  { %2073 = vrot.lane.b32.xlu0 %v602_v11, %s7916_s10  ;;  %v2215_v11 = vsel %vm2206_vm5, %v2150_v35, %v16502_v1  ;;  %v2216_v33 = vsel %vm2206_vm5, %v2151_v40, %v16509_v9  ;;  %v7703_v35 = vld [vmem:[%s15185_s0 + $0x78] sm:$0xff]  ;;  %v16514_v1 = vld [vmem:[#allocation106_spill] sm:$0xff]  ;;  %s6520_s10 = sshll.u32 %s15192_s7, 4  ;;  %s6521_s10 = int_to_ptr.hbm [resolvable:$true] %s6520_s10 }
 0x558   :  { %v2280_v53 = vsel %vm2271_vm4, %v2215_v11, %v16503_v7  ;;  %v2281_v57 = vsel %vm2271_vm4, %v2216_v33, %v16510_v0  ;;  %v2152_v11 = vsel %vm2141_vm3, %v7703_v35, %v16514_v1  ;;  %v16515_v7 = vld [vmem:[#allocation71_spill] sm:$0xff]  ;;  %v16520_v19 = vld [vmem:[#allocation73_spill] sm:$0xff] }
 0x559   :  { %v2345_v46 = vsel %vm2336_vm6, %v2280_v53, %v16504_v36  ;;  %v2346_v13 = vsel %vm2336_vm6, %v2281_v57, %v16511_v18  ;;  %v2217_v53 = vsel %vm2206_vm5, %v2152_v11, %v16515_v7  ;;  %v16516_v36 = vld [vmem:[#allocation272_spill] sm:$0xff]  ;;  %v2153_v40 = vsel %vm2141_vm3, %v7704_v30, %v16520_v19  ;;  %v16521_v9 = vld [vmem:[#allocation101_spill] sm:$0xff]  ;;  %v16522_v0 = vld [vmem:[#allocation271_spill] sm:$0xff] }
 0x55a   :  { %v2410_v4 = vsel %vm2401_vm8, %v2345_v46, %v16505_v17  ;;  %v2411_v60 = vsel %vm2401_vm8, %v2346_v13, %v16512_v51  ;;  %v2282_v46 = vsel %vm2271_vm4, %v2217_v53, %v16516_v36  ;;  %v16517_v17 = vld [vmem:[#allocation318_spill] sm:$0xff]  ;;  %v2218_v33 = vsel %vm2206_vm5, %v2153_v40, %v16521_v9  ;;  %v16523_v18 = vld [vmem:[#allocation308_spill] sm:$0xff]  ;;  %v16527_v1 = vld [vmem:[#allocation117_spill] sm:$0xff] }
 0x55b   :  { %v2475_v14 = vsel %vm2466_vm7, %v2410_v4, %v16506_v20  ;;  %v16518_v4 = vld [vmem:[#allocation370_spill] sm:$0xff]  ;;  %v1970_v20 = vpop.permute.xlu2 %1969  ;;  %v2283_v57 = vsel %vm2271_vm4, %v2218_v33, %v16522_v0  ;;  %v7705_v35 = vld [vmem:[%s15185_s0 + $0x90] sm:$0xff]  ;;  %v16529_v36 = vld [vmem:[#allocation261_spill] sm:$0xff] }
 0x55c   :  { %6537 = vmatmul.msk.f32.gmra.mxu0 %vm2667_vm10, %v2604_v56  ;;  %v2540_v27 = vsel %vm2531_vm9, %v2475_v14, %v16507_v3  ;;  %v2476_v56 = vsel %vm2466_vm7, %v2411_v60, %v16513_v12  ;;  %v16519_v14 = vld [vmem:[#allocation407_spill] sm:$0xff]  ;;  %v16524_v13 = vld [vmem:[#allocation382_spill] sm:$0xff]  ;;  %v1972_v60 = vpop.permute.xlu0 %1971  ;;  %v2154_v11 = vsel %vm2141_vm3, %v7705_v35, %v16527_v1  ;;  %v7706_v30 = vld [vmem:[%s15185_s0 + $0x98] sm:$0xff] }
 0x55d   :  { %v2605_v55 = vsel %vm2596_vm11, %v2540_v27, %v1966_v38  ;;  %v2541_v62 = vsel %vm2531_vm9, %v2476_v56, %v10989_v8  ;;  %v2347_v8 = vsel %vm2336_vm6, %v2282_v46, %v16517_v17  ;;  %v16526_v56 = vld [vmem:[#allocation66_spill] sm:$0xff]  ;;  %v16528_v7 = vld [vmem:[#allocation111_spill] sm:$0xff]  ;;  %v16533_v19 = vld [vmem:[#allocation116_spill] sm:$0xff] }
 0x55e   :  { %v2606_v47 = vsel %vm2596_vm11, %v2541_v62, %v1968_v58  ;;  %v2412_v38 = vsel %vm2401_vm8, %v2347_v8, %v16518_v4  ;;  %v16525_v58 = vld [vmem:[#allocation406_spill] sm:$0xff]  ;;  %v2219_v53 = vsel %vm2206_vm5, %v2154_v11, %v16528_v7  ;;  %v16531_v4 = vld [vmem:[#allocation91_spill] sm:$0xff]  ;;  %v2155_v40 = vsel %vm2141_vm3, %v7706_v30, %v16533_v19  ;;  %v16534_v9 = vld [vmem:[#allocation81_spill] sm:$0xff] }
 0x55f   :  { %v2477_v3 = vsel %vm2466_vm7, %v2412_v38, %v16519_v14  ;;  %v2284_v46 = vsel %vm2271_vm4, %v2219_v53, %v16529_v36  ;;  %v16530_v17 = vld [vmem:[#allocation322_spill] sm:$0xff]  ;;  %v16532_v14 = vld [vmem:[#allocation399_spill] sm:$0xff]  ;;  %v2220_v33 = vsel %vm2206_vm5, %v2155_v40, %v16534_v9  ;;  %v16540_v1 = vld [vmem:[#allocation84_spill] sm:$0xff] }
 0x560   :  { %v2542_v27 = vsel %vm2531_vm9, %v2477_v3, %v10987_v45  ;;  %v2348_v45 = vsel %vm2336_vm6, %v2283_v57, %v16523_v18  ;;  %v2349_v8 = vsel %vm2336_vm6, %v2284_v46, %v16530_v17  ;;  %v16535_v0 = vld [vmem:[#allocation275_spill] sm:$0xff]  ;;  %v7917_v18 = vmov 0.0   ;;  %v16541_v7 = vld [vmem:[#allocation176_spill] sm:$0xff]  ;;  %v16542_v36 = vld [vmem:[#allocation274_spill] sm:$0xff] }
 0x561   :  { %v2413_v51 = vsel %vm2401_vm8, %v2348_v45, %v16524_v13  ;;  %v2414_v38 = vsel %vm2401_vm8, %v2349_v8, %v16531_v4  ;;  %v2285_v57 = vsel %vm2271_vm4, %v2220_v33, %v16535_v0  ;;  %3153 = vst.msk [vmem:[#allocation2 + $0x18] sm:$0x1] %vm3151_vm12, %v7917_v18  ;;  %v16537_v13 = vld [vmem:[#allocation373_spill] sm:$0xff]  ;;  %v7707_v35 = vld [vmem:[%s15185_s0 + $0xa8] sm:$0xff]  ;;  %v16544_v4 = vld [vmem:[#allocation384_spill] sm:$0xff] }
 0x562   :  { %v2478_v12 = vsel %vm2466_vm7, %v2413_v51, %v16525_v58  ;;  %v2479_v3 = vsel %vm2466_vm7, %v2414_v38, %v16532_v14  ;;  %3189 = vst.msk [vmem:[#allocation2 + $0x29] sm:$0x1] %vm3151_vm12, %v7917_v18  ;;  %v16538_v58 = vld [vmem:[#allocation410_spill] sm:$0xff]  ;;  %v2156_v11 = vsel %vm2141_vm3, %v7707_v35, %v16540_v1  ;;  %v16543_v17 = vld [vmem:[#allocation311_spill] sm:$0xff]  ;;  %v16545_v14 = vld [vmem:[#allocation409_spill] sm:$0xff] }
 0x563   :  { %v2543_v62 = vsel %vm2531_vm9, %v2478_v12, %v16526_v56  ;;  %3138 = vst.msk [vmem:[#allocation2] sm:$0xff] %vm3137_vm13, %v7917_v18  ;;  %v16539_v56 = vld [vmem:[#allocation77_spill] sm:$0xff]  ;;  %v2221_v53 = vsel %vm2206_vm5, %v2156_v11, %v16541_v7  ;;  %v7708_v19 = vld [vmem:[%s15185_s0 + $0xb0] sm:$0xff] }
 0x564   :  { %6538 = vmatmul.msk.f32.gmra.mxu0 %vm2667_vm10, %v2605_v55  ;;  %v2607_v55 = vsel %vm2596_vm11, %v2542_v27, %v1970_v20  ;;  %v1974_v20 = vpop.permute.xlu1 %1973  ;;  %v2544_v27 = vsel %vm2531_vm9, %v2479_v3, %v10999_v16  ;;  %v16536_v16 = vld [vmem:[#allocation321_spill] sm:$0xff]  ;;  %3139 = vst.msk [vmem:[#allocation2 + $0x8] sm:$0xff] %vm3137_vm13, %v7917_v18  ;;  %v2286_v46 = vsel %vm2271_vm4, %v2221_v53, %v16542_v36  ;;  %v16548_v33 = vld [vmem:[#allocation112_spill] sm:$0xff]  ;;  %v16555_v53 = vld [vmem:[#allocation278_spill] sm:$0xff] }
 0x565   :  { %v2350_v45 = vsel %vm2336_vm6, %v2285_v57, %v16536_v16  ;;  %3140 = vst.msk [vmem:[#allocation2 + $0x10] sm:$0xff] %vm3137_vm13, %v7917_v18  ;;  %v2351_v8 = vsel %vm2336_vm6, %v2286_v46, %v16543_v17  ;;  %v16547_v40 = vld [vmem:[#allocation125_spill] sm:$0xff]  ;;  %v16549_v57 = vld [vmem:[#allocation264_spill] sm:$0xff] }
 0x566   :  { %v2415_v51 = vsel %vm2401_vm8, %v2350_v45, %v16537_v13  ;;  %3141 = vst.msk [vmem:[#allocation2 + $0x1b0] sm:$0xff] %vm3137_vm13, %v7917_v18  ;;  %v2416_v38 = vsel %vm2401_vm8, %v2351_v8, %v16544_v4  ;;  %v2157_v9 = vsel %vm2141_vm3, %v7708_v19, %v16547_v40  ;;  %v16550_v45 = vld [vmem:[#allocation325_spill] sm:$0xff]  ;;  %v16553_v1 = vld [vmem:[#allocation124_spill] sm:$0xff] }
 0x567   :  { %v2480_v12 = vsel %vm2466_vm7, %v2415_v51, %v16538_v58  ;;  %3142 = vst.msk [vmem:[#allocation2 + $0x1b8] sm:$0xff] %vm3137_vm13, %v7917_v18  ;;  %v2481_v3 = vsel %vm2466_vm7, %v2416_v38, %v16545_v14  ;;  %v2222_v0 = vsel %vm2206_vm5, %v2157_v9, %v16548_v33  ;;  %v16551_v51 = vld [vmem:[#allocation383_spill] sm:$0xff]  ;;  %v7709_v35 = vld [vmem:[%s15185_s0 + $0xc0] sm:$0xff]  ;;  %v16556_v17 = vld [vmem:[#allocation324_spill] sm:$0xff] }
 0x568   :  { %3143 = vst.msk [vmem:[#allocation2 + $0x1c0] sm:$0xff] %vm3137_vm13, %v7917_v18  ;;  %v2287_v16 = vsel %vm2271_vm4, %v2222_v0, %v16549_v57  ;;  %v2158_v11 = vsel %vm2141_vm3, %v7709_v35, %v16553_v1  ;;  %v11622_v46 = vld [vmem:[%s15187_s2] ss:$0 sm:$0xff]  ;;  %v16557_v4 = vld [vmem:[#allocation376_spill] sm:$0xff]  ;;  %v7710_v9 = vld [vmem:[%s15185_s0 + $0xc8] sm:$0xff] }
 0x569   :  { %3145 = vst.msk [vmem:[#allocation2 + $0x198] sm:$0xff] %vm3137_vm13, %v7917_v18  ;;  %v2352_v13 = vsel %vm2336_vm6, %v2287_v16, %v16550_v45  ;;  %v16558_v14 = vld [vmem:[#allocation413_spill] sm:$0xff]  ;;  %v16560_v33 = vld [vmem:[#allocation94_spill] sm:$0xff] }
 0x56a   :  { %3146 = vst.msk [vmem:[#allocation2 + $0x1a0] sm:$0xff] %vm3137_vm13, %v7917_v18  ;;  %v2159_v0 = vsel %vm2141_vm3, %v7710_v9, %v16560_v33  ;;  %v16561_v16 = vld [vmem:[#allocation121_spill] sm:$0xff]  ;;  %v16572_v9 = vld [vmem:[#allocation402_spill] sm:$0xff] }
 0x56b   :  { %3147 = vst.msk [vmem:[#allocation2 + $0x1a8] sm:$0xff] %vm3137_vm13, %v7917_v18  ;;  %v2224_v45 = vsel %vm2206_vm5, %v2159_v0, %v16561_v16 }
 0x56c   :  { %6539 = vmatmul.msk.f32.gmra.mxu0 %vm2667_vm10, %v2606_v47  ;;  %v2608_v47 = vsel %vm2596_vm11, %v2543_v62, %v1972_v60  ;;  %v1976_v60 = vpop.permute.xlu2 %1975  ;;  %v2545_v62 = vsel %vm2531_vm9, %v2480_v12, %v16539_v56  ;;  %3148 = vst.msk [vmem:[#allocation2 + $0x348] sm:$0xff] %vm3137_vm13, %v7917_v18  ;;  %v1980_v58 = vpop.permute.xlu1 %1979  ;;  %v16552_v12 = vld [vmem:[#allocation400_spill] sm:$0xff] }
 0x56d   :  { %3149 = vst.msk [vmem:[#allocation2 + $0x350] sm:$0xff] %vm3137_vm13, %v7917_v18 }
 0x56e   :  { %3150 = vst.msk [vmem:[#allocation2 + $0x358] sm:$0xff] %vm3137_vm13, %v7917_v18 }
 0x56f   :  { %3154 = vst.msk [vmem:[#allocation2 + $0x30] sm:$0x1] %vm3151_vm12, %v7917_v18 }
 0x570   :  { %3155 = vst.msk [vmem:[#allocation2 + $0x48] sm:$0x1] %vm3151_vm12, %v7917_v18 }
 0x571   :  { %3156 = vst.msk [vmem:[#allocation2 + $0x60] sm:$0x1] %vm3151_vm12, %v7917_v18 }
 0x572   :  { %3157 = vst.msk [vmem:[#allocation2 + $0x78] sm:$0x1] %vm3151_vm12, %v7917_v18 }
 0x573   :  { %3158 = vst.msk [vmem:[#allocation2 + $0x90] sm:$0x1] %vm3151_vm12, %v7917_v18 }
 0x574   :  { %6540 = vmatmul.msk.f32.gmra.mxu0 %vm2667_vm10, %v2607_v55  ;;  %v2609_v55 = vsel %vm2596_vm11, %v2544_v27, %v1974_v20  ;;  %v1978_v20 = vpop.permute.xlu0 %1977  ;;  %v16546_v27 = vld [vmem:[#allocation67_spill] sm:$0xff]  ;;  %3159 = vst.msk [vmem:[#allocation2 + $0xa8] sm:$0x1] %vm3151_vm12, %v7917_v18 }
 0x575   :  { %3160 = vst.msk [vmem:[#allocation2 + $0xc0] sm:$0x1] %vm3151_vm12, %v7917_v18 }
 0x576   :  { %3161 = vst.msk [vmem:[#allocation2 + $0xd8] sm:$0x1] %vm3151_vm12, %v7917_v18 }
 0x577   :  { %3162 = vst.msk [vmem:[#allocation2 + $0xf0] sm:$0x1] %vm3151_vm12, %v7917_v18 }
 0x578   :  { %3163 = vst.msk [vmem:[#allocation2 + $0x108] sm:$0x1] %vm3151_vm12, %v7917_v18 }
 0x579   :  { %3164 = vst.msk [vmem:[#allocation2 + $0x120] sm:$0x1] %vm3151_vm12, %v7917_v18 }
 0x57a   :  { %3165 = vst.msk [vmem:[#allocation2 + $0x138] sm:$0x1] %vm3151_vm12, %v7917_v18 }
 0x57b   :  { %3166 = vst.msk [vmem:[#allocation2 + $0x150] sm:$0x1] %vm3151_vm12, %v7917_v18 }
 0x57c   :  { %6541 = vmatmul.msk.f32.gmra.mxu0 %vm2667_vm10, %v2608_v47  ;;  %v2610_v47 = vsel %vm2596_vm11, %v2545_v62, %v1976_v60  ;;  %v2417_v60 = vsel %vm2401_vm8, %v2352_v13, %v16551_v51  ;;  %3167 = vst.msk [vmem:[#allocation2 + $0x168] sm:$0x1] %vm3151_vm12, %v7917_v18  ;;  %v16562_v13 = vld [vmem:[#allocation277_spill] sm:$0xff] }
 0x57d   :  { %v2482_v56 = vsel %vm2466_vm7, %v2417_v60, %v16552_v12  ;;  %3168 = vst.msk [vmem:[#allocation2 + $0x180] sm:$0x1] %vm3151_vm12, %v7917_v18  ;;  %v2289_v51 = vsel %vm2271_vm4, %v2224_v45, %v16562_v13  ;;  %v16563_v60 = vld [vmem:[#allocation314_spill] sm:$0xff]  ;;  %v16564_v12 = vld [vmem:[#allocation387_spill] sm:$0xff] }
 0x57e   :  { %v2547_v62 = vsel %vm2531_vm9, %v2482_v56, %v11011_v29  ;;  %v16554_v29 = vld [vmem:[#allocation92_spill] sm:$0xff]  ;;  %3171 = vst.msk [vmem:[#allocation2 + $0x1c8] sm:$0x1] %vm3151_vm12, %v7917_v18 }
 0x57f   :  { %v2223_v7 = vsel %vm2206_vm5, %v2158_v11, %v16554_v29  ;;  %3172 = vst.msk [vmem:[#allocation2 + $0x1e0] sm:$0x1] %vm3151_vm12, %v7917_v18  ;;  %v16566_v11 = vld [vmem:[#allocation89_spill] sm:$0xff] }
 0x580   :  { %v2288_v36 = vsel %vm2271_vm4, %v2223_v7, %v16555_v53  ;;  %3173 = vst.msk [vmem:[#allocation2 + $0x1f8] sm:$0x1] %vm3151_vm12, %v7917_v18 }
 0x581   :  { %v2353_v8 = vsel %vm2336_vm6, %v2288_v36, %v16556_v17  ;;  %3174 = vst.msk [vmem:[#allocation2 + $0x210] sm:$0x1] %vm3151_vm12, %v7917_v18  ;;  %v7711_v36 = vld [vmem:[%s15185_s0 + $0xd8] sm:$0xff]  ;;  %v16567_v17 = vld [vmem:[#allocation131_spill] sm:$0xff] }
 0x582   :  { %v2418_v38 = vsel %vm2401_vm8, %v2353_v8, %v16557_v4  ;;  %3175 = vst.msk [vmem:[#allocation2 + $0x228] sm:$0x1] %vm3151_vm12, %v7917_v18  ;;  %v2160_v8 = vsel %vm2141_vm3, %v7711_v36, %v16567_v17  ;;  %v16577_v17 = vld [vmem:[#allocation379_spill] sm:$0xff] }
 0x583   :  { %3176 = vst.msk [vmem:[#allocation2 + $0x240] sm:$0x1] %vm3151_vm12, %v7917_v18 }
 0x584   :  { %6542 = vmatmul.msk.f32.gmra.mxu0 %vm2667_vm10, %v2609_v55  ;;  %v2546_v55 = vsel %vm2531_vm9, %v2481_v3, %v16546_v27  ;;  %v2483_v3 = vsel %vm2466_vm7, %v2418_v38, %v16558_v14  ;;  %3177 = vst.msk [vmem:[#allocation2 + $0x258] sm:$0x1] %vm3151_vm12, %v7917_v18  ;;  %v16568_v38 = vld [vmem:[#allocation122_spill] sm:$0xff]  ;;  %v16569_v14 = vld [vmem:[#allocation267_spill] sm:$0xff] }
 0x585   :  { %v2611_v30 = vsel %vm2596_vm11, %v2546_v55, %v1978_v20  ;;  %v1982_v20 = vpop.permute.xlu2 %1981  ;;  %v16559_v55 = vld [vmem:[#allocation87_spill] sm:$0xff]  ;;  %3178 = vst.msk [vmem:[#allocation2 + $0x270] sm:$0x1] %vm3151_vm12, %v7917_v18 }
 0x586   :  { %3179 = vst.msk [vmem:[#allocation2 + $0x288] sm:$0x1] %vm3151_vm12, %v7917_v18 }
 0x587   :  { %3180 = vst.msk [vmem:[#allocation2 + $0x2a0] sm:$0x1] %vm3151_vm12, %v7917_v18 }
 0x588   :  { %3181 = vst.msk [vmem:[#allocation2 + $0x2b8] sm:$0x1] %vm3151_vm12, %v7917_v18 }
 0x589   :  { %3182 = vst.msk [vmem:[#allocation2 + $0x2d0] sm:$0x1] %vm3151_vm12, %v7917_v18 }
 0x58a   :  { %3183 = vst.msk [vmem:[#allocation2 + $0x2e8] sm:$0x1] %vm3151_vm12, %v7917_v18 }
 0x58b   :  { %3184 = vst.msk [vmem:[#allocation2 + $0x300] sm:$0x1] %vm3151_vm12, %v7917_v18 }
 0x58c   :  { %6543 = vmatmul.msk.f32.gmra.mxu0 %vm2667_vm10, %v2610_v47  ;;  %v2612_v47 = vsel %vm2596_vm11, %v2547_v62, %v1980_v58  ;;  %v2354_v58 = vsel %vm2336_vm6, %v2289_v51, %v16563_v60  ;;  %v1984_v62 = vpop.permute.xlu0 %1983  ;;  %3185 = vst.msk [vmem:[#allocation2 + $0x318] sm:$0x1] %vm3151_vm12, %v7917_v18  ;;  %v7712_v51 = vld [vmem:[%s15185_s0 + $0xe0] sm:$0xff] }
 0x58d   :  { %v2419_v56 = vsel %vm2401_vm8, %v2354_v58, %v16564_v12  ;;  %v16573_v60 = vld [vmem:[#allocation130_spill] sm:$0xff]  ;;  %3186 = vst.msk [vmem:[#allocation2 + $0x330] sm:$0x1] %vm3151_vm12, %v7917_v18 }
 0x58e   :  { %v2161_v58 = vsel %vm2141_vm3, %v7712_v51, %v16573_v60  ;;  %3190 = vst.msk [vmem:[#allocation2 + $0x41] sm:$0x1] %vm3151_vm12, %v7917_v18  ;;  %v5500_v51 = vld [vmem:[%s15188_s3 + $0x108] sm:$0xff]  ;;  %v16583_v60 = vld [vmem:[#allocation280_spill] sm:$0xff] }
 0x58f   :  { %3191 = vst.msk [vmem:[#allocation2 + $0x59] sm:$0x1] %vm3151_vm12, %v7917_v18 }
 0x590   :  { %3192 = vst.msk [vmem:[#allocation2 + $0x71] sm:$0x1] %vm3151_vm12, %v7917_v18 }
 0x591   :  { %3193 = vst.msk [vmem:[#allocation2 + $0x89] sm:$0x1] %vm3151_vm12, %v7917_v18 }
 0x592   :  { %3194 = vst.msk [vmem:[#allocation2 + $0xa1] sm:$0x1] %vm3151_vm12, %v7917_v18 }
 0x593   :  { %3195 = vst.msk [vmem:[#allocation2 + $0xb9] sm:$0x1] %vm3151_vm12, %v7917_v18 }
 0x594   :  { %6544 = vmatmul.msk.f32.gmra.mxu0 %vm2667_vm10, %v2611_v30  ;;  %v2548_v30 = vsel %vm2531_vm9, %v2483_v3, %v16559_v55  ;;  %3196 = vst.msk [vmem:[#allocation2 + $0xd1] sm:$0x1] %vm3151_vm12, %v7917_v18 }
 0x595   :  { %v2613_v40 = vsel %vm2596_vm11, %v2548_v30, %v1982_v20  ;;  %v2225_v20 = vsel %vm2206_vm5, %v2160_v8, %v16568_v38  ;;  %v16571_v30 = vld [vmem:[#allocation386_spill] sm:$0xff]  ;;  %3197 = vst.msk [vmem:[#allocation2 + $0xe9] sm:$0x1] %vm3151_vm12, %v7917_v18 }
 0x596   :  { %v2290_v3 = vsel %vm2271_vm4, %v2225_v20, %v16569_v14  ;;  %v16580_v14 = vld [vmem:[#allocation416_spill] sm:$0xff]  ;;  %3198 = vst.msk [vmem:[#allocation2 + $0x101] sm:$0x1] %vm3151_vm12, %v7917_v18 }
 0x597   :  { %3199 = vst.msk [vmem:[#allocation2 + $0x119] sm:$0x1] %vm3151_vm12, %v7917_v18 }
 0x598   :  { %3200 = vst.msk [vmem:[#allocation2 + $0x131] sm:$0x1] %vm3151_vm12, %v7917_v18 }
 0x599   :  { %3201 = vst.msk [vmem:[#allocation2 + $0x149] sm:$0x1] %vm3151_vm12, %v7917_v18 }
 0x59a   :  { %3202 = vst.msk [vmem:[#allocation2 + $0x161] sm:$0x1] %vm3151_vm12, %v7917_v18 }
 0x59b   :  { %3203 = vst.msk [vmem:[#allocation2 + $0x179] sm:$0x1] %vm3151_vm12, %v7917_v18 }
 0x59c   :  { %6545 = vmatmul.msk.f32.gmra.mxu0 %vm2667_vm10, %v2612_v47  ;;  %v16565_v47 = vld [vmem:[#allocation412_spill] sm:$0xff]  ;;  %3204 = vst.msk [vmem:[#allocation2 + $0x191] sm:$0x1] %vm3151_vm12, %v7917_v18 }
 0x59d   :  { %v2484_v35 = vsel %vm2466_vm7, %v2419_v56, %v16565_v47  ;;  %3207 = vst.msk [vmem:[#allocation2 + $0x1d9] sm:$0x1] %vm3151_vm12, %v7917_v18 }
 0x59e   :  { %v2549_v29 = vsel %vm2531_vm9, %v2484_v35, %v16566_v11  ;;  %v16575_v35 = vld [vmem:[#allocation281_spill] sm:$0xff]  ;;  %3208 = vst.msk [vmem:[#allocation2 + $0x1f1] sm:$0x1] %vm3151_vm12, %v7917_v18 }
 0x59f   :  { %v2614_v53 = vsel %vm2596_vm11, %v2549_v29, %v1984_v62  ;;  %3209 = vst.msk [vmem:[#allocation2 + $0x209] sm:$0x1] %vm3151_vm12, %v7917_v18 }
 0x5a0   :  { %3210 = vst.msk [vmem:[#allocation2 + $0x221] sm:$0x1] %vm3151_vm12, %v7917_v18 }
 0x5a1   :  { %v2881_v27 = vpop.f32.mrf.mxu0  ;;  %3211 = vst.msk [vmem:[#allocation2 + $0x239] sm:$0x1] %vm3151_vm12, %v7917_v18 }
 0x5a2   :  { %v2882_v19 = vadd.f32 %v11622_v46, %v2881_v27  ;;  %v16570_v27 = vld [vmem:[#allocation328_spill] sm:$0xff]  ;;  %3212 = vst.msk [vmem:[#allocation2 + $0x251] sm:$0x1] %vm3151_vm12, %v7917_v18 }
 0x5a3   :  { %v2355_v55 = vsel %vm2336_vm6, %v2290_v3, %v16570_v27  ;;  %3213 = vst.msk [vmem:[#allocation2 + $0x269] sm:$0x1] %vm3151_vm12, %v7917_v18 }
 0x5a4   :  { %v3073_v57 = vmax.f32 %v2882_v19, 0.0  ;;  %6546 = vmatmul.msk.f32.gmra.mxu0 %vm2667_vm10, %v2613_v40  ;;  %v2420_v19 = vsel %vm2401_vm8, %v2355_v55, %v16571_v30  ;;  %v1986_v40 = vpop.permute.xlu1 %1985  ;;  %v5502_v30 = vld [vmem:[%s15188_s3 + $0x118] sm:$0xff]  ;;  %3214 = vst.msk [vmem:[#allocation2 + $0x281] sm:$0x1] %vm3151_vm12, %v7917_v18 }
 0x5a5   :  { %v2485_v33 = vsel %vm2466_vm7, %v2420_v19, %v16572_v9  ;;  %6065 = vmatpush.msra.mxu3 %v5502_v30  ;;  %3215 = vst.msk [vmem:[#allocation2 + $0x299] sm:$0x1] %vm3151_vm12, %v7917_v18 }
 0x5a6   :  { %3225 = vst.msk [vmem:[#allocation2 + $0x19] sm:$0xff] %vm3137_vm13, %v3073_v57  ;;  %v2550_v57 = vsel %vm2531_vm9, %v2485_v33, %v11028_v43  ;;  %v16574_v43 = vld [vmem:[#allocation102_spill] sm:$0xff]  ;;  %v5501_v33 = vld [vmem:[%s15188_s3 + $0x110] sm:$0xff] }
 0x5a7   :  { %v2615_v45 = vsel %vm2596_vm11, %v2550_v57, %v1986_v40  ;;  %v2226_v56 = vsel %vm2206_vm5, %v2161_v58, %v16574_v43  ;;  %6066 = vmatpush.msra.mxu3 %v5501_v33  ;;  %v16584_v43 = vld [vmem:[#allocation317_spill] sm:$0xff]  ;;  %3216 = vst.msk [vmem:[#allocation2 + $0x2b1] sm:$0x1] %vm3151_vm12, %v7917_v18 }
 0x5a8   :  { %3217 = vst.msk [vmem:[#allocation2 + $0x2c9] sm:$0x1] %vm3151_vm12, %v7917_v18 }
 0x5a9   :  { %v2884_v1 = vpop.f32.mrf.mxu0  ;;  %6067 = vmatpush.msra.mxu3 %v5500_v51  ;;  %3218 = vst.msk [vmem:[#allocation2 + $0x2e1] sm:$0x1] %vm3151_vm12, %v7917_v18 }
 0x5aa   :  { %v2885_v7 = vadd.f32 %v11622_v46, %v2884_v1  ;;  %v2291_v1 = vsel %vm2271_vm4, %v2226_v56, %v16575_v35  ;;  %v1990_v35 = vpop.permute.xlu0 %1989  ;;  %3219 = vst.msk [vmem:[#allocation2 + $0x2f9] sm:$0x1] %vm3151_vm12, %v7917_v18 }
 0x5ab   :  { %3220 = vst.msk [vmem:[#allocation2 + $0x311] sm:$0x1] %vm3151_vm12, %v7917_v18 }
 0x5ac   :  { %v3074_v4 = vmax.f32 %v2885_v7, 0.0  ;;  %6547 = vmatmul.msk.f32.gmra.mxu0 %vm2667_vm10, %v2614_v53  ;;  %v16576_v53 = vld [vmem:[#allocation327_spill] sm:$0xff]  ;;  %3221 = vst.msk [vmem:[#allocation2 + $0x329] sm:$0x1] %vm3151_vm12, %v7917_v18 }
 0x5ad   :  { %v3292_v13 = vld [vmem:[#allocation2 + $0x18] sm:$0xff]  ;;  %v2356_v36 = vsel %vm2336_vm6, %v2291_v1, %v16576_v53  ;;  %3222 = vst.msk [vmem:[#allocation2 + $0x341] sm:$0x1] %vm3151_vm12, %v7917_v18 }
 0x5ae   :  { %3226 = vst.msk [vmem:[#allocation2 + $0x21] sm:$0xff] %vm3137_vm13, %v3074_v4  ;;  %v3498_v11 = vrot.slane %v3292_v13, 1  ;;  %v2421_v8 = vsel %vm2401_vm8, %v2356_v36, %v16577_v17  ;;  %v1988_v4 = vpop.permute.xlu2 %1987  ;;  %v7714_v1 = vld [vmem:[%s15185_s0 + $0xf8] sm:$0xff]  ;;  %v16588_v17 = vld [vmem:[#allocation183_spill] sm:$0xff] }
 0x5af   :  { %v2486_v3 = vsel %vm2466_vm7, %v2421_v8, %v16580_v14  ;;  %3152 = vst.msk [vmem:[#allocation2] sm:$0x1] %vm3151_vm12, %v7917_v18 }
 0x5b0   :  { %v2551_v19 = vsel %vm2531_vm9, %v2486_v3, %v11026_v21  ;;  %v7713_v21 = vld [vmem:[%s15185_s0 + $0xf0] sm:$0xff]  ;;  %3169 = vst.msk [vmem:[#allocation2 + $0x198] sm:$0x1] %vm3151_vm12, %v7917_v18 }
 0x5b1   :  { %v2887_v0 = vpop.f32.mrf.mxu0  ;;  %v2616_v9 = vsel %vm2596_vm11, %v2551_v19, %v1988_v4  ;;  %v16589_v4 = vld [vmem:[#allocation76_spill] sm:$0xff]  ;;  %v16591_v19 = vld [vmem:[#allocation331_spill] sm:$0xff]  ;;  %3170 = vst.msk [vmem:[#allocation2 + $0x1b0] sm:$0x1] %vm3151_vm12, %v7917_v18 }
 0x5b2   :  { %v2888_v16 = vadd.f32 %v11622_v46, %v2887_v0  ;;  %v16581_v0 = vld [vmem:[#allocation105_spill] sm:$0xff]  ;;  %3187 = vst.msk [vmem:[#allocation2 + $0x348] sm:$0x1] %vm3151_vm12, %v7917_v18 }
 0x5b3   :  { %v2162_v57 = vsel %vm2141_vm3, %v7713_v21, %v16581_v0  ;;  %3188 = vst.msk [vmem:[#allocation2 + $0x11] sm:$0x1] %vm3151_vm12, %v7917_v18 }
 0x5b4   :  { %v3075_v12 = vmax.f32 %v2888_v16, 0.0  ;;  %6548 = vmatmul.msk.f32.gmra.mxu0 %vm2667_vm10, %v2615_v45  ;;  %v16582_v45 = vld [vmem:[#allocation184_spill] sm:$0xff]  ;;  %3205 = vst.msk [vmem:[#allocation2 + $0x1a9] sm:$0x1] %vm3151_vm12, %v7917_v18 }
 0x5b5   :  { %v3293_v62 = vld [vmem:[#allocation2 + $0x20] sm:$0xff]  ;;  %v3294_v47 = vld [vmem:[#allocation2 + $0x28] sm:$0xff]  ;;  %v2227_v13 = vsel %vm2206_vm5, %v2162_v57, %v16582_v45  ;;  %3206 = vst.msk [vmem:[#allocation2 + $0x1c1] sm:$0x1] %vm3151_vm12, %v7917_v18 }
 0x5b6   :  { %3227 = vst.msk [vmem:[#allocation2 + $0x31] sm:$0xff] %vm3137_vm13, %v3075_v12  ;;  %v3499_v29 = vrot.slane %v3293_v62, 1  ;;  %v3501_v7 = vrot.slane %v3294_v47, 1  ;;  %v2292_v58 = vsel %vm2271_vm4, %v2227_v13, %v16583_v60  ;;  %v5499_v12 = vld [vmem:[%s15188_s3 + $0x100] sm:$0xff]  ;;  %v16585_v62 = vld [vmem:[#allocation391_spill] sm:$0xff] }
 0x5b7   :  { %v2357_v56 = vsel %vm2336_vm6, %v2292_v58, %v16584_v43  ;;  %6068 = vmatpush.msra.mxu3 %v5499_v12  ;;  %v16593_v58 = vld [vmem:[#allocation405_spill] sm:$0xff]  ;;  %v1992_v43 = vpop.permute.xlu1 %1991  ;;  %3223 = vst.msk [vmem:[#allocation2 + $0x359] sm:$0x1] %vm3151_vm12, %v7917_v18  ;;  %v16612_v18 = vld [vmem:[#allocation175_spill] sm:$0xff] }
 0x5b8   :  { %v11738_v38 = vsel %vm231_vm0, %v3498_v11, %v3499_v29  ;;  %v11741_v20 = vsel %vm231_vm0, %v3499_v29, %v3501_v7  ;;  %v2422_v47 = vsel %vm2401_vm8, %v2357_v56, %v16585_v62  ;;  %v16586_v11 = vld [vmem:[#allocation134_spill] sm:$0xff]  ;;  %v16587_v7 = vld [vmem:[#allocation415_spill] sm:$0xff] }
 0x5b9   :  { %16578 = vst [vmem:[#allocation39_spill] sm:$0xff] %v11738_v38  ;;  %v2890_v27 = vpop.f32.mrf.mxu0  ;;  %v6678_v55 = vpack.i.bf16 %v11741_v20, %v11738_v38  ;;  %v2163_v29 = vsel %vm2141_vm3, %v7714_v1, %v16586_v11  ;;  %v2487_v53 = vsel %vm2466_vm7, %v2422_v47, %v16587_v7 }
 0x5ba   :  { %16579 = vst [vmem:[#allocation163_spill] sm:$0xff] %v11741_v20  ;;  %v2891_v40 = vadd.f32 %v11622_v46, %v2890_v27  ;;  %v2228_v8 = vsel %vm2206_vm5, %v2163_v29, %v16588_v17  ;;  %v2552_v14 = vsel %vm2531_vm9, %v2487_v53, %v16589_v4  ;;  %v16590_v27 = vld [vmem:[#allocation270_spill] sm:$0xff] }
 0x5bb   :  { %6679 = vrot.lane.b32.xlu0 %v6678_v55, %s7918_s11  ;;  %v2293_v55 = vsel %vm2271_vm4, %v2228_v8, %v16590_v27  ;;  %v2617_v30 = vsel %vm2596_vm11, %v2552_v14, %v1990_v35  ;;  %v7715_v17 = vld [vmem:[%s15185_s0 + $0x108] sm:$0xff]  ;;  %v16594_v8 = vld [vmem:[#allocation133_spill] sm:$0xff] }
 0x5bc   :  { %v3076_v16 = vmax.f32 %v2891_v40, 0.0  ;;  %6549 = vmatmul.msk.f32.gmra.mxu0 %vm2667_vm10, %v2616_v9  ;;  %v2358_v40 = vsel %vm2336_vm6, %v2293_v55, %v16591_v19  ;;  %v16592_v9 = vld [vmem:[#allocation390_spill] sm:$0xff]  ;;  %v2164_v4 = vsel %vm2141_vm3, %v7715_v17, %v16594_v8  ;;  %v1996_v17 = vpop.permute.xlu0 %1995 }
 0x5bd   :  { %v3295_v3 = vld [vmem:[#allocation2 + $0x30] sm:$0xff]  ;;  %v2423_v33 = vsel %vm2401_vm8, %v2358_v40, %v16592_v9  ;;  %v16597_v55 = vld [vmem:[#allocation330_spill] sm:$0xff]  ;;  %v1994_v9 = vpop.permute.xlu2 %1993 }
 0x5be   :  { %3228 = vst.msk [vmem:[#allocation2 + $0x39] sm:$0xff] %vm3137_vm13, %v3076_v16  ;;  %v3663_v0 = vrot.slane %v3295_v3, 2  ;;  %v3503_v16 = vrot.slane %v3295_v3, 1  ;;  %v2488_v12 = vsel %vm2466_vm7, %v2423_v33, %v16593_v58  ;;  %v16596_v3 = vld [vmem:[#allocation7_spill] sm:$0xff]  ;;  %v16598_v19 = vld [vmem:[#allocation174_spill] sm:$0xff]  ;;  %v16602_v58 = vld [vmem:[#allocation9_spill] sm:$0xff] }
 0x5bf   :  { %v2553_v7 = vsel %vm2531_vm9, %v2488_v12, %v11040_v59  ;;  %v16595_v59 = vld [vmem:[#allocation113_spill] sm:$0xff]  ;;  %v16599_v33 = vld [vmem:[#allocation419_spill] sm:$0xff]  ;;  %v16759_v20 = vld [vmem:[#allocation234_spill] sm:$0xff] }
 0x5c0   :  { %v2618_v53 = vsel %vm2596_vm11, %v2553_v7, %v1992_v43  ;;  %v2229_v14 = vsel %vm2206_vm5, %v2164_v4, %v16595_v59  ;;  %v16604_v7 = vld [vmem:[#allocation185_spill] sm:$0xff]  ;;  %v16605_v4 = vld [vmem:[#allocation418_spill] sm:$0xff] }
 0x5c1   :  { %v11804_v36 = vpop.f32.mrf.mxu0  ;;  %v2294_v27 = vsel %vm2271_vm4, %v2229_v14, %v16596_v3  ;;  %v16606_v14 = vld [vmem:[#allocation99_spill] sm:$0xff] }
 0x5c2   :  { %v2894_v43 = vadd.f32 %v11622_v46, %v11804_v36 }
 0x5c4   :  { %6550 = vmatmul.msk.f32.gmra.mxu0 %vm2667_vm10, %v2617_v30  ;;  %v2359_v30 = vsel %vm2336_vm6, %v2294_v27, %v16597_v55 }
 0x5c5   :  { %v3296_v21 = vld [vmem:[#allocation2 + $0x38] sm:$0xff]  ;;  %v3297_v57 = vld [vmem:[#allocation2 + $0x40] sm:$0xff]  ;;  %v2424_v40 = vsel %vm2401_vm8, %v2359_v30, %v16598_v19  ;;  %v3290_v30 = vld [vmem:[#allocation2 + $0x8] sm:$0xff] }
 0x5c6   :  { %v3664_v45 = vrot.slane %v3296_v21, 2  ;;  %v3504_v13 = vrot.slane %v3296_v21, 1  ;;  %v3506_v51 = vrot.slane %v3297_v57, 1  ;;  %v3666_v60 = vrot.slane %v3297_v57, 2 }
 0x5c7   :  { %v2489_v21 = vsel %vm2466_vm7, %v2424_v40, %v16599_v33  ;;  %v7717_v40 = vld [vmem:[%s15185_s0 + $0x120] sm:$0xff] }
 0x5c8   :  { %v3665_v56 = vsel %vm392_vm1, %v3663_v0, %v3664_v45  ;;  %v11836_v62 = vsel %vm231_vm0, %v3503_v16, %v3504_v13  ;;  %v11839_v47 = vsel %vm231_vm0, %v3504_v13, %v3506_v51  ;;  %v3667_v35 = vsel %vm392_vm1, %v3664_v45, %v3666_v60  ;;  %v7716_v45 = vld [vmem:[%s15185_s0 + $0x110] sm:$0xff] }
 0x5c9   :  { %v2896_v1 = vpop.f32.mrf.mxu0  ;;  %6594 = vmatmul.msk.f32.vlgmr.msra.gmra.mxu3 %vm3137_vm13, %v3665_v56  ;;  %v6683_v11 = vpack.i.bf16 %v11839_v47, %v11836_v62  ;;  %v11847_v29 = vpack.i.bf16 %v3667_v35, %v3665_v56  ;;  %v2554_v57 = vsel %vm2531_vm9, %v2489_v21, %v11038_v32  ;;  %v16600_v13 = vld [vmem:[#allocation115_spill] sm:$0xff]  ;;  %v16601_v32 = vld [vmem:[#allocation189_spill] sm:$0xff]  ;;  %v16603_v56 = vld [vmem:[#allocation320_spill] sm:$0xff] }
 0x5ca   :  { %v2619_v16 = vsel %vm2596_vm11, %v2554_v57, %v1994_v9  ;;  %v2165_v51 = vsel %vm2141_vm3, %v7716_v45, %v16600_v13  ;;  %v16607_v9 = vld [vmem:[#allocation137_spill] sm:$0xff] }
 0x5cb   :  { %6684 = vrot.lane.b32.xlu1 %v6683_v11, %s7918_s11  ;;  %v2230_v60 = vsel %vm2206_vm5, %v2165_v51, %v16601_v32  ;;  %v2897_v11 = vadd.f32 %v11622_v46, %v2896_v1  ;;  %v3077_v1 = vmax.f32 %v2894_v43, 0.0  ;;  %v2166_v33 = vsel %vm2141_vm3, %v7717_v40, %v16607_v9  ;;  %v16609_v13 = vld [vmem:[#allocation273_spill] sm:$0xff] }
 0x5cc   :  { %6551 = vmatmul.msk.f32.gmra.mxu0 %vm2667_vm10, %v2618_v53  ;;  %v2295_v12 = vsel %vm2271_vm4, %v2230_v60, %v16602_v58  ;;  %v3494_v60 = vrot.slane %v3290_v30, 1  ;;  %v7718_v58 = vld [vmem:[%s15185_s0 + $0x128] sm:$0xff] }
 0x5cd   :  { %v3078_v55 = vmax.f32 %v2897_v11, 0.0  ;;  %3229 = vst.msk [vmem:[#allocation2 + $0x49] sm:$0xff] %vm3137_vm13, %v3077_v1 }
 0x5cf   :  { %3230 = vst.msk [vmem:[#allocation2 + $0x51] sm:$0xff] %vm3137_vm13, %v3078_v55 }
 0x5d1   :  { %v2899_v0 = vpop.f32.mrf.mxu0  ;;  %6595 = vmatmul.msk.f32.gmra.mxu3 %vm3137_vm13, %v3667_v35  ;;  %v2360_v35 = vsel %vm2336_vm6, %v2295_v12, %v16603_v56  ;;  %v16610_v12 = vld [vmem:[#allocation136_spill] sm:$0xff]  ;;  %v16611_v56 = vld [vmem:[#allocation334_spill] sm:$0xff] }
 0x5d2   :  { %v2425_v53 = vsel %vm2401_vm8, %v2360_v35, %v16604_v7  ;;  %v2900_v8 = vadd.f32 %v11622_v46, %v2899_v0  ;;  %v16608_v0 = vld [vmem:[#allocation188_spill] sm:$0xff]  ;;  %v2167_v43 = vsel %vm2141_vm3, %v7718_v58, %v16610_v12 }
 0x5d3   :  { %v2490_v36 = vsel %vm2466_vm7, %v2425_v53, %v16605_v4  ;;  %v2231_v57 = vsel %vm2206_vm5, %v2166_v33, %v16608_v0  ;;  %v2232_v11 = vsel %vm2206_vm5, %v2167_v43, %v16612_v18  ;;  %v16613_v7 = vld [vmem:[#allocation192_spill] sm:$0xff]  ;;  %v16617_v33 = vld [vmem:[#allocation114_spill] sm:$0xff] }
 0x5d4   :  { %6552 = vmatmul.msk.f32.gmra.mxu0 %vm2667_vm10, %v2619_v16  ;;  %v2555_v3 = vsel %vm2531_vm9, %v2490_v36, %v16606_v14  ;;  %v3079_v21 = vmax.f32 %v2900_v8, 0.0  ;;  %v3289_v16 = vld [vmem:[#allocation2] sm:$0xff]  ;;  %v2296_v51 = vsel %vm2271_vm4, %v2231_v57, %v16609_v13  ;;  %v16614_v8 = vld [vmem:[#allocation8_spill] sm:$0xff] }
 0x5d5   :  { %v2620_v19 = vsel %vm2596_vm11, %v2555_v3, %v1996_v17  ;;  %v3493_v32 = vrot.slane %v3289_v16, 1  ;;  %v2361_v35 = vsel %vm2336_vm6, %v2296_v51, %v16611_v56  ;;  %v1998_v17 = vpop.permute.xlu1 %1997  ;;  %v2297_v4 = vsel %vm2271_vm4, %v2232_v11, %v16614_v8  ;;  %v16615_v36 = vld [vmem:[#allocation408_spill] sm:$0xff]  ;;  %v16618_v16 = vld [vmem:[#allocation422_spill] sm:$0xff] }
 0x5d6   :  { %v2426_v53 = vsel %vm2401_vm8, %v2361_v35, %v16613_v7  ;;  %3231 = vst.msk [vmem:[#allocation2 + $0x61] sm:$0xff] %vm3137_vm13, %v3079_v21  ;;  %v3291_v14 = vld [vmem:[#allocation2 + $0x10] sm:$0xff]  ;;  %v3298_v51 = vld [vmem:[#allocation2 + $0x48] sm:$0xff]  ;;  %v3300_v43 = vld [vmem:[#allocation2 + $0x58] sm:$0xff] }
 0x5d7   :  { %v3496_v55 = vrot.slane %v3291_v14, 1  ;;  %v3299_v58 = vld [vmem:[#allocation2 + $0x50] sm:$0xff]  ;;  %v3668_v12 = vrot.slane %v3298_v51, 2  ;;  %v3508_v56 = vrot.slane %v3298_v51, 1  ;;  %v3511_v18 = vrot.slane %v3300_v43, 1 }
 0x5d8   :  { %v3509_v35 = vrot.slane %v3299_v58, 1  ;;  %v3671_v11 = vrot.slane %v3300_v43, 2 }
 0x5d9   :  { %v2902_v59 = vpop.f32.mrf.mxu0  ;;  %v3497_v0 = vsel %vm231_vm0, %v3494_v60, %v3496_v55 }
 0x5da   :  { %v2903_v27 = vadd.f32 %v11622_v46, %v2902_v59  ;;  %v2491_v59 = vsel %vm2466_vm7, %v2426_v53, %v16615_v36  ;;  %v7719_v53 = vld [vmem:[%s15185_s0 + $0x138] sm:$0xff] }
 0x5db   :  { %v2556_v1 = vsel %vm2531_vm9, %v2491_v59, %v11052_v34 }
 0x5dc   :  { %6553 = vmatmul.msk.f32.gmra.mxu0 %vm2667_vm10, %v2620_v19  ;;  %v3080_v45 = vmax.f32 %v2903_v27, 0.0  ;;  %v3495_v27 = vsel %vm231_vm0, %v3493_v32, %v3494_v60  ;;  %v16616_v19 = vld [vmem:[#allocation333_spill] sm:$0xff]  ;;  %v2621_v9 = vsel %vm2596_vm11, %v2556_v1, %v1998_v17  ;;  %v3669_v60 = vrot.slane %v3299_v58, 2  ;;  %v16619_v17 = vld [vmem:[#allocation123_spill] sm:$0xff] }
 0x5dd   :  { %v2362_v40 = vsel %vm2336_vm6, %v2297_v4, %v16616_v19  ;;  %v6673_v13 = vpack.i.bf16 %v3497_v0, %v3495_v27  ;;  %v3301_v7 = vld [vmem:[#allocation2 + $0x60] sm:$0xff]  ;;  %v11991_v1 = vsel %vm231_vm0, %v3508_v56, %v3509_v35  ;;  %v11994_v27 = vsel %vm231_vm0, %v3509_v35, %v3511_v18  ;;  %v16622_v35 = vld [vmem:[#allocation323_spill] sm:$0xff] }
 0x5de   :  { %3232 = vst.msk [vmem:[#allocation2 + $0x69] sm:$0xff] %vm3137_vm13, %v3080_v45  ;;  %v2427_v21 = vsel %vm2401_vm8, %v2362_v40, %v16617_v33  ;;  %v2000_v45 = vpop.permute.xlu2 %1999  ;;  %v3673_v36 = vrot.slane %v3301_v7, 2  ;;  %v3513_v14 = vrot.slane %v3301_v7, 1  ;;  %v3672_v55 = vsel %vm392_vm1, %v3669_v60, %v3671_v11  ;;  %v16623_v11 = vld [vmem:[#allocation190_spill] sm:$0xff] }
 0x5df   :  { %v2492_v34 = vsel %vm2466_vm7, %v2427_v21, %v16618_v16  ;;  %6674 = vrot.lane.b32.xlu2 %v6673_v13, %s7918_s11  ;;  %v6688_v19 = vpack.i.bf16 %v11994_v27, %v11991_v1  ;;  %v16620_v16 = vld [vmem:[#allocation195_spill] sm:$0xff] }
 0x5e0   :  { %v2557_v32 = vsel %vm2531_vm9, %v2492_v34, %v11050_v26  ;;  %v2168_v26 = vsel %vm2141_vm3, %v7719_v53, %v16619_v17  ;;  %v2002_v53 = vpop.permute.xlu0 %2001  ;;  %v16624_v17 = vld [vmem:[#allocation421_spill] sm:$0xff] }
 0x5e1   :  { %v2905_v3 = vpop.f32.mrf.mxu0  ;;  %v2622_v8 = vsel %vm2596_vm11, %v2557_v32, %v2000_v45  ;;  %v2233_v34 = vsel %vm2206_vm5, %v2168_v26, %v16620_v16 }
 0x5e2   :  { %v2906_v30 = vadd.f32 %v11622_v46, %v2905_v3  ;;  %v3670_v3 = vsel %vm392_vm1, %v3668_v12, %v3669_v60  ;;  %v16621_v12 = vld [vmem:[#allocation12_spill] sm:$0xff] }
 0x5e3   :  { %6596 = vmatmul.msk.f32.gmra.mxu3 %vm3137_vm13, %v3670_v3  ;;  %v12000_v40 = vpack.i.bf16 %v3672_v55, %v3670_v3  ;;  %v2298_v43 = vsel %vm2271_vm4, %v2233_v34, %v16621_v12  ;;  %v16629_v34 = vld [vmem:[#allocation337_spill] sm:$0xff] }
 0x5e4   :  { %v3081_v57 = vmax.f32 %v2906_v30, 0.0  ;;  %6554 = vmatmul.msk.f32.gmra.mxu0 %vm2667_vm10, %v2621_v9  ;;  %v2363_v18 = vsel %vm2336_vm6, %v2298_v43, %v16622_v35 }
 0x5e5   :  { %v3302_v4 = vld [vmem:[#allocation2 + $0x68] sm:$0xff]  ;;  %v3303_v59 = vld [vmem:[#allocation2 + $0x70] sm:$0xff]  ;;  %v2428_v7 = vsel %vm2401_vm8, %v2363_v18, %v16623_v11 }
 0x5e6   :  { %3233 = vst.msk [vmem:[#allocation2 + $0x79] sm:$0xff] %vm3137_vm13, %v3081_v57  ;;  %v3674_v33 = vrot.slane %v3302_v4, 2  ;;  %v3514_v21 = vrot.slane %v3302_v4, 1  ;;  %v3516_v0 = vrot.slane %v3303_v59, 1  ;;  %v3676_v57 = vrot.slane %v3303_v59, 2  ;;  %v7720_v4 = vld [vmem:[%s15185_s0 + $0x140] sm:$0xff] }
 0x5e7   :  { %6689 = vrot.lane.b32.xlu2 %v6688_v19, %s7918_s11  ;;  %v2493_v26 = vsel %vm2466_vm7, %v2428_v7, %v16624_v17 }
 0x5e8   :  { %v3675_v13 = vsel %vm392_vm1, %v3673_v36, %v3674_v33  ;;  %v12008_v51 = vsel %vm231_vm0, %v3513_v14, %v3514_v21  ;;  %v12011_v32 = vsel %vm231_vm0, %v3514_v21, %v3516_v0  ;;  %v12014_v58 = vsel %vm392_vm1, %v3674_v33, %v3676_v57  ;;  %v16625_v36 = vld [vmem:[#allocation140_spill] sm:$0xff] }
 0x5e9   :  { %v2908_v30 = vpop.f32.mrf.mxu0  ;;  %v6693_v56 = vpack.i.bf16 %v12011_v32, %v12008_v51  ;;  %v12022_v60 = vpack.i.bf16 %v12014_v58, %v3675_v13  ;;  %v2169_v59 = vsel %vm2141_vm3, %v7720_v4, %v16625_v36  ;;  %v16626_v14 = vld [vmem:[#allocation88_spill] sm:$0xff] }
 0x5ea   :  { %v2909_v9 = vadd.f32 %v11622_v46, %v2908_v30  ;;  %v2558_v3 = vsel %vm2531_vm9, %v2493_v26, %v16626_v14  ;;  %v16628_v0 = vld [vmem:[#allocation276_spill] sm:$0xff]  ;;  %v2004_v26 = vpop.permute.xlu1 %2003  ;;  %v16631_v14 = vld [vmem:[#allocation411_spill] sm:$0xff] }
 0x5eb   :  { %6694 = vrot.lane.b32.xlu0 %v6693_v56, %s7918_s11  ;;  %6597 = vmatmul.msk.f32.gmra.mxu3 %vm3137_vm13, %v3672_v55  ;;  %v2623_v21 = vsel %vm2596_vm11, %v2558_v3, %v2002_v53  ;;  %v16630_v53 = vld [vmem:[#allocation198_spill] sm:$0xff] }
 0x5ec   :  { %v3082_v45 = vmax.f32 %v2909_v9, 0.0  ;;  %6555 = vmatmul.msk.f32.gmra.mxu0 %vm2667_vm10, %v2622_v8  ;;  %v16627_v9 = vld [vmem:[#allocation194_spill] sm:$0xff] }
 0x5ed   :  { %v3304_v19 = vld [vmem:[#allocation2 + $0x78] sm:$0xff]  ;;  %v2234_v33 = vsel %vm2206_vm5, %v2169_v59, %v16627_v9 }
 0x5ee   :  { %3234 = vst.msk [vmem:[#allocation2 + $0x81] sm:$0xff] %vm3137_vm13, %v3082_v45  ;;  %v2299_v57 = vsel %vm2271_vm4, %v2234_v33, %v16628_v0  ;;  %v3678_v43 = vrot.slane %v3304_v19, 2  ;;  %v3518_v56 = vrot.slane %v3304_v19, 1 }
 0x5ef   :  { %v2364_v45 = vsel %vm2336_vm6, %v2299_v57, %v16629_v34  ;;  %v7721_v57 = vld [vmem:[%s15185_s0 + $0x150] sm:$0xff] }
 0x5f0   :  { %v2429_v17 = vsel %vm2401_vm8, %v2364_v45, %v16630_v53 }
 0x5f1   :  { %v2911_v8 = vpop.f32.mrf.mxu0  ;;  %v2494_v3 = vsel %vm2466_vm7, %v2429_v17, %v16631_v14  ;;  %v16638_v14 = vld [vmem:[#allocation129_spill] sm:$0xff] }
 0x5f2   :  { %v2912_v30 = vadd.f32 %v11622_v46, %v2911_v8  ;;  %v2559_v33 = vsel %vm2531_vm9, %v2494_v3, %v11062_v44 }
 0x5f3   :  { %6598 = vmatmul.msk.f32.gmra.mxu3 %vm3137_vm13, %v3675_v13  ;;  %v2624_v0 = vsel %vm2596_vm11, %v2559_v33, %v2004_v26  ;;  %v16634_v13 = vld [vmem:[#allocation10_spill] sm:$0xff]  ;;  %v7722_v26 = vld [vmem:[%s15185_s0 + $0x158] sm:$0xff] }
 0x5f4   :  { %v3083_v16 = vmax.f32 %v2912_v30, 0.0  ;;  %6556 = vmatmul.msk.f32.gmra.mxu0 %vm2667_vm10, %v2623_v21  ;;  %v2171_v3 = vsel %vm2141_vm3, %v7722_v26, %v16638_v14 }
 0x5f5   :  { %v3305_v12 = vld [vmem:[#allocation2 + $0x80] sm:$0xff]  ;;  %v3306_v55 = vld [vmem:[#allocation2 + $0x88] sm:$0xff] }
 0x5f6   :  { %3235 = vst.msk [vmem:[#allocation2 + $0x91] sm:$0xff] %vm3137_vm13, %v3083_v16  ;;  %v3679_v35 = vrot.slane %v3305_v12, 2  ;;  %v3519_v18 = vrot.slane %v3305_v12, 1  ;;  %v3521_v11 = vrot.slane %v3306_v55, 1  ;;  %v3681_v7 = vrot.slane %v3306_v55, 2  ;;  %v16632_v16 = vld [vmem:[#allocation139_spill] sm:$0xff] }
 0x5f7   :  { %v2170_v34 = vsel %vm2141_vm3, %v7721_v57, %v16632_v16  ;;  %v16633_v12 = vld [vmem:[#allocation179_spill] sm:$0xff]  ;;  %v16635_v55 = vld [vmem:[#allocation336_spill] sm:$0xff] }
 0x5f8   :  { %v3680_v8 = vsel %vm392_vm1, %v3678_v43, %v3679_v35  ;;  %v12054_v4 = vsel %vm231_vm0, %v3518_v56, %v3519_v18  ;;  %v12057_v36 = vsel %vm231_vm0, %v3519_v18, %v3521_v11  ;;  %v12060_v59 = vsel %vm392_vm1, %v3679_v35, %v3681_v7  ;;  %v16636_v35 = vld [vmem:[#allocation385_spill] sm:$0xff]  ;;  %v2006_v11 = vpop.permute.xlu2 %2005  ;;  %v16640_v16 = vld [vmem:[#allocation15_spill] sm:$0xff] }
 0x5f9   :  { %v2914_v30 = vpop.f32.mrf.mxu0  ;;  %v6698_v19 = vpack.i.bf16 %v12057_v36, %v12054_v4  ;;  %v12067_v9 = vpack.i.bf16 %v12060_v59, %v3680_v8  ;;  %v2235_v44 = vsel %vm2206_vm5, %v2170_v34, %v16633_v12  ;;  %v16637_v7 = vld [vmem:[#allocation425_spill] sm:$0xff]  ;;  %v16641_v12 = vld [vmem:[#allocation126_spill] sm:$0xff] }
 0x5fa   :  { %v2915_v21 = vadd.f32 %v11622_v46, %v2914_v30  ;;  %v2300_v43 = vsel %vm2271_vm4, %v2235_v44, %v16634_v13 }
 0x5fb   :  { %6699 = vrot.lane.b32.xlu1 %v6698_v19, %s7918_s11  ;;  %v2365_v56 = vsel %vm2336_vm6, %v2300_v43, %v16635_v55  ;;  %6599 = vmatmul.msk.f32.gmra.mxu3 %vm3137_vm13, %v12014_v58 }
 0x5fc   :  { %v3084_v45 = vmax.f32 %v2915_v21, 0.0  ;;  %6557 = vmatmul.msk.f32.gmra.mxu0 %vm2667_vm10, %v2624_v0  ;;  %v2430_v18 = vsel %vm2401_vm8, %v2365_v56, %v16636_v35  ;;  %v16639_v21 = vld [vmem:[#allocation201_spill] sm:$0xff] }
 0x5fd   :  { %v2495_v53 = vsel %vm2466_vm7, %v2430_v18, %v16637_v7  ;;  %v3307_v33 = vld [vmem:[#allocation2 + $0x90] sm:$0xff]  ;;  %v2236_v0 = vsel %vm2206_vm5, %v2171_v3, %v16639_v21 }
 0x5fe   :  { %3236 = vst.msk [vmem:[#allocation2 + $0x99] sm:$0xff] %vm3137_vm13, %v3084_v45  ;;  %v2560_v30 = vsel %vm2531_vm9, %v2495_v53, %v11060_v37  ;;  %v2301_v34 = vsel %vm2271_vm4, %v2236_v0, %v16640_v16  ;;  %v3683_v13 = vrot.slane %v3307_v33, 2  ;;  %v3523_v43 = vrot.slane %v3307_v33, 1  ;;  %v2008_v53 = vpop.permute.xlu0 %2007 }
 0x5ff   :  { %v2625_v57 = vsel %vm2596_vm11, %v2560_v30, %v2006_v11  ;;  %v2366_v37 = vsel %vm2336_vm6, %v2301_v34, %v16641_v12  ;;  %v16642_v11 = vld [vmem:[#allocation196_spill] sm:$0xff]  ;;  %v16645_v12 = vld [vmem:[#allocation143_spill] sm:$0xff] }
 0x600   :  { %v2431_v7 = vsel %vm2401_vm8, %v2366_v37, %v16642_v11  ;;  %v16644_v30 = vld [vmem:[#allocation424_spill] sm:$0xff]  ;;  %v16650_v11 = vld [vmem:[#allocation414_spill] sm:$0xff] }
 0x601   :  { %v2917_v17 = vpop.f32.mrf.mxu0 }
 0x602   :  { %v2918_v19 = vadd.f32 %v11622_v46, %v2917_v17 }
 0x603   :  { %6600 = vmatmul.msk.f32.gmra.mxu3 %vm3137_vm13, %v3680_v8  ;;  %v16647_v8 = vld [vmem:[#allocation279_spill] sm:$0xff] }
 0x604   :  { %v3085_v45 = vmax.f32 %v2918_v19, 0.0  ;;  %6558 = vmatmul.msk.f32.gmra.mxu0 %vm2667_vm10, %v2625_v57  ;;  %v2496_v19 = vsel %vm2466_vm7, %v2431_v7, %v16644_v30  ;;  %v7724_v30 = vld [vmem:[%s15185_s0 + $0x170] sm:$0xff] }
 0x605   :  { %v3308_v44 = vld [vmem:[#allocation2 + $0x98] sm:$0xff]  ;;  %v3309_v58 = vld [vmem:[#allocation2 + $0xa0] sm:$0xff]  ;;  %v2561_v57 = vsel %vm2531_vm9, %v2496_v19, %v11031_v42 }
 0x606   :  { %3237 = vst.msk [vmem:[#allocation2 + $0xa9] sm:$0xff] %vm3137_vm13, %v3085_v45  ;;  %v3684_v55 = vrot.slane %v3308_v44, 2  ;;  %v3524_v56 = vrot.slane %v3308_v44, 1  ;;  %v3526_v35 = vrot.slane %v3309_v58, 1  ;;  %v3686_v18 = vrot.slane %v3309_v58, 2  ;;  %v7723_v45 = vld [vmem:[%s15185_s0 + $0x168] sm:$0xff] }
 0x607   :  { %v2626_v34 = vsel %vm2596_vm11, %v2561_v57, %v2008_v53  ;;  %v2172_v37 = vsel %vm2141_vm3, %v7723_v45, %v16645_v12  ;;  %v16651_v19 = vld [vmem:[#allocation142_spill] sm:$0xff] }
 0x608   :  { %v3685_v17 = vsel %vm392_vm1, %v3683_v13, %v3684_v55  ;;  %v12115_v26 = vsel %vm231_vm0, %v3523_v43, %v3524_v56  ;;  %v12118_v14 = vsel %vm231_vm0, %v3524_v56, %v3526_v35  ;;  %v12121_v3 = vsel %vm392_vm1, %v3684_v55, %v3686_v18  ;;  %v16646_v13 = vld [vmem:[#allocation200_spill] sm:$0xff]  ;;  %v2010_v18 = vpop.permute.xlu1 %2009 }
 0x609   :  { %16643 = vst [vmem:[#allocation167_spill] sm:$0xff] %v12115_v26  ;;  %v2920_v33 = vpop.f32.mrf.mxu0  ;;  %v6703_v21 = vpack.i.bf16 %v12118_v14, %v12115_v26  ;;  %v12128_v0 = vpack.i.bf16 %v12121_v3, %v3685_v17  ;;  %v2237_v42 = vsel %vm2206_vm5, %v2172_v37, %v16646_v13  ;;  %v16648_v43 = vld [vmem:[#allocation340_spill] sm:$0xff]  ;;  %v16653_v37 = vld [vmem:[#allocation13_spill] sm:$0xff] }
 0x60a   :  { %v2921_v16 = vadd.f32 %v11622_v46, %v2920_v33  ;;  %v2302_v58 = vsel %vm2271_vm4, %v2237_v42, %v16647_v8  ;;  %v16649_v56 = vld [vmem:[#allocation204_spill] sm:$0xff]  ;;  %v2173_v33 = vsel %vm2141_vm3, %v7724_v30, %v16651_v19  ;;  %v16654_v42 = vld [vmem:[#allocation339_spill] sm:$0xff] }
 0x60b   :  { %6704 = vrot.lane.b32.xlu2 %v6703_v21, %s7918_s11  ;;  %v2367_v55 = vsel %vm2336_vm6, %v2302_v58, %v16648_v43  ;;  %6601 = vmatmul.msk.f32.gmra.mxu3 %vm3137_vm13, %v12060_v59 }
 0x60c   :  { %v3086_v44 = vmax.f32 %v2921_v16, 0.0  ;;  %6559 = vmatmul.msk.f32.gmra.mxu0 %vm2667_vm10, %v2626_v34  ;;  %v2432_v35 = vsel %vm2401_vm8, %v2367_v55, %v16649_v56  ;;  %v16652_v34 = vld [vmem:[#allocation182_spill] sm:$0xff] }
 0x60d   :  { %v2497_v7 = vsel %vm2466_vm7, %v2432_v35, %v16650_v11  ;;  %v3310_v16 = vld [vmem:[#allocation2 + $0xa8] sm:$0xff]  ;;  %v2238_v45 = vsel %vm2206_vm5, %v2173_v33, %v16652_v34 }
 0x60e   :  { %3238 = vst.msk [vmem:[#allocation2 + $0xb1] sm:$0xff] %vm3137_vm13, %v3086_v44  ;;  %v2562_v21 = vsel %vm2531_vm9, %v2497_v7, %v11074_v5  ;;  %v2303_v44 = vsel %vm2271_vm4, %v2238_v45, %v16653_v37  ;;  %v3688_v58 = vrot.slane %v3310_v16, 2  ;;  %v3528_v43 = vrot.slane %v3310_v16, 1 }
 0x60f   :  { %v2627_v12 = vsel %vm2596_vm11, %v2562_v21, %v2010_v18  ;;  %v2368_v5 = vsel %vm2336_vm6, %v2303_v44, %v16654_v42  ;;  %v16655_v18 = vld [vmem:[#allocation186_spill] sm:$0xff]  ;;  %v7725_v42 = vld [vmem:[%s15185_s0 + $0x1b0] sm:$0xff] }
 0x610   :  { %v2433_v7 = vsel %vm2401_vm8, %v2368_v5, %v16655_v18  ;;  %v16659_v5 = vld [vmem:[#allocation132_spill] sm:$0xff]  ;;  %v2014_v18 = vpop.permute.xlu0 %2013 }
 0x611   :  { %v2923_v53 = vpop.f32.mrf.mxu0 }
 0x612   :  { %v2924_v57 = vadd.f32 %v11622_v46, %v2923_v53  ;;  %v2012_v53 = vpop.permute.xlu2 %2011 }
 0x613   :  { %6602 = vmatmul.msk.f32.gmra.mxu3 %vm3137_vm13, %v3685_v17  ;;  %v16661_v17 = vld [vmem:[#allocation18_spill] sm:$0xff] }
 0x614   :  { %v3087_v13 = vmax.f32 %v2924_v57, 0.0  ;;  %6560 = vmatmul.msk.f32.gmra.mxu0 %vm2667_vm10, %v2627_v12  ;;  %v16658_v57 = vld [vmem:[#allocation428_spill] sm:$0xff] }
 0x615   :  { %v3311_v8 = vld [vmem:[#allocation2 + $0xb0] sm:$0xff]  ;;  %v3312_v59 = vld [vmem:[#allocation2 + $0xb8] sm:$0xff]  ;;  %v2498_v16 = vsel %vm2466_vm7, %v2433_v7, %v16658_v57 }
 0x616   :  { %3239 = vst.msk [vmem:[#allocation2 + $0xc1] sm:$0xff] %vm3137_vm13, %v3087_v13  ;;  %v3689_v55 = vrot.slane %v3311_v8, 2  ;;  %v3529_v56 = vrot.slane %v3311_v8, 1  ;;  %v3531_v35 = vrot.slane %v3312_v59, 1  ;;  %v3691_v11 = vrot.slane %v3312_v59, 2  ;;  %v16660_v59 = vld [vmem:[#allocation207_spill] sm:$0xff] }
 0x617   :  { %v2563_v37 = vsel %vm2531_vm9, %v2498_v16, %v11072_v50  ;;  %v2174_v8 = vsel %vm2141_vm3, %v7725_v42, %v16659_v5  ;;  %v16664_v7 = vld [vmem:[#allocation427_spill] sm:$0xff]  ;;  %v7726_v16 = vld [vmem:[%s15185_s0 + $0x1b8] sm:$0xff]  ;;  %v16666_v42 = vld [vmem:[#allocation206_spill] sm:$0xff] }
 0x618   :  { %v3690_v30 = vsel %vm392_vm1, %v3688_v58, %v3689_v55  ;;  %v12176_v19 = vsel %vm231_vm0, %v3528_v43, %v3529_v56  ;;  %v12179_v33 = vsel %vm231_vm0, %v3529_v56, %v3531_v35  ;;  %v12182_v21 = vsel %vm392_vm1, %v3689_v55, %v3691_v11  ;;  %v16662_v55 = vld [vmem:[#allocation329_spill] sm:$0xff]  ;;  %v16663_v35 = vld [vmem:[#allocation202_spill] sm:$0xff] }
 0x619   :  { %16656 = vst [vmem:[#allocation55_spill] sm:$0xff] %v12176_v19  ;;  %v2926_v34 = vpop.f32.mrf.mxu0  ;;  %v6708_v45 = vpack.i.bf16 %v12179_v33, %v12176_v19  ;;  %v12189_v12 = vpack.i.bf16 %v12182_v21, %v3690_v30  ;;  %v2628_v13 = vsel %vm2596_vm11, %v2563_v37, %v2012_v53  ;;  %v2239_v50 = vsel %vm2206_vm5, %v2174_v8, %v16660_v59 }
 0x61a   :  { %16657 = vst [vmem:[#allocation43_spill] sm:$0xff] %v12179_v33  ;;  %v2927_v44 = vadd.f32 %v11622_v46, %v2926_v34  ;;  %v2304_v43 = vsel %vm2271_vm4, %v2239_v50, %v16661_v17  ;;  %v16665_v34 = vld [vmem:[#allocation146_spill] sm:$0xff]  ;;  %v16668_v17 = vld [vmem:[#allocation343_spill] sm:$0xff] }
 0x61b   :  { %6709 = vrot.lane.b32.xlu0 %v6708_v45, %s7918_s11  ;;  %v2369_v56 = vsel %vm2336_vm6, %v2304_v43, %v16662_v55  ;;  %v2175_v45 = vsel %vm2141_vm3, %v7726_v16, %v16665_v34  ;;  %6603 = vmatmul.msk.f32.gmra.mxu3 %vm3137_vm13, %v12121_v3  ;;  %v2016_v16 = vpop.permute.xlu1 %2015 }
 0x61c   :  { %v3088_v58 = vmax.f32 %v2927_v44, 0.0  ;;  %6561 = vmatmul.msk.f32.gmra.mxu0 %vm2667_vm10, %v2628_v13  ;;  %v2434_v11 = vsel %vm2401_vm8, %v2369_v56, %v16663_v35  ;;  %v2240_v5 = vsel %vm2206_vm5, %v2175_v45, %v16666_v42 }
 0x61d   :  { %v2499_v53 = vsel %vm2466_vm7, %v2434_v11, %v16664_v7  ;;  %v3313_v13 = vld [vmem:[#allocation2 + $0xc0] sm:$0xff] }
 0x61e   :  { %3240 = vst.msk [vmem:[#allocation2 + $0xc9] sm:$0xff] %vm3137_vm13, %v3088_v58  ;;  %v2564_v37 = vsel %vm2531_vm9, %v2499_v53, %v11048_v10  ;;  %v16667_v58 = vld [vmem:[#allocation6_spill] sm:$0xff]  ;;  %v3693_v55 = vrot.slane %v3313_v13, 2  ;;  %v3533_v56 = vrot.slane %v3313_v13, 1  ;;  %v16672_v13 = vld [vmem:[#allocation417_spill] sm:$0xff] }
 0x61f   :  { %v2629_v8 = vsel %vm2596_vm11, %v2564_v37, %v2014_v18  ;;  %v2305_v59 = vsel %vm2271_vm4, %v2240_v5, %v16667_v58  ;;  %v16669_v18 = vld [vmem:[#allocation210_spill] sm:$0xff] }
 0x620   :  { %v2370_v10 = vsel %vm2336_vm6, %v2305_v59, %v16668_v17 }
 0x621   :  { %v2929_v57 = vpop.f32.mrf.mxu0 }
 0x622   :  { %v2930_v44 = vadd.f32 %v11622_v46, %v2929_v57  ;;  %v2435_v57 = vsel %vm2401_vm8, %v2370_v10, %v16669_v18  ;;  %v7727_v10 = vld [vmem:[%s15185_s0 + $0x1c8] sm:$0xff] }
 0x623   :  { %v2500_v42 = vsel %vm2466_vm7, %v2435_v57, %v16672_v13  ;;  %6604 = vmatmul.msk.f32.gmra.mxu3 %vm3137_vm13, %v3690_v30  ;;  %v16675_v30 = vld [vmem:[#allocation282_spill] sm:$0xff]  ;;  %v2018_v57 = vpop.permute.xlu2 %2017 }
 0x624   :  { %v3089_v50 = vmax.f32 %v2930_v44, 0.0  ;;  %6562 = vmatmul.msk.f32.gmra.mxu0 %vm2667_vm10, %v2629_v8  ;;  %v2565_v59 = vsel %vm2531_vm9, %v2500_v42, %v11086_v2 }
 0x625   :  { %v3314_v43 = vld [vmem:[#allocation2 + $0xc8] sm:$0xff]  ;;  %v3315_v3 = vld [vmem:[#allocation2 + $0xd0] sm:$0xff]  ;;  %v2630_v17 = vsel %vm2596_vm11, %v2565_v59, %v2016_v16 }
 0x626   :  { %3241 = vst.msk [vmem:[#allocation2 + $0xd9] sm:$0xff] %vm3137_vm13, %v3089_v50  ;;  %v3694_v35 = vrot.slane %v3314_v43, 2  ;;  %v3534_v11 = vrot.slane %v3314_v43, 1  ;;  %v3536_v7 = vrot.slane %v3315_v3, 1  ;;  %v3696_v53 = vrot.slane %v3315_v3, 2  ;;  %v16673_v43 = vld [vmem:[#allocation145_spill] sm:$0xff] }
 0x627   :  { %v16678_v16 = vld [vmem:[#allocation430_spill] sm:$0xff] }
 0x628   :  { %v3695_v34 = vsel %vm392_vm1, %v3693_v55, %v3694_v35  ;;  %v12237_v45 = vsel %vm231_vm0, %v3533_v56, %v3534_v11  ;;  %v12240_v37 = vsel %vm231_vm0, %v3534_v11, %v3536_v7  ;;  %v12243_v44 = vsel %vm392_vm1, %v3694_v35, %v3696_v53  ;;  %v16674_v56 = vld [vmem:[#allocation187_spill] sm:$0xff]  ;;  %v16676_v11 = vld [vmem:[#allocation342_spill] sm:$0xff] }
 0x629   :  { %16670 = vst [vmem:[#allocation168_spill] sm:$0xff] %v12237_v45  ;;  %v2932_v5 = vpop.f32.mrf.mxu0  ;;  %v6713_v8 = vpack.i.bf16 %v12240_v37, %v12237_v45  ;;  %v12250_v58 = vpack.i.bf16 %v12243_v44, %v3695_v34  ;;  %v2176_v55 = vsel %vm2141_vm3, %v7727_v10, %v16673_v43  ;;  %v16677_v53 = vld [vmem:[#allocation191_spill] sm:$0xff]  ;;  %v16680_v43 = vld [vmem:[#allocation213_spill] sm:$0xff] }
 0x62a   :  { %16671 = vst [vmem:[#allocation53_spill] sm:$0xff] %v12240_v37  ;;  %v2933_v50 = vadd.f32 %v11622_v46, %v2932_v5  ;;  %v2241_v2 = vsel %vm2206_vm5, %v2176_v55, %v16674_v56  ;;  %v7728_v5 = vld [vmem:[%s15185_s0 + $0x1d0] sm:$0xff] }
 0x62b   :  { %6714 = vrot.lane.b32.xlu1 %v6713_v8, %s7918_s11  ;;  %v2306_v35 = vsel %vm2271_vm4, %v2241_v2, %v16675_v30  ;;  %v16679_v8 = vld [vmem:[#allocation135_spill] sm:$0xff]  ;;  %6605 = vmatmul.msk.f32.gmra.mxu3 %vm3137_vm13, %v12182_v21  ;;  %v16681_v56 = vld [vmem:[#allocation16_spill] sm:$0xff] }
 0x62c   :  { %v3090_v3 = vmax.f32 %v2933_v50, 0.0  ;;  %6563 = vmatmul.msk.f32.gmra.mxu0 %vm2667_vm10, %v2630_v17  ;;  %v2371_v7 = vsel %vm2336_vm6, %v2306_v35, %v16676_v11  ;;  %v2177_v59 = vsel %vm2141_vm3, %v7728_v5, %v16679_v8  ;;  %v16682_v35 = vld [vmem:[#allocation332_spill] sm:$0xff]  ;;  %v2020_v8 = vpop.permute.xlu0 %2019 }
 0x62d   :  { %v2436_v18 = vsel %vm2401_vm8, %v2371_v7, %v16677_v53  ;;  %v3316_v10 = vld [vmem:[#allocation2 + $0xd8] sm:$0xff]  ;;  %v2242_v55 = vsel %vm2206_vm5, %v2177_v59, %v16680_v43 }
 0x62e   :  { %3242 = vst.msk [vmem:[#allocation2 + $0xe1] sm:$0xff] %vm3137_vm13, %v3090_v3  ;;  %v2501_v13 = vsel %vm2466_vm7, %v2436_v18, %v16678_v16  ;;  %v2307_v2 = vsel %vm2271_vm4, %v2242_v55, %v16681_v56  ;;  %v3698_v7 = vrot.slane %v3316_v10, 2  ;;  %v3538_v53 = vrot.slane %v3316_v10, 1  ;;  %v16686_v43 = vld [vmem:[#allocation429_spill] sm:$0xff] }
 0x62f   :  { %v2566_v50 = vsel %vm2531_vm9, %v2501_v13, %v11084_v61  ;;  %v2372_v61 = vsel %vm2336_vm6, %v2307_v2, %v16682_v35 }
 0x630   :  { %v2631_v3 = vsel %vm2596_vm11, %v2566_v50, %v2018_v57  ;;  %v16683_v57 = vld [vmem:[#allocation208_spill] sm:$0xff] }
 0x631   :  { %v2935_v42 = vpop.f32.mrf.mxu0  ;;  %v2437_v5 = vsel %vm2401_vm8, %v2372_v61, %v16683_v57 }
 0x632   :  { %v2936_v17 = vadd.f32 %v11622_v46, %v2935_v42  ;;  %v2502_v55 = vsel %vm2466_vm7, %v2437_v5, %v16686_v43  ;;  %v2022_v5 = vpop.permute.xlu1 %2021 }
 0x633   :  { %6606 = vmatmul.msk.f32.gmra.mxu3 %vm3137_vm13, %v3695_v34  ;;  %v16689_v34 = vld [vmem:[#allocation11_spill] sm:$0xff] }
 0x634   :  { %v3091_v30 = vmax.f32 %v2936_v17, 0.0  ;;  %6564 = vmatmul.msk.f32.gmra.mxu0 %vm2667_vm10, %v2631_v3 }
 0x635   :  { %v3317_v11 = vld [vmem:[#allocation2 + $0xe0] sm:$0xff]  ;;  %v3318_v21 = vld [vmem:[#allocation2 + $0xe8] sm:$0xff] }
 0x636   :  { %3243 = vst.msk [vmem:[#allocation2 + $0xf1] sm:$0xff] %vm3137_vm13, %v3091_v30  ;;  %v3699_v18 = vrot.slane %v3317_v11, 2  ;;  %v3539_v16 = vrot.slane %v3317_v11, 1  ;;  %v3541_v13 = vrot.slane %v3318_v21, 1  ;;  %v3701_v42 = vrot.slane %v3318_v21, 2  ;;  %v7729_v11 = vld [vmem:[%s15185_s0 + $0x1e0] sm:$0xff] }
 0x637   :  { %v2567_v30 = vsel %vm2531_vm9, %v2502_v55, %v11064_v15 }
 0x638   :  { %v3700_v59 = vsel %vm392_vm1, %v3698_v7, %v3699_v18  ;;  %v12298_v50 = vsel %vm231_vm0, %v3538_v53, %v3539_v16  ;;  %v12301_v17 = vsel %vm231_vm0, %v3539_v16, %v3541_v13  ;;  %v12304_v10 = vsel %vm392_vm1, %v3699_v18, %v3701_v42  ;;  %v16687_v7 = vld [vmem:[#allocation149_spill] sm:$0xff]  ;;  %v16688_v18 = vld [vmem:[#allocation212_spill] sm:$0xff]  ;;  %v16690_v16 = vld [vmem:[#allocation346_spill] sm:$0xff] }
 0x639   :  { %16684 = vst [vmem:[#allocation166_spill] sm:$0xff] %v12298_v50  ;;  %v2938_v3 = vpop.f32.mrf.mxu0  ;;  %v6718_v56 = vpack.i.bf16 %v12301_v17, %v12298_v50  ;;  %v12311_v2 = vpack.i.bf16 %v12304_v10, %v3700_v59  ;;  %v2632_v61 = vsel %vm2596_vm11, %v2567_v30, %v2020_v8  ;;  %v2178_v21 = vsel %vm2141_vm3, %v7729_v11, %v16687_v7  ;;  %v16691_v42 = vld [vmem:[#allocation216_spill] sm:$0xff] }
 0x63a   :  { %16685 = vst [vmem:[#allocation75_spill] sm:$0xff] %v12301_v17  ;;  %v2939_v35 = vadd.f32 %v11622_v46, %v2938_v3  ;;  %v2243_v15 = vsel %vm2206_vm5, %v2178_v21, %v16688_v18  ;;  %v16692_v8 = vld [vmem:[#allocation420_spill] sm:$0xff]  ;;  %v7730_v3 = vld [vmem:[%s15185_s0 + $0x1e8] sm:$0xff]  ;;  %v16694_v21 = vld [vmem:[#allocation193_spill] sm:$0xff] }
 0x63b   :  { %6719 = vrot.lane.b32.xlu2 %v6718_v56, %s7918_s11  ;;  %v2308_v46 = vsel %vm2271_vm4, %v2243_v15, %v16689_v34  ;;  %v16693_v56 = vld [vmem:[#allocation148_spill] sm:$0xff]  ;;  %6607 = vmatmul.msk.f32.gmra.mxu3 %vm3137_vm13, %v12243_v44  ;;  %v16695_v15 = vld [vmem:[#allocation283_spill] sm:$0xff]  ;;  %v16696_v44 = vld [vmem:[#allocation345_spill] sm:$0xff] }
 0x63c   :  { %v3092_v53 = vmax.f32 %v2939_v35, 0.0  ;;  %6565 = vmatmul.msk.f32.gmra.mxu0 %vm2667_vm10, %v2632_v61  ;;  %v2373_v13 = vsel %vm2336_vm6, %v2308_v46, %v16690_v16  ;;  %v2179_v30 = vsel %vm2141_vm3, %v7730_v3, %v16693_v56  ;;  %v12348_v61 = vld [vmem:[%s15187_s2] ss:$0 sm:$0xff] }
 0x63d   :  { %v2438_v57 = vsel %vm2401_vm8, %v2373_v13, %v16691_v42  ;;  %v3319_v7 = vld [vmem:[#allocation2 + $0xf0] sm:$0xff] }
 0x63e   :  { %3244 = vst.msk [vmem:[#allocation2 + $0xf9] sm:$0xff] %vm3137_vm13, %v3092_v53  ;;  %v2503_v43 = vsel %vm2466_vm7, %v2438_v57, %v16692_v8  ;;  %v2244_v53 = vsel %vm2206_vm5, %v2179_v30, %v16694_v21  ;;  %v3703_v13 = vrot.slane %v3319_v7, 2  ;;  %v3543_v57 = vrot.slane %v3319_v7, 1  ;;  %v2024_v30 = vpop.permute.xlu2 %2023 }
 0x63f   :  { %v2568_v35 = vsel %vm2531_vm9, %v2503_v43, %v11098_v39  ;;  %v2309_v34 = vsel %vm2271_vm4, %v2244_v53, %v16695_v15  ;;  %v16700_v53 = vld [vmem:[#allocation23_spill] sm:$0xff] }
 0x640   :  { %v2633_v18 = vsel %vm2596_vm11, %v2568_v35, %v2022_v5  ;;  %v2374_v46 = vsel %vm2336_vm6, %v2309_v34, %v16696_v44  ;;  %v16697_v5 = vld [vmem:[#allocation197_spill] sm:$0xff] }
 0x641   :  { %v2941_v55 = vpop.f32.mrf.mxu0  ;;  %v2439_v56 = vsel %vm2401_vm8, %v2374_v46, %v16697_v5 }
 0x642   :  { %v2942_v11 = vadd.f32 %v12348_v61, %v2941_v55 }
 0x643   :  { %6608 = vmatmul.msk.f32.gmra.mxu3 %vm3137_vm13, %v3700_v59  ;;  %v16703_v59 = vld [vmem:[#allocation19_spill] sm:$0xff] }
 0x644   :  { %v3093_v39 = vmax.f32 %v2942_v11, 0.0  ;;  %6566 = vmatmul.msk.f32.gmra.mxu0 %vm2667_vm10, %v2633_v18  ;;  %v2504_v18 = vsel %vm2466_vm7, %v2439_v56, %v16700_v53  ;;  %v16705_v56 = vld [vmem:[#allocation214_spill] sm:$0xff]  ;;  %v2026_v53 = vpop.permute.xlu0 %2025 }
 0x645   :  { %v3320_v16 = vld [vmem:[#allocation2 + $0xf8] sm:$0xff]  ;;  %v3321_v42 = vld [vmem:[#allocation2 + $0x100] sm:$0xff]  ;;  %v2569_v44 = vsel %vm2531_vm9, %v2504_v18, %v11096_v23 }
 0x646   :  { %3245 = vst.msk [vmem:[#allocation2 + $0x109] sm:$0xff] %vm3137_vm13, %v3093_v39  ;;  %v3704_v8 = vrot.slane %v3320_v16, 2  ;;  %v3544_v43 = vrot.slane %v3320_v16, 1  ;;  %v3546_v55 = vrot.slane %v3321_v42, 1  ;;  %v3706_v3 = vrot.slane %v3321_v42, 2  ;;  %v16701_v42 = vld [vmem:[#allocation138_spill] sm:$0xff] }
 0x647   :  { %v2634_v16 = vsel %vm2596_vm11, %v2569_v44, %v2024_v30  ;;  %v16706_v18 = vld [vmem:[#allocation22_spill] sm:$0xff] }
 0x648   :  { %v3705_v35 = vsel %vm392_vm1, %v3703_v13, %v3704_v8  ;;  %v12364_v11 = vsel %vm231_vm0, %v3543_v57, %v3544_v43  ;;  %v12367_v21 = vsel %vm231_vm0, %v3544_v43, %v3546_v55  ;;  %v12370_v7 = vsel %vm392_vm1, %v3704_v8, %v3706_v3  ;;  %v7732_v13 = vld [vmem:[%s15185_s0 + $0x1f8] sm:$0xff]  ;;  %v16702_v43 = vld [vmem:[#allocation219_spill] sm:$0xff]  ;;  %v7733_v44 = vld [vmem:[%s15185_s0 + $0x200] sm:$0xff] }
 0x649   :  { %16698 = vst [vmem:[#allocation69_spill] sm:$0xff] %v12364_v11  ;;  %v2944_v15 = vpop.f32.mrf.mxu0  ;;  %v6723_v34 = vpack.i.bf16 %v12367_v21, %v12364_v11  ;;  %v12377_v39 = vpack.i.bf16 %v12370_v7, %v3705_v35  ;;  %v2180_v57 = vsel %vm2141_vm3, %v7732_v13, %v16701_v42  ;;  %v16704_v3 = vld [vmem:[#allocation335_spill] sm:$0xff] }
 0x64a   :  { %16699 = vst [vmem:[#allocation243_spill] sm:$0xff] %v12367_v21  ;;  %v2945_v46 = vadd.f32 %v12348_v61, %v2944_v15  ;;  %v2245_v23 = vsel %vm2206_vm5, %v2180_v57, %v16702_v43 }
 0x64b   :  { %6724 = vrot.lane.b32.xlu0 %v6723_v34, %s7918_s11  ;;  %v2310_v55 = vsel %vm2271_vm4, %v2245_v23, %v16703_v59  ;;  %6609 = vmatmul.msk.f32.gmra.mxu3 %vm3137_vm13, %v12304_v10  ;;  %v16709_v59 = vld [vmem:[#allocation14_spill] sm:$0xff] }
 0x64c   :  { %v3094_v8 = vmax.f32 %v2945_v46, 0.0  ;;  %6567 = vmatmul.msk.f32.gmra.mxu0 %vm2667_vm10, %v2634_v16  ;;  %v2375_v5 = vsel %vm2336_vm6, %v2310_v55, %v16704_v3  ;;  %v16707_v46 = vld [vmem:[#allocation152_spill] sm:$0xff] }
 0x64d   :  { %v2440_v30 = vsel %vm2401_vm8, %v2375_v5, %v16705_v56  ;;  %v2181_v16 = vsel %vm2141_vm3, %v7733_v44, %v16707_v46  ;;  %v3322_v57 = vld [vmem:[#allocation2 + $0x108] sm:$0xff]  ;;  %v16710_v5 = vld [vmem:[#allocation349_spill] sm:$0xff] }
 0x64e   :  { %3246 = vst.msk [vmem:[#allocation2 + $0x111] sm:$0xff] %vm3137_vm13, %v3094_v8  ;;  %v2505_v15 = vsel %vm2466_vm7, %v2440_v30, %v16706_v18  ;;  %v16708_v8 = vld [vmem:[#allocation218_spill] sm:$0xff]  ;;  %v3708_v30 = vrot.slane %v3322_v57, 2  ;;  %v3548_v18 = vrot.slane %v3322_v57, 1 }
 0x64f   :  { %v2570_v13 = vsel %vm2531_vm9, %v2505_v15, %v11076_v31  ;;  %v2246_v43 = vsel %vm2206_vm5, %v2181_v16, %v16708_v8 }
 0x650   :  { %v2635_v23 = vsel %vm2596_vm11, %v2570_v13, %v2026_v53  ;;  %v2311_v55 = vsel %vm2271_vm4, %v2246_v43, %v16709_v59  ;;  %v16711_v53 = vld [vmem:[#allocation222_spill] sm:$0xff]  ;;  %v2028_v13 = vpop.permute.xlu1 %2027 }
 0x651   :  { %v2947_v34 = vpop.f32.mrf.mxu0  ;;  %v2376_v31 = vsel %vm2336_vm6, %v2311_v55, %v16710_v5  ;;  %v12435_v55 = vpop.f32.mrf.mxu3 }
 0x652   :  { %v2948_v42 = vadd.f32 %v12348_v61, %v2947_v34  ;;  %v2441_v16 = vsel %vm2401_vm8, %v2376_v31, %v16711_v53  ;;  %16715 = vst [vmem:[#allocation371_spill] sm:$0xff] %v12435_v55  ;;  %v16743_v55 = vld [vmem:[#allocation209_spill] sm:$0xff] }
 0x653   :  { %6610 = vmatmul.msk.f32.gmra.mxu3 %vm3137_vm13, %v3705_v35  ;;  %v16718_v35 = vld [vmem:[#allocation286_spill] sm:$0xff] }
 0x654   :  { %v3095_v3 = vmax.f32 %v2948_v42, 0.0  ;;  %6568 = vmatmul.msk.f32.gmra.mxu0 %vm2667_vm10, %v2635_v23  ;;  %v16714_v23 = vld [vmem:[#allocation423_spill] sm:$0xff] }
 0x655   :  { %v3323_v56 = vld [vmem:[#allocation2 + $0x110] sm:$0xff]  ;;  %v3324_v10 = vld [vmem:[#allocation2 + $0x118] sm:$0xff]  ;;  %v2506_v59 = vsel %vm2466_vm7, %v2441_v16, %v16714_v23 }
 0x656   :  { %3247 = vst.msk [vmem:[#allocation2 + $0x121] sm:$0xff] %vm3137_vm13, %v3095_v3  ;;  %v3709_v15 = vrot.slane %v3323_v56, 2  ;;  %v3549_v34 = vrot.slane %v3323_v56, 1  ;;  %v3551_v44 = vrot.slane %v3324_v10, 1  ;;  %v3711_v46 = vrot.slane %v3324_v10, 2  ;;  %v16719_v16 = vld [vmem:[#allocation348_spill] sm:$0xff] }
 0x657   :  { %v2571_v56 = vsel %vm2531_vm9, %v2506_v59, %v11113_v54  ;;  %v16720_v23 = vld [vmem:[#allocation203_spill] sm:$0xff] }
 0x658   :  { %v3710_v42 = vsel %vm392_vm1, %v3708_v30, %v3709_v15  ;;  %v12425_v8 = vsel %vm231_vm0, %v3548_v18, %v3549_v34  ;;  %v12428_v43 = vsel %vm231_vm0, %v3549_v34, %v3551_v44  ;;  %v12431_v57 = vsel %vm392_vm1, %v3709_v15, %v3711_v46  ;;  %v7734_v18 = vld [vmem:[%s15185_s0 + $0x210] sm:$0xff] }
 0x659   :  { %16712 = vst [vmem:[#allocation310_spill] sm:$0xff] %v12425_v8  ;;  %v2950_v3 = vpop.f32.mrf.mxu0  ;;  %v6728_v5 = vpack.i.bf16 %v12428_v43, %v12425_v8  ;;  %v12440_v31 = vpack.i.bf16 %v12431_v57, %v3710_v42  ;;  %v2636_v10 = vsel %vm2596_vm11, %v2571_v56, %v2028_v13  ;;  %v16716_v15 = vld [vmem:[#allocation151_spill] sm:$0xff] }
 0x65a   :  { %16713 = vst [vmem:[#allocation170_spill] sm:$0xff] %v12428_v43  ;;  %v2951_v30 = vadd.f32 %v12348_v61, %v2950_v3  ;;  %v2182_v34 = vsel %vm2141_vm3, %v7734_v18, %v16716_v15  ;;  %v16717_v46 = vld [vmem:[#allocation199_spill] sm:$0xff]  ;;  %v2030_v3 = vpop.permute.xlu2 %2029  ;;  %v16722_v18 = vld [vmem:[#allocation141_spill] sm:$0xff] }
 0x65b   :  { %6729 = vrot.lane.b32.xlu1 %v6728_v5, %s7918_s11  ;;  %v2247_v54 = vsel %vm2206_vm5, %v2182_v34, %v16717_v46  ;;  %v16721_v5 = vld [vmem:[#allocation26_spill] sm:$0xff]  ;;  %6611 = vmatmul.msk.f32.gmra.mxu3 %vm3137_vm13, %v12370_v7  ;;  %v16723_v46 = vld [vmem:[#allocation225_spill] sm:$0xff] }
 0x65c   :  { %v3096_v44 = vmax.f32 %v2951_v30, 0.0  ;;  %6569 = vmatmul.msk.f32.gmra.mxu0 %vm2667_vm10, %v2636_v10  ;;  %v2312_v53 = vsel %vm2271_vm4, %v2247_v54, %v16718_v35  ;;  %v7735_v10 = vld [vmem:[%s15185_s0 + $0x218] sm:$0xff] }
 0x65d   :  { %v2377_v13 = vsel %vm2336_vm6, %v2312_v53, %v16719_v16  ;;  %v2183_v15 = vsel %vm2141_vm3, %v7735_v10, %v16722_v18  ;;  %v12478_v53 = vpop.f32.mrf.mxu3  ;;  %v3325_v16 = vld [vmem:[#allocation2 + $0x120] sm:$0xff] }
 0x65e   :  { %3248 = vst.msk [vmem:[#allocation2 + $0x129] sm:$0xff] %vm3137_vm13, %v3096_v44  ;;  %v2442_v59 = vsel %vm2401_vm8, %v2377_v13, %v16720_v23  ;;  %v2248_v54 = vsel %vm2206_vm5, %v2183_v15, %v16723_v46  ;;  %v16725_v13 = vld [vmem:[#allocation285_spill] sm:$0xff]  ;;  %v3553_v18 = vrot.slane %v3325_v16, 1  ;;  %v16727_v15 = vld [vmem:[#allocation220_spill] sm:$0xff] }
 0x65f   :  { %v2507_v56 = vsel %vm2466_vm7, %v2442_v59, %v16721_v5  ;;  %16724 = vst [vmem:[#allocation72_spill] sm:$0xff] %v12478_v53  ;;  %v2313_v23 = vsel %vm2271_vm4, %v2248_v54, %v16725_v13  ;;  %v16728_v54 = vld [vmem:[#allocation25_spill] sm:$0xff] }
 0x660   :  { %v2572_v34 = vsel %vm2531_vm9, %v2507_v56, %v11111_v25  ;;  %v16726_v25 = vld [vmem:[#allocation338_spill] sm:$0xff] }
 0x661   :  { %v2953_v30 = vpop.f32.mrf.mxu0  ;;  %v2637_v35 = vsel %vm2596_vm11, %v2572_v34, %v2030_v3  ;;  %v2378_v5 = vsel %vm2336_vm6, %v2313_v23, %v16726_v25 }
 0x662   :  { %v2954_v44 = vadd.f32 %v12348_v61, %v2953_v30  ;;  %v3713_v30 = vrot.slane %v3325_v16, 2  ;;  %v2443_v34 = vsel %vm2401_vm8, %v2378_v5, %v16727_v15 }
 0x663   :  { %6612 = vmatmul.msk.f32.gmra.mxu3 %vm3137_vm13, %v3710_v42  ;;  %v16732_v42 = vld [vmem:[#allocation224_spill] sm:$0xff] }
 0x664   :  { %v3097_v59 = vmax.f32 %v2954_v44, 0.0  ;;  %6570 = vmatmul.msk.f32.gmra.mxu0 %vm2667_vm10, %v2637_v35  ;;  %v2508_v44 = vsel %vm2466_vm7, %v2443_v34, %v16728_v54  ;;  %v2032_v35 = vpop.permute.xlu0 %2031 }
 0x665   :  { %v3326_v7 = vld [vmem:[#allocation2 + $0x128] sm:$0xff]  ;;  %v3327_v56 = vld [vmem:[#allocation2 + $0x130] sm:$0xff] }
 0x666   :  { %3249 = vst.msk [vmem:[#allocation2 + $0x139] sm:$0xff] %vm3137_vm13, %v3097_v59  ;;  %v3714_v10 = vrot.slane %v3326_v7, 2  ;;  %v3554_v3 = vrot.slane %v3326_v7, 1  ;;  %v3556_v46 = vrot.slane %v3327_v56, 1  ;;  %v3716_v53 = vrot.slane %v3327_v56, 2  ;;  %v12519_v34 = vpop.f32.mrf.mxu3 }
 0x667   :  { %v2573_v59 = vsel %vm2531_vm9, %v2508_v44, %v11088_v28  ;;  %v7736_v28 = vld [vmem:[%s15185_s0 + $0x228] sm:$0xff]  ;;  %16733 = vst [vmem:[#allocation45_spill] sm:$0xff] %v12519_v34  ;;  %v16735_v44 = vld [vmem:[#allocation352_spill] sm:$0xff] }
 0x668   :  { %v3715_v13 = vsel %vm392_vm1, %v3713_v30, %v3714_v10  ;;  %v12492_v23 = vsel %vm231_vm0, %v3553_v18, %v3554_v3  ;;  %v12497_v16 = vsel %vm231_vm0, %v3554_v3, %v3556_v46  ;;  %v12500_v5 = vsel %vm392_vm1, %v3714_v10, %v3716_v53  ;;  %v16731_v3 = vld [vmem:[#allocation155_spill] sm:$0xff]  ;;  %v16734_v46 = vld [vmem:[#allocation17_spill] sm:$0xff] }
 0x669   :  { %16729 = vst [vmem:[#allocation60_spill] sm:$0xff] %v12492_v23  ;;  %v2956_v25 = vpop.f32.mrf.mxu0  ;;  %v6733_v56 = vpack.i.bf16 %v12497_v16, %v12492_v23  ;;  %v12507_v30 = vpack.i.bf16 %v12500_v5, %v3715_v13  ;;  %v2638_v18 = vsel %vm2596_vm11, %v2573_v59, %v2032_v35  ;;  %v2184_v53 = vsel %vm2141_vm3, %v7736_v28, %v16731_v3  ;;  %v16736_v59 = vld [vmem:[#allocation228_spill] sm:$0xff] }
 0x66a   :  { %16730 = vst [vmem:[#allocation86_spill] sm:$0xff] %v12497_v16  ;;  %v2957_v7 = vadd.f32 %v12348_v61, %v2956_v25  ;;  %v2249_v15 = vsel %vm2206_vm5, %v2184_v53, %v16732_v42  ;;  %v7737_v3 = vld [vmem:[%s15185_s0 + $0x230] sm:$0xff]  ;;  %v16738_v53 = vld [vmem:[#allocation154_spill] sm:$0xff] }
 0x66b   :  { %6734 = vrot.lane.b32.xlu2 %v6733_v56, %s7918_s11  ;;  %v2314_v54 = vsel %vm2271_vm4, %v2249_v15, %v16734_v46  ;;  %v16737_v56 = vld [vmem:[#allocation426_spill] sm:$0xff]  ;;  %v2185_v42 = vsel %vm2141_vm3, %v7737_v3, %v16738_v53  ;;  %6613 = vmatmul.msk.f32.gmra.mxu3 %vm3137_vm13, %v12431_v57  ;;  %v16741_v3 = vld [vmem:[#allocation351_spill] sm:$0xff] }
 0x66c   :  { %v3098_v10 = vmax.f32 %v2957_v7, 0.0  ;;  %6571 = vmatmul.msk.f32.gmra.mxu0 %vm2667_vm10, %v2638_v18  ;;  %v2379_v35 = vsel %vm2336_vm6, %v2314_v54, %v16735_v44  ;;  %v2034_v7 = vpop.permute.xlu1 %2033  ;;  %v16739_v54 = vld [vmem:[#allocation205_spill] sm:$0xff]  ;;  %v16778_v16 = vld [vmem:[#allocation31_spill] sm:$0xff] }
 0x66d   :  { %v2444_v25 = vsel %vm2401_vm8, %v2379_v35, %v16736_v59  ;;  %v3328_v46 = vld [vmem:[#allocation2 + $0x138] sm:$0xff]  ;;  %v2250_v44 = vsel %vm2206_vm5, %v2185_v42, %v16739_v54 }
 0x66e   :  { %3250 = vst.msk [vmem:[#allocation2 + $0x141] sm:$0xff] %vm3137_vm13, %v3098_v10  ;;  %v2509_v18 = vsel %vm2466_vm7, %v2444_v25, %v16737_v56  ;;  %v16740_v59 = vld [vmem:[#allocation289_spill] sm:$0xff]  ;;  %v3718_v53 = vrot.slane %v3328_v46, 2  ;;  %v3558_v34 = vrot.slane %v3328_v46, 1 }
 0x66f   :  { %v2574_v10 = vsel %vm2531_vm9, %v2509_v18, %v11123_v63  ;;  %v2315_v25 = vsel %vm2271_vm4, %v2250_v44, %v16740_v59  ;;  %v12548_v18 = vpop.f32.mrf.mxu3  ;;  %v2036_v44 = vpop.permute.xlu2 %2035 }
 0x670   :  { %v2639_v35 = vsel %vm2596_vm11, %v2574_v10, %v2034_v7  ;;  %v2380_v63 = vsel %vm2336_vm6, %v2315_v25, %v16741_v3  ;;  %16742 = vst [vmem:[#allocation263_spill] sm:$0xff] %v12548_v18 }
 0x671   :  { %v2959_v28 = vpop.f32.mrf.mxu0 }
 0x672   :  { %v2960_v15 = vadd.f32 %v12348_v61, %v2959_v28 }
 0x673   :  { %6614 = vmatmul.msk.f32.gmra.mxu3 %vm3137_vm13, %v3715_v13 }
 0x674   :  { %v3099_v56 = vmax.f32 %v2960_v15, 0.0  ;;  %6572 = vmatmul.msk.f32.gmra.mxu0 %vm2667_vm10, %v2639_v35  ;;  %v2445_v15 = vsel %vm2401_vm8, %v2380_v63, %v16743_v55 }
 0x675   :  { %v3329_v57 = vld [vmem:[#allocation2 + $0x140] sm:$0xff]  ;;  %v3330_v28 = vld [vmem:[#allocation2 + $0x148] sm:$0xff] }
 0x676   :  { %3251 = vst.msk [vmem:[#allocation2 + $0x151] sm:$0xff] %vm3137_vm13, %v3099_v56  ;;  %v3719_v42 = vrot.slane %v3329_v57, 2  ;;  %v3559_v54 = vrot.slane %v3329_v57, 1  ;;  %v3561_v7 = vrot.slane %v3330_v28, 1  ;;  %v3721_v10 = vrot.slane %v3330_v28, 2  ;;  %v16746_v56 = vld [vmem:[#allocation29_spill] sm:$0xff] }
 0x677   :  { %v2510_v3 = vsel %vm2466_vm7, %v2445_v15, %v16746_v56  ;;  %v16748_v15 = vld [vmem:[#allocation231_spill] sm:$0xff]  ;;  %v12584_v13 = vpop.f32.mrf.mxu3  ;;  %v16750_v56 = vld [vmem:[#allocation288_spill] sm:$0xff] }
 0x678   :  { %v3720_v35 = vsel %vm392_vm1, %v3718_v53, %v3719_v42  ;;  %v12555_v59 = vsel %vm231_vm0, %v3558_v34, %v3559_v54  ;;  %v12558_v25 = vsel %vm231_vm0, %v3559_v54, %v3561_v7  ;;  %v12561_v46 = vsel %vm392_vm1, %v3719_v42, %v3721_v10  ;;  %v7738_v42 = vld [vmem:[%s15185_s0 + $0x240] sm:$0xff]  ;;  %v16747_v54 = vld [vmem:[#allocation144_spill] sm:$0xff]  ;;  %16749 = vst [vmem:[#allocation164_spill] sm:$0xff] %v12584_v13 }
 0x679   :  { %16744 = vst [vmem:[#allocation309_spill] sm:$0xff] %v12555_v59  ;;  %v2962_v57 = vpop.f32.mrf.mxu0  ;;  %v6738_v28 = vpack.i.bf16 %v12558_v25, %v12555_v59  ;;  %v12568_v55 = vpack.i.bf16 %v12561_v46, %v3720_v35  ;;  %v2575_v34 = vsel %vm2531_vm9, %v2510_v3, %v11121_v6  ;;  %v2186_v7 = vsel %vm2141_vm3, %v7738_v42, %v16747_v54  ;;  %v16751_v3 = vld [vmem:[#allocation341_spill] sm:$0xff]  ;;  %v2038_v42 = vpop.permute.xlu0 %2037 }
 0x67a   :  { %16745 = vst [vmem:[#allocation171_spill] sm:$0xff] %v12558_v25  ;;  %v2963_v63 = vadd.f32 %v12348_v61, %v2962_v57  ;;  %v2640_v53 = vsel %vm2596_vm11, %v2575_v34, %v2036_v44  ;;  %v2251_v6 = vsel %vm2206_vm5, %v2186_v7, %v16748_v15  ;;  %v7739_v7 = vld [vmem:[%s15185_s0 + $0x248] sm:$0xff] }
 0x67b   :  { %6739 = vrot.lane.b32.xlu0 %v6738_v28, %s7918_s11  ;;  %v2316_v44 = vsel %vm2271_vm4, %v2251_v6, %v16750_v56  ;;  %v16752_v28 = vld [vmem:[#allocation226_spill] sm:$0xff]  ;;  %6615 = vmatmul.msk.f32.gmra.mxu3 %vm3137_vm13, %v12500_v5 }
 0x67c   :  { %v3100_v10 = vmax.f32 %v2963_v63, 0.0  ;;  %6573 = vmatmul.msk.f32.gmra.mxu0 %vm2667_vm10, %v2640_v53  ;;  %v2381_v57 = vsel %vm2336_vm6, %v2316_v44, %v16751_v3  ;;  %v16753_v63 = vld [vmem:[#allocation28_spill] sm:$0xff]  ;;  %v16754_v15 = vld [vmem:[#allocation158_spill] sm:$0xff] }
 0x67d   :  { %v2446_v34 = vsel %vm2401_vm8, %v2381_v57, %v16752_v28  ;;  %v2187_v6 = vsel %vm2141_vm3, %v7739_v7, %v16754_v15  ;;  %v3331_v44 = vld [vmem:[#allocation2 + $0x150] sm:$0xff]  ;;  %v16755_v3 = vld [vmem:[#allocation230_spill] sm:$0xff] }
 0x67e   :  { %3252 = vst.msk [vmem:[#allocation2 + $0x159] sm:$0xff] %vm3137_vm13, %v3100_v10  ;;  %v2511_v53 = vsel %vm2466_vm7, %v2446_v34, %v16753_v63  ;;  %v2252_v57 = vsel %vm2206_vm5, %v2187_v6, %v16755_v3  ;;  %v16756_v34 = vld [vmem:[#allocation21_spill] sm:$0xff]  ;;  %v16757_v7 = vld [vmem:[#allocation355_spill] sm:$0xff]  ;;  %v3723_v15 = vrot.slane %v3331_v44, 2  ;;  %v3563_v18 = vrot.slane %v3331_v44, 1 }
 0x67f   :  { %v2576_v10 = vsel %vm2531_vm9, %v2511_v53, %v11109_v52  ;;  %v2317_v63 = vsel %vm2271_vm4, %v2252_v57, %v16756_v34  ;;  %v12613_v53 = vpop.f32.mrf.mxu3  ;;  %v2040_v57 = vpop.permute.xlu1 %2039 }
 0x680   :  { %v2641_v28 = vsel %vm2596_vm11, %v2576_v10, %v2038_v42  ;;  %v2382_v52 = vsel %vm2336_vm6, %v2317_v63, %v16757_v7  ;;  %16758 = vst [vmem:[#allocation70_spill] sm:$0xff] %v12613_v53 }
 0x681   :  { %v2965_v54 = vpop.f32.mrf.mxu0 }
 0x682   :  { %v2966_v56 = vadd.f32 %v12348_v61, %v2965_v54 }
 0x683   :  { %6616 = vmatmul.msk.f32.gmra.mxu3 %vm3137_vm13, %v3720_v35 }
 0x684   :  { %v3101_v13 = vmax.f32 %v2966_v56, 0.0  ;;  %6574 = vmatmul.msk.f32.gmra.mxu0 %vm2667_vm10, %v2641_v28  ;;  %v2447_v56 = vsel %vm2401_vm8, %v2382_v52, %v16759_v20 }
 0x685   :  { %v3332_v5 = vld [vmem:[#allocation2 + $0x158] sm:$0xff]  ;;  %v3333_v54 = vld [vmem:[#allocation2 + $0x160] sm:$0xff] }
 0x686   :  { %3253 = vst.msk [vmem:[#allocation2 + $0x169] sm:$0xff] %vm3137_vm13, %v3101_v13  ;;  %v3724_v6 = vrot.slane %v3332_v5, 2  ;;  %v3564_v3 = vrot.slane %v3332_v5, 1  ;;  %v3566_v42 = vrot.slane %v3333_v54, 1  ;;  %v3726_v10 = vrot.slane %v3333_v54, 2  ;;  %v16762_v13 = vld [vmem:[#allocation20_spill] sm:$0xff] }
 0x687   :  { %v2512_v7 = vsel %vm2466_vm7, %v2447_v56, %v16762_v13  ;;  %v16764_v56 = vld [vmem:[#allocation211_spill] sm:$0xff]  ;;  %v12652_v35 = vpop.f32.mrf.mxu3  ;;  %v16766_v13 = vld [vmem:[#allocation292_spill] sm:$0xff] }
 0x688   :  { %v12619_v28 = vsel %vm392_vm1, %v3723_v15, %v3724_v6  ;;  %v12622_v34 = vsel %vm231_vm0, %v3563_v18, %v3564_v3  ;;  %v12625_v63 = vsel %vm231_vm0, %v3564_v3, %v3566_v42  ;;  %v12628_v44 = vsel %vm392_vm1, %v3724_v6, %v3726_v10  ;;  %v7740_v6 = vld [vmem:[%s15185_s0 + $0x258] sm:$0xff]  ;;  %16765 = vst [vmem:[#allocation83_spill] sm:$0xff] %v12652_v35 }
 0x689   :  { %16760 = vst [vmem:[#allocation169_spill] sm:$0xff] %v12622_v34  ;;  %v2968_v5 = vpop.f32.mrf.mxu0  ;;  %v6743_v20 = vpack.i.bf16 %v12625_v63, %v12622_v34  ;;  %v12636_v52 = vpack.i.bf16 %v12628_v44, %v12619_v28  ;;  %v2577_v18 = vsel %vm2531_vm9, %v2512_v7, %v11135_v49  ;;  %v16763_v3 = vld [vmem:[#allocation157_spill] sm:$0xff]  ;;  %v16767_v7 = vld [vmem:[#allocation354_spill] sm:$0xff] }
 0x68a   :  { %16761 = vst [vmem:[#allocation74_spill] sm:$0xff] %v12625_v63  ;;  %v2969_v15 = vadd.f32 %v12348_v61, %v2968_v5  ;;  %v2642_v54 = vsel %vm2596_vm11, %v2577_v18, %v2040_v57  ;;  %v2188_v42 = vsel %vm2141_vm3, %v7740_v6, %v16763_v3  ;;  %v2042_v6 = vpop.permute.xlu2 %2041 }
 0x68b   :  { %6744 = vrot.lane.b32.xlu1 %v6743_v20, %s7918_s11  ;;  %v2253_v49 = vsel %vm2206_vm5, %v2188_v42, %v16764_v56  ;;  %v16768_v20 = vld [vmem:[#allocation215_spill] sm:$0xff]  ;;  %v7741_v42 = vld [vmem:[%s15185_s0 + $0x260] sm:$0xff]  ;;  %6617 = vmatmul.msk.f32.gmra.mxu3 %vm3137_vm13, %v12561_v46 }
 0x68c   :  { %v3102_v10 = vmax.f32 %v2969_v15, 0.0  ;;  %6575 = vmatmul.msk.f32.gmra.mxu0 %vm2667_vm10, %v2642_v54  ;;  %v2318_v57 = vsel %vm2271_vm4, %v2253_v49, %v16766_v13  ;;  %v16769_v15 = vld [vmem:[#allocation32_spill] sm:$0xff]  ;;  %v16770_v56 = vld [vmem:[#allocation147_spill] sm:$0xff] }
 0x68d   :  { %v2383_v5 = vsel %vm2336_vm6, %v2318_v57, %v16767_v7  ;;  %v2189_v49 = vsel %vm2141_vm3, %v7741_v42, %v16770_v56  ;;  %v12673_v57 = vld [vmem:[#allocation2 + $0x198] sm:$0xff]  ;;  %v12675_v7 = vld [vmem:[#allocation2 + $0x1a0] sm:$0xff] }
 0x68e   :  { %3254 = vst.msk [vmem:[#allocation2 + $0x171] sm:$0xff] %vm3137_vm13, %v3102_v10  ;;  %v2448_v18 = vsel %vm2401_vm8, %v2383_v5, %v16768_v20  ;;  %v16772_v5 = vld [vmem:[#allocation237_spill] sm:$0xff]  ;;  %v3909_v42 = vrot.slane %v12673_v57, 1  ;;  %v3910_v56 = vrot.slane %v12675_v7, 1 }
 0x68f   :  { %v2513_v54 = vsel %vm2466_vm7, %v2448_v18, %v16769_v15  ;;  %16771 = vst [vmem:[#allocation262_spill] sm:$0xff] %v12673_v57  ;;  %v2254_v20 = vsel %vm2206_vm5, %v2189_v49, %v16772_v5  ;;  %v3334_v15 = vld [vmem:[#allocation2 + $0x168] sm:$0xff] }
 0x690   :  { %v2578_v10 = vsel %vm2531_vm9, %v2513_v54, %v11133_v41  ;;  %v16773_v41 = vld [vmem:[#allocation291_spill] sm:$0xff]  ;;  %v12688_v49 = vsel %vm231_vm0, %v3909_v42, %v3910_v56  ;;  %v3568_v63 = vrot.slane %v3334_v15, 1 }
 0x691   :  { %v2971_v3 = vpop.f32.mrf.mxu0  ;;  %v2643_v18 = vsel %vm2596_vm11, %v2578_v10, %v2042_v6  ;;  %v2319_v54 = vsel %vm2271_vm4, %v2254_v20, %v16773_v41  ;;  %16775 = vst [vmem:[#allocation41_spill] sm:$0xff] %v12688_v49  ;;  %v12690_v6 = vpop.f32.mrf.mxu3  ;;  %v3728_v10 = vrot.slane %v3334_v15, 2  ;;  %v16777_v20 = vld [vmem:[#allocation232_spill] sm:$0xff] }
 0x692   :  { %v2972_v13 = vadd.f32 %v12348_v61, %v2971_v3  ;;  %v16774_v3 = vld [vmem:[#allocation344_spill] sm:$0xff]  ;;  %16776 = vst [vmem:[#allocation173_spill] sm:$0xff] %v12690_v6 }
 0x693   :  { %v2384_v35 = vsel %vm2336_vm6, %v2319_v54, %v16774_v3  ;;  %v2044_v3 = vpop.permute.xlu0 %2043  ;;  %6618 = vmatmul.msk.f32.gmra.mxu3 %vm3137_vm13, %v12619_v28  ;;  %v16781_v28 = vld [vmem:[#allocation161_spill] sm:$0xff] }
 0x694   :  { %v3103_v46 = vmax.f32 %v2972_v13, 0.0  ;;  %6576 = vmatmul.msk.f32.gmra.mxu0 %vm2667_vm10, %v2643_v18  ;;  %v2449_v13 = vsel %vm2401_vm8, %v2384_v35, %v16777_v20 }
 0x695   :  { %v3335_v53 = vld [vmem:[#allocation2 + $0x170] sm:$0xff]  ;;  %v3336_v34 = vld [vmem:[#allocation2 + $0x178] sm:$0xff]  ;;  %v2514_v54 = vsel %vm2466_vm7, %v2449_v13, %v16778_v16 }
 0x696   :  { %3255 = vst.msk [vmem:[#allocation2 + $0x181] sm:$0xff] %vm3137_vm13, %v3103_v46  ;;  %v3729_v5 = vrot.slane %v3335_v53, 2  ;;  %v3569_v38 = vrot.slane %v3335_v53, 1  ;;  %v3571_v18 = vrot.slane %v3336_v34, 1  ;;  %v3731_v41 = vrot.slane %v3336_v34, 2 }
 0x697   :  { %v2579_v46 = vsel %vm2531_vm9, %v2514_v54, %v11125_v24  ;;  %v12720_v24 = vld [vmem:[#allocation2 + $0x1a8] sm:$0xff] }
 0x698   :  { %v12698_v42 = vsel %vm392_vm1, %v3728_v10, %v3729_v5  ;;  %v12701_v6 = vsel %vm231_vm0, %v3568_v63, %v3569_v38  ;;  %v12706_v53 = vsel %vm231_vm0, %v3569_v38, %v3571_v18  ;;  %v12709_v35 = vsel %vm392_vm1, %v3729_v5, %v3731_v41  ;;  %v7742_v5 = vld [vmem:[%s15185_s0 + $0x270] sm:$0xff] }
 0x699   :  { %16779 = vst [vmem:[#allocation375_spill] sm:$0xff] %v12701_v6  ;;  %v2974_v15 = vpop.f32.mrf.mxu0  ;;  %v6748_v34 = vpack.i.bf16 %v12706_v53, %v12701_v6  ;;  %v12718_v63 = vpack.i.bf16 %v12709_v35, %v12698_v42  ;;  %v2644_v38 = vsel %vm2596_vm11, %v2579_v46, %v2044_v3  ;;  %v3912_v10 = vrot.slane %v12720_v24, 1  ;;  %v16782_v18 = vld [vmem:[#allocation236_spill] sm:$0xff] }
 0x69a   :  { %16780 = vst [vmem:[#allocation93_spill] sm:$0xff] %v12706_v53  ;;  %v2975_v16 = vadd.f32 %v12348_v61, %v2974_v15  ;;  %v2190_v20 = vsel %vm2141_vm3, %v7742_v5, %v16781_v28  ;;  %v16785_v46 = vld [vmem:[#allocation24_spill] sm:$0xff]  ;;  %v16786_v53 = vld [vmem:[#allocation358_spill] sm:$0xff]  ;;  %v2046_v28 = vpop.permute.xlu1 %2045 }
 0x69b   :  { %6749 = vrot.lane.b32.xlu2 %v6748_v34, %s7918_s11  ;;  %v2255_v41 = vsel %vm2206_vm5, %v2190_v20, %v16782_v18  ;;  %v12736_v3 = vsel %vm231_vm0, %v3910_v56, %v3912_v10  ;;  %v12747_v20 = vpop.f32.mrf.mxu3  ;;  %v16789_v18 = vld [vmem:[#allocation27_spill] sm:$0xff]  ;;  %6619 = vmatmul.msk.f32.gmra.mxu3 %vm3137_vm13, %v12628_v44  ;;  %v16832_v6 = vld [vmem:[#allocation248_spill] sm:$0xff] }
 0x69c   :  { %v3104_v13 = vmax.f32 %v2975_v16, 0.0  ;;  %6577 = vmatmul.msk.f32.gmra.mxu0 %vm2667_vm10, %v2644_v38  ;;  %16784 = vst [vmem:[#allocation85_spill] sm:$0xff] %v12736_v3  ;;  %v2320_v15 = vsel %vm2271_vm4, %v2255_v41, %v16785_v46  ;;  %v16787_v38 = vld [vmem:[#allocation239_spill] sm:$0xff]  ;;  %v16790_v41 = vld [vmem:[#allocation160_spill] sm:$0xff] }
 0x69d   :  { %v12733_v54 = vld [vmem:[#allocation2 + $0x180] sm:$0xff]  ;;  %v2385_v16 = vsel %vm2336_vm6, %v2320_v15, %v16786_v53  ;;  %16788 = vst [vmem:[#allocation82_spill] sm:$0xff] %v12747_v20 }
 0x69e   :  { %16783 = vst [vmem:[#allocation79_spill] sm:$0xff] %v12733_v54  ;;  %v2450_v5 = vsel %vm2401_vm8, %v2385_v16, %v16787_v38  ;;  %v16791_v16 = vld [vmem:[#allocation217_spill] sm:$0xff]  ;;  %v3893_v44 = vrot.slane %v12733_v54, 2 }
 0x69f   :  { %3256 = vst.msk [vmem:[#allocation2 + $0x189] sm:$0xff] %vm3137_vm13, %v3104_v13  ;;  %v2515_v56 = vsel %vm2466_vm7, %v2450_v5, %v16789_v18  ;;  %v7743_v13 = vld [vmem:[%s15185_s0 + $0x278] sm:$0xff]  ;;  %v16792_v18 = vld [vmem:[#allocation295_spill] sm:$0xff] }
 0x6a0   :  { %v2191_v53 = vsel %vm2141_vm3, %v7743_v13, %v16790_v41  ;;  %v2580_v46 = vsel %vm2531_vm9, %v2515_v56, %v11148_v48  ;;  %v16793_v13 = vld [vmem:[#allocation357_spill] sm:$0xff] }
 0x6a1   :  { %v2977_v10 = vpop.f32.mrf.mxu0  ;;  %v2256_v38 = vsel %vm2206_vm5, %v2191_v53, %v16791_v16  ;;  %v2645_v5 = vsel %vm2596_vm11, %v2580_v46, %v2046_v28  ;;  %v16795_v16 = vld [vmem:[#allocation221_spill] sm:$0xff] }
 0x6a2   :  { %v2978_v15 = vadd.f32 %v12348_v61, %v2977_v10  ;;  %v2321_v34 = vsel %vm2271_vm4, %v2256_v38, %v16792_v18  ;;  %v3819_v10 = vrot.slane %v12733_v54, 1  ;;  %v2048_v18 = vpop.permute.xlu2 %2047  ;;  %v16801_v54 = vld [vmem:[#allocation97_spill] sm:$0xff] }
 0x6a3   :  { %v2386_v41 = vsel %vm2336_vm6, %v2321_v34, %v16793_v13  ;;  %v12800_v3 = vpop.f32.mrf.mxu3  ;;  %6620 = vmatmul.msk.f32.gmra.mxu3 %vm3137_vm13, %v12698_v42 }
 0x6a4   :  { %v3105_v20 = vmax.f32 %v2978_v15, 0.0  ;;  %6578 = vmatmul.msk.f32.gmra.mxu0 %vm2667_vm10, %v2645_v5  ;;  %v2451_v38 = vsel %vm2401_vm8, %v2386_v41, %v16795_v16  ;;  %v16800_v41 = vld [vmem:[#allocation36_spill] sm:$0xff]  ;;  %16802 = vst [vmem:[#allocation54_spill] sm:$0xff] %v12800_v3  ;;  %v2050_v3 = vpop.permute.xlu0 %2049 }
 0x6a5   :  { %v2516_v16 = vsel %vm2466_vm7, %v2451_v38, %v16800_v41 }
 0x6a6   :  { %v12769_v48 = vld [vmem:[#allocation2 + $0x188] sm:$0xff]  ;;  %v3339_v56 = vld [vmem:[#allocation2 + $0x190] sm:$0xff]  ;;  %3257 = vst.msk [vmem:[#allocation2 + $0x1c9] sm:$0xff] %vm3137_vm13, %v3105_v20 }
 0x6a7   :  { %16794 = vst [vmem:[#allocation249_spill] sm:$0xff] %v12769_v48  ;;  %v3894_v28 = vrot.slane %v12769_v48, 2  ;;  %v3822_v53 = vrot.slane %v3339_v56, 1  ;;  %v3896_v46 = vrot.slane %v3339_v56, 2  ;;  %v3820_v15 = vrot.slane %v12769_v48, 1  ;;  %v16808_v48 = vld [vmem:[#allocation297_spill] sm:$0xff] }
 0x6a9   :  { %v12783_v13 = vsel %vm392_vm1, %v3893_v44, %v3894_v28  ;;  %v12786_v20 = vsel %vm392_vm1, %v3894_v28, %v3896_v46  ;;  %v12789_v56 = vsel %vm231_vm0, %v3820_v15, %v3822_v53  ;;  %v12792_v49 = vsel %vm231_vm0, %v3819_v10, %v3820_v15  ;;  %v2980_v34 = vpop.f32.mrf.mxu0  ;;  %v7744_v53 = vld [vmem:[%s15185_s0 + $0x288] sm:$0xff] }
 0x6aa   :  { %16796 = vst [vmem:[#allocation313_spill] sm:$0xff] %v12783_v13  ;;  %v2581_v44 = vsel %vm2531_vm9, %v2516_v16, %v16801_v54  ;;  %v2981_v28 = vadd.f32 %v12348_v61, %v2980_v34  ;;  %v16803_v46 = vld [vmem:[#allocation150_spill] sm:$0xff]  ;;  %v16806_v34 = vld [vmem:[#allocation347_spill] sm:$0xff] }
 0x6ab   :  { %16797 = vst [vmem:[#allocation374_spill] sm:$0xff] %v12786_v20  ;;  %v2646_v10 = vsel %vm2596_vm11, %v2581_v44, %v2048_v18  ;;  %v2192_v15 = vsel %vm2141_vm3, %v7744_v53, %v16803_v46  ;;  %v16804_v54 = vld [vmem:[#allocation242_spill] sm:$0xff]  ;;  %v16809_v46 = vld [vmem:[#allocation40_spill] sm:$0xff]  ;;  %6621 = vmatmul.msk.f32.gmra.mxu3 %vm3137_vm13, %v12709_v35 }
 0x6ac   :  { %16798 = vst [vmem:[#allocation172_spill] sm:$0xff] %v12789_v56  ;;  %v3106_v38 = vmax.f32 %v2981_v28, 0.0  ;;  %6579 = vmatmul.msk.f32.gmra.mxu0 %vm2667_vm10, %v2646_v10  ;;  %v2257_v41 = vsel %vm2206_vm5, %v2192_v15, %v16804_v54  ;;  %v16805_v16 = vld [vmem:[#allocation294_spill] sm:$0xff]  ;;  %v7745_v10 = vld [vmem:[%s15185_s0 + $0x290] sm:$0xff]  ;;  %v16815_v56 = vld [vmem:[#allocation393_spill] sm:$0xff] }
 0x6ad   :  { %16799 = vst [vmem:[#allocation48_spill] sm:$0xff] %v12792_v49  ;;  %v2322_v42 = vsel %vm2271_vm4, %v2257_v41, %v16805_v16  ;;  %v16807_v44 = vld [vmem:[#allocation394_spill] sm:$0xff]  ;;  %v2193_v15 = vsel %vm2141_vm3, %v7745_v10, %v16809_v46 }
 0x6ae   :  { %3258 = vst.msk [vmem:[#allocation2 + $0x1d1] sm:$0xff] %vm3137_vm13, %v3106_v38  ;;  %v2387_v18 = vsel %vm2336_vm6, %v2322_v42, %v16806_v34  ;;  %v16810_v54 = vld [vmem:[#allocation110_spill] sm:$0xff]  ;;  %v16811_v42 = vld [vmem:[#allocation241_spill] sm:$0xff]  ;;  %v16812_v34 = vld [vmem:[#allocation284_spill] sm:$0xff] }
 0x6af   :  { %v2452_v5 = vsel %vm2401_vm8, %v2387_v18, %v16807_v44  ;;  %v3346_v16 = vld [vmem:[#allocation2 + $0x1c8] sm:$0xff]  ;;  %v12838_v44 = vpop.f32.mrf.mxu3 }
 0x6b0   :  { %v2517_v28 = vsel %vm2466_vm7, %v2452_v5, %v16808_v48  ;;  %v2258_v48 = vsel %vm2206_vm5, %v2193_v15, %v16811_v42  ;;  %16813 = vst [vmem:[#allocation266_spill] sm:$0xff] %v12838_v44  ;;  %v3738_v49 = vrot.slane %v3346_v16, 2 }
 0x6b1   :  { %v2983_v53 = vpop.f32.mrf.mxu0  ;;  %v2582_v38 = vsel %vm2531_vm9, %v2517_v28, %v16810_v54  ;;  %v2323_v18 = vsel %vm2271_vm4, %v2258_v48, %v16812_v34  ;;  %v16814_v28 = vld [vmem:[#allocation362_spill] sm:$0xff]  ;;  %v2052_v34 = vpop.permute.xlu1 %2051 }
 0x6b2   :  { %v2984_v41 = vadd.f32 %v12348_v61, %v2983_v53  ;;  %v2647_v5 = vsel %vm2596_vm11, %v2582_v38, %v2050_v3  ;;  %v2388_v46 = vsel %vm2336_vm6, %v2323_v18, %v16814_v28  ;;  %v3578_v53 = vrot.slane %v3346_v16, 1  ;;  %v16818_v28 = vld [vmem:[#allocation30_spill] sm:$0xff] }
 0x6b3   :  { %v2453_v48 = vsel %vm2401_vm8, %v2388_v46, %v16815_v56  ;;  %v16819_v56 = vld [vmem:[#allocation108_spill] sm:$0xff]  ;;  %6622 = vmatmul.msk.f32.gmra.mxu3 %vm3137_vm13, %v12783_v13 }
 0x6b4   :  { %v3107_v10 = vmax.f32 %v2984_v41, 0.0  ;;  %6580 = vmatmul.msk.f32.gmra.mxu0 %vm2667_vm10, %v2647_v5 }
 0x6b5   :  { %v3347_v35 = vld [vmem:[#allocation2 + $0x1d0] sm:$0xff]  ;;  %v3348_v54 = vld [vmem:[#allocation2 + $0x1d8] sm:$0xff] }
 0x6b6   :  { %3259 = vst.msk [vmem:[#allocation2 + $0x1e1] sm:$0xff] %vm3137_vm13, %v3107_v10  ;;  %v3579_v15 = vrot.slane %v3347_v35, 1  ;;  %v3581_v42 = vrot.slane %v3348_v54, 1  ;;  %v3739_v3 = vrot.slane %v3347_v35, 2  ;;  %v3741_v38 = vrot.slane %v3348_v54, 2 }
 0x6b7   :  { %v2518_v10 = vsel %vm2466_vm7, %v2453_v48, %v16818_v28  ;;  %v16823_v28 = vld [vmem:[#allocation361_spill] sm:$0xff] }
 0x6b8   :  { %v12847_v41 = vsel %vm231_vm0, %v3578_v53, %v3579_v15  ;;  %v12850_v5 = vsel %vm231_vm0, %v3579_v15, %v3581_v42  ;;  %v3740_v18 = vsel %vm392_vm1, %v3738_v49, %v3739_v3  ;;  %v3742_v16 = vsel %vm392_vm1, %v3739_v3, %v3741_v38  ;;  %v7746_v49 = vld [vmem:[%s15185_s0 + $0x2a0] sm:$0xff]  ;;  %v16820_v15 = vld [vmem:[#allocation35_spill] sm:$0xff] }
 0x6b9   :  { %16816 = vst [vmem:[#allocation312_spill] sm:$0xff] %v12847_v41  ;;  %v2986_v44 = vpop.f32.mrf.mxu0  ;;  %v6758_v35 = vpack.i.bf16 %v12850_v5, %v12847_v41  ;;  %v12858_v54 = vpack.i.bf16 %v3742_v16, %v3740_v18  ;;  %v2583_v46 = vsel %vm2531_vm9, %v2518_v10, %v16819_v56  ;;  %v2194_v42 = vsel %vm2141_vm3, %v7746_v49, %v16820_v15  ;;  %v16821_v38 = vld [vmem:[#allocation223_spill] sm:$0xff]  ;;  %v12879_v56 = vpop.f32.mrf.mxu3 }
 0x6ba   :  { %16817 = vst [vmem:[#allocation364_spill] sm:$0xff] %v12850_v5  ;;  %v2987_v53 = vadd.f32 %v12348_v61, %v2986_v44  ;;  %v2648_v3 = vsel %vm2596_vm11, %v2583_v46, %v2052_v34  ;;  %v2259_v48 = vsel %vm2206_vm5, %v2194_v42, %v16821_v38  ;;  %v16822_v16 = vld [vmem:[#allocation299_spill] sm:$0xff]  ;;  %v16827_v42 = vld [vmem:[#allocation432_spill] sm:$0xff]  ;;  %v16828_v38 = vld [vmem:[#allocation245_spill] sm:$0xff] }
 0x6bb   :  { %6759 = vrot.lane.b32.xlu1 %v6758_v35, %s7918_s11  ;;  %v2324_v44 = vsel %vm2271_vm4, %v2259_v48, %v16822_v16  ;;  %16824 = vst [vmem:[#allocation100_spill] sm:$0xff] %v12879_v56  ;;  %v16825_v49 = vld [vmem:[#allocation227_spill] sm:$0xff]  ;;  %v2054_v35 = vpop.permute.xlu2 %2053  ;;  %v16829_v16 = vld [vmem:[#allocation120_spill] sm:$0xff]  ;;  %6623 = vmatmul.msk.f32.gmra.mxu3 %vm3137_vm13, %v12786_v20  ;;  %v16831_v56 = vld [vmem:[#allocation350_spill] sm:$0xff] }
 0x6bc   :  { %v3108_v18 = vmax.f32 %v2987_v53, 0.0  ;;  %6581 = vmatmul.msk.f32.gmra.mxu0 %vm2667_vm10, %v2648_v3  ;;  %v2389_v10 = vsel %vm2336_vm6, %v2324_v44, %v16823_v28  ;;  %v7747_v46 = vld [vmem:[%s15185_s0 + $0x2a8] sm:$0xff]  ;;  %v16826_v53 = vld [vmem:[#allocation153_spill] sm:$0xff] }
 0x6bd   :  { %v2454_v34 = vsel %vm2401_vm8, %v2389_v10, %v16825_v49  ;;  %v2195_v15 = vsel %vm2141_vm3, %v7747_v46, %v16826_v53  ;;  %v3349_v28 = vld [vmem:[#allocation2 + $0x1e0] sm:$0xff]  ;;  %v3919_v46 = vrot.slane %v12673_v57, 2  ;;  %v3343_v53 = vld [vmem:[#allocation2 + $0x1b0] sm:$0xff] }
 0x6be   :  { %3260 = vst.msk [vmem:[#allocation2 + $0x1e9] sm:$0xff] %vm3137_vm13, %v3108_v18  ;;  %v2519_v3 = vsel %vm2466_vm7, %v2454_v34, %v16827_v42  ;;  %v2260_v48 = vsel %vm2206_vm5, %v2195_v15, %v16828_v38  ;;  %v16830_v10 = vld [vmem:[#allocation298_spill] sm:$0xff]  ;;  %v3344_v42 = vld [vmem:[#allocation2 + $0x1b8] sm:$0xff]  ;;  %v3920_v38 = vrot.slane %v12675_v7, 2  ;;  %v3583_v57 = vrot.slane %v3349_v28, 1 }
 0x6bf   :  { %v2584_v18 = vsel %vm2531_vm9, %v2519_v3, %v16829_v16  ;;  %v2325_v49 = vsel %vm2271_vm4, %v2260_v48, %v16830_v10  ;;  %v3345_v15 = vld [vmem:[#allocation2 + $0x1c0] sm:$0xff]  ;;  %v3573_v3 = vrot.slane %v3343_v53, 1  ;;  %v3574_v16 = vrot.slane %v3344_v42, 1 }
 0x6c0   :  { %v2649_v5 = vsel %vm2596_vm11, %v2584_v18, %v2054_v35  ;;  %v3576_v41 = vrot.slane %v3345_v15, 1  ;;  %v2390_v48 = vsel %vm2336_vm6, %v2325_v49, %v16831_v56  ;;  %v3743_v18 = vrot.slane %v3349_v28, 2 }
 0x6c1   :  { %v2989_v44 = vpop.f32.mrf.mxu0  ;;  %v2455_v56 = vsel %vm2401_vm8, %v2390_v48, %v16832_v6  ;;  %v3921_v49 = vsel %vm392_vm1, %v3919_v46, %v3920_v38  ;;  %v12912_v59 = vpop.f32.mrf.mxu3 }
 0x6c2   :  { %v2990_v34 = vadd.f32 %v12348_v61, %v2989_v44  ;;  %v3575_v44 = vsel %vm231_vm0, %v3573_v3, %v3574_v16  ;;  %v3577_v20 = vsel %vm231_vm0, %v3574_v16, %v3576_v41  ;;  %16833 = vst [vmem:[#allocation56_spill] sm:$0xff] %v12912_v59 }
 0x6c3   :  { %6624 = vmatmul.msk.f32.gmra.mxu3 %vm3137_vm13, %v3921_v49 }
 0x6c4   :  { %v3109_v10 = vmax.f32 %v2990_v34, 0.0  ;;  %6582 = vmatmul.msk.f32.gmra.mxu0 %vm2667_vm10, %v2649_v5  ;;  %v6753_v5 = vpack.i.bf16 %v3577_v20, %v3575_v44  ;;  %v2056_v34 = vpop.permute.xlu0 %2055  ;;  %v3922_v44 = vrot.slane %v12720_v24, 2  ;;  %v16841_v24 = vld [vmem:[#allocation363_spill] sm:$0xff] }
 0x6c5   :  { %v3350_v35 = vld [vmem:[#allocation2 + $0x1e8] sm:$0xff]  ;;  %v3351_v13 = vld [vmem:[#allocation2 + $0x1f0] sm:$0xff] }
 0x6c6   :  { %3261 = vst.msk [vmem:[#allocation2 + $0x1f9] sm:$0xff] %vm3137_vm13, %v3109_v10  ;;  %v3744_v7 = vrot.slane %v3350_v35, 2  ;;  %v3584_v53 = vrot.slane %v3350_v35, 1  ;;  %v3586_v42 = vrot.slane %v3351_v13, 1  ;;  %v3746_v15 = vrot.slane %v3351_v13, 2  ;;  %v16836_v13 = vld [vmem:[#allocation431_spill] sm:$0xff]  ;;  %6754 = vrot.lane.b32.xlu0 %v6753_v5, %s7918_s11 }
 0x6c7   :  { %v2520_v6 = vsel %vm2466_vm7, %v2455_v56, %v16836_v13  ;;  %v16839_v56 = vld [vmem:[#allocation244_spill] sm:$0xff]  ;;  %v16840_v5 = vld [vmem:[#allocation287_spill] sm:$0xff] }
 0x6c8   :  { %v3745_v28 = vsel %vm392_vm1, %v3743_v18, %v3744_v7  ;;  %v12916_v3 = vsel %vm231_vm0, %v3583_v57, %v3584_v53  ;;  %v12919_v41 = vsel %vm231_vm0, %v3584_v53, %v3586_v42  ;;  %v12922_v16 = vsel %vm392_vm1, %v3744_v7, %v3746_v15  ;;  %v16837_v57 = vld [vmem:[#allocation98_spill] sm:$0xff]  ;;  %v7748_v7 = vld [vmem:[%s15185_s0 + $0x2b8] sm:$0xff]  ;;  %v16838_v53 = vld [vmem:[#allocation47_spill] sm:$0xff] }
 0x6c9   :  { %16834 = vst [vmem:[#allocation80_spill] sm:$0xff] %v12916_v3  ;;  %v2992_v48 = vpop.f32.mrf.mxu0  ;;  %v6763_v20 = vpack.i.bf16 %v12919_v41, %v12916_v3  ;;  %v12929_v46 = vpack.i.bf16 %v12922_v16, %v3745_v28  ;;  %v2585_v10 = vsel %vm2531_vm9, %v2520_v6, %v16837_v57  ;;  %v2196_v42 = vsel %vm2141_vm3, %v7748_v7, %v16838_v53  ;;  %v2058_v57 = vpop.permute.xlu1 %2057  ;;  %v7749_v7 = vld [vmem:[%s15185_s0 + $0x2c0] sm:$0xff] }
 0x6ca   :  { %16835 = vst [vmem:[#allocation265_spill] sm:$0xff] %v12919_v41  ;;  %v2993_v35 = vadd.f32 %v12348_v61, %v2992_v48  ;;  %v2650_v18 = vsel %vm2596_vm11, %v2585_v10, %v2056_v34  ;;  %v2261_v49 = vsel %vm2206_vm5, %v2196_v42, %v16839_v56  ;;  %v3923_v6 = vsel %vm392_vm1, %v3920_v38, %v3922_v44  ;;  %v16842_v48 = vld [vmem:[#allocation247_spill] sm:$0xff]  ;;  %v16843_v10 = vld [vmem:[#allocation33_spill] sm:$0xff]  ;;  %v16844_v53 = vld [vmem:[#allocation46_spill] sm:$0xff] }
 0x6cb   :  { %6764 = vrot.lane.b32.xlu2 %v6763_v20, %s7918_s11  ;;  %v2326_v34 = vsel %vm2271_vm4, %v2261_v49, %v16840_v5  ;;  %v2197_v42 = vsel %vm2141_vm3, %v7749_v7, %v16844_v53  ;;  %v12964_v49 = vpop.f32.mrf.mxu3  ;;  %6625 = vmatmul.msk.f32.gmra.mxu3 %vm3137_vm13, %v3923_v6  ;;  %v16847_v5 = vld [vmem:[#allocation229_spill] sm:$0xff] }
 0x6cc   :  { %v3110_v15 = vmax.f32 %v2993_v35, 0.0  ;;  %6583 = vmatmul.msk.f32.gmra.mxu0 %vm2667_vm10, %v2650_v18  ;;  %v2391_v13 = vsel %vm2336_vm6, %v2326_v34, %v16841_v24  ;;  %16846 = vst [vmem:[#allocation302_spill] sm:$0xff] %v12964_v49  ;;  %v2262_v34 = vsel %vm2206_vm5, %v2197_v42, %v16847_v5 }
 0x6cd   :  { %v2456_v20 = vsel %vm2401_vm8, %v2391_v13, %v16842_v48  ;;  %v3352_v44 = vld [vmem:[#allocation2 + $0x1f8] sm:$0xff] }
 0x6ce   :  { %3262 = vst.msk [vmem:[#allocation2 + $0x201] sm:$0xff] %vm3137_vm13, %v3110_v15  ;;  %v2521_v35 = vsel %vm2466_vm7, %v2456_v20, %v16843_v10  ;;  %v16845_v15 = vld [vmem:[#allocation118_spill] sm:$0xff]  ;;  %v16848_v13 = vld [vmem:[#allocation301_spill] sm:$0xff]  ;;  %v3748_v53 = vrot.slane %v3352_v44, 2 }
 0x6cf   :  { %v2586_v56 = vsel %vm2531_vm9, %v2521_v35, %v16845_v15  ;;  %v2327_v48 = vsel %vm2271_vm4, %v2262_v34, %v16848_v13  ;;  %v16849_v10 = vld [vmem:[#allocation34_spill] sm:$0xff]  ;;  %v3588_v15 = vrot.slane %v3352_v44, 1  ;;  %v2060_v34 = vpop.permute.xlu2 %2059 }
 0x6d0   :  { %v2651_v24 = vsel %vm2596_vm11, %v2586_v56, %v2058_v57  ;;  %v2392_v35 = vsel %vm2336_vm6, %v2327_v48, %v16849_v10  ;;  %v16850_v57 = vld [vmem:[#allocation233_spill] sm:$0xff] }
 0x6d1   :  { %v2995_v18 = vpop.f32.mrf.mxu0  ;;  %v2457_v56 = vsel %vm2401_vm8, %v2392_v35, %v16850_v57  ;;  %v16853_v48 = vld [vmem:[#allocation49_spill] sm:$0xff] }
 0x6d2   :  { %v2996_v38 = vadd.f32 %v12348_v61, %v2995_v18 }
 0x6d3   :  { %6626 = vmatmul.msk.f32.gmra.mxu3 %vm3137_vm13, %v3745_v28  ;;  %v13007_v57 = vpop.f32.mrf.mxu3 }
 0x6d4   :  { %v3111_v20 = vmax.f32 %v2996_v38, 0.0  ;;  %6584 = vmatmul.msk.f32.gmra.mxu0 %vm2667_vm10, %v2651_v24  ;;  %16856 = vst [vmem:[#allocation177_spill] sm:$0xff] %v13007_v57 }
 0x6d5   :  { %v3353_v7 = vld [vmem:[#allocation2 + $0x200] sm:$0xff]  ;;  %v3354_v6 = vld [vmem:[#allocation2 + $0x208] sm:$0xff] }
 0x6d6   :  { %3263 = vst.msk [vmem:[#allocation2 + $0x211] sm:$0xff] %vm3137_vm13, %v3111_v20  ;;  %v3749_v18 = vrot.slane %v3353_v7, 2  ;;  %v3589_v49 = vrot.slane %v3353_v7, 1  ;;  %v3591_v42 = vrot.slane %v3354_v6, 1  ;;  %v3751_v5 = vrot.slane %v3354_v6, 2 }
 0x6d7   :  { %v2522_v20 = vsel %vm2466_vm7, %v2457_v56, %v16853_v48  ;;  %v16857_v48 = vld [vmem:[#allocation251_spill] sm:$0xff] }
 0x6d8   :  { %v3750_v38 = vsel %vm392_vm1, %v3748_v53, %v3749_v18  ;;  %v12981_v24 = vsel %vm231_vm0, %v3588_v15, %v3589_v49  ;;  %v12984_v13 = vsel %vm231_vm0, %v3589_v49, %v3591_v42  ;;  %v12987_v44 = vsel %vm392_vm1, %v3749_v18, %v3751_v5  ;;  %v16854_v53 = vld [vmem:[#allocation128_spill] sm:$0xff] }
 0x6d9   :  { %16851 = vst [vmem:[#allocation181_spill] sm:$0xff] %v12981_v24  ;;  %v2998_v10 = vpop.f32.mrf.mxu0  ;;  %v6768_v7 = vpack.i.bf16 %v12984_v13, %v12981_v24  ;;  %v12994_v35 = vpack.i.bf16 %v12987_v44, %v3750_v38  ;;  %v2587_v6 = vsel %vm2531_vm9, %v2522_v20, %v16854_v53  ;;  %v7750_v18 = vld [vmem:[%s15185_s0 + $0x2d0] sm:$0xff]  ;;  %v16860_v53 = vld [vmem:[#allocation254_spill] sm:$0xff] }
 0x6da   :  { %16852 = vst [vmem:[#allocation378_spill] sm:$0xff] %v12984_v13  ;;  %v2999_v49 = vadd.f32 %v12348_v61, %v2998_v10  ;;  %v2652_v15 = vsel %vm2596_vm11, %v2587_v6, %v2060_v34  ;;  %v16855_v42 = vld [vmem:[#allocation156_spill] sm:$0xff]  ;;  %v16859_v10 = vld [vmem:[#allocation353_spill] sm:$0xff] }
 0x6db   :  { %6769 = vrot.lane.b32.xlu0 %v6768_v7, %s7918_s11  ;;  %v2198_v5 = vsel %vm2141_vm3, %v7750_v18, %v16855_v42  ;;  %v16858_v20 = vld [vmem:[#allocation300_spill] sm:$0xff]  ;;  %v2062_v18 = vpop.permute.xlu0 %2061  ;;  %v16861_v42 = vld [vmem:[#allocation59_spill] sm:$0xff]  ;;  %6627 = vmatmul.msk.f32.gmra.mxu3 %vm3137_vm13, %v12922_v16 }
 0x6dc   :  { %v3112_v56 = vmax.f32 %v2999_v49, 0.0  ;;  %6585 = vmatmul.msk.f32.gmra.mxu0 %vm2667_vm10, %v2652_v15  ;;  %v2263_v28 = vsel %vm2206_vm5, %v2198_v5, %v16857_v48  ;;  %v7751_v15 = vld [vmem:[%s15185_s0 + $0x2d8] sm:$0xff] }
 0x6dd   :  { %v2328_v34 = vsel %vm2271_vm4, %v2263_v28, %v16858_v20  ;;  %v16862_v5 = vld [vmem:[#allocation44_spill] sm:$0xff]  ;;  %v16863_v28 = vld [vmem:[#allocation109_spill] sm:$0xff] }
 0x6de   :  { %3264 = vst.msk [vmem:[#allocation2 + $0x219] sm:$0xff] %vm3137_vm13, %v3112_v56  ;;  %v2393_v7 = vsel %vm2336_vm6, %v2328_v34, %v16859_v10  ;;  %v2199_v48 = vsel %vm2141_vm3, %v7751_v15, %v16862_v5  ;;  %v3355_v34 = vld [vmem:[#allocation2 + $0x210] sm:$0xff]  ;;  %v16864_v10 = vld [vmem:[#allocation250_spill] sm:$0xff] }
 0x6df   :  { %v2458_v6 = vsel %vm2401_vm8, %v2393_v7, %v16860_v53  ;;  %v2264_v7 = vsel %vm2206_vm5, %v2199_v48, %v16864_v10  ;;  %v16866_v15 = vld [vmem:[#allocation366_spill] sm:$0xff]  ;;  %v3593_v41 = vrot.slane %v3355_v34, 1  ;;  %v16868_v10 = vld [vmem:[#allocation253_spill] sm:$0xff] }
 0x6e0   :  { %v2523_v49 = vsel %vm2466_vm7, %v2458_v6, %v16861_v42  ;;  %v16865_v6 = vld [vmem:[#allocation290_spill] sm:$0xff] }
 0x6e1   :  { %v3001_v57 = vpop.f32.mrf.mxu0  ;;  %v2588_v56 = vsel %vm2531_vm9, %v2523_v49, %v16863_v28  ;;  %v2329_v42 = vsel %vm2271_vm4, %v2264_v7, %v16865_v6  ;;  %v3753_v28 = vrot.slane %v3355_v34, 2  ;;  %v2064_v7 = vpop.permute.xlu1 %2063 }
 0x6e2   :  { %v3002_v20 = vadd.f32 %v12348_v61, %v3001_v57  ;;  %v2653_v53 = vsel %vm2596_vm11, %v2588_v56, %v2062_v18  ;;  %v2394_v49 = vsel %vm2336_vm6, %v2329_v42, %v16866_v15  ;;  %v13039_v61 = vpop.f32.mrf.mxu3 }
 0x6e3   :  { %16867 = vst [vmem:[#allocation178_spill] sm:$0xff] %v13039_v61  ;;  %6628 = vmatmul.msk.f32.gmra.mxu3 %vm3137_vm13, %v3750_v38  ;;  %v16875_v38 = vld [vmem:[#allocation235_spill] sm:$0xff] }
 0x6e4   :  { %v3113_v59 = vmax.f32 %v3002_v20, 0.0  ;;  %6586 = vmatmul.msk.f32.gmra.mxu0 %vm2667_vm10, %v2653_v53  ;;  %v2459_v20 = vsel %vm2401_vm8, %v2394_v49, %v16868_v10  ;;  %v16874_v10 = vld [vmem:[#allocation52_spill] sm:$0xff] }
 0x6e5   :  { %v3356_v5 = vld [vmem:[#allocation2 + $0x218] sm:$0xff]  ;;  %v3357_v16 = vld [vmem:[#allocation2 + $0x220] sm:$0xff] }
 0x6e6   :  { %3265 = vst.msk [vmem:[#allocation2 + $0x229] sm:$0xff] %vm3137_vm13, %v3113_v59  ;;  %v3754_v57 = vrot.slane %v3356_v5, 2  ;;  %v3594_v48 = vrot.slane %v3356_v5, 1  ;;  %v3596_v18 = vrot.slane %v3357_v16, 1  ;;  %v3756_v56 = vrot.slane %v3357_v16, 2  ;;  %v16871_v59 = vld [vmem:[#allocation37_spill] sm:$0xff] }
 0x6e7   :  { %v2524_v15 = vsel %vm2466_vm7, %v2459_v20, %v16871_v59 }
 0x6e8   :  { %v3755_v53 = vsel %vm392_vm1, %v3753_v28, %v3754_v57  ;;  %v13046_v6 = vsel %vm231_vm0, %v3593_v41, %v3594_v48  ;;  %v13049_v42 = vsel %vm231_vm0, %v3594_v48, %v3596_v18  ;;  %v13052_v34 = vsel %vm392_vm1, %v3754_v57, %v3756_v56  ;;  %v16873_v28 = vld [vmem:[#allocation127_spill] sm:$0xff]  ;;  %v13067_v57 = vld [vmem:[%s15187_s2] ss:$0 sm:$0xff]  ;;  %s7922_s2 = smov [#allocation3]  }
 0x6e9   :  { %16869 = vst [vmem:[#allocation401_spill] sm:$0xff] %v13046_v6  ;;  %v3004_v5 = vpop.f32.mrf.mxu0  ;;  %v6773_v16 = vpack.i.bf16 %v13049_v42, %v13046_v6  ;;  %v13059_v49 = vpack.i.bf16 %v13052_v34, %v3755_v53  ;;  %v2589_v41 = vsel %vm2531_vm9, %v2524_v15, %v16873_v28  ;;  %v7753_v56 = vld [vmem:[%s15185_s0 + $0x2e8] sm:$0xff]  ;;  %v16876_v28 = vld [vmem:[#allocation304_spill] sm:$0xff]  ;;  %v2066_v6 = vpop.permute.xlu2 %2065  ;;  %s6518_s30 = sshll.u32 %s7922_s2, 4  ;;  %s6519_s30 = int_to_ptr.vmem [resolvable:$true] %s6518_s30 }
 0x6ea   :  { %16870 = vst [vmem:[#allocation96_spill] sm:$0xff] %v13049_v42  ;;  %v3005_v48 = vadd.f32 %v13067_v57, %v3004_v5  ;;  %v2654_v18 = vsel %vm2596_vm11, %v2589_v41, %v2064_v7  ;;  %v2200_v20 = vsel %vm2141_vm3, %v7753_v56, %v16874_v10  ;;  %v16877_v7 = vld [vmem:[#allocation365_spill] sm:$0xff]  ;;  %v16878_v41 = vld [vmem:[#allocation238_spill] sm:$0xff]  ;;  %v13087_v42 = vpop.f32.mrf.mxu3  ;;  %v7754_v10 = vld [vmem:[%s15185_s0 + $0x2f0] sm:$0xff] }
 0x6eb   :  { %16872 = vst [vmem:[#allocation90_spill] sm:$0xff] %v13059_v49  ;;  %6774 = vrot.lane.b32.xlu1 %v6773_v16, %s7918_s11  ;;  %v2265_v15 = vsel %vm2206_vm5, %v2200_v20, %v16875_v38  ;;  %v16881_v20 = vld [vmem:[#allocation159_spill] sm:$0xff]  ;;  %6629 = vmatmul.msk.f32.gmra.mxu3 %vm3137_vm13, %v12987_v44 }
 0x6ec   :  { %v3114_v59 = vmax.f32 %v3005_v48, 0.0  ;;  %6587 = vmatmul.msk.f32.gmra.mxu0 %vm2667_vm10, %v2654_v18  ;;  %v2330_v5 = vsel %vm2271_vm4, %v2265_v15, %v16876_v28  ;;  %16879 = vst [vmem:[#allocation255_spill] sm:$0xff] %v13087_v42  ;;  %v16880_v48 = vld [vmem:[#allocation68_spill] sm:$0xff]  ;;  %v16882_v38 = vld [vmem:[#allocation119_spill] sm:$0xff] }
 0x6ed   :  { %v2395_v16 = vsel %vm2336_vm6, %v2330_v5, %v16877_v7  ;;  %v3358_v5 = vld [vmem:[#allocation2 + $0x228] sm:$0xff]  ;;  %v16883_v7 = vld [vmem:[#allocation257_spill] sm:$0xff] }
 0x6ee   :  { %3266 = vst.msk [vmem:[#allocation2 + $0x231] sm:$0xff] %vm3137_vm13, %v3114_v59  ;;  %v2460_v61 = vsel %vm2401_vm8, %v2395_v16, %v16878_v41  ;;  %v2201_v59 = vsel %vm2141_vm3, %v7754_v10, %v16881_v20  ;;  %v16884_v41 = vld [vmem:[#allocation303_spill] sm:$0xff]  ;;  %v16885_v10 = vld [vmem:[#allocation356_spill] sm:$0xff]  ;;  %v3598_v24 = vrot.slane %v3358_v5, 1 }
 0x6ef   :  { %v2525_v18 = vsel %vm2466_vm7, %v2460_v61, %v16880_v48  ;;  %v2266_v61 = vsel %vm2206_vm5, %v2201_v59, %v16883_v7 }
 0x6f0   :  { %v2590_v15 = vsel %vm2531_vm9, %v2525_v18, %v16882_v38  ;;  %v2331_v48 = vsel %vm2271_vm4, %v2266_v61, %v16884_v41  ;;  %v3758_v38 = vrot.slane %v3358_v5, 2  ;;  %v2068_v61 = vpop.permute.xlu0 %2067 }
 0x6f1   :  { %v3007_v56 = vpop.f32.mrf.mxu0  ;;  %v2655_v16 = vsel %vm2596_vm11, %v2590_v15, %v2066_v6  ;;  %v2396_v18 = vsel %vm2336_vm6, %v2331_v48, %v16885_v10  ;;  %v16886_v6 = vld [vmem:[#allocation395_spill] sm:$0xff] }
 0x6f2   :  { %v3008_v28 = vadd.f32 %v13067_v57, %v3007_v56  ;;  %v2461_v15 = vsel %vm2401_vm8, %v2396_v18, %v16886_v6 }
 0x6f3   :  { %6630 = vmatmul.msk.f32.gmra.mxu3 %vm3137_vm13, %v3755_v53  ;;  %v16895_v53 = vld [vmem:[#allocation293_spill] sm:$0xff] }
 0x6f4   :  { %v3115_v42 = vmax.f32 %v3008_v28, 0.0  ;;  %6588 = vmatmul.msk.f32.gmra.mxu0 %vm2667_vm10, %v2655_v16 }
 0x6f5   :  { %v3359_v20 = vld [vmem:[#allocation2 + $0x230] sm:$0xff]  ;;  %v3360_v44 = vld [vmem:[#allocation2 + $0x238] sm:$0xff] }
 0x6f6   :  { %3267 = vst.msk [vmem:[#allocation2 + $0x241] sm:$0xff] %vm3137_vm13, %v3115_v42  ;;  %v3759_v56 = vrot.slane %v3359_v20, 2  ;;  %v3599_v13 = vrot.slane %v3359_v20, 1  ;;  %v3601_v59 = vrot.slane %v3360_v44, 1  ;;  %v3761_v7 = vrot.slane %v3360_v44, 2  ;;  %v16890_v42 = vld [vmem:[#allocation50_spill] sm:$0xff]  ;;  %v13132_v44 = vpop.f32.mrf.mxu3  ;;  %v2070_v20 = vpop.permute.xlu1 %2069 }
 0x6f7   :  { %v2526_v48 = vsel %vm2466_vm7, %v2461_v15, %v16890_v42  ;;  %16892 = vst [vmem:[#allocation389_spill] sm:$0xff] %v13132_v44  ;;  %v16894_v42 = vld [vmem:[#allocation256_spill] sm:$0xff] }
 0x6f8   :  { %v13113_v28 = vsel %vm392_vm1, %v3758_v38, %v3759_v56  ;;  %v13116_v16 = vsel %vm231_vm0, %v3598_v24, %v3599_v13  ;;  %v13119_v41 = vsel %vm231_vm0, %v3599_v13, %v3601_v59  ;;  %v13122_v5 = vsel %vm392_vm1, %v3759_v56, %v3761_v7  ;;  %v16891_v38 = vld [vmem:[#allocation326_spill] sm:$0xff]  ;;  %v16893_v7 = vld [vmem:[#allocation64_spill] sm:$0xff] }
 0x6f9   :  { %16887 = vst [vmem:[#allocation316_spill] sm:$0xff] %v13116_v16  ;;  %v3010_v10 = vpop.f32.mrf.mxu0  ;;  %v6778_v18 = vpack.i.bf16 %v13119_v41, %v13116_v16  ;;  %v2591_v24 = vsel %vm2531_vm9, %v2526_v48, %v16891_v38  ;;  %v7755_v59 = vld [vmem:[%s15185_s0 + $0x300] sm:$0xff]  ;;  %v16897_v38 = vld [vmem:[#allocation252_spill] sm:$0xff] }
 0x6fa   :  { %16888 = vst [vmem:[#allocation388_spill] sm:$0xff] %v13119_v41  ;;  %v3011_v13 = vadd.f32 %v13067_v57, %v3010_v10  ;;  %v2656_v56 = vsel %vm2596_vm11, %v2591_v24, %v2068_v61  ;;  %v2202_v6 = vsel %vm2141_vm3, %v7755_v59, %v16893_v7  ;;  %v16896_v61 = vld [vmem:[#allocation369_spill] sm:$0xff]  ;;  %v16898_v44 = vld [vmem:[#allocation296_spill] sm:$0xff]  ;;  %v16899_v7 = vld [vmem:[#allocation63_spill] sm:$0xff] }
 0x6fb   :  { %16889 = vst [vmem:[#allocation377_spill] sm:$0xff] %v13122_v5  ;;  %6779 = vrot.lane.b32.xlu2 %v6778_v18, %s7918_s11  ;;  %v2267_v48 = vsel %vm2206_vm5, %v2202_v6, %v16894_v42  ;;  %v16900_v42 = vld [vmem:[#allocation359_spill] sm:$0xff]  ;;  %6631 = vmatmul.msk.f32.gmra.mxu3 %vm3137_vm13, %v13052_v34  ;;  %v16905_v16 = vld [vmem:[#allocation392_spill] sm:$0xff] }
 0x6fc   :  { %v3116_v15 = vmax.f32 %v3011_v13, 0.0  ;;  %6589 = vmatmul.msk.f32.gmra.mxu0 %vm2667_vm10, %v2656_v56  ;;  %v2332_v10 = vsel %vm2271_vm4, %v2267_v48, %v16895_v53  ;;  %v7756_v56 = vld [vmem:[%s15185_s0 + $0x308] sm:$0xff] }
 0x6fd   :  { %v2397_v18 = vsel %vm2336_vm6, %v2332_v10, %v16896_v61  ;;  %v2203_v6 = vsel %vm2141_vm3, %v7756_v56, %v16899_v7  ;;  %v3361_v53 = vld [vmem:[#allocation2 + $0x240] sm:$0xff]  ;;  %v16901_v10 = vld [vmem:[#allocation240_spill] sm:$0xff] }
 0x6fe   :  { %3268 = vst.msk [vmem:[#allocation2 + $0x249] sm:$0xff] %vm3137_vm13, %v3116_v15  ;;  %v2462_v24 = vsel %vm2401_vm8, %v2397_v18, %v16897_v38  ;;  %v16902_v18 = vld [vmem:[#allocation307_spill] sm:$0xff]  ;;  %v3603_v41 = vrot.slane %v3361_v53, 1 }
 0x6ff   :  { %v2527_v13 = vsel %vm2466_vm7, %v2462_v24, %v16898_v44  ;;  %v2268_v44 = vsel %vm2206_vm5, %v2203_v6, %v16901_v10  ;;  %v13170_v24 = vpop.f32.mrf.mxu3 }
 0x700   :  { %v2592_v15 = vsel %vm2531_vm9, %v2527_v13, %v16900_v42  ;;  %v2333_v38 = vsel %vm2271_vm4, %v2268_v44, %v16902_v18  ;;  %16903 = vst [vmem:[#allocation180_spill] sm:$0xff] %v13170_v24  ;;  %v16904_v13 = vld [vmem:[#allocation368_spill] sm:$0xff]  ;;  %v3763_v42 = vrot.slane %v3361_v53, 2  ;;  %v2072_v18 = vpop.permute.xlu2 %2071 }
 0x701   :  { %v3013_v59 = vpop.f32.mrf.mxu0  ;;  %v2657_v61 = vsel %vm2596_vm11, %v2592_v15, %v2070_v20  ;;  %v2398_v7 = vsel %vm2336_vm6, %v2333_v38, %v16904_v13 }
 0x702   :  { %v3014_v48 = vadd.f32 %v13067_v57, %v3013_v59  ;;  %v2463_v44 = vsel %vm2401_vm8, %v2398_v7, %v16905_v16 }
 0x703   :  { %6632 = vmatmul.msk.f32.gmra.mxu3 %vm3137_vm13, %v13113_v28 }
 0x704   :  { %v3117_v56 = vmax.f32 %v3014_v48, 0.0  ;;  %6590 = vmatmul.msk.f32.gmra.mxu0 %vm2667_vm10, %v2657_v61 }
 0x705   :  { %v3362_v34 = vld [vmem:[#allocation2 + $0x248] sm:$0xff]  ;;  %v3363_v59 = vld [vmem:[#allocation2 + $0x250] sm:$0xff] }
 0x706   :  { %3269 = vst.msk [vmem:[#allocation2 + $0x259] sm:$0xff] %vm3137_vm13, %v3117_v56  ;;  %v3764_v6 = vrot.slane %v3362_v34, 2  ;;  %v3604_v10 = vrot.slane %v3362_v34, 1  ;;  %v3606_v20 = vrot.slane %v3363_v59, 1  ;;  %v3766_v15 = vrot.slane %v3363_v59, 2  ;;  %v16910_v56 = vld [vmem:[#allocation78_spill] sm:$0xff] }
 0x707   :  { %v2528_v13 = vsel %vm2466_vm7, %v2463_v44, %v16910_v56  ;;  %v16913_v56 = vld [vmem:[#allocation260_spill] sm:$0xff]  ;;  %v13213_v7 = vpop.f32.mrf.mxu3 }
 0x708   :  { %v13179_v48 = vsel %vm392_vm1, %v3763_v42, %v3764_v6  ;;  %v13182_v61 = vsel %vm231_vm0, %v3603_v41, %v3604_v10  ;;  %v13185_v38 = vsel %vm231_vm0, %v3604_v10, %v3606_v20  ;;  %v13188_v53 = vsel %vm392_vm1, %v3764_v6, %v3766_v15  ;;  %v16911_v42 = vld [vmem:[#allocation162_spill] sm:$0xff]  ;;  %v7757_v10 = vld [vmem:[%s15185_s0 + $0x318] sm:$0xff]  ;;  %16915 = vst [vmem:[#allocation315_spill] sm:$0xff] %v13213_v7 }
 0x709   :  { %16906 = vst [vmem:[#allocation246_spill] sm:$0xff] %v13179_v48  ;;  %v3016_v34 = vpop.f32.mrf.mxu0  ;;  %v6783_v16 = vpack.i.bf16 %v13185_v38, %v13182_v61  ;;  %v2593_v41 = vsel %vm2531_vm9, %v2528_v13, %v16911_v42  ;;  %v16912_v20 = vld [vmem:[#allocation38_spill] sm:$0xff] }
 0x70a   :  { %16907 = vst [vmem:[#allocation95_spill] sm:$0xff] %v13182_v61  ;;  %v3017_v59 = vadd.f32 %v13067_v57, %v3016_v34  ;;  %v2658_v6 = vsel %vm2596_vm11, %v2593_v41, %v2072_v18  ;;  %v2204_v15 = vsel %vm2141_vm3, %v7757_v10, %v16912_v20  ;;  %v16914_v42 = vld [vmem:[#allocation306_spill] sm:$0xff]  ;;  %v16916_v18 = vld [vmem:[#allocation360_spill] sm:$0xff]  ;;  %v2074_v10 = vpop.permute.xlu0 %2073 }
 0x70b   :  { %16908 = vst [vmem:[#allocation62_spill] sm:$0xff] %v13185_v38  ;;  %6784 = vrot.lane.b32.xlu0 %v6783_v16, %s7918_s11  ;;  %v2269_v13 = vsel %vm2206_vm5, %v2204_v15, %v16913_v56  ;;  %v16917_v41 = vld [vmem:[#allocation398_spill] sm:$0xff]  ;;  %v16919_v56 = vld [vmem:[#allocation61_spill] sm:$0xff]  ;;  %6633 = vmatmul.msk.f32.gmra.mxu3 %vm3137_vm13, %v13122_v5 }
 0x70c   :  { %16909 = vst [vmem:[#allocation269_spill] sm:$0xff] %v13188_v53  ;;  %v3118_v44 = vmax.f32 %v3017_v59, 0.0  ;;  %6591 = vmatmul.msk.f32.gmra.mxu0 %vm2667_vm10, %v2658_v6  ;;  %v2334_v34 = vsel %vm2271_vm4, %v2269_v13, %v16914_v42  ;;  %v16918_v59 = vld [vmem:[#allocation58_spill] sm:$0xff]  ;;  %v16920_v42 = vld [vmem:[#allocation165_spill] sm:$0xff] }
 0x70d   :  { %v2399_v16 = vsel %vm2336_vm6, %v2334_v34, %v16916_v18  ;;  %v7758_v15 = vld [vmem:[%s15185_s0 + $0x320] sm:$0xff]  ;;  %v3364_v18 = vld [vmem:[#allocation2 + $0x258] sm:$0xff]  ;;  %s7919_s0 = smov 64  }
 0x70e   :  { %3270 = vst.msk [vmem:[#allocation2 + $0x261] sm:$0xff] %vm3137_vm13, %v3118_v44  ;;  %v2464_v24 = vsel %vm2401_vm8, %v2399_v16, %v16917_v41  ;;  %v2205_v13 = vsel %vm2141_vm3, %v7758_v15, %v16919_v56  ;;  %v16921_v16 = vld [vmem:[#allocation259_spill] sm:$0xff]  ;;  %v16923_v15 = vld [vmem:[#allocation372_spill] sm:$0xff]  ;;  %v3608_v5 = vrot.slane %v3364_v18, 1 }
 0x70f   :  { %v2529_v6 = vsel %vm2466_vm7, %v2464_v24, %v16918_v59  ;;  %v2270_v24 = vsel %vm2206_vm5, %v2205_v13, %v16921_v16  ;;  %v16922_v59 = vld [vmem:[#allocation42_spill] sm:$0xff] }
 0x710   :  { %v2594_v44 = vsel %vm2531_vm9, %v2529_v6, %v16920_v42  ;;  %v2335_v7 = vsel %vm2271_vm4, %v2270_v24, %v16922_v59  ;;  %v3768_v42 = vrot.slane %v3364_v18, 2  ;;  %v2076_v24 = vpop.permute.xlu1 %2075  ;;  %v16930_v59 = vld [vmem:[#allocation51_spill] sm:$0xff] }
 0x711   :  { %v3019_v20 = vpop.f32.mrf.mxu0  ;;  %v2659_v41 = vsel %vm2596_vm11, %v2594_v44, %v2074_v10  ;;  %v2400_v6 = vsel %vm2336_vm6, %v2335_v7, %v16923_v15  ;;  %v16924_v10 = vld [vmem:[#allocation397_spill] sm:$0xff] }
 0x712   :  { %v3020_v34 = vadd.f32 %v13067_v57, %v3019_v20  ;;  %v2465_v44 = vsel %vm2401_vm8, %v2400_v6, %v16924_v10 }
 0x713   :  { %6634 = vmatmul.msk.f32.gmra.mxu3 %vm3137_vm13, %v13179_v48 }
 0x714   :  { %v3119_v61 = vmax.f32 %v3020_v34, 0.0  ;;  %6592 = vmatmul.msk.f32.gmra.mxu0 %vm2667_vm10, %v2659_v41  ;;  %v13243_v34 = vpop.f32.mrf.mxu3 }
 0x715   :  { %v3365_v56 = vld [vmem:[#allocation2 + $0x260] sm:$0xff]  ;;  %v3366_v38 = vld [vmem:[#allocation2 + $0x268] sm:$0xff]  ;;  %16925 = vst [vmem:[#allocation367_spill] sm:$0xff] %v13243_v34 }
 0x716   :  { %3271 = vst.msk [vmem:[#allocation2 + $0x271] sm:$0xff] %vm3137_vm13, %v3119_v61  ;;  %v3769_v20 = vrot.slane %v3365_v56, 2  ;;  %v3609_v3 = vrot.slane %v3365_v56, 1  ;;  %v3611_v13 = vrot.slane %v3366_v38, 1  ;;  %v3771_v16 = vrot.slane %v3366_v38, 2 }
 0x717   :  { %v2530_v38 = vsel %vm2466_vm7, %v2465_v44, %v16930_v59 }
 0x718   :  { %v13246_v41 = vsel %vm392_vm1, %v3768_v42, %v3769_v20  ;;  %v13249_v7 = vsel %vm231_vm0, %v3608_v5, %v3609_v3  ;;  %v13252_v18 = vsel %vm231_vm0, %v3609_v3, %v3611_v13  ;;  %v13255_v61 = vsel %vm392_vm1, %v3769_v20, %v3771_v16 }
 0x719   :  { %16926 = vst [vmem:[#allocation404_spill] sm:$0xff] %v13246_v41  ;;  %v3022_v15 = vpop.f32.mrf.mxu0  ;;  %v6788_v6 = vpack.i.bf16 %v13252_v18, %v13249_v7  ;;  %v2595_v5 = vsel %vm2531_vm9, %v2530_v38, %v11237_v22 }
 0x71a   :  { %16927 = vst [vmem:[#allocation65_spill] sm:$0xff] %v13249_v7  ;;  %v3023_v3 = vadd.f32 %v13067_v57, %v3022_v15  ;;  %v2660_v42 = vsel %vm2596_vm11, %v2595_v5, %v2076_v24 }
 0x71b   :  { %16928 = vst [vmem:[#allocation104_spill] sm:$0xff] %v13252_v18  ;;  %6789 = vrot.lane.b32.xlu1 %v6788_v6, %s7918_s11  ;;  %6635 = vmatmul.msk.f32.gmra.mxu3 %vm3137_vm13, %v13188_v53 }
 0x71c   :  { %16929 = vst [vmem:[#allocation268_spill] sm:$0xff] %v13255_v61  ;;  %v3120_v20 = vmax.f32 %v3023_v3, 0.0  ;;  %6593 = vmatmul.msk.f32.gmra.mxu0 %vm2667_vm10, %v2660_v42  ;;  %v13272_v16 = vpop.f32.mrf.mxu3 }
 0x71d   :  { %16931 = vst [vmem:[#allocation305_spill] sm:$0xff] %v13272_v16  ;;  %v3367_v10 = vld [vmem:[#allocation2 + $0x270] sm:$0xff] }
 0x71e   :  { %3272 = vst.msk [vmem:[#allocation2 + $0x279] sm:$0xff] %vm3137_vm13, %v3120_v20  ;;  %v3773_v24 = vrot.slane %v3367_v10, 2  ;;  %v3613_v6 = vrot.slane %v3367_v10, 1 }
 0x721   :  { %v3025_v13 = vpop.f32.mrf.mxu0 }
 0x722   :  { %v3026_v22 = vadd.f32 %v13067_v57, %v3025_v13 }
 0x723   :  { %6636 = vmatmul.msk.f32.gmra.mxu3 %vm3137_vm13, %v13246_v41 }
 0x724   :  { %v3121_v44 = vmax.f32 %v3026_v22, 0.0 }
 0x725   :  { %v3368_v59 = vld [vmem:[#allocation2 + $0x278] sm:$0xff]  ;;  %v3369_v38 = vld [vmem:[#allocation2 + $0x280] sm:$0xff] }
 0x726   :  { %3273 = vst.msk [vmem:[#allocation2 + $0x289] sm:$0xff] %vm3137_vm13, %v3121_v44  ;;  %v3774_v15 = vrot.slane %v3368_v59, 2  ;;  %v3614_v5 = vrot.slane %v3368_v59, 1  ;;  %v3616_v3 = vrot.slane %v3369_v38, 1  ;;  %v3776_v42 = vrot.slane %v3369_v38, 2  ;;  %v13297_v38 = vpop.f32.mrf.mxu3 }
 0x727   :  { %16936 = vst [vmem:[#allocation103_spill] sm:$0xff] %v13297_v38 }
 0x728   :  { %v13279_v20 = vsel %vm392_vm1, %v3773_v24, %v3774_v15  ;;  %v13282_v56 = vsel %vm231_vm0, %v3613_v6, %v3614_v5  ;;  %v13285_v13 = vsel %vm231_vm0, %v3614_v5, %v3616_v3  ;;  %v13288_v22 = vsel %vm392_vm1, %v3774_v15, %v3776_v42 }
 0x729   :  { %16932 = vst [vmem:[#allocation381_spill] sm:$0xff] %v13279_v20  ;;  %v3028_v16 = vpop.f32.mrf.mxu0  ;;  %v6793_v44 = vpack.i.bf16 %v13285_v13, %v13282_v56 }
 0x72a   :  { %16933 = vst [vmem:[#allocation403_spill] sm:$0xff] %v13282_v56  ;;  %v3029_v10 = vadd.f32 %v13067_v57, %v3028_v16 }
 0x72b   :  { %16934 = vst [vmem:[#allocation57_spill] sm:$0xff] %v13285_v13  ;;  %6794 = vrot.lane.b32.xlu2 %v6793_v44, %s7918_s11  ;;  %6637 = vmatmul.msk.f32.gmra.mxu3 %vm3137_vm13, %v13255_v61 }
 0x72c   :  { %16935 = vst [vmem:[#allocation107_spill] sm:$0xff] %v13288_v22  ;;  %v3122_v24 = vmax.f32 %v3029_v10, 0.0 }
 0x72d   :  { %v3370_v16 = vld [vmem:[#allocation2 + $0x288] sm:$0xff] }
 0x72e   :  { %3274 = vst.msk [vmem:[#allocation2 + $0x291] sm:$0xff] %vm3137_vm13, %v3122_v24  ;;  %v3778_v42 = vrot.slane %v3370_v16, 2  ;;  %v3618_v41 = vrot.slane %v3370_v16, 1  ;;  %v13304_v59 = vpop.f32.mrf.mxu3 }
 0x72f   :  { %16937 = vst [vmem:[#allocation258_spill] sm:$0xff] %v13304_v59 }
 0x731   :  { %v3031_v15 = vpop.f32.mrf.mxu0 }
 0x732   :  { %v3032_v6 = vadd.f32 %v13067_v57, %v3031_v15 }
 0x733   :  { %6638 = vmatmul.msk.f32.gmra.mxu3 %vm3137_vm13, %v13279_v20 }
 0x734   :  { %v3123_v5 = vmax.f32 %v3032_v6, 0.0 }
 0x735   :  { %v3371_v3 = vld [vmem:[#allocation2 + $0x290] sm:$0xff]  ;;  %v3372_v34 = vld [vmem:[#allocation2 + $0x298] sm:$0xff] }
 0x736   :  { %3275 = vst.msk [vmem:[#allocation2 + $0x2a1] sm:$0xff] %vm3137_vm13, %v3123_v5  ;;  %v3779_v10 = vrot.slane %v3371_v3, 2  ;;  %v3619_v44 = vrot.slane %v3371_v3, 1  ;;  %v3621_v38 = vrot.slane %v3372_v34, 1  ;;  %v3781_v24 = vrot.slane %v3372_v34, 2 }
 0x738   :  { %v13308_v56 = vsel %vm392_vm1, %v3778_v42, %v3779_v10  ;;  %v13311_v61 = vsel %vm231_vm0, %v3618_v41, %v3619_v44  ;;  %v13314_v15 = vsel %vm231_vm0, %v3619_v44, %v3621_v38  ;;  %v13317_v6 = vsel %vm392_vm1, %v3779_v10, %v3781_v24  ;;  %v13328_v38 = vpop.f32.mrf.mxu3 }
 0x739   :  { %16938 = vst [vmem:[#allocation319_spill] sm:$0xff] %v13308_v56  ;;  %v3034_v16 = vpop.f32.mrf.mxu0  ;;  %v6798_v5 = vpack.i.bf16 %v13314_v15, %v13311_v61 }
 0x73a   :  { %16939 = vst [vmem:[#allocation380_spill] sm:$0xff] %v13311_v61  ;;  %v3035_v34 = vadd.f32 %v13067_v57, %v3034_v16  ;;  %v13422_v61 = vld [vmem:[#allocation2 + $0x8] sm:$0xff] }
 0x73b   :  { %16940 = vst [vmem:[#allocation396_spill] sm:$0xff] %v13314_v15  ;;  %6799 = vrot.lane.b32.xlu0 %v6798_v5, %s7918_s11  ;;  %6639 = vmatmul.msk.f32.gmra.mxu3 %vm3137_vm13, %v13288_v22 }
 0x73c   :  { %16941 = vst [vmem:[#allocation106_spill] sm:$0xff] %v13317_v6  ;;  %v3124_v41 = vmax.f32 %v3035_v34, 0.0 }
 0x73d   :  { %16942 = vst [vmem:[#allocation71_spill] sm:$0xff] %v13328_v38  ;;  %v3373_v44 = vld [vmem:[#allocation2 + $0x2a0] sm:$0xff] }
 0x73e   :  { %3276 = vst.msk [vmem:[#allocation2 + $0x2a9] sm:$0xff] %vm3137_vm13, %v3124_v41  ;;  %v3783_v59 = vrot.slane %v3373_v44, 2  ;;  %v3623_v20 = vrot.slane %v3373_v44, 1 }
 0x741   :  { %v3037_v42 = vpop.f32.mrf.mxu0 }
 0x742   :  { %v3038_v10 = vadd.f32 %v13067_v57, %v3037_v42 }
 0x743   :  { %6640 = vmatmul.msk.f32.gmra.mxu3 %vm3137_vm13, %v13308_v56 }
 0x744   :  { %v3125_v24 = vmax.f32 %v3038_v10, 0.0 }
 0x745   :  { %v3374_v3 = vld [vmem:[#allocation2 + $0x2a8] sm:$0xff]  ;;  %v3375_v15 = vld [vmem:[#allocation2 + $0x2b0] sm:$0xff] }
 0x746   :  { %3277 = vst.msk [vmem:[#allocation2 + $0x2b9] sm:$0xff] %vm3137_vm13, %v3125_v24  ;;  %v3784_v16 = vrot.slane %v3374_v3, 2  ;;  %v3624_v5 = vrot.slane %v3374_v3, 1  ;;  %v3626_v34 = vrot.slane %v3375_v15, 1  ;;  %v3786_v41 = vrot.slane %v3375_v15, 2  ;;  %v13350_v15 = vpop.f32.mrf.mxu3 }
 0x747   :  { %16947 = vst [vmem:[#allocation73_spill] sm:$0xff] %v13350_v15 }
 0x748   :  { %v13335_v38 = vsel %vm392_vm1, %v3783_v59, %v3784_v16  ;;  %v13338_v7 = vsel %vm231_vm0, %v3623_v20, %v3624_v5  ;;  %v13341_v42 = vsel %vm231_vm0, %v3624_v5, %v3626_v34  ;;  %v13344_v10 = vsel %vm392_vm1, %v3784_v16, %v3786_v41 }
 0x749   :  { %16943 = vst [vmem:[#allocation272_spill] sm:$0xff] %v13335_v38  ;;  %v3040_v22 = vpop.f32.mrf.mxu0  ;;  %v6803_v44 = vpack.i.bf16 %v13341_v42, %v13338_v7 }
 0x74a   :  { %16944 = vst [vmem:[#allocation318_spill] sm:$0xff] %v13338_v7  ;;  %v3041_v20 = vadd.f32 %v13067_v57, %v3040_v22 }
 0x74b   :  { %16945 = vst [vmem:[#allocation370_spill] sm:$0xff] %v13341_v42  ;;  %6804 = vrot.lane.b32.xlu1 %v6803_v44, %s7918_s11  ;;  %6641 = vmatmul.msk.f32.gmra.mxu3 %vm3137_vm13, %v13317_v6 }
 0x74c   :  { %16946 = vst [vmem:[#allocation407_spill] sm:$0xff] %v13344_v10  ;;  %v3126_v59 = vmax.f32 %v3041_v20, 0.0 }
 0x74d   :  { %v3376_v5 = vld [vmem:[#allocation2 + $0x2b8] sm:$0xff] }
 0x74e   :  { %3278 = vst.msk [vmem:[#allocation2 + $0x2c1] sm:$0xff] %vm3137_vm13, %v3126_v59  ;;  %v13360_v34 = vpop.f32.mrf.mxu3  ;;  %v3788_v22 = vrot.slane %v3376_v5, 2  ;;  %v3628_v44 = vrot.slane %v3376_v5, 1 }
 0x74f   :  { %16948 = vst [vmem:[#allocation101_spill] sm:$0xff] %v13360_v34 }
 0x751   :  { %v3043_v24 = vpop.f32.mrf.mxu0 }
 0x752   :  { %v3044_v16 = vadd.f32 %v13067_v57, %v3043_v24 }
 0x753   :  { %6642 = vmatmul.msk.f32.gmra.mxu3 %vm3137_vm13, %v13335_v38 }
 0x754   :  { %v3127_v41 = vmax.f32 %v3044_v16, 0.0 }
 0x755   :  { %v3377_v3 = vld [vmem:[#allocation2 + $0x2c0] sm:$0xff]  ;;  %v3378_v15 = vld [vmem:[#allocation2 + $0x2c8] sm:$0xff] }
 0x756   :  { %3279 = vst.msk [vmem:[#allocation2 + $0x2d1] sm:$0xff] %vm3137_vm13, %v3127_v41  ;;  %v3789_v7 = vrot.slane %v3377_v3, 2  ;;  %v3629_v20 = vrot.slane %v3377_v3, 1  ;;  %v3631_v42 = vrot.slane %v3378_v15, 1  ;;  %v3791_v59 = vrot.slane %v3378_v15, 2 }
 0x758   :  { %v13364_v56 = vsel %vm392_vm1, %v3788_v22, %v3789_v7  ;;  %v13367_v6 = vsel %vm231_vm0, %v3628_v44, %v3629_v20  ;;  %v13370_v34 = vsel %vm231_vm0, %v3629_v20, %v3631_v42  ;;  %v13373_v16 = vsel %vm392_vm1, %v3789_v7, %v3791_v59  ;;  %v13383_v22 = vpop.f32.mrf.mxu3 }
 0x759   :  { %16949 = vst [vmem:[#allocation271_spill] sm:$0xff] %v13364_v56  ;;  %v3046_v24 = vpop.f32.mrf.mxu0  ;;  %v6808_v15 = vpack.i.bf16 %v13370_v34, %v13367_v6 }
 0x75a   :  { %16950 = vst [vmem:[#allocation308_spill] sm:$0xff] %v13367_v6  ;;  %v3047_v3 = vadd.f32 %v13067_v57, %v3046_v24 }
 0x75b   :  { %16951 = vst [vmem:[#allocation382_spill] sm:$0xff] %v13370_v34  ;;  %6809 = vrot.lane.b32.xlu2 %v6808_v15, %s7918_s11  ;;  %6643 = vmatmul.msk.f32.gmra.mxu3 %vm3137_vm13, %v13344_v10 }
 0x75c   :  { %16952 = vst [vmem:[#allocation406_spill] sm:$0xff] %v13373_v16  ;;  %v3128_v41 = vmax.f32 %v3047_v3, 0.0 }
 0x75d   :  { %16953 = vst [vmem:[#allocation66_spill] sm:$0xff] %v13383_v22  ;;  %v3379_v44 = vld [vmem:[#allocation2 + $0x2d0] sm:$0xff] }
 0x75e   :  { %3280 = vst.msk [vmem:[#allocation2 + $0x2d9] sm:$0xff] %vm3137_vm13, %v3128_v41  ;;  %v3793_v24 = vrot.slane %v3379_v44, 2  ;;  %v3633_v6 = vrot.slane %v3379_v44, 1 }
 0x760   :  { %v13390_v34 = vpop.f32.mrf.mxu3 }
 0x761   :  { %v3049_v7 = vpop.f32.mrf.mxu0  ;;  %16954 = vst [vmem:[#allocation117_spill] sm:$0xff] %v13390_v34 }
 0x762   :  { %v3050_v42 = vadd.f32 %v13067_v57, %v3049_v7 }
 0x763   :  { %6644 = vmatmul.msk.f32.gmra.mxu3 %vm3137_vm13, %v13364_v56 }
 0x764   :  { %v3129_v20 = vmax.f32 %v3050_v42, 0.0 }
 0x765   :  { %v3380_v59 = vld [vmem:[#allocation2 + $0x2d8] sm:$0xff]  ;;  %v3381_v38 = vld [vmem:[#allocation2 + $0x2e0] sm:$0xff] }
 0x766   :  { %3281 = vst.msk [vmem:[#allocation2 + $0x2e9] sm:$0xff] %vm3137_vm13, %v3129_v20  ;;  %v3794_v3 = vrot.slane %v3380_v59, 2  ;;  %v3634_v15 = vrot.slane %v3380_v59, 1  ;;  %v3636_v5 = vrot.slane %v3381_v38, 1  ;;  %v3796_v22 = vrot.slane %v3381_v38, 2 }
 0x768   :  { %v13393_v41 = vsel %vm392_vm1, %v3793_v24, %v3794_v3  ;;  %v13396_v10 = vsel %vm231_vm0, %v3633_v6, %v3634_v15  ;;  %v13399_v7 = vsel %vm231_vm0, %v3634_v15, %v3636_v5  ;;  %v13402_v42 = vsel %vm392_vm1, %v3794_v3, %v3796_v22  ;;  %v13413_v22 = vpop.f32.mrf.mxu3 }
 0x769   :  { %16955 = vst [vmem:[#allocation111_spill] sm:$0xff] %v13393_v41  ;;  %v3052_v44 = vpop.f32.mrf.mxu0  ;;  %v6813_v20 = vpack.i.bf16 %v13399_v7, %v13396_v10 }
 0x76a   :  { %16956 = vst [vmem:[#allocation261_spill] sm:$0xff] %v13396_v10  ;;  %v3053_v59 = vadd.f32 %v13067_v57, %v3052_v44  ;;  %v13419_v10 = vld [vmem:[#allocation2] sm:$0xff] }
 0x76b   :  { %16957 = vst [vmem:[#allocation322_spill] sm:$0xff] %v13399_v7  ;;  %6814 = vrot.lane.b32.xlu0 %v6813_v20, %s7918_s11  ;;  %6645 = vmatmul.msk.f32.gmra.mxu3 %vm3137_vm13, %v13373_v16  ;;  %v7761_v16 = vld [vmem:[#allocation2 + $0x10] sm:$0xff] }
 0x76c   :  { %16958 = vst [vmem:[#allocation91_spill] sm:$0xff] %v13402_v42  ;;  %v3130_v6 = vmax.f32 %v3053_v59, 0.0 }
 0x76d   :  { %16959 = vst [vmem:[#allocation399_spill] sm:$0xff] %v13413_v22  ;;  %v3382_v3 = vld [vmem:[#allocation2 + $0x2e8] sm:$0xff]  ;;  %v3653_v22 = vrot.slane %v13419_v10, 2 }
 0x76e   :  { %3282 = vst.msk [vmem:[#allocation2 + $0x2f1] sm:$0xff] %vm3137_vm13, %v3130_v6  ;;  %v3798_v34 = vrot.slane %v3382_v3, 2  ;;  %v3638_v56 = vrot.slane %v3382_v3, 1 }
 0x771   :  { %v3055_v5 = vpop.f32.mrf.mxu0 }
 0x772   :  { %v3056_v24 = vadd.f32 %v13067_v57, %v3055_v5  ;;  %v3654_v5 = vrot.slane %v13422_v61, 2 }
 0x773   :  { %6646 = vmatmul.msk.f32.gmra.mxu3 %vm3137_vm13, %v13393_v41 }
 0x774   :  { %v3131_v15 = vmax.f32 %v3056_v24, 0.0  ;;  %v3656_v24 = vrot.slane %v7761_v16, 2 }
 0x775   :  { %v3383_v38 = vld [vmem:[#allocation2 + $0x2f0] sm:$0xff]  ;;  %v3384_v7 = vld [vmem:[#allocation2 + $0x2f8] sm:$0xff] }
 0x776   :  { %3283 = vst.msk [vmem:[#allocation2 + $0x301] sm:$0xff] %vm3137_vm13, %v3131_v15  ;;  %v3799_v44 = vrot.slane %v3383_v38, 2  ;;  %v3639_v20 = vrot.slane %v3383_v38, 1  ;;  %v3641_v59 = vrot.slane %v3384_v7, 1  ;;  %v3801_v6 = vrot.slane %v3384_v7, 2 }
 0x778   :  { %v13426_v18 = vsel %vm392_vm1, %v3798_v34, %v3799_v44  ;;  %v13429_v3 = vsel %vm231_vm0, %v3638_v56, %v3639_v20  ;;  %v13432_v38 = vsel %vm231_vm0, %v3639_v20, %v3641_v59  ;;  %v13435_v7 = vsel %vm392_vm1, %v3799_v44, %v3801_v6  ;;  %v13445_v56 = vpop.f32.mrf.mxu3 }
 0x779   :  { %16960 = vst [vmem:[#allocation116_spill] sm:$0xff] %v13426_v18  ;;  %v3058_v15 = vpop.f32.mrf.mxu0  ;;  %v6818_v13 = vpack.i.bf16 %v13432_v38, %v13429_v3  ;;  %v3655_v44 = vsel %vm392_vm1, %v3653_v22, %v3654_v5  ;;  %v3657_v20 = vsel %vm392_vm1, %v3654_v5, %v3656_v24 }
 0x77a   :  { %16961 = vst [vmem:[#allocation81_spill] sm:$0xff] %v13429_v3  ;;  %v3059_v34 = vadd.f32 %v13067_v57, %v3058_v15  ;;  %v6833_v59 = vpack.i.bf16 %v3657_v20, %v3655_v44 }
 0x77b   :  { %16962 = vst [vmem:[#allocation275_spill] sm:$0xff] %v13432_v38  ;;  %6819 = vrot.lane.b32.xlu1 %v6818_v13, %s7918_s11  ;;  %6647 = vmatmul.msk.f32.gmra.mxu3 %vm3137_vm13, %v13402_v42 }
 0x77c   :  { %16963 = vst [vmem:[#allocation321_spill] sm:$0xff] %v13435_v7  ;;  %v3132_v16 = vmax.f32 %v3059_v34, 0.0 }
 0x77d   :  { %16964 = vst [vmem:[#allocation373_spill] sm:$0xff] %v13445_v56  ;;  %v3385_v3 = vld [vmem:[#allocation2 + $0x300] sm:$0xff] }
 0x77e   :  { %3284 = vst.msk [vmem:[#allocation2 + $0x309] sm:$0xff] %vm3137_vm13, %v3132_v16  ;;  %v3803_v34 = vrot.slane %v3385_v3, 2  ;;  %v3643_v22 = vrot.slane %v3385_v3, 1 }
 0x780   :  { %v13454_v38 = vpop.f32.mrf.mxu3 }
 0x781   :  { %v3061_v6 = vpop.f32.mrf.mxu0  ;;  %16965 = vst [vmem:[#allocation410_spill] sm:$0xff] %v13454_v38 }
 0x782   :  { %v3062_v53 = vadd.f32 %v13067_v57, %v3061_v6 }
 0x783   :  { %6834 = vrot.lane.b32.xlu1 %v6833_v59, %s7919_s0  ;;  %6648 = vmatmul.msk.f32.gmra.mxu3 %vm3137_vm13, %v13426_v18 }
 0x784   :  { %v3133_v13 = vmax.f32 %v3062_v53, 0.0 }
 0x785   :  { %v3386_v15 = vld [vmem:[#allocation2 + $0x308] sm:$0xff]  ;;  %v3387_v56 = vld [vmem:[#allocation2 + $0x310] sm:$0xff] }
 0x786   :  { %3285 = vst.msk [vmem:[#allocation2 + $0x319] sm:$0xff] %vm3137_vm13, %v3133_v13  ;;  %v3804_v5 = vrot.slane %v3386_v15, 2  ;;  %v3644_v24 = vrot.slane %v3386_v15, 1  ;;  %v3646_v16 = vrot.slane %v3387_v56, 1  ;;  %v3806_v44 = vrot.slane %v3387_v56, 2 }
 0x788   :  { %v13458_v20 = vsel %vm392_vm1, %v3803_v34, %v3804_v5  ;;  %v13461_v6 = vsel %vm231_vm0, %v3643_v22, %v3644_v24  ;;  %v13464_v53 = vsel %vm231_vm0, %v3644_v24, %v3646_v16  ;;  %v13467_v59 = vsel %vm392_vm1, %v3804_v5, %v3806_v44  ;;  %v13476_v34 = vld [vmem:[#allocation2 + $0x20] sm:$0xff]  ;;  %v7763_v24 = vld [vmem:[#allocation2 + $0x28] sm:$0xff]  ;;  %v13482_v44 = vld [vmem:[#allocation2 + $0x18] sm:$0xff]  ;;  %v13488_v18 = vpop.f32.mrf.mxu3 }
 0x789   :  { %16966 = vst [vmem:[#allocation77_spill] sm:$0xff] %v13458_v20  ;;  %v3064_v3 = vpop.f32.mrf.mxu0  ;;  %v6823_v13 = vpack.i.bf16 %v13464_v53, %v13461_v6  ;;  %v3659_v22 = vrot.slane %v13476_v34, 2  ;;  %v3661_v16 = vrot.slane %v7763_v24, 2  ;;  %v3658_v15 = vrot.slane %v13482_v44, 2 }
 0x78a   :  { %16967 = vst [vmem:[#allocation84_spill] sm:$0xff] %v13461_v6  ;;  %v3065_v56 = vadd.f32 %v13067_v57, %v3064_v3 }
 0x78b   :  { %16968 = vst [vmem:[#allocation176_spill] sm:$0xff] %v13464_v53  ;;  %6849 = vrot.lane.b32.xlu1 %v12000_v40, %s7919_s0  ;;  %6824 = vrot.lane.b32.xlu2 %v6823_v13, %s7918_s11  ;;  %v3660_v3 = vsel %vm392_vm1, %v3658_v15, %v3659_v22  ;;  %v3662_v38 = vsel %vm392_vm1, %v3659_v22, %v3661_v16 }
 0x78c   :  { %16969 = vst [vmem:[#allocation274_spill] sm:$0xff] %v13467_v59  ;;  %v3134_v5 = vmax.f32 %v3065_v56, 0.0  ;;  %v13490_v24 = vpack.i.bf16 %v3662_v38, %v3660_v3  ;;  %6649 = vmatmul.msk.f32.gmra.mxu3 %vm3137_vm13, %v13435_v7 }
 0x78d   :  { %16970 = vst [vmem:[#allocation311_spill] sm:$0xff] %v13488_v18  ;;  %v3388_v56 = vld [vmem:[#allocation2 + $0x318] sm:$0xff] }
 0x78e   :  { %3286 = vst.msk [vmem:[#allocation2 + $0x321] sm:$0xff] %vm3137_vm13, %v3134_v5  ;;  %v3808_v22 = vrot.slane %v3388_v56, 2  ;;  %v3648_v18 = vrot.slane %v3388_v56, 1 }
 0x791   :  { %v3067_v6 = vpop.f32.mrf.mxu0 }
 0x792   :  { %v3068_v13 = vadd.f32 %v13067_v57, %v3067_v6 }
 0x793   :  { %6864 = vrot.lane.b32.xlu1 %v12128_v0, %s7919_s0  ;;  %6839 = vrot.lane.b32.xlu2 %v13490_v24, %s7919_s0 }
 0x794   :  { %v3135_v15 = vmax.f32 %v3068_v13, 0.0  ;;  %6650 = vmatmul.msk.f32.gmra.mxu3 %vm3137_vm13, %v13458_v20 }
 0x795   :  { %v3389_v5 = vld [vmem:[#allocation2 + $0x320] sm:$0xff]  ;;  %v3390_v16 = vld [vmem:[#allocation2 + $0x328] sm:$0xff] }
 0x796   :  { %3287 = vst.msk [vmem:[#allocation2 + $0x331] sm:$0xff] %vm3137_vm13, %v3135_v15  ;;  %v3809_v38 = vrot.slane %v3389_v5, 2  ;;  %v3649_v3 = vrot.slane %v3389_v5, 1  ;;  %v3651_v53 = vrot.slane %v3390_v16, 1  ;;  %v3811_v7 = vrot.slane %v3390_v16, 2  ;;  %v13516_v5 = vpop.f32.mrf.mxu3  ;;  %v7766_v15 = vld [vmem:[#allocation2 + $0x1b8] sm:$0xff] }
 0x797   :  { %16975 = vst [vmem:[#allocation112_spill] sm:$0xff] %v13516_v5  ;;  %v7767_v5 = vld [vmem:[#allocation2 + $0x1c0] sm:$0xff] }
 0x798   :  { %v13501_v6 = vsel %vm392_vm1, %v3808_v22, %v3809_v38  ;;  %v13504_v41 = vsel %vm231_vm0, %v3648_v18, %v3649_v3  ;;  %v13507_v42 = vsel %vm231_vm0, %v3649_v3, %v3651_v53  ;;  %v13510_v13 = vsel %vm392_vm1, %v3809_v38, %v3811_v7  ;;  %v13541_v38 = vpop.permute.xlu2 %6674 }
 0x799   :  { %16971 = vst [vmem:[#allocation384_spill] sm:$0xff] %v13501_v6  ;;  %v3070_v48 = vpop.f32.mrf.mxu0  ;;  %v6828_v56 = vpack.i.bf16 %v13507_v42, %v13504_v41 }
 0x79a   :  { %16972 = vst [vmem:[#allocation409_spill] sm:$0xff] %v13504_v41  ;;  %v3071_v18 = vadd.f32 %v13067_v57, %v3070_v48 }
 0x79b   :  { %16973 = vst [vmem:[#allocation67_spill] sm:$0xff] %v13507_v42  ;;  %6879 = vrot.lane.b32.xlu1 %v12311_v2, %s7919_s0  ;;  %6829 = vrot.lane.b32.xlu0 %v6828_v56, %s7918_s11  ;;  %v3736_v42 = vrot.slane %v7767_v5, 2 }
 0x79c   :  { %16974 = vst [vmem:[#allocation125_spill] sm:$0xff] %v13510_v13  ;;  %v3136_v7 = vmax.f32 %v3071_v18, 0.0  ;;  %6854 = vrot.lane.b32.xlu2 %v12022_v60, %s7919_s0  ;;  %6651 = vmatmul.msk.f32.gmra.mxu3 %vm3137_vm13, %v13467_v59  ;;  %v13582_v59 = vld [vmem:[#allocation2 + $0x30] sm:$0xff] }
 0x79d   :  { %v13526_v53 = vld [vmem:[#allocation2 + $0x330] sm:$0xff] }
 0x79e   :  { %16976 = vst [vmem:[#allocation264_spill] sm:$0xff] %v13526_v53  ;;  %v13537_v57 = vpop.f32.mrf.mxu3  ;;  %v3898_v3 = vrot.slane %v13526_v53, 2 }
 0x79f   :  { %3288 = vst.msk [vmem:[#allocation2 + $0x339] sm:$0xff] %vm3137_vm13, %v3136_v7 }
 0x7a0   :  { %16977 = vst [vmem:[#allocation325_spill] sm:$0xff] %v13537_v57  ;;  %v3734_v57 = vrot.slane %v7766_v15, 2 }
 0x7a2   :  { %v3737_v15 = vsel %vm392_vm1, %v3734_v57, %v3736_v42 }
 0x7a3   :  { %6894 = vrot.lane.b32.xlu1 %v12507_v30, %s7919_s0  ;;  %6844 = vrot.lane.b32.xlu0 %v11847_v29, %s7919_s0 }
 0x7a4   :  { %6869 = vrot.lane.b32.xlu2 %v12189_v12, %s7919_s0  ;;  %6652 = vmatmul.msk.f32.gmra.mxu3 %vm3137_vm13, %v13501_v6  ;;  %v6938_v6 = vpack.i.bf16 %v13582_v59, %v13113_v28 }
 0x7a6   :  { %v3392_v48 = vld [vmem:[#allocation2 + $0x338] sm:$0xff]  ;;  %v3393_v16 = vld [vmem:[#allocation2 + $0x340] sm:$0xff] }
 0x7a7   :  { %v3899_v56 = vrot.slane %v3392_v48, 2  ;;  %v3901_v18 = vrot.slane %v3393_v16, 2  ;;  %v13560_v48 = vpop.permute.xlu1 %6684  ;;  %v13562_v16 = vpop.f32.mrf.mxu3 }
 0x7a8   :  { %16980 = vst [vmem:[#allocation124_spill] sm:$0xff] %v13562_v16 }
 0x7a9   :  { %v13545_v7 = vsel %vm392_vm1, %v3898_v3, %v3899_v56  ;;  %v13548_v22 = vsel %vm392_vm1, %v3899_v56, %v3901_v18  ;;  %v13564_v3 = vpop.permute.xlu2 %6689  ;;  %v7765_v56 = vld [vmem:[#allocation2 + $0x1b0] sm:$0xff] }
 0x7aa   :  { %16978 = vst [vmem:[#allocation383_spill] sm:$0xff] %v13545_v7  ;;  %v3733_v18 = vrot.slane %v7765_v56, 2 }
 0x7ab   :  { %16979 = vst [vmem:[#allocation400_spill] sm:$0xff] %v13548_v22  ;;  %6909 = vrot.lane.b32.xlu1 %v12718_v63, %s7919_s0  ;;  %6859 = vrot.lane.b32.xlu0 %v12067_v9, %s7919_s0 }
 0x7ac   :  { %6884 = vrot.lane.b32.xlu2 %v12377_v39, %s7919_s0  ;;  %6653 = vmatmul.msk.f32.gmra.mxu3 %vm3137_vm13, %v13510_v13  ;;  %v3735_v56 = vsel %vm392_vm1, %v3733_v18, %v3734_v57  ;;  %v13591_v18 = vpop.permute.xlu0 %6679 }
 0x7ad   :  { %v6913_v20 = vpack.i.bf16 %v3737_v15, %v3735_v56  ;;  %v13598_v56 = vld [vmem:[#allocation2 + $0x38] sm:$0xff]  ;;  %v13600_v15 = vld [vmem:[#allocation2 + $0x48] sm:$0xff] }
 0x7af   :  { %v13574_v16 = vpop.permute.xlu1 %6699  ;;  %v13580_v5 = vpop.f32.mrf.mxu3 }
 0x7b0   :  { %16982 = vst [vmem:[#allocation278_spill] sm:$0xff] %v13580_v5  ;;  %v6953_v5 = vpack.i.bf16 %v13600_v15, %v13598_v56 }
 0x7b1   :  { %v13578_v53 = vpop.permute.xlu2 %6704 }
 0x7b2   :  { %16981 = vst [vmem:[#allocation92_spill] sm:$0xff] %v13578_v53 }
 0x7b3   :  { %6924 = vrot.lane.b32.xlu1 %v12929_v46, %s7919_s0  ;;  %6874 = vrot.lane.b32.xlu0 %v12250_v58, %s7919_s0 }
 0x7b4   :  { %6899 = vrot.lane.b32.xlu2 %v12568_v55, %s7919_s0  ;;  %6654 = vmatmul.msk.f32.gmra.mxu3 %vm3137_vm13, %v13545_v7 }
 0x7b7   :  { %v13594_v42 = vpop.permute.xlu1 %6714  ;;  %v13604_v7 = vpop.f32.mrf.mxu3 }
 0x7b8   :  { %16983 = vst [vmem:[#allocation324_spill] sm:$0xff] %v13594_v42 }
 0x7b9   :  { %v13596_v57 = vpop.permute.xlu2 %6719  ;;  %16985 = vst [vmem:[#allocation413_spill] sm:$0xff] %v13604_v7  ;;  %v6968_v7 = vpack.i.bf16 %v13582_v59, %v11991_v1 }
 0x7ba   :  { %16984 = vst [vmem:[#allocation376_spill] sm:$0xff] %v13596_v57  ;;  %v6948_v57 = vpack.i.bf16 %v13482_v44, %v11836_v62 }
 0x7bb   :  { %6939 = vrot.lane.b32.xlu1 %v6938_v6, %s7919_s0  ;;  %6889 = vrot.lane.b32.xlu0 %v12440_v31, %s7919_s0 }
 0x7bc   :  { %6914 = vrot.lane.b32.xlu2 %v6913_v20, %s7919_s0  ;;  %6655 = vmatmul.msk.f32.gmra.mxu3 %vm3137_vm13, %v13548_v22  ;;  %v13611_v20 = vpop.permute.xlu0 %6694 }
 0x7bf   :  { %v13615_v6 = vpop.permute.xlu1 %6729 }
 0x7c0   :  { %16986 = vst [vmem:[#allocation87_spill] sm:$0xff] %v13615_v6 }
 0x7c1   :  { %v13617_v13 = vpop.permute.xlu2 %6734 }
 0x7c2   :  { %16987 = vst [vmem:[#allocation94_spill] sm:$0xff] %v13617_v13  ;;  %v6958_v13 = vpack.i.bf16 %v13476_v34, %v11839_v47 }
 0x7c3   :  { %6954 = vrot.lane.b32.xlu1 %v6953_v5, %s7919_s0  ;;  %6904 = vrot.lane.b32.xlu0 %v12636_v52, %s7919_s0 }
 0x7c4   :  { %6929 = vrot.lane.b32.xlu2 %v12994_v35, %s7919_s0  ;;  %v13624_v5 = vpop.permute.xlu0 %6709 }
 0x7c5   :  { %16988 = vst [vmem:[#allocation121_spill] sm:$0xff] %v13624_v5  ;;  %v13666_v5 = vld [vmem:[#allocation2 + $0x90] sm:$0xff] }
 0x7c7   :  { %v13628_v22 = vpop.permute.xlu1 %6744 }
 0x7c8   :  { %16989 = vst [vmem:[#allocation277_spill] sm:$0xff] %v13628_v22  ;;  %v13645_v22 = vld [vmem:[#allocation2 + $0x50] sm:$0xff] }
 0x7c9   :  { %v13630_v41 = vpop.permute.xlu2 %6749 }
 0x7ca   :  { %16990 = vst [vmem:[#allocation314_spill] sm:$0xff] %v13630_v41  ;;  %v6998_v41 = vpack.i.bf16 %v13645_v22, %v12011_v32 }
 0x7cb   :  { %6969 = vrot.lane.b32.xlu1 %v6968_v7, %s7920_s16  ;;  %6919 = vrot.lane.b32.xlu0 %v12858_v54, %s7919_s0 }
 0x7cc   :  { %6944 = vrot.lane.b32.xlu2 %v13490_v24, %s7918_s11  ;;  %v13638_v7 = vpop.permute.xlu0 %6724 }
 0x7cd   :  { %16991 = vst [vmem:[#allocation387_spill] sm:$0xff] %v13638_v7  ;;  %v13664_v7 = vld [vmem:[#allocation2 + $0x80] sm:$0xff] }
 0x7ce   :  { %v7013_v53 = vpack.i.bf16 %v13666_v5, %v13664_v7 }
 0x7cf   :  { %v13641_v6 = vpop.permute.xlu1 %6759 }
 0x7d0   :  { %16992 = vst [vmem:[#allocation412_spill] sm:$0xff] %v13641_v6 }
 0x7d1   :  { %v13643_v24 = vpop.permute.xlu2 %6764 }
 0x7d2   :  { %16993 = vst [vmem:[#allocation89_spill] sm:$0xff] %v13643_v24 }
 0x7d3   :  { %6984 = vrot.lane.b32.xlu1 %v12000_v40, %s7918_s11  ;;  %6934 = vrot.lane.b32.xlu0 %v13059_v49, %s7919_s0  ;;  %v13651_v40 = vld [vmem:[#allocation2 + $0x60] sm:$0xff]  ;;  %v6978_v49 = vpack.i.bf16 %v13598_v56, %v11994_v27 }
 0x7d4   :  { %6959 = vrot.lane.b32.xlu2 %v6958_v13, %s7920_s16  ;;  %v6973_v42 = vpack.i.bf16 %v13651_v40, %v13645_v22  ;;  %v13657_v13 = vpop.permute.xlu0 %6739 }
 0x7d5   :  { %16994 = vst [vmem:[#allocation131_spill] sm:$0xff] %v13657_v13 }
 0x7d7   :  { %v13660_v24 = vpop.permute.xlu1 %6774 }
 0x7d8   :  { %16995 = vst [vmem:[#allocation122_spill] sm:$0xff] %v13660_v24  ;;  %v13682_v24 = vld [vmem:[#allocation2 + $0x78] sm:$0xff] }
 0x7d9   :  { %v13662_v6 = vpop.permute.xlu2 %6779  ;;  %17000 = vst [vmem:[#allocation130_spill] sm:$0xff] %v13682_v24  ;;  %v7028_v13 = vpack.i.bf16 %v13682_v24, %v12115_v26  ;;  %v7038_v26 = vpack.i.bf16 %v13664_v7, %v12118_v14 }
 0x7da   :  { %16996 = vst [vmem:[#allocation267_spill] sm:$0xff] %v13662_v6 }
 0x7db   :  { %6999 = vrot.lane.b32.xlu1 %v6998_v41, %s7920_s16  ;;  %6949 = vrot.lane.b32.xlu0 %v6948_v57, %s7920_s16  ;;  %v6988_v41 = vpack.i.bf16 %v13600_v15, %v12008_v51 }
 0x7dc   :  { %6974 = vrot.lane.b32.xlu2 %v6973_v42, %s7919_s0  ;;  %v13675_v42 = vpop.permute.xlu0 %6754 }
 0x7dd   :  { %16997 = vst [vmem:[#allocation328_spill] sm:$0xff] %v13675_v42 }
 0x7df   :  { %v13678_v57 = vpop.permute.xlu1 %6789 }
 0x7e0   :  { %16998 = vst [vmem:[#allocation386_spill] sm:$0xff] %v13678_v57 }
 0x7e1   :  { %v13680_v6 = vpop.permute.xlu2 %6794 }
 0x7e2   :  { %16999 = vst [vmem:[#allocation402_spill] sm:$0xff] %v13680_v6  ;;  %v13698_v6 = vld [vmem:[#allocation2 + $0x68] sm:$0xff] }
 0x7e3   :  { %7014 = vrot.lane.b32.xlu1 %v7013_v53, %s7919_s0  ;;  %6964 = vrot.lane.b32.xlu0 %v11847_v29, %s7918_s11  ;;  %v6993_v57 = vpack.i.bf16 %v13682_v24, %v13698_v6  ;;  %v7018_v42 = vpack.i.bf16 %v13698_v6, %v12057_v36  ;;  %v13720_v24 = vld [vmem:[#allocation2 + $0xa8] sm:$0xff] }
 0x7e4   :  { %6989 = vrot.lane.b32.xlu2 %v6988_v41, %s7920_s16  ;;  %v13694_v53 = vpop.permute.xlu0 %6769  ;;  %17008 = vst [vmem:[#allocation280_spill] sm:$0xff] %v13720_v24 }
 0x7e5   :  { %17002 = vst [vmem:[#allocation281_spill] sm:$0xff] %v13694_v53  ;;  %v7008_v53 = vpack.i.bf16 %v13651_v40, %v12054_v4 }
 0x7e7   :  { %v13692_v29 = vpop.permute.xlu1 %6804 }
 0x7e8   :  { %17001 = vst [vmem:[#allocation102_spill] sm:$0xff] %v13692_v29 }
 0x7e9   :  { %v13696_v41 = vpop.permute.xlu2 %6809 }
 0x7ea   :  { %17003 = vst [vmem:[#allocation327_spill] sm:$0xff] %v13696_v41  ;;  %v13714_v41 = vld [vmem:[#allocation2 + $0x98] sm:$0xff] }
 0x7eb   :  { %7029 = vrot.lane.b32.xlu1 %v7028_v13, %s7920_s16  ;;  %6979 = vrot.lane.b32.xlu0 %v6978_v49, %s7920_s16  ;;  %17007 = vst [vmem:[#allocation184_spill] sm:$0xff] %v13714_v41  ;;  %v7058_v29 = vpack.i.bf16 %v13714_v41, %v12179_v33 }
 0x7ec   :  { %7004 = vrot.lane.b32.xlu2 %v12022_v60, %s7918_s11  ;;  %v13710_v49 = vpop.permute.xlu0 %6784 }
 0x7ed   :  { %17005 = vst [vmem:[#allocation416_spill] sm:$0xff] %v13710_v49 }
 0x7ef   :  { %v13708_v60 = vpop.permute.xlu1 %6819 }
 0x7f0   :  { %17004 = vst [vmem:[#allocation379_spill] sm:$0xff] %v13708_v60  ;;  %v7780_v60 = vld [vmem:[#allocation2 + $0xd8] sm:$0xff] }
 0x7f1   :  { %v13712_v13 = vpop.permute.xlu2 %6824 }
 0x7f2   :  { %17006 = vst [vmem:[#allocation105_spill] sm:$0xff] %v13712_v13  ;;  %v13731_v13 = vld [vmem:[#allocation2 + $0xc8] sm:$0xff] }
 0x7f3   :  { %7044 = vrot.lane.b32.xlu1 %v12128_v0, %s7918_s11  ;;  %6994 = vrot.lane.b32.xlu0 %v6993_v57, %s7919_s0  ;;  %v7033_v0 = vpack.i.bf16 %v13720_v24, %v13714_v41  ;;  %v7073_v49 = vpack.i.bf16 %v7780_v60, %v13731_v13  ;;  %v7048_v41 = vpack.i.bf16 %v13666_v5, %v12176_v19 }
 0x7f4   :  { %7019 = vrot.lane.b32.xlu2 %v7018_v42, %s7920_s16  ;;  %v13727_v42 = vpop.permute.xlu0 %6799 }
 0x7f5   :  { %17009 = vst [vmem:[#allocation317_spill] sm:$0xff] %v13727_v42 }
 0x7f7   :  { %v13729_v57 = vpop.permute.xlu1 %6834 }
 0x7f9   :  { %v13734_v33 = vpop.permute.xlu2 %6839 }
 0x7fb   :  { %7059 = vrot.lane.b32.xlu1 %v7058_v29, %s7920_s16  ;;  %7009 = vrot.lane.b32.xlu0 %v7008_v53, %s7920_s16 }
 0x7fc   :  { %7034 = vrot.lane.b32.xlu2 %v7033_v0, %s7919_s0  ;;  %v13742_v29 = vpop.permute.xlu0 %6814  ;;  %v13746_v0 = vld [vmem:[#allocation2 + $0xc0] sm:$0xff] }
 0x7fd   :  { %17010 = vst [vmem:[#allocation391_spill] sm:$0xff] %v13742_v29  ;;  %v7088_v42 = vpack.i.bf16 %v13746_v0, %v12298_v50 }
 0x7fe   :  { %17011 = vst [vmem:[#allocation134_spill] sm:$0xff] %v13746_v0 }
 0x7ff   :  { %v13744_v53 = vpop.permute.xlu1 %6849 }
 0x803   :  { %7074 = vrot.lane.b32.xlu1 %v7073_v49, %s7919_s0  ;;  %7024 = vrot.lane.b32.xlu0 %v12067_v9, %s7918_s11  ;;  %v13754_v49 = vpop.permute.xlu2 %6854 }
 0x804   :  { %7049 = vrot.lane.b32.xlu2 %v7048_v41, %s7920_s16  ;;  %v13760_v41 = vld [vmem:[#allocation2 + $0xb0] sm:$0xff] }
 0x805   :  { %17013 = vst [vmem:[#allocation183_spill] sm:$0xff] %v13760_v41  ;;  %v7053_v29 = vpack.i.bf16 %v13746_v0, %v13760_v41  ;;  %v7078_v50 = vpack.i.bf16 %v13760_v41, %v12240_v37  ;;  %v7068_v0 = vpack.i.bf16 %v13720_v24, %v12237_v45  ;;  %v13779_v41 = vld [vmem:[#allocation2 + $0xf0] sm:$0xff] }
 0x807   :  { %v13766_v19 = vpop.permute.xlu1 %6864 }
 0x80b   :  { %7089 = vrot.lane.b32.xlu1 %v7088_v42, %s7920_s16  ;;  %7039 = vrot.lane.b32.xlu0 %v7038_v26, %s7920_s16  ;;  %v13772_v26 = vpop.permute.xlu2 %6869  ;;  %v7783_v42 = vld [vmem:[#allocation2 + $0xe0] sm:$0xff] }
 0x80c   :  { %7064 = vrot.lane.b32.xlu2 %v12189_v12, %s7918_s11  ;;  %17014 = vst [vmem:[#allocation76_spill] sm:$0xff] %v13772_v26  ;;  %v7093_v37 = vpack.i.bf16 %v13779_v41, %v7783_v42  ;;  %v7108_v26 = vpack.i.bf16 %v7780_v60, %v12364_v11 }
 0x80d   :  { %v13758_v9 = vpop.permute.xlu0 %6829 }
 0x80e   :  { %17012 = vst [vmem:[#allocation415_spill] sm:$0xff] %v13758_v9  ;;  %v7118_v9 = vpack.i.bf16 %v7783_v42, %v12367_v21  ;;  %v5481_v42 = vld [vmem:[%s15188_s3 + $0x70] sm:$0xff] }
 0x813   :  { %7104 = vrot.lane.b32.xlu1 %v12311_v2, %s7918_s11  ;;  %7054 = vrot.lane.b32.xlu0 %v7053_v29, %s7919_s0  ;;  %v5482_v2 = vld [vmem:[%s15188_s3 + $0x78] sm:$0xff] }
 0x814   :  { %7079 = vrot.lane.b32.xlu2 %v7078_v50, %s7920_s16  ;;  %v13785_v50 = vpop.permute.xlu1 %6879  ;;  %v5498_v29 = vld [vmem:[%s15188_s3 + $0xf8] sm:$0xff]  ;;  %5635 = vmatpush.msra.mxu1 %v5482_v2  ;;  %v5480_v2 = vld [vmem:[%s15188_s3 + $0x68] sm:$0xff] }
 0x815   :  { %v13774_v12 = vpop.permute.xlu0 %6844  ;;  %17015 = vst [vmem:[#allocation270_spill] sm:$0xff] %v13785_v50  ;;  %5844 = vmatpush.msra.mxu2 %v5498_v29  ;;  %v13805_v50 = vld [vmem:[#allocation2 + $0x120] sm:$0xff]  ;;  %v5496_v29 = vld [vmem:[%s15188_s3 + $0xe8] sm:$0xff] }
 0x816   :  { %5636 = vmatpush.msra.mxu1 %v5481_v42  ;;  %v5479_v42 = vld [vmem:[%s15188_s3 + $0x60] sm:$0xff] }
 0x818   :  { %5637 = vmatpush.msra.mxu1 %v5480_v2 }
 0x81a   :  { %5638 = vmatpush.msra.mxu1 %v5479_v42  ;;  %v5492_v42 = vld [vmem:[%s15188_s3 + $0xc8] sm:$0xff] }
 0x81b   :  { %7119 = vrot.lane.b32.xlu1 %v7118_v9, %s7920_s16  ;;  %7069 = vrot.lane.b32.xlu0 %v7068_v0, %s7920_s16  ;;  %v13801_v0 = vpop.permute.xlu2 %6884  ;;  %v13803_v9 = vld [vmem:[#allocation2 + $0x110] sm:$0xff] }
 0x81c   :  { %7094 = vrot.lane.b32.xlu2 %v7093_v37, %s7919_s0  ;;  %v5497_v37 = vld [vmem:[%s15188_s3 + $0xf0] sm:$0xff]  ;;  %17016 = vst [vmem:[#allocation331_spill] sm:$0xff] %v13801_v0  ;;  %v7133_v24 = vpack.i.bf16 %v13805_v50, %v13803_v9  ;;  %v7787_v0 = vld [vmem:[#allocation2 + $0x108] sm:$0xff] }
 0x81d   :  { %v13796_v21 = vpop.permute.xlu0 %6859  ;;  %5845 = vmatpush.msra.mxu2 %v5497_v37  ;;  %v5494_v37 = vld [vmem:[%s15188_s3 + $0xd8] sm:$0xff]  ;;  %v7148_v2 = vpack.i.bf16 %v7787_v0, %v12492_v23 }
 0x81f   :  { %5846 = vmatpush.msra.mxu2 %v5496_v29  ;;  %v7098_v29 = vpack.i.bf16 %v13731_v13, %v12301_v17  ;;  %v5476_v13 = vld [vmem:[%s15188_s3 + $0x48] sm:$0xff] }
 0x823   :  { %7134 = vrot.lane.b32.xlu1 %v7133_v24, %s7919_s0  ;;  %7084 = vrot.lane.b32.xlu0 %v12250_v58, %s7918_s11  ;;  %v5495_v58 = vld [vmem:[%s15188_s3 + $0xe0] sm:$0xff]  ;;  %v13828_v24 = vpop.permute.xlu1 %6894  ;;  %v13842_v11 = vpop.permute.xlu2 %6899 }
 0x824   :  { %7109 = vrot.lane.b32.xlu2 %v7108_v26, %s7920_s16  ;;  %17018 = vst [vmem:[#allocation405_spill] sm:$0xff] %v13828_v24  ;;  %v5478_v26 = vld [vmem:[%s15188_s3 + $0x58] sm:$0xff]  ;;  %5847 = vmatpush.msra.mxu2 %v5495_v58  ;;  %v5477_v24 = vld [vmem:[%s15188_s3 + $0x50] sm:$0xff]  ;;  %v5475_v58 = vld [vmem:[%s15188_s3 + $0x40] sm:$0xff] }
 0x825   :  { %v13823_v60 = vpop.permute.xlu0 %6874  ;;  %17019 = vst [vmem:[#allocation133_spill] sm:$0xff] %v13842_v11  ;;  %5639 = vmatpush.msra.mxu1 %v5478_v26  ;;  %v17030_v11 = vld [vmem:[#allocation375_spill] sm:$0xff] }
 0x826   :  { %17017 = vst [vmem:[#allocation390_spill] sm:$0xff] %v13823_v60  ;;  %5848 = vmatpush.msra.mxu2 %v5494_v37  ;;  %v5493_v60 = vld [vmem:[%s15188_s3 + $0xd0] sm:$0xff]  ;;  %v5491_v37 = vld [vmem:[%s15188_s3 + $0xc0] sm:$0xff] }
 0x827   :  { %5640 = vmatpush.msra.mxu1 %v5477_v24 }
 0x828   :  { %5849 = vmatpush.msra.mxu2 %v5493_v60  ;;  %v7788_v60 = vld [vmem:[#allocation2 + $0xf8] sm:$0xff] }
 0x829   :  { %5641 = vmatpush.msra.mxu1 %v5476_v13  ;;  %v7138_v13 = vpack.i.bf16 %v7788_v60, %v12428_v43 }
 0x82a   :  { %5850 = vmatpush.msra.mxu2 %v5492_v42  ;;  %v5473_v42 = vld [vmem:[%s15188_s3 + $0x30] sm:$0xff] }
 0x82b   :  { %7149 = vrot.lane.b32.xlu1 %v7148_v2, %s7920_s16  ;;  %7099 = vrot.lane.b32.xlu0 %v7098_v29, %s7920_s16  ;;  %v13868_v24 = vpop.permute.xlu1 %6909  ;;  %v7113_v2 = vpack.i.bf16 %v7787_v0, %v7788_v60  ;;  %v5490_v29 = vld [vmem:[%s15188_s3 + $0xb8] sm:$0xff]  ;;  %v5489_v0 = vld [vmem:[%s15188_s3 + $0xb0] sm:$0xff] }
 0x82c   :  { %7124 = vrot.lane.b32.xlu2 %v12377_v39, %s7918_s11  ;;  %v5474_v39 = vld [vmem:[%s15188_s3 + $0x38] sm:$0xff]  ;;  %5642 = vmatpush.msra.mxu1 %v5475_v58  ;;  %17021 = vst [vmem:[#allocation7_spill] sm:$0xff] %v13868_v24  ;;  %v13883_v58 = vpop.permute.xlu2 %6914  ;;  %v5471_v60 = vld [vmem:[%s15188_s3 + $0x20] sm:$0xff] }
 0x82d   :  { %v13860_v26 = vpop.permute.xlu0 %6889  ;;  %5851 = vmatpush.msra.mxu2 %v5491_v37  ;;  %17022 = vst [vmem:[#allocation330_spill] sm:$0xff] %v13883_v58  ;;  %v5472_v37 = vld [vmem:[%s15188_s3 + $0x28] sm:$0xff]  ;;  %v13906_v58 = vld [vmem:[#allocation2 + $0x138] sm:$0xff] }
 0x82e   :  { %17020 = vst [vmem:[#allocation113_spill] sm:$0xff] %v13860_v26  ;;  %5643 = vmatpush.msra.mxu1 %v5474_v39  ;;  %v17031_v26 = vld [vmem:[#allocation86_spill] sm:$0xff] }
 0x82f   :  { %5852 = vmatpush.msra.mxu2 %v5490_v29  ;;  %v7789_v29 = vld [vmem:[#allocation2 + $0x128] sm:$0xff] }
 0x830   :  { %5644 = vmatpush.msra.mxu1 %v5473_v42  ;;  %v7128_v42 = vpack.i.bf16 %v13779_v41, %v12425_v8  ;;  %v5469_v41 = vld [vmem:[%s15188_s3 + $0x10] sm:$0xff]  ;;  %v7794_v8 = vld [vmem:[#allocation2 + $0x140] sm:$0xff] }
 0x831   :  { %5853 = vmatpush.msra.mxu2 %v5489_v0  ;;  %v5470_v0 = vld [vmem:[%s15188_s3 + $0x18] sm:$0xff] }
 0x832   :  { %5645 = vmatpush.msra.mxu1 %v5472_v37  ;;  %v7153_v37 = vpack.i.bf16 %v13906_v58, %v7789_v29 }
 0x833   :  { %7164 = vrot.lane.b32.xlu1 %v12507_v30, %s7918_s11  ;;  %7114 = vrot.lane.b32.xlu0 %v7113_v2, %s7919_s0  ;;  %v5488_v30 = vld [vmem:[%s15188_s3 + $0xa8] sm:$0xff]  ;;  %v5487_v2 = vld [vmem:[%s15188_s3 + $0xa0] sm:$0xff]  ;;  %v13912_v24 = vpop.permute.xlu1 %6924 }
 0x834   :  { %7139 = vrot.lane.b32.xlu2 %v7138_v13, %s7920_s16  ;;  %5854 = vmatpush.msra.mxu2 %v5488_v30  ;;  %v7178_v13 = vpack.i.bf16 %v7789_v29, %v12558_v25  ;;  %v5486_v30 = vld [vmem:[%s15188_s3 + $0x98] sm:$0xff]  ;;  %17024 = vst [vmem:[#allocation419_spill] sm:$0xff] %v13912_v24  ;;  %v13926_v29 = vpop.permute.xlu2 %6929 }
 0x835   :  { %v13892_v39 = vpop.permute.xlu0 %6904  ;;  %5646 = vmatpush.msra.mxu1 %v5471_v60  ;;  %v5485_v60 = vld [vmem:[%s15188_s3 + $0x90] sm:$0xff]  ;;  %17025 = vst [vmem:[#allocation115_spill] sm:$0xff] %v13926_v29  ;;  %v17027_v24 = vld [vmem:[#allocation309_spill] sm:$0xff] }
 0x836   :  { %17023 = vst [vmem:[#allocation174_spill] sm:$0xff] %v13892_v39  ;;  %5855 = vmatpush.msra.mxu2 %v5487_v2  ;;  %v5468_v2 = vld [vmem:[%s15188_s3 + $0x8] sm:$0xff]  ;;  %v7793_v39 = vld [vmem:[#allocation2 + $0x150] sm:$0xff] }
 0x837   :  { %5647 = vmatpush.msra.mxu1 %v5470_v0  ;;  %v5467_v0 = vld [vmem:[%s15188_s3] sm:$0xff]  ;;  %v7208_v25 = vpack.i.bf16 %v7793_v39, %v17030_v11  ;;  %v7173_v17 = vpack.i.bf16 %v7793_v39, %v7794_v8 }
 0x838   :  { %5856 = vmatpush.msra.mxu2 %v5486_v30  ;;  %v13938_v30 = vld [vmem:[#allocation2 + $0x168] sm:$0xff] }
 0x839   :  { %5648 = vmatpush.msra.mxu1 %v5469_v41  ;;  %v5483_v41 = vld [vmem:[%s15188_s3 + $0x80] sm:$0xff] }
 0x83a   :  { %5857 = vmatpush.msra.mxu2 %v5485_v60  ;;  %v7168_v60 = vpack.i.bf16 %v13805_v50, %v17027_v24  ;;  %v7158_v50 = vpack.i.bf16 %v13803_v9, %v17031_v26  ;;  %v17032_v26 = vld [vmem:[#allocation39_spill] sm:$0xff] }
 0x83b   :  { %7179 = vrot.lane.b32.xlu1 %v7178_v13, %s7920_s16  ;;  %7129 = vrot.lane.b32.xlu0 %v7128_v42, %s7920_s16  ;;  %v5484_v42 = vld [vmem:[%s15188_s3 + $0x88] sm:$0xff] }
 0x83c   :  { %7154 = vrot.lane.b32.xlu2 %v7153_v37, %s7919_s0  ;;  %5649 = vmatpush.msra.mxu1 %v5468_v2  ;;  %v13936_v37 = vld [vmem:[#allocation2 + $0x158] sm:$0xff]  ;;  %v13951_v2 = vpop.permute.xlu1 %6939 }
 0x83d   :  { %v13928_v13 = vpop.permute.xlu0 %6919  ;;  %v7193_v29 = vpack.i.bf16 %v13938_v30, %v13936_v37  ;;  %5858 = vmatpush.msra.mxu2 %v5484_v42  ;;  %17028 = vst [vmem:[#allocation9_spill] sm:$0xff] %v13951_v2  ;;  %v6945_v42 = vpop.permute.xlu2 %6944 }
 0x83e   :  { %17026 = vst [vmem:[#allocation189_spill] sm:$0xff] %v13928_v13  ;;  %5650 = vmatpush.msra.mxu1 %v5467_v0  ;;  %v6676_v0 = vunpack.i.l.bf16 %v13541_v38 }
 0x83f   :  { %5859 = vmatpush.msra.mxu2 %v5483_v41  ;;  %v6942_v41 = vunpack.i.h.bf16 %v13951_v2  ;;  %v6947_v2 = vunpack.i.h.bf16 %v6945_v42 }
 0x843   :  { %7194 = vrot.lane.b32.xlu1 %v7193_v29, %s7919_s0  ;;  %7144 = vrot.lane.b32.xlu0 %v12440_v31, %s7918_s11  ;;  %v6946_v29 = vunpack.i.l.bf16 %v6945_v42  ;;  %v6836_v31 = vunpack.i.l.bf16 %v13729_v57 }
 0x844   :  { %7169 = vrot.lane.b32.xlu2 %v7168_v60, %s7920_s16  ;;  %v6955_v11 = vpop.permute.xlu1 %6954 }
 0x845   :  { %v13953_v13 = vpop.permute.xlu0 %6934 }
 0x846   :  { %17029 = vst [vmem:[#allocation320_spill] sm:$0xff] %v13953_v13  ;;  %v5081_v13 = vsel %vm3137_vm13, %v13419_v10, %v6676_v0  ;;  %v6960_v10 = vpop.permute.xlu2 %6959  ;;  %v6956_v0 = vunpack.i.l.bf16 %v6955_v11 }
 0x84b   :  { %7209 = vrot.lane.b32.xlu1 %v7208_v25, %s7920_s16  ;;  %7159 = vrot.lane.b32.xlu0 %v7158_v50, %s7920_s16  ;;  %v5275_v25 = vsel %vm3137_vm13, %v17032_v26, %v6946_v29  ;;  %v5146_v50 = vsel %vm5145_vm14, %v5081_v13, %v6836_v31  ;;  %v6677_v26 = vunpack.i.h.bf16 %v13541_v38  ;;  %v6837_v13 = vunpack.i.h.bf16 %v13729_v57  ;;  %v7795_v31 = vld [vmem:[#allocation2 + $0x170] sm:$0xff] }
 0x84c   :  { %7184 = vrot.lane.b32.xlu2 %v12568_v55, %s7918_s11  ;;  %v5339_v23 = vsel %vm5145_vm14, %v5275_v25, %v6942_v41  ;;  %v6961_v29 = vunpack.i.l.bf16 %v6960_v10  ;;  %v6970_v25 = vpop.permute.xlu1 %6969 }
 0x84d   :  { %v6950_v60 = vpop.permute.xlu0 %6949  ;;  %v5082_v38 = vsel %vm3137_vm13, %v13422_v61, %v6677_v26  ;;  %v6957_v26 = vunpack.i.h.bf16 %v6955_v11 }
 0x84e   :  { %v6952_v9 = vunpack.i.h.bf16 %v6950_v60  ;;  %v6951_v24 = vunpack.i.l.bf16 %v6950_v60  ;;  %v17033_v60 = vld [vmem:[#allocation74_spill] sm:$0xff] }
 0x84f   :  { %v7198_v45 = vpack.i.bf16 %v7794_v8, %v17033_v60 }
 0x850   :  { %v5211_v43 = vsel %vm5210_vm15, %v5146_v50, %v6952_v9  ;;  %v5403_v55 = vsel %vm5210_vm15, %v5339_v23, %v6951_v24  ;;  %v6962_v23 = vunpack.i.h.bf16 %v6960_v10  ;;  %v17034_v24 = vld [vmem:[#allocation163_spill] sm:$0xff]  ;;  %v17036_v9 = vld [vmem:[#allocation169_spill] sm:$0xff]  ;;  %v6681_v10 = vunpack.i.l.bf16 %v13591_v18 }
 0x851   :  { %5651 = vmatmul.f32.vlgmr.msra.gmra.mxu1 %v5211_v43  ;;  %5860 = vmatmul.f32.vlgmr.msra.gmra.mxu2 %v5403_v55  ;;  %v5276_v39 = vsel %vm3137_vm13, %v17034_v24, %v6947_v2  ;;  %v7188_v2 = vpack.i.bf16 %v13906_v58, %v17036_v9  ;;  %v7796_v50 = vld [vmem:[#allocation2 + $0x180] sm:$0xff]  ;;  %v6972_v58 = vunpack.i.h.bf16 %v6970_v25 }
 0x852   :  { %v5340_v43 = vsel %vm5145_vm14, %v5276_v39, %v6956_v0  ;;  %v7213_v55 = vpack.i.bf16 %v7796_v50, %v7795_v31  ;;  %v6841_v0 = vunpack.i.l.bf16 %v13734_v33  ;;  %v5083_v24 = vsel %vm3137_vm13, %v13482_v44, %v6681_v10  ;;  %v6975_v39 = vpop.permute.xlu2 %6974 }
 0x853   :  { %7224 = vrot.lane.b32.xlu1 %v12718_v63, %s7918_s11  ;;  %7174 = vrot.lane.b32.xlu0 %v7173_v17, %s7919_s0  ;;  %v5147_v63 = vsel %vm5145_vm14, %v5082_v38, %v6837_v13  ;;  %v5404_v57 = vsel %vm5210_vm15, %v5340_v43, %v6961_v29  ;;  %v6682_v44 = vunpack.i.h.bf16 %v13591_v18 }
 0x854   :  { %7199 = vrot.lane.b32.xlu2 %v7198_v45, %s7920_s16  ;;  %v5212_v17 = vsel %vm5210_vm15, %v5147_v63, %v6962_v23  ;;  %v17035_v45 = vld [vmem:[#allocation172_spill] sm:$0xff]  ;;  %v6971_v23 = vunpack.i.l.bf16 %v6970_v25  ;;  %v5148_v43 = vsel %vm5145_vm14, %v5083_v24, %v6841_v0  ;;  %v14004_v63 = vld [vmem:[#allocation2 + $0x1e0] sm:$0xff]  ;;  %v7799_v0 = vld [vmem:[#allocation2 + $0x1c8] sm:$0xff]  ;;  %v6686_v24 = vunpack.i.l.bf16 %v13560_v48 }
 0x855   :  { %v6965_v42 = vpop.permute.xlu0 %6964  ;;  %v7238_v41 = vpack.i.bf16 %v7795_v31, %v17035_v45  ;;  %v5213_v38 = vsel %vm5210_vm15, %v5148_v43, %v6972_v58  ;;  %v5084_v18 = vsel %vm3137_vm13, %v13476_v34, %v6682_v44  ;;  %v6846_v43 = vunpack.i.l.bf16 %v13774_v12 }
 0x856   :  { %v6966_v8 = vunpack.i.l.bf16 %v6965_v42  ;;  %v6967_v29 = vunpack.i.h.bf16 %v6965_v42  ;;  %v6842_v42 = vunpack.i.h.bf16 %v13734_v33  ;;  %v5085_v44 = vsel %vm3137_vm13, %v13582_v59, %v6686_v24  ;;  %v7800_v24 = vld [vmem:[#allocation2 + $0x1e8] sm:$0xff] }
 0x858   :  { %v5277_v61 = vsel %vm3137_vm13, %v11836_v62, %v6966_v8  ;;  %v7797_v8 = vld [vmem:[#allocation2 + $0x1a0] sm:$0xff]  ;;  %v5278_v50 = vsel %vm3137_vm13, %v11839_v47, %v6967_v29  ;;  %v6977_v29 = vunpack.i.h.bf16 %v6975_v39 }
 0x859   :  { %5654 = vmatmul.f32.gmra.mxu1 %v5212_v17  ;;  %5863 = vmatmul.f32.gmra.mxu2 %v5404_v57  ;;  %v5341_v13 = vsel %vm5145_vm14, %v5277_v61, %v6957_v26  ;;  %v7253_v11 = vpack.i.bf16 %v14004_v63, %v7797_v8  ;;  %v17037_v57 = vld [vmem:[#allocation48_spill] sm:$0xff] }
 0x85a   :  { %v5405_v62 = vsel %vm5210_vm15, %v5341_v13, %v6971_v23  ;;  %v7228_v31 = vpack.i.bf16 %v13938_v30, %v17037_v57  ;;  %v5149_v30 = vsel %vm5145_vm14, %v5084_v18, %v6842_v42  ;;  %v17038_v26 = vld [vmem:[#allocation80_spill] sm:$0xff]  ;;  %v17039_v13 = vld [vmem:[#allocation93_spill] sm:$0xff]  ;;  %v6990_v47 = vpop.permute.xlu2 %6989  ;;  %v5150_v42 = vsel %vm5145_vm14, %v5085_v44, %v6846_v43 }
 0x85b   :  { %7239 = vrot.lane.b32.xlu1 %v7238_v41, %s7920_s16  ;;  %7189 = vrot.lane.b32.xlu0 %v7188_v2, %s7920_s16  ;;  %v6985_v41 = vpop.permute.xlu1 %6984  ;;  %v7268_v58 = vpack.i.bf16 %v7799_v0, %v17038_v26  ;;  %v7218_v23 = vpack.i.bf16 %v13936_v37, %v17039_v13  ;;  %v6992_v37 = vunpack.i.h.bf16 %v6990_v47  ;;  %v17044_v18 = vld [vmem:[#allocation249_spill] sm:$0xff] }
 0x85c   :  { %7214 = vrot.lane.b32.xlu2 %v7213_v55, %s7919_s0  ;;  %v6976_v55 = vunpack.i.l.bf16 %v6975_v39  ;;  %v6986_v10 = vunpack.i.l.bf16 %v6985_v41 }
 0x85d   :  { %v6980_v17 = vpop.permute.xlu0 %6979 }
 0x85e   :  { %v6982_v2 = vunpack.i.h.bf16 %v6980_v17  ;;  %v6981_v25 = vunpack.i.l.bf16 %v6980_v17  ;;  %v5342_v61 = vsel %vm5145_vm14, %v5278_v50, %v6976_v55  ;;  %v5279_v34 = vsel %vm3137_vm13, %v11991_v1, %v6986_v10  ;;  %v17043_v10 = vld [vmem:[#allocation262_spill] sm:$0xff] }
 0x85f   :  { %v6991_v17 = vunpack.i.l.bf16 %v6990_v47  ;;  %v5215_v1 = vsel %vm5210_vm15, %v5150_v42, %v6992_v37  ;;  %v6687_v55 = vunpack.i.h.bf16 %v13560_v48  ;;  %v17045_v59 = vpack.i.bf16 %v17043_v10, %v17044_v18  ;;  %v17050_v37 = vld [vmem:[#allocation41_spill] sm:$0xff] }
 0x860   :  { %v5406_v33 = vsel %vm5210_vm15, %v5342_v61, %v6981_v25 }
 0x861   :  { %5657 = vmatmul.f32.gmra.mxu1 %v5213_v38  ;;  %5866 = vmatmul.f32.gmra.mxu2 %v5405_v62  ;;  %v17040_v38 = vld [vmem:[#allocation374_spill] sm:$0xff]  ;;  %v17041_v62 = vld [vmem:[#allocation313_spill] sm:$0xff] }
 0x862   :  { %v17042_v8 = vpack.i.bf16 %v17040_v38, %v17041_v62  ;;  %v6691_v62 = vunpack.i.l.bf16 %v13564_v3 }
 0x863   :  { %7254 = vrot.lane.b32.xlu1 %v7253_v11, %s7919_s0  ;;  %7204 = vrot.lane.b32.xlu0 %v12636_v52, %s7918_s11  ;;  %v5214_v52 = vsel %vm5210_vm15, %v5149_v30, %v6982_v2  ;;  %v5343_v11 = vsel %vm5145_vm14, %v5279_v34, %v6977_v29  ;;  %v6987_v2 = vunpack.i.h.bf16 %v6985_v41  ;;  %v7000_v25 = vpop.permute.xlu1 %6999  ;;  %v6847_v41 = vunpack.i.h.bf16 %v13774_v12  ;;  %v17046_v30 = vld [vmem:[#allocation85_spill] sm:$0xff]  ;;  %v17048_v34 = vld [vmem:[#allocation378_spill] sm:$0xff] }
 0x864   :  { %7229 = vrot.lane.b32.xlu2 %v7228_v31, %s7920_s16  ;;  %v5407_v39 = vsel %vm5210_vm15, %v5343_v11, %v6991_v17  ;;  %v17047_v61 = vpack.i.bf16 %v17044_v18, %v17046_v30  ;;  %v7001_v0 = vunpack.i.l.bf16 %v7000_v25  ;;  %v7298_v43 = vpack.i.bf16 %v7800_v24, %v17048_v34 }
 0x865   :  { %v6995_v31 = vpop.permute.xlu0 %6994  ;;  %v6851_v17 = vunpack.i.l.bf16 %v13744_v53 }
 0x866   :  { %v6996_v50 = vunpack.i.l.bf16 %v6995_v31  ;;  %v6997_v44 = vunpack.i.h.bf16 %v6995_v31 }
 0x869   :  { %5660 = vmatmul.f32.gmra.mxu1 %v5214_v52  ;;  %5869 = vmatmul.f32.gmra.mxu2 %v5406_v33  ;;  %v7002_v52 = vunpack.i.h.bf16 %v7000_v25  ;;  %v5280_v33 = vsel %vm3137_vm13, %v11994_v27, %v6987_v2  ;;  %v14063_v27 = vld [vmem:[#allocation2 + $0x1f8] sm:$0xff] }
 0x86a   :  { %v5344_v48 = vsel %vm5145_vm14, %v5280_v33, %v6996_v50  ;;  %v7273_v38 = vpack.i.bf16 %v14063_v27, %v7800_v24  ;;  %v6692_v33 = vunpack.i.h.bf16 %v13564_v3  ;;  %v7804_v24 = vld [vmem:[#allocation2 + $0x210] sm:$0xff] }
 0x86b   :  { %7269 = vrot.lane.b32.xlu1 %v7268_v58, %s7920_s16  ;;  %7219 = vrot.lane.b32.xlu0 %v7218_v23, %s7920_s16  ;;  %v7005_v58 = vpop.permute.xlu2 %7004  ;;  %v5408_v47 = vsel %vm5210_vm15, %v5344_v48, %v7001_v0  ;;  %v6852_v48 = vunpack.i.h.bf16 %v13744_v53 }
 0x86c   :  { %7244 = vrot.lane.b32.xlu2 %v17042_v8, %s7918_s11  ;;  %v17049_v8 = vld [vmem:[#allocation79_spill] sm:$0xff]  ;;  %v7007_v10 = vunpack.i.h.bf16 %v7005_v58  ;;  %v5088_v3 = vsel %vm3137_vm13, %v13645_v22, %v6692_v33 }
 0x86d   :  { %v7010_v29 = vpop.permute.xlu0 %7009  ;;  %v17051_v11 = vpack.i.bf16 %v17049_v8, %v17050_v37  ;;  %v6696_v8 = vunpack.i.l.bf16 %v13611_v20  ;;  %v6856_v37 = vunpack.i.l.bf16 %v13754_v49 }
 0x86e   :  { %v7012_v42 = vunpack.i.h.bf16 %v7010_v29  ;;  %v7011_v2 = vunpack.i.l.bf16 %v7010_v29 }
 0x871   :  { %5663 = vmatmul.f32.gmra.mxu1 %v5215_v1  ;;  %5872 = vmatmul.f32.gmra.mxu2 %v5407_v39  ;;  %v7015_v1 = vpop.permute.xlu1 %7014  ;;  %v5087_v39 = vsel %vm3137_vm13, %v13600_v15, %v6691_v62  ;;  %v17054_v62 = vld [vmem:[#allocation265_spill] sm:$0xff] }
 0x872   :  { %v5152_v50 = vsel %vm5145_vm14, %v5087_v39, %v6851_v17 }
 0x873   :  { %7284 = vrot.lane.b32.xlu1 %v12929_v46, %s7918_s11  ;;  %7234 = vrot.lane.b32.xlu0 %v17045_v59, %s7919_s0  ;;  %v5086_v46 = vsel %vm3137_vm13, %v13598_v56, %v6687_v55  ;;  %v7006_v56 = vunpack.i.l.bf16 %v7005_v58  ;;  %v5217_v18 = vsel %vm5210_vm15, %v5152_v50, %v7012_v42  ;;  %v14082_v59 = vld [vmem:[#allocation2 + $0x218] sm:$0xff]  ;;  %v7020_v15 = vpop.permute.xlu2 %7019  ;;  %v5282_v58 = vsel %vm3137_vm13, %v12011_v32, %v7007_v10  ;;  %v7806_v10 = vld [vmem:[#allocation2 + $0x200] sm:$0xff] }
 0x874   :  { %7259 = vrot.lane.b32.xlu2 %v17047_v61, %s7920_s16  ;;  %v5151_v23 = vsel %vm5145_vm14, %v5086_v46, %v6847_v41  ;;  %v14084_v41 = vld [vmem:[#allocation2 + $0x228] sm:$0xff]  ;;  %v7016_v61 = vunpack.i.l.bf16 %v7015_v1  ;;  %v7022_v46 = vunpack.i.h.bf16 %v7020_v15 }
 0x875   :  { %v5216_v12 = vsel %vm5210_vm15, %v5151_v23, %v7002_v52  ;;  %v5281_v25 = vsel %vm3137_vm13, %v12008_v51, %v7006_v56  ;;  %v7313_v30 = vpack.i.bf16 %v14084_v41, %v14082_v59  ;;  %v17052_v51 = vld [vmem:[#allocation181_spill] sm:$0xff]  ;;  %v7025_v0 = vpop.permute.xlu0 %7024 }
 0x876   :  { %v5345_v55 = vsel %vm5145_vm14, %v5281_v25, %v6997_v44  ;;  %v7288_v52 = vpack.i.bf16 %v14004_v63, %v17052_v51  ;;  %v5346_v23 = vsel %vm5145_vm14, %v5282_v58, %v7016_v61  ;;  %v7026_v63 = vunpack.i.l.bf16 %v7025_v0 }
 0x877   :  { %v5409_v31 = vsel %vm5210_vm15, %v5345_v55, %v7011_v2  ;;  %v5089_v2 = vsel %vm3137_vm13, %v13651_v40, %v6696_v8  ;;  %v7027_v50 = vunpack.i.h.bf16 %v7025_v0  ;;  %v6857_v61 = vunpack.i.h.bf16 %v13754_v49 }
 0x878   :  { %v5283_v22 = vsel %vm3137_vm13, %v12054_v4, %v7026_v63  ;;  %v5154_v25 = vsel %vm5145_vm14, %v5089_v2, %v6856_v37  ;;  %v7807_v63 = vld [vmem:[#allocation2 + $0x230] sm:$0xff] }
 0x879   :  { %5666 = vmatmul.f32.gmra.mxu1 %v5216_v12  ;;  %5875 = vmatmul.f32.gmra.mxu2 %v5408_v47  ;;  %v7021_v12 = vunpack.i.l.bf16 %v7020_v15  ;;  %v5153_v47 = vsel %vm5145_vm14, %v5088_v3, %v6852_v48  ;;  %v7030_v32 = vpop.permute.xlu1 %7029  ;;  %v17056_v15 = vld [vmem:[#allocation377_spill] sm:$0xff]  ;;  %v5284_v0 = vsel %vm3137_vm13, %v12057_v36, %v7027_v50  ;;  %v17058_v3 = vld [vmem:[#allocation62_spill] sm:$0xff] }
 0x87a   :  { %v7032_v17 = vunpack.i.h.bf16 %v7030_v32  ;;  %v7031_v42 = vunpack.i.l.bf16 %v7030_v32  ;;  %v17057_v40 = vpack.i.bf16 %v17056_v15, %v13113_v28  ;;  %v6861_v32 = vunpack.i.l.bf16 %v13796_v21 }
 0x87b   :  { %7299 = vrot.lane.b32.xlu1 %v7298_v43, %s7920_s16  ;;  %7249 = vrot.lane.b32.xlu0 %v17051_v11, %s7920_s16  ;;  %v5410_v53 = vsel %vm5210_vm15, %v5346_v23, %v7021_v12  ;;  %v17053_v43 = vld [vmem:[#allocation316_spill] sm:$0xff]  ;;  %v7017_v11 = vunpack.i.h.bf16 %v7015_v1  ;;  %v7035_v39 = vpop.permute.xlu2 %7034  ;;  %v7293_v1 = vpack.i.bf16 %v7804_v24, %v7806_v10 }
 0x87c   :  { %7274 = vrot.lane.b32.xlu2 %v7273_v38, %s7919_s0  ;;  %v7328_v29 = vpack.i.bf16 %v7804_v24, %v17053_v43  ;;  %v7805_v38 = vld [vmem:[#allocation2 + $0x1d0] sm:$0xff]  ;;  %v5219_v55 = vsel %vm5210_vm15, %v5154_v25, %v7032_v17  ;;  %v14140_v24 = vld [vmem:[#allocation2 + $0x240] sm:$0xff]  ;;  %v7037_v8 = vunpack.i.h.bf16 %v7035_v39 }
 0x87d   :  { %v7278_v56 = vpack.i.bf16 %v7805_v38, %v17054_v62  ;;  %v5347_v44 = vsel %vm5145_vm14, %v5283_v22, %v7017_v11  ;;  %v17060_v38 = vld [vmem:[#allocation167_spill] sm:$0xff]  ;;  %v17061_v17 = vld [vmem:[#allocation130_spill] sm:$0xff] }
 0x87e   :  { %v5411_v4 = vsel %vm5210_vm15, %v5347_v44, %v7031_v42 }
 0x881   :  { %5669 = vmatmul.f32.gmra.mxu1 %v5217_v18  ;;  %5878 = vmatmul.f32.gmra.mxu2 %v5409_v31  ;;  %v7040_v18 = vpop.permute.xlu0 %7039 }
 0x882   :  { %v7042_v33 = vunpack.i.h.bf16 %v7040_v18  ;;  %v7041_v48 = vunpack.i.l.bf16 %v7040_v18 }
 0x883   :  { %7314 = vrot.lane.b32.xlu1 %v7313_v30, %s7919_s0  ;;  %7264 = vrot.lane.b32.xlu0 %v12858_v54, %s7918_s11  ;;  %v5218_v54 = vsel %vm5210_vm15, %v5153_v47, %v7022_v46  ;;  %v6697_v30 = vunpack.i.h.bf16 %v13611_v20  ;;  %v7036_v46 = vunpack.i.l.bf16 %v7035_v39  ;;  %v7358_v47 = vpack.i.bf16 %v7807_v63, %v17058_v3  ;;  %v7050_v36 = vpop.permute.xlu2 %7049 }
 0x884   :  { %7289 = vrot.lane.b32.xlu2 %v7288_v52, %s7920_s16  ;;  %v7045_v52 = vpop.permute.xlu1 %7044  ;;  %v7051_v37 = vunpack.i.l.bf16 %v7050_v36 }
 0x885   :  { %v7046_v58 = vunpack.i.l.bf16 %v7045_v52  ;;  %v5090_v20 = vsel %vm3137_vm13, %v13698_v6, %v6697_v30  ;;  %v5348_v23 = vsel %vm5145_vm14, %v5284_v0, %v7036_v46  ;;  %v7333_v6 = vpack.i.bf16 %v14140_v24, %v7807_v63  ;;  %v17063_v30 = vld [vmem:[#allocation90_spill] sm:$0xff] }
 0x886   :  { %v5155_v28 = vsel %vm5145_vm14, %v5090_v20, %v6857_v61  ;;  %v5412_v49 = vsel %vm5210_vm15, %v5348_v23, %v7041_v48  ;;  %v7047_v2 = vunpack.i.h.bf16 %v7045_v52 }
 0x887   :  { %v5220_v12 = vsel %vm5210_vm15, %v5155_v28, %v7042_v33  ;;  %v17065_v28 = vld [vmem:[#allocation388_spill] sm:$0xff] }
 0x888   :  { %v7338_v23 = vpack.i.bf16 %v14082_v59, %v17065_v28 }
 0x889   :  { %5672 = vmatmul.f32.gmra.mxu1 %v5218_v54  ;;  %5881 = vmatmul.f32.gmra.mxu2 %v5410_v53  ;;  %v17059_v54 = vld [vmem:[#allocation401_spill] sm:$0xff]  ;;  %v7055_v11 = vpop.permute.xlu0 %7054 }
 0x88a   :  { %v7308_v53 = vpack.i.bf16 %v14063_v27, %v17059_v54  ;;  %v7052_v27 = vunpack.i.h.bf16 %v7050_v36 }
 0x88b   :  { %7329 = vrot.lane.b32.xlu1 %v7328_v29, %s7920_s16  ;;  %7279 = vrot.lane.b32.xlu0 %v7278_v56, %s7920_s16  ;;  %v6701_v29 = vunpack.i.l.bf16 %v13574_v16  ;;  %v5285_v56 = vsel %vm3137_vm13, %v17060_v38, %v7046_v58  ;;  %v17064_v58 = vld [vmem:[#allocation246_spill] sm:$0xff] }
 0x88c   :  { %7304 = vrot.lane.b32.xlu2 %v12994_v35, %s7918_s11  ;;  %v17055_v35 = vld [vmem:[#allocation96_spill] sm:$0xff]  ;;  %v5349_v22 = vsel %vm5145_vm14, %v5285_v56, %v7037_v8  ;;  %v17069_v56 = vld [vmem:[#allocation55_spill] sm:$0xff] }
 0x88d   :  { %v7318_v31 = vpack.i.bf16 %v7806_v10, %v17055_v35  ;;  %v5091_v44 = vsel %vm3137_vm13, %v17061_v17, %v6701_v29  ;;  %v5413_v50 = vsel %vm5210_vm15, %v5349_v22, %v7051_v37  ;;  %v7056_v10 = vunpack.i.l.bf16 %v7055_v11  ;;  %v7811_v22 = vld [vmem:[#allocation2 + $0x248] sm:$0xff]  ;;  %v7812_v37 = vld [vmem:[#allocation2 + $0x258] sm:$0xff] }
 0x88e   :  { %v5156_v42 = vsel %vm5145_vm14, %v5091_v44, %v6861_v32 }
 0x88f   :  { %v5221_v25 = vsel %vm5210_vm15, %v5156_v42, %v7052_v27 }
 0x891   :  { %5675 = vmatmul.f32.gmra.mxu1 %v5219_v55  ;;  %5884 = vmatmul.f32.gmra.mxu2 %v5411_v4  ;;  %v7809_v55 = vld [vmem:[#allocation2 + $0x260] sm:$0xff]  ;;  %v7060_v4 = vpop.permute.xlu1 %7059 }
 0x892   :  { %v7373_v39 = vpack.i.bf16 %v17056_v15, %v7809_v55  ;;  %v7062_v61 = vunpack.i.h.bf16 %v7060_v4  ;;  %v5286_v15 = vsel %vm3137_vm13, %v12118_v14, %v7047_v2  ;;  %v7061_v33 = vunpack.i.l.bf16 %v7060_v4  ;;  %v7070_v14 = vpop.permute.xlu0 %7069  ;;  %v17070_v2 = vld [vmem:[#allocation57_spill] sm:$0xff] }
 0x893   :  { %7344 = vrot.lane.b32.xlu1 %v17057_v40, %s7918_s11  ;;  %7294 = vrot.lane.b32.xlu0 %v7293_v1, %s7919_s0  ;;  %v17062_v1 = vld [vmem:[#allocation95_spill] sm:$0xff]  ;;  %v6862_v40 = vunpack.i.h.bf16 %v13796_v21  ;;  %v5350_v52 = vsel %vm5145_vm14, %v5286_v15, %v7056_v10  ;;  %v7071_v59 = vunpack.i.l.bf16 %v7070_v14 }
 0x894   :  { %7319 = vrot.lane.b32.xlu2 %v7318_v31, %s7920_s16  ;;  %v7348_v18 = vpack.i.bf16 %v14084_v41, %v17062_v1  ;;  %v6702_v31 = vunpack.i.h.bf16 %v13574_v16  ;;  %v7065_v16 = vpop.permute.xlu2 %7064  ;;  %v5414_v46 = vsel %vm5210_vm15, %v5350_v52, %v7061_v33  ;;  %v7810_v21 = vld [vmem:[#allocation2 + $0x270] sm:$0xff] }
 0x895   :  { %v7388_v20 = vpack.i.bf16 %v17064_v58, %v7810_v21  ;;  %v7066_v63 = vunpack.i.l.bf16 %v7065_v16  ;;  %v7067_v17 = vunpack.i.h.bf16 %v7065_v16  ;;  %v17073_v33 = vld [vmem:[#allocation184_spill] sm:$0xff] }
 0x896   :  { %v5092_v41 = vsel %vm3137_vm13, %v13664_v7, %v6702_v31  ;;  %v6866_v7 = vunpack.i.l.bf16 %v13766_v19 }
 0x897   :  { %v5157_v48 = vsel %vm5145_vm14, %v5092_v41, %v6862_v40  ;;  %v5287_v32 = vsel %vm3137_vm13, %v17069_v56, %v7066_v63  ;;  %v17072_v40 = vld [vmem:[#allocation43_spill] sm:$0xff]  ;;  %v17080_v56 = vld [vmem:[#allocation280_spill] sm:$0xff] }
 0x898   :  { %v5222_v0 = vsel %vm5210_vm15, %v5157_v48, %v7062_v61 }
 0x899   :  { %5678 = vmatmul.f32.gmra.mxu1 %v5220_v12  ;;  %5887 = vmatmul.f32.gmra.mxu2 %v5412_v49  ;;  %v17066_v12 = vld [vmem:[#allocation92_spill] sm:$0xff]  ;;  %v7075_v29 = vpop.permute.xlu1 %7074 }
 0x89a   :  { %v6706_v49 = vunpack.i.l.bf16 %v17066_v12  ;;  %v6707_v10 = vunpack.i.h.bf16 %v17066_v12  ;;  %v7085_v31 = vpop.permute.xlu0 %7084 }
 0x89b   :  { %7359 = vrot.lane.b32.xlu1 %v7358_v47, %s7920_s16  ;;  %7309 = vrot.lane.b32.xlu0 %v7308_v53, %s7920_s16  ;;  %v7057_v47 = vunpack.i.h.bf16 %v7055_v11  ;;  %v17067_v53 = vld [vmem:[#allocation269_spill] sm:$0xff]  ;;  %v7353_v11 = vpack.i.bf16 %v7812_v37, %v7811_v22  ;;  %v7086_v52 = vunpack.i.l.bf16 %v7085_v31 }
 0x89c   :  { %7334 = vrot.lane.b32.xlu2 %v7333_v6, %s7919_s0  ;;  %v17068_v36 = vpack.i.bf16 %v17067_v53, %v17064_v58  ;;  %v7072_v6 = vunpack.i.h.bf16 %v7070_v14  ;;  %v5093_v38 = vsel %vm3137_vm13, %v13666_v5, %v6706_v49  ;;  %v17071_v5 = vld [vmem:[#allocation104_spill] sm:$0xff]  ;;  %v5094_v41 = vsel %vm3137_vm13, %v17073_v33, %v6707_v10  ;;  %v17075_v58 = vld [vmem:[#allocation65_spill] sm:$0xff]  ;;  %v17076_v14 = vld [vmem:[#allocation403_spill] sm:$0xff] }
 0x89d   :  { %v5158_v8 = vsel %vm5145_vm14, %v5093_v38, %v6866_v7  ;;  %v5351_v27 = vsel %vm5145_vm14, %v5287_v32, %v7057_v47  ;;  %v7378_v4 = vpack.i.bf16 %v7811_v22, %v17071_v5  ;;  %v7393_v12 = vpack.i.bf16 %v7812_v37, %v17076_v14  ;;  %v17077_v49 = vld [vmem:[#allocation121_spill] sm:$0xff]  ;;  %v17078_v7 = vld [vmem:[#allocation168_spill] sm:$0xff] }
 0x89e   :  { %v5223_v44 = vsel %vm5210_vm15, %v5158_v8, %v7072_v6  ;;  %v5415_v42 = vsel %vm5210_vm15, %v5351_v27, %v7071_v59  ;;  %v6711_v63 = vunpack.i.l.bf16 %v17077_v49  ;;  %v5289_v47 = vsel %vm3137_vm13, %v17078_v7, %v7086_v52 }
 0x89f   :  { %v7087_v22 = vunpack.i.h.bf16 %v7085_v31  ;;  %v17087_v31 = vld [vmem:[#allocation107_spill] sm:$0xff] }
 0x8a0   :  { %v5095_v32 = vsel %vm3137_vm13, %v17080_v56, %v6711_v63  ;;  %v14250_v63 = vld [vmem:[#allocation2 + $0x278] sm:$0xff]  ;;  %v17094_v56 = vld [vmem:[#allocation390_spill] sm:$0xff] }
 0x8a1   :  { %5681 = vmatmul.f32.gmra.mxu1 %v5221_v25  ;;  %5890 = vmatmul.f32.gmra.mxu2 %v5413_v50  ;;  %v7403_v25 = vpack.i.bf16 %v7809_v55, %v17070_v2  ;;  %v7080_v50 = vpop.permute.xlu2 %7079  ;;  %v5288_v55 = vsel %vm3137_vm13, %v17072_v40, %v7067_v17  ;;  %v7398_v7 = vpack.i.bf16 %v17067_v53, %v14250_v63 }
 0x8a2   :  { %v7081_v15 = vunpack.i.l.bf16 %v7080_v50  ;;  %v7100_v17 = vpop.permute.xlu0 %7099 }
 0x8a3   :  { %7374 = vrot.lane.b32.xlu1 %v7373_v39, %s7919_s0  ;;  %7324 = vrot.lane.b32.xlu0 %v17063_v30, %s7918_s11  ;;  %v7076_v39 = vunpack.i.l.bf16 %v7075_v29  ;;  %v7082_v30 = vunpack.i.h.bf16 %v7080_v50  ;;  %v17084_v50 = vld [vmem:[#allocation268_spill] sm:$0xff] }
 0x8a4   :  { %7349 = vrot.lane.b32.xlu2 %v7348_v18, %s7920_s16  ;;  %v6867_v18 = vunpack.i.h.bf16 %v13766_v19 }
 0x8a5   :  { %v5352_v61 = vsel %vm5145_vm14, %v5288_v55, %v7076_v39  ;;  %v17085_v39 = vld [vmem:[#allocation404_spill] sm:$0xff]  ;;  %v7102_v55 = vunpack.i.h.bf16 %v7100_v17 }
 0x8a6   :  { %v5159_v16 = vsel %vm5145_vm14, %v5094_v41, %v6867_v18  ;;  %v5416_v19 = vsel %vm5210_vm15, %v5352_v61, %v7081_v15  ;;  %v7101_v61 = vunpack.i.l.bf16 %v7100_v17  ;;  %v17090_v15 = vld [vmem:[#allocation53_spill] sm:$0xff] }
 0x8a7   :  { %v5224_v48 = vsel %vm5210_vm15, %v5159_v16, %v7082_v30  ;;  %v17088_v30 = vld [vmem:[#allocation381_spill] sm:$0xff]  ;;  %v5290_v52 = vsel %vm3137_vm13, %v17090_v15, %v7087_v22  ;;  %v17091_v16 = vld [vmem:[#allocation183_spill] sm:$0xff] }
 0x8a8   :  { %v17089_v40 = vpack.i.bf16 %v17087_v31, %v17088_v30  ;;  %v6480_v22 = vld [vmem:[%s15190_s5 + $0x38] sm:$0xff] }
 0x8a9   :  { %5684 = vmatmul.f32.gmra.mxu1 %v5222_v0  ;;  %5893 = vmatmul.f32.gmra.mxu2 %v5414_v46  ;;  %v17074_v0 = vld [vmem:[#allocation380_spill] sm:$0xff]  ;;  %v7095_v8 = vpop.permute.xlu2 %7094 }
 0x8aa   :  { %v7418_v46 = vpack.i.bf16 %v7810_v21, %v17074_v0  ;;  %v7077_v21 = vunpack.i.h.bf16 %v7075_v29  ;;  %v6712_v29 = vunpack.i.h.bf16 %v17077_v49  ;;  %v7096_v33 = vunpack.i.l.bf16 %v7095_v8  ;;  %6499 = vmatpush.msrb.mxu0 %v6480_v22  ;;  %v14269_v17 = vpop.permute.xlu0 %7114 }
 0x8ab   :  { %7389 = vrot.lane.b32.xlu1 %v7388_v20, %s7919_s0  ;;  %7339 = vrot.lane.b32.xlu0 %v7338_v23, %s7920_s16  ;;  %v7368_v20 = vpack.i.bf16 %v14140_v24, %v17075_v58  ;;  %v7090_v23 = vpop.permute.xlu1 %7089  ;;  %v7097_v53 = vunpack.i.h.bf16 %v7095_v8  ;;  %v14274_v8 = vld [vmem:[#allocation2 + $0x288] sm:$0xff] }
 0x8ac   :  { %7364 = vrot.lane.b32.xlu2 %v17068_v36, %s7918_s11  ;;  %v17079_v36 = vld [vmem:[#allocation76_spill] sm:$0xff]  ;;  %v7092_v24 = vunpack.i.h.bf16 %v7090_v23  ;;  %v5353_v59 = vsel %vm5145_vm14, %v5289_v47, %v7077_v21  ;;  %v7091_v38 = vunpack.i.l.bf16 %v7090_v23 }
 0x8ad   :  { %v6871_v6 = vunpack.i.l.bf16 %v17079_v36  ;;  %v6872_v10 = vunpack.i.h.bf16 %v17079_v36  ;;  %v14254_v36 = vld [vmem:[#allocation2 + $0x290] sm:$0xff] }
 0x8ae   :  { %v17092_v21 = vld [vmem:[#allocation324_spill] sm:$0xff] }
 0x8af   :  { %v5160_v27 = vsel %vm5145_vm14, %v5095_v32, %v6871_v6  ;;  %v7423_v6 = vpack.i.bf16 %v17084_v50, %v14254_v36  ;;  %v6876_v32 = vunpack.i.l.bf16 %v17094_v56 }
 0x8b0   :  { %v5225_v37 = vsel %vm5210_vm15, %v5160_v27, %v7092_v24  ;;  %v6716_v24 = vunpack.i.l.bf16 %v17092_v21 }
 0x8b1   :  { %5687 = vmatmul.f32.gmra.mxu1 %v5223_v44  ;;  %5896 = vmatmul.f32.gmra.mxu2 %v5415_v42  ;;  %v17081_v44 = vld [vmem:[#allocation106_spill] sm:$0xff]  ;;  %v17082_v42 = vld [vmem:[#allocation319_spill] sm:$0xff]  ;;  %v7110_v47 = vpop.permute.xlu2 %7109 }
 0x8b2   :  { %v7112_v27 = vunpack.i.h.bf16 %v7110_v47 }
 0x8b3   :  { %7404 = vrot.lane.b32.xlu1 %v7403_v25, %s7920_s16  ;;  %7354 = vrot.lane.b32.xlu0 %v7353_v11, %s7919_s0  ;;  %v5417_v11 = vsel %vm5210_vm15, %v5353_v59, %v7091_v38  ;;  %v17083_v25 = vpack.i.bf16 %v17081_v44, %v17082_v42  ;;  %v7105_v18 = vpop.permute.xlu1 %7104  ;;  %v17093_v59 = vld [vmem:[#allocation166_spill] sm:$0xff] }
 0x8b4   :  { %7379 = vrot.lane.b32.xlu2 %v7378_v4, %s7920_s16  ;;  %v17086_v4 = vpack.i.bf16 %v17084_v50, %v17085_v39  ;;  %v7106_v41 = vunpack.i.l.bf16 %v7105_v18 }
 0x8b6   :  { %v5291_v38 = vsel %vm3137_vm13, %v17093_v59, %v7106_v41  ;;  %v14288_v41 = vld [vmem:[%s15189_s4] ss:$0 sm:$0xff] }
 0x8b9   :  { %5690 = vmatmul.f32.gmra.mxu1 %v5224_v48  ;;  %5899 = vmatmul.f32.gmra.mxu2 %v5416_v19  ;;  %v5096_v48 = vsel %vm3137_vm13, %v17091_v16, %v6712_v29  ;;  %v6717_v16 = vunpack.i.h.bf16 %v17092_v21  ;;  %v7125_v21 = vpop.permute.xlu2 %7124 }
 0x8ba   :  { %v5161_v19 = vsel %vm5145_vm14, %v5096_v48, %v6872_v10  ;;  %v7413_v10 = vpack.i.bf16 %v17085_v39, %v14274_v8  ;;  %v14290_v39 = vld [vmem:[#allocation2 + $0x2a0] sm:$0xff] }
 0x8bb   :  { %7419 = vrot.lane.b32.xlu1 %v7418_v46, %s7920_s16  ;;  %7369 = vrot.lane.b32.xlu0 %v7368_v20, %s7920_s16  ;;  %v5354_v46 = vsel %vm5145_vm14, %v5290_v52, %v7096_v33  ;;  %v5226_v20 = vsel %vm5210_vm15, %v5161_v19, %v7102_v55  ;;  %v7120_v52 = vpop.permute.xlu1 %7119  ;;  %v7116_v33 = vunpack.i.l.bf16 %v14269_v17 }
 0x8bc   :  { %7394 = vrot.lane.b32.xlu2 %v7393_v12, %s7920_s16  ;;  %v5418_v23 = vsel %vm5210_vm15, %v5354_v46, %v7101_v61  ;;  %v14246_v12 = vld [vmem:[#allocation2 + $0x2a8] sm:$0xff]  ;;  %v14280_v61 = vld [vmem:[#allocation2 + $0x2b8] sm:$0xff]  ;;  %v7122_v48 = vunpack.i.h.bf16 %v7120_v52 }
 0x8bd   :  { %v7448_v49 = vpack.i.bf16 %v17087_v31, %v14246_v12  ;;  %v7107_v31 = vunpack.i.h.bf16 %v7105_v18  ;;  %v7463_v15 = vpack.i.bf16 %v17082_v42, %v14280_v61  ;;  %v7438_v18 = vpack.i.bf16 %v17088_v30, %v14290_v39  ;;  %v17096_v46 = vld [vmem:[#allocation75_spill] sm:$0xff] }
 0x8be   :  { %v6877_v42 = vunpack.i.h.bf16 %v17094_v56  ;;  %v7121_v30 = vunpack.i.l.bf16 %v7120_v52 }
 0x8c1   :  { %5693 = vmatmul.f32.gmra.mxu1 %v5225_v37  ;;  %5902 = vmatmul.f32.gmra.mxu2 %v5417_v11  ;;  %v5355_v37 = vsel %vm5145_vm14, %v5291_v38, %v7097_v53  ;;  %v7111_v11 = vunpack.i.l.bf16 %v7110_v47  ;;  %v7819_v47 = vld [vmem:[#allocation2 + $0xc8] sm:$0xff] }
 0x8c3   :  { %7434 = vrot.lane.b32.xlu1 %v17083_v25, %s7918_s11  ;;  %7384 = vrot.lane.b32.xlu0 %v17086_v4, %s7918_s11  ;;  %v17095_v25 = vld [vmem:[#allocation134_spill] sm:$0xff]  ;;  %v5419_v55 = vsel %vm5210_vm15, %v5355_v37, %v7111_v11  ;;  %v7130_v37 = vpop.permute.xlu0 %7129 }
 0x8c4   :  { %7409 = vrot.lane.b32.xlu2 %v17089_v40, %s7918_s11  ;;  %v5097_v50 = vsel %vm3137_vm13, %v17095_v25, %v6716_v24  ;;  %v17099_v11 = vld [vmem:[#allocation370_spill] sm:$0xff]  ;;  %v17100_v25 = vld [vmem:[#allocation376_spill] sm:$0xff]  ;;  %v7131_v52 = vunpack.i.l.bf16 %v7130_v37 }
 0x8c5   :  { %v5162_v4 = vsel %vm5145_vm14, %v5097_v50, %v6876_v32  ;;  %v17097_v32 = vld [vmem:[#allocation382_spill] sm:$0xff]  ;;  %v6721_v50 = vunpack.i.l.bf16 %v17100_v25 }
 0x8c6   :  { %v5227_v40 = vsel %vm5210_vm15, %v5162_v4, %v7112_v27  ;;  %v7478_v53 = vpack.i.bf16 %v14246_v12, %v17097_v32  ;;  %v17098_v27 = vld [vmem:[#allocation396_spill] sm:$0xff]  ;;  %v7126_v4 = vunpack.i.l.bf16 %v7125_v21  ;;  %v7117_v12 = vunpack.i.h.bf16 %v14269_v17  ;;  %v17104_v17 = vld [vmem:[#allocation318_spill] sm:$0xff] }
 0x8c7   :  { %v7428_v22 = vpack.i.bf16 %v14250_v63, %v17098_v27 }
 0x8c9   :  { %5696 = vmatmul.f32.gmra.mxu1 %v5226_v20  ;;  %5905 = vmatmul.f32.gmra.mxu2 %v5418_v23  ;;  %v5292_v20 = vsel %vm3137_vm13, %v17096_v46, %v7107_v31 }
 0x8cb   :  { %7449 = vrot.lane.b32.xlu1 %v7448_v49, %s7919_s0  ;;  %7399 = vrot.lane.b32.xlu0 %v7398_v7, %s7919_s0  ;;  %v5356_v49 = vsel %vm5145_vm14, %v5292_v20, %v7116_v33  ;;  %v7443_v20 = vpack.i.bf16 %v14274_v8, %v17104_v17  ;;  %v17107_v8 = vld [vmem:[#allocation308_spill] sm:$0xff] }
 0x8cc   :  { %7424 = vrot.lane.b32.xlu2 %v7423_v6, %s7919_s0  ;;  %v5098_v6 = vsel %vm3137_vm13, %v7819_v47, %v6717_v16  ;;  %v5420_v56 = vsel %vm5210_vm15, %v5356_v49, %v7121_v30  ;;  %v17105_v49 = vld [vmem:[#allocation72_spill] sm:$0xff] }
 0x8cd   :  { %v5163_v59 = vsel %vm5145_vm14, %v5098_v6, %v6877_v42  ;;  %v7820_v42 = vld [vmem:[#allocation2 + $0xd8] sm:$0xff]  ;;  %v7127_v6 = vunpack.i.h.bf16 %v7125_v21 }
 0x8ce   :  { %v5652_v29 = vpop.f32.mrf.mxu1  ;;  %v5228_v38 = vsel %vm5210_vm15, %v5163_v59, %v7122_v48  ;;  %v5099_v48 = vsel %vm3137_vm13, %v7820_v42, %v6721_v50  ;;  %v6722_v50 = vunpack.i.h.bf16 %v17100_v25  ;;  %v17108_v25 = vld [vmem:[#allocation243_spill] sm:$0xff]  ;;  %v7821_v42 = vld [vmem:[#allocation2 + $0xe0] sm:$0xff] }
 0x8cf   :  { %v5653_v23 = vadd.f32 %v14288_v41, %v5652_v29  ;;  %v7453_v29 = vpack.i.bf16 %v14254_v36, %v17099_v11 }
 0x8d1   :  { %5699 = vmatmul.f32.gmra.mxu1 %v5227_v40  ;;  %5908 = vmatmul.f32.gmra.mxu2 %v5419_v55  ;;  %v17102_v40 = vld [vmem:[#allocation371_spill] sm:$0xff] }
 0x8d3   :  { %7464 = vrot.lane.b32.xlu1 %v7463_v15, %s7919_s0  ;;  %7414 = vrot.lane.b32.xlu0 %v7413_v10, %s7919_s0  ;;  %v17101_v10 = vld [vmem:[#allocation270_spill] sm:$0xff]  ;;  %v7132_v15 = vunpack.i.h.bf16 %v7130_v37 }
 0x8d4   :  { %7439 = vrot.lane.b32.xlu2 %v7438_v18, %s7919_s0  ;;  %v5861_v19 = vpop.f32.mrf.mxu2  ;;  %v6881_v31 = vunpack.i.l.bf16 %v17101_v10  ;;  %v14321_v18 = vpop.permute.xlu1 %7134  ;;  %v6882_v21 = vunpack.i.h.bf16 %v17101_v10 }
 0x8d5   :  { %v5862_v24 = vadd.f32 %v5861_v19, %v5653_v23  ;;  %v17103_v19 = vld [vmem:[#allocation69_spill] sm:$0xff] }
 0x8d6   :  { %v5655_v7 = vpop.f32.mrf.mxu1  ;;  %v5293_v46 = vsel %vm3137_vm13, %v17103_v19, %v7126_v4  ;;  %v14342_v4 = vpop.permute.xlu0 %7144  ;;  %v17109_v19 = vld [vmem:[#allocation45_spill] sm:$0xff] }
 0x8d7   :  { %v6071_v55 = vadd.f32 %v17102_v40, %v5862_v24  ;;  %v5656_v63 = vadd.f32 %v14288_v41, %v5655_v7  ;;  %v5164_v7 = vsel %vm5145_vm14, %v5099_v48, %v6881_v31  ;;  %v5357_v47 = vsel %vm5145_vm14, %v5293_v46, %v7117_v12 }
 0x8d8   :  { %v5229_v24 = vsel %vm5210_vm15, %v5164_v7, %v7132_v15  ;;  %v5421_v59 = vsel %vm5210_vm15, %v5357_v47, %v7131_v52  ;;  %v5100_v48 = vsel %vm3137_vm13, %v7821_v42, %v6722_v50  ;;  %v17110_v7 = vld [vmem:[#allocation387_spill] sm:$0xff] }
 0x8d9   :  { %5702 = vmatmul.f32.gmra.mxu1 %v5228_v38  ;;  %5911 = vmatmul.f32.gmra.mxu2 %v5420_v56  ;;  %v6262_v23 = vmax.f32 %v6071_v55, 0.0  ;;  %v17106_v38 = vld [vmem:[#allocation261_spill] sm:$0xff]  ;;  %v5165_v46 = vsel %vm5145_vm14, %v5100_v48, %v6882_v21  ;;  %v6726_v47 = vunpack.i.l.bf16 %v17110_v7  ;;  %v17118_v50 = vld [vmem:[#allocation331_spill] sm:$0xff] }
 0x8da   :  { %v7493_v56 = vpack.i.bf16 %v14280_v61, %v17106_v38  ;;  %v6886_v21 = vunpack.i.l.bf16 %v17118_v50 }
 0x8db   :  { %7479 = vrot.lane.b32.xlu1 %v7478_v53, %s7920_s16  ;;  %7429 = vrot.lane.b32.xlu0 %v7428_v22, %s7920_s16  ;;  %v7140_v53 = vpop.permute.xlu2 %7139  ;;  %v7136_v22 = vunpack.i.l.bf16 %v14321_v18  ;;  %v6326_v61 = vsel %vm5145_vm14, %v6262_v23, 0.0 }
 0x8dc   :  { %7454 = vrot.lane.b32.xlu2 %v7453_v29, %s7920_s16  ;;  %v5864_v36 = vpop.f32.mrf.mxu2  ;;  %v7468_v29 = vpack.i.bf16 %v14290_v39, %v17107_v8  ;;  %v7142_v40 = vunpack.i.h.bf16 %v7140_v53  ;;  %v7141_v10 = vunpack.i.l.bf16 %v7140_v53  ;;  %v17115_v53 = vld [vmem:[#allocation272_spill] sm:$0xff] }
 0x8dd   :  { %v5865_v33 = vadd.f32 %v5864_v36, %v5656_v63  ;;  %v5294_v63 = vsel %vm3137_vm13, %v17108_v25, %v7127_v6  ;;  %v7146_v36 = vunpack.i.l.bf16 %v14342_v4  ;;  %v17111_v6 = vld [vmem:[#allocation91_spill] sm:$0xff] }
 0x8de   :  { %v5658_v16 = vpop.f32.mrf.mxu1  ;;  %v5358_v52 = vsel %vm5145_vm14, %v5294_v63, %v7136_v22 }
 0x8df   :  { %v6074_v30 = vadd.f32 %v17105_v49, %v5865_v33  ;;  %v5659_v12 = vadd.f32 %v14288_v41, %v5658_v16  ;;  %v5422_v23 = vsel %vm5210_vm15, %v5358_v52, %v7141_v10  ;;  %v7150_v49 = vpop.permute.xlu1 %7149 }
 0x8e0   :  { %v7152_v63 = vunpack.i.h.bf16 %v7150_v49 }
 0x8e1   :  { %v6263_v37 = vmax.f32 %v6074_v30, 0.0  ;;  %5705 = vmatmul.f32.gmra.mxu1 %v5229_v24  ;;  %5914 = vmatmul.f32.gmra.mxu2 %v5421_v59  ;;  %v17112_v24 = vld [vmem:[#allocation111_spill] sm:$0xff] }
 0x8e2   :  { %v17113_v59 = vpack.i.bf16 %v17111_v6, %v17112_v24 }
 0x8e3   :  { %7494 = vrot.lane.b32.xlu1 %v7493_v56, %s7920_s16  ;;  %7444 = vrot.lane.b32.xlu0 %v7443_v20, %s7920_s16  ;;  %v6327_v31 = vsel %vm5145_vm14, %v6263_v37, 0.0  ;;  %v5230_v20 = vsel %vm5210_vm15, %v5165_v46, %v7142_v40  ;;  %v17114_v56 = vld [vmem:[#allocation407_spill] sm:$0xff]  ;;  %v17117_v37 = vld [vmem:[#allocation310_spill] sm:$0xff] }
 0x8e4   :  { %7469 = vrot.lane.b32.xlu2 %v7468_v29, %s7920_s16  ;;  %v6328_v39 = vadd.f32 %v6327_v31, %v6326_v61  ;;  %v5867_v55 = vpop.f32.mrf.mxu2  ;;  %v17116_v22 = vpack.i.bf16 %v17114_v56, %v17115_v53  ;;  %v5295_v29 = vsel %vm3137_vm13, %v17117_v37, %v7146_v36  ;;  %v7137_v61 = vunpack.i.h.bf16 %v14321_v18  ;;  %v17119_v40 = vld [vmem:[#allocation406_spill] sm:$0xff]  ;;  %v17122_v46 = vld [vmem:[#allocation263_spill] sm:$0xff]  ;;  %v7160_v37 = vpop.permute.xlu0 %7159 }
 0x8e5   :  { %v5868_v15 = vadd.f32 %v5867_v55, %v5659_v12  ;;  %v17120_v55 = vld [vmem:[#allocation271_spill] sm:$0xff]  ;;  %v7151_v36 = vunpack.i.l.bf16 %v7150_v49 }
 0x8e6   :  { %v5661_v33 = vpop.f32.mrf.mxu1  ;;  %v17121_v25 = vpack.i.bf16 %v17119_v40, %v17120_v55  ;;  %v5359_v42 = vsel %vm5145_vm14, %v5295_v29, %v7137_v61  ;;  %v6887_v61 = vunpack.i.h.bf16 %v17118_v50 }
 0x8e7   :  { %v6077_v16 = vadd.f32 %v17109_v19, %v5868_v15  ;;  %v5662_v12 = vadd.f32 %v14288_v41, %v5661_v33  ;;  %v7822_v19 = vld [vmem:[#allocation2 + $0xf0] sm:$0xff]  ;;  %v5423_v49 = vsel %vm5210_vm15, %v5359_v42, %v7151_v36 }
 0x8e8   :  { %v5101_v18 = vsel %vm3137_vm13, %v7822_v19, %v6726_v47 }
 0x8e9   :  { %v6264_v30 = vmax.f32 %v6077_v16, 0.0  ;;  %5708 = vmatmul.f32.gmra.mxu1 %v5230_v20  ;;  %5917 = vmatmul.f32.gmra.mxu2 %v5422_v23  ;;  %v14378_v16 = vpop.permute.xlu2 %7154  ;;  %v5166_v20 = vsel %vm5145_vm14, %v5101_v18, %v6886_v21  ;;  %v14382_v23 = vld [vmem:[#allocation2 + $0x2c0] sm:$0xff]  ;;  %v14393_v21 = vld [vmem:[#allocation2 + $0x2d8] sm:$0xff] }
 0x8ea   :  { %v7156_v42 = vunpack.i.l.bf16 %v14378_v16  ;;  %v7826_v18 = vld [vmem:[#allocation2 + $0xf8] sm:$0xff] }
 0x8eb   :  { %7509 = vrot.lane.b32.xlu1 %v17113_v59, %s7918_s11  ;;  %7459 = vrot.lane.b32.xlu0 %v17116_v22, %s7918_s11  ;;  %v6329_v31 = vsel %vm5145_vm14, %v6264_v30, 0.0  ;;  %v7147_v30 = vunpack.i.h.bf16 %v14342_v4  ;;  %v5231_v59 = vsel %vm5210_vm15, %v5166_v20, %v7152_v63  ;;  %v14389_v22 = vld [vmem:[#allocation2 + $0x2f0] sm:$0xff]  ;;  %v6727_v4 = vunpack.i.h.bf16 %v17110_v7 }
 0x8ec   :  { %7484 = vrot.lane.b32.xlu2 %v17121_v25, %s7918_s11  ;;  %v6330_v15 = vadd.f32 %v6329_v31, %v6328_v39  ;;  %v5870_v52 = vpop.f32.mrf.mxu2  ;;  %v7473_v39 = vpack.i.bf16 %v17081_v44, %v14382_v23  ;;  %v7523_v47 = vpack.i.bf16 %v17119_v40, %v14389_v22  ;;  %v7498_v44 = vpack.i.bf16 %v17114_v56, %v14393_v21  ;;  %v14401_v31 = vpop.permute.xlu1 %7164 }
 0x8ed   :  { %v5871_v10 = vadd.f32 %v5870_v52, %v5662_v12  ;;  %v7162_v25 = vunpack.i.h.bf16 %v7160_v37  ;;  %v7161_v63 = vunpack.i.l.bf16 %v7160_v37  ;;  %v7166_v50 = vunpack.i.l.bf16 %v14401_v31 }
 0x8ee   :  { %v5664_v48 = vpop.f32.mrf.mxu1 }
 0x8ef   :  { %v6080_v33 = vadd.f32 %v17122_v46, %v5871_v10  ;;  %v5665_v40 = vadd.f32 %v14288_v41, %v5664_v48  ;;  %v17123_v10 = vld [vmem:[#allocation170_spill] sm:$0xff]  ;;  %v5102_v46 = vsel %vm3137_vm13, %v7826_v18, %v6727_v4 }
 0x8f0   :  { %v5296_v7 = vsel %vm3137_vm13, %v17123_v10, %v7147_v30  ;;  %v5167_v20 = vsel %vm5145_vm14, %v5102_v46, %v6887_v61  ;;  %v14416_v30 = vld [vmem:[#allocation2 + $0x300] sm:$0xff]  ;;  %v14424_v4 = vld [vmem:[#allocation2 + $0x2e8] sm:$0xff] }
 0x8f1   :  { %v6265_v29 = vmax.f32 %v6080_v33, 0.0  ;;  %5711 = vmatmul.f32.gmra.mxu1 %v5231_v59  ;;  %5920 = vmatmul.f32.gmra.mxu2 %v5423_v49  ;;  %v17124_v33 = vld [vmem:[#allocation164_spill] sm:$0xff]  ;;  %v7538_v49 = vpack.i.bf16 %v17112_v24, %v14416_v30  ;;  %v7513_v61 = vpack.i.bf16 %v17120_v55, %v14424_v4 }
 0x8f2   :  { %v17126_v24 = vld [vmem:[#allocation60_spill] sm:$0xff] }
 0x8f3   :  { %7524 = vrot.lane.b32.xlu1 %v7523_v47, %s7919_s0  ;;  %7474 = vrot.lane.b32.xlu0 %v7473_v39, %s7919_s0  ;;  %v6331_v12 = vsel %vm5145_vm14, %v6265_v29, 0.0  ;;  %v5360_v39 = vsel %vm5145_vm14, %v5296_v7, %v7156_v42  ;;  %v14420_v47 = vld [vmem:[#allocation2 + $0x2d0] sm:$0xff]  ;;  %v7170_v29 = vpop.permute.xlu2 %7169 }
 0x8f4   :  { %7499 = vrot.lane.b32.xlu2 %v7498_v44, %s7919_s0  ;;  %v6332_v52 = vadd.f32 %v6331_v12, %v6330_v15  ;;  %v5873_v56 = vpop.f32.mrf.mxu2  ;;  %v5232_v15 = vsel %vm5210_vm15, %v5167_v20, %v7162_v25  ;;  %v5424_v59 = vsel %vm5210_vm15, %v5360_v39, %v7161_v63  ;;  %v7488_v37 = vpack.i.bf16 %v17115_v53, %v14420_v47  ;;  %v17125_v12 = vld [vmem:[#allocation87_spill] sm:$0xff]  ;;  %v17127_v63 = vld [vmem:[#allocation113_spill] sm:$0xff] }
 0x8f5   :  { %v5874_v36 = vadd.f32 %v5873_v56, %v5665_v40  ;;  %v6731_v40 = vunpack.i.l.bf16 %v17125_v12  ;;  %v5297_v25 = vsel %vm3137_vm13, %v17126_v24, %v7166_v50  ;;  %v6891_v53 = vunpack.i.l.bf16 %v17127_v63  ;;  %v7830_v20 = vld [vmem:[#allocation2 + $0x108] sm:$0xff]  ;;  %v7180_v24 = vpop.permute.xlu1 %7179 }
 0x8f6   :  { %v5667_v19 = vpop.f32.mrf.mxu1  ;;  %v7157_v56 = vunpack.i.h.bf16 %v14378_v16  ;;  %v7172_v55 = vunpack.i.h.bf16 %v7170_v29  ;;  %v17128_v16 = vld [vmem:[#allocation70_spill] sm:$0xff] }
 0x8f7   :  { %v6083_v48 = vadd.f32 %v17124_v33, %v5874_v36  ;;  %v5668_v7 = vadd.f32 %v14288_v41, %v5667_v19  ;;  %v7171_v33 = vunpack.i.l.bf16 %v7170_v29  ;;  %v5103_v39 = vsel %vm3137_vm13, %v7830_v20, %v6731_v40  ;;  %v17129_v19 = vld [vmem:[#allocation322_spill] sm:$0xff]  ;;  %v17130_v29 = vld [vmem:[#allocation176_spill] sm:$0xff] }
 0x8f8   :  { %v5361_v46 = vsel %vm5145_vm14, %v5297_v25, %v7157_v56  ;;  %v17131_v56 = vld [vmem:[#allocation275_spill] sm:$0xff] }
 0x8f9   :  { %v6266_v44 = vmax.f32 %v6083_v48, 0.0  ;;  %5714 = vmatmul.f32.gmra.mxu1 %v5232_v15  ;;  %5923 = vmatmul.f32.gmra.mxu2 %v5424_v59  ;;  %v14439_v48 = vpop.permute.xlu0 %7174  ;;  %v5168_v59 = vsel %vm5145_vm14, %v5103_v39, %v6891_v53  ;;  %v7528_v53 = vpack.i.bf16 %v14393_v21, %v17131_v56  ;;  %v7831_v39 = vld [vmem:[#allocation2 + $0x110] sm:$0xff] }
 0x8fa   :  { %v7176_v25 = vunpack.i.l.bf16 %v14439_v48 }
 0x8fb   :  { %7539 = vrot.lane.b32.xlu1 %v7538_v49, %s7919_s0  ;;  %7489 = vrot.lane.b32.xlu0 %v7488_v37, %s7919_s0  ;;  %v6333_v10 = vsel %vm5145_vm14, %v6266_v44, 0.0  ;;  %v7503_v49 = vpack.i.bf16 %v14382_v23, %v17129_v19  ;;  %v5233_v37 = vsel %vm5210_vm15, %v5168_v59, %v7172_v55  ;;  %v5425_v44 = vsel %vm5210_vm15, %v5361_v46, %v7171_v33 }
 0x8fc   :  { %7514 = vrot.lane.b32.xlu2 %v7513_v61, %s7919_s0  ;;  %v6334_v42 = vadd.f32 %v6333_v10, %v6332_v52  ;;  %v5876_v36 = vpop.f32.mrf.mxu2  ;;  %v7167_v52 = vunpack.i.h.bf16 %v14401_v31  ;;  %v7553_v61 = vpack.i.bf16 %v14389_v22, %v17130_v29  ;;  %v6732_v23 = vunpack.i.h.bf16 %v17125_v12  ;;  %v14524_v29 = vld [vmem:[#allocation2 + $0x338] sm:$0xff] }
 0x8fd   :  { %v5877_v18 = vadd.f32 %v5876_v36, %v5668_v7  ;;  %v6892_v31 = vunpack.i.h.bf16 %v17127_v63  ;;  %v7182_v7 = vunpack.i.h.bf16 %v7180_v24  ;;  %v7181_v33 = vunpack.i.l.bf16 %v7180_v24 }
 0x8fe   :  { %v5670_v50 = vpop.f32.mrf.mxu1  ;;  %v5104_v63 = vsel %vm3137_vm13, %v7831_v39, %v6732_v23  ;;  %v17137_v23 = vld [vmem:[#allocation94_spill] sm:$0xff]  ;;  %v14486_v39 = vpop.permute.xlu1 %7194 }
 0x8ff   :  { %v6086_v15 = vadd.f32 %v17128_v16, %v5877_v18  ;;  %v5671_v22 = vadd.f32 %v14288_v41, %v5670_v50  ;;  %v17132_v18 = vld [vmem:[#allocation86_spill] sm:$0xff]  ;;  %v7185_v16 = vpop.permute.xlu2 %7184  ;;  %v5169_v50 = vsel %vm5145_vm14, %v5104_v63, %v6892_v31 }
 0x900   :  { %v5298_v21 = vsel %vm3137_vm13, %v17132_v18, %v7167_v52  ;;  %v7186_v31 = vunpack.i.l.bf16 %v7185_v16 }
 0x901   :  { %v6267_v40 = vmax.f32 %v6086_v15, 0.0  ;;  %5717 = vmatmul.f32.gmra.mxu1 %v5233_v37  ;;  %5926 = vmatmul.f32.gmra.mxu2 %v5425_v44  ;;  %v5362_v12 = vsel %vm5145_vm14, %v5298_v21, %v7176_v25  ;;  %v17133_v15 = vld [vmem:[#allocation83_spill] sm:$0xff]  ;;  %v17134_v37 = vld [vmem:[#allocation409_spill] sm:$0xff]  ;;  %v7190_v24 = vpop.permute.xlu0 %7189 }
 0x902   :  { %v7568_v52 = vpack.i.bf16 %v14416_v30, %v17134_v37  ;;  %v17135_v44 = vld [vmem:[#allocation81_spill] sm:$0xff]  ;;  %v7177_v30 = vunpack.i.h.bf16 %v14439_v48  ;;  %v7192_v18 = vunpack.i.h.bf16 %v7190_v24  ;;  %v7191_v21 = vunpack.i.l.bf16 %v7190_v24 }
 0x903   :  { %7554 = vrot.lane.b32.xlu1 %v7553_v61, %s7920_s16  ;;  %7504 = vrot.lane.b32.xlu0 %v7503_v49, %s7920_s16  ;;  %v6335_v10 = vsel %vm5145_vm14, %v6267_v40, 0.0  ;;  %v5234_v49 = vsel %vm5210_vm15, %v5169_v50, %v7182_v7  ;;  %v7518_v61 = vpack.i.bf16 %v14420_v47, %v17135_v44  ;;  %v17136_v40 = vld [vmem:[#allocation84_spill] sm:$0xff]  ;;  %v7832_v48 = vld [vmem:[#allocation2 + $0x120] sm:$0xff] }
 0x904   :  { %7529 = vrot.lane.b32.xlu2 %v7528_v53, %s7920_s16  ;;  %v6336_v55 = vadd.f32 %v6335_v10, %v6334_v42  ;;  %v5879_v36 = vpop.f32.mrf.mxu2  ;;  %v5426_v42 = vsel %vm5210_vm15, %v5362_v12, %v7181_v33  ;;  %v7543_v53 = vpack.i.bf16 %v14424_v4, %v17136_v40  ;;  %v6736_v10 = vunpack.i.l.bf16 %v17137_v23  ;;  %v6479_v12 = vld [vmem:[%s15190_s5 + $0x30] sm:$0xff]  ;;  %v17140_v50 = vld [vmem:[#allocation173_spill] sm:$0xff] }
 0x905   :  { %v5880_v46 = vadd.f32 %v5879_v36, %v5671_v22  ;;  %v17138_v22 = vld [vmem:[#allocation405_spill] sm:$0xff]  ;;  %6500 = vmatpush.msrb.mxu0 %v6479_v12 }
 0x906   :  { %v5673_v20 = vpop.f32.mrf.mxu1  ;;  %v6896_v7 = vunpack.i.l.bf16 %v17138_v22 }
 0x907   :  { %v6089_v59 = vadd.f32 %v17133_v15, %v5880_v46  ;;  %v5674_v36 = vadd.f32 %v14288_v41, %v5673_v20  ;;  %v5105_v15 = vsel %vm3137_vm13, %v7832_v48, %v6736_v10  ;;  %v6737_v10 = vunpack.i.h.bf16 %v17137_v23  ;;  %v17147_v23 = vld [vmem:[#allocation274_spill] sm:$0xff]  ;;  %v17148_v48 = vld [vmem:[#allocation77_spill] sm:$0xff] }
 0x909   :  { %v6268_v25 = vmax.f32 %v6089_v59, 0.0  ;;  %5720 = vmatmul.f32.gmra.mxu1 %v5234_v49  ;;  %5929 = vmatmul.f32.gmra.mxu2 %v5426_v42  ;;  %v17139_v59 = vld [vmem:[#allocation309_spill] sm:$0xff] }
 0x90a   :  { %v5299_v20 = vsel %vm3137_vm13, %v17139_v59, %v7186_v31  ;;  %v17141_v31 = vld [vmem:[#allocation125_spill] sm:$0xff] }
 0x90b   :  { %7569 = vrot.lane.b32.xlu1 %v7568_v52, %s7920_s16  ;;  %7519 = vrot.lane.b32.xlu0 %v7518_v61, %s7920_s16  ;;  %v6337_v47 = vsel %vm5145_vm14, %v6268_v25, 0.0  ;;  %v5363_v42 = vsel %vm5145_vm14, %v5299_v20, %v7177_v30  ;;  %v7187_v52 = vunpack.i.h.bf16 %v7185_v16  ;;  %v7200_v25 = vpop.permute.xlu2 %7199  ;;  %v17145_v16 = vld [vmem:[#allocation116_spill] sm:$0xff] }
 0x90c   :  { %7544 = vrot.lane.b32.xlu2 %v7543_v53, %s7920_s16  ;;  %v6338_v4 = vadd.f32 %v6337_v47, %v6336_v55  ;;  %v5882_v46 = vpop.f32.mrf.mxu2  ;;  %v5170_v55 = vsel %vm5145_vm14, %v5105_v15, %v6896_v7  ;;  %v5427_v24 = vsel %vm5210_vm15, %v5363_v42, %v7191_v21  ;;  %v7196_v53 = vunpack.i.l.bf16 %v14486_v39  ;;  %v17144_v7 = vld [vmem:[#allocation321_spill] sm:$0xff]  ;;  %v14507_v21 = vpop.permute.xlu0 %7204 }
 0x90d   :  { %v5883_v33 = vadd.f32 %v5882_v46, %v5674_v36  ;;  %v5235_v61 = vsel %vm5210_vm15, %v5170_v55, %v7192_v18  ;;  %v17142_v36 = vld [vmem:[#allocation384_spill] sm:$0xff]  ;;  %v17146_v30 = vpack.i.bf16 %v17144_v7, %v17145_v16  ;;  %v6897_v18 = vunpack.i.h.bf16 %v17138_v22 }
 0x90e   :  { %v5676_v63 = vpop.f32.mrf.mxu1  ;;  %v17143_v46 = vpack.i.bf16 %v17141_v31, %v17142_v36  ;;  %v17149_v15 = vpack.i.bf16 %v17147_v23, %v17148_v48  ;;  %v7202_v59 = vunpack.i.h.bf16 %v7200_v25 }
 0x90f   :  { %v6092_v49 = vadd.f32 %v17140_v50, %v5883_v33  ;;  %v5677_v33 = vadd.f32 %v14288_v41, %v5676_v63 }
 0x911   :  { %v6269_v47 = vmax.f32 %v6092_v49, 0.0  ;;  %5723 = vmatmul.f32.gmra.mxu1 %v5235_v61  ;;  %5932 = vmatmul.f32.gmra.mxu2 %v5427_v24  ;;  %v17150_v49 = vld [vmem:[#allocation171_spill] sm:$0xff]  ;;  %v7201_v61 = vunpack.i.l.bf16 %v7200_v25  ;;  %v7206_v24 = vunpack.i.l.bf16 %v14507_v21 }
 0x912   :  { %v5300_v55 = vsel %vm3137_vm13, %v17150_v49, %v7187_v52  ;;  %v7598_v52 = vpack.i.bf16 %v17147_v23, %v14524_v29  ;;  %v14528_v25 = vld [vmem:[#allocation2 + $0x308] sm:$0xff] }
 0x913   :  { %7584 = vrot.lane.b32.xlu1 %v17143_v46, %s7918_s11  ;;  %7534 = vrot.lane.b32.xlu0 %v17146_v30, %s7918_s11  ;;  %v6339_v12 = vsel %vm5145_vm14, %v6269_v47, 0.0  ;;  %v5364_v22 = vsel %vm5145_vm14, %v5300_v55, %v7196_v53  ;;  %v7833_v46 = vld [vmem:[#allocation2 + $0x128] sm:$0xff]  ;;  %v7548_v53 = vpack.i.bf16 %v17111_v6, %v14528_v25  ;;  %v5301_v23 = vsel %vm3137_vm13, %v17036_v9, %v7206_v24  ;;  %v17153_v55 = vld [vmem:[#allocation133_spill] sm:$0xff] }
 0x914   :  { %7559 = vrot.lane.b32.xlu2 %v17149_v15, %s7918_s11  ;;  %v6340_v20 = vadd.f32 %v6339_v12, %v6338_v4  ;;  %v5885_v50 = vpop.f32.mrf.mxu2  ;;  %v5106_v63 = vsel %vm3137_vm13, %v7833_v46, %v6737_v10  ;;  %v17151_v30 = vld [vmem:[#allocation82_spill] sm:$0xff]  ;;  %v5428_v12 = vsel %vm5210_vm15, %v5364_v22, %v7201_v61  ;;  %v6901_v6 = vunpack.i.l.bf16 %v17153_v55  ;;  %v7837_v24 = vld [vmem:[#allocation2 + $0x138] sm:$0xff] }
 0x915   :  { %v5886_v42 = vadd.f32 %v5885_v50, %v5677_v33  ;;  %v5171_v15 = vsel %vm5145_vm14, %v5106_v63, %v6897_v18  ;;  %v7210_v33 = vpop.permute.xlu1 %7209  ;;  %v14532_v50 = vld [vmem:[#allocation2 + $0x320] sm:$0xff]  ;;  %v14546_v63 = vld [vmem:[#allocation2 + $0x348] sm:$0xff] }
 0x916   :  { %v5679_v47 = vpop.f32.mrf.mxu1  ;;  %v5236_v4 = vsel %vm5210_vm15, %v5171_v15, %v7202_v59  ;;  %v7573_v18 = vpack.i.bf16 %v17144_v7, %v14532_v50  ;;  %v17152_v59 = vld [vmem:[#allocation131_spill] sm:$0xff]  ;;  %v7212_v7 = vunpack.i.h.bf16 %v7210_v33 }
 0x917   :  { %v6095_v37 = vadd.f32 %v17151_v30, %v5886_v42  ;;  %v6741_v49 = vunpack.i.l.bf16 %v17152_v59  ;;  %v5680_v22 = vadd.f32 %v14288_v41, %v5679_v47 }
 0x919   :  { %v6270_v10 = vmax.f32 %v6095_v37, 0.0  ;;  %5726 = vmatmul.f32.gmra.mxu1 %v5236_v4  ;;  %5935 = vmatmul.f32.gmra.mxu2 %v5428_v12  ;;  %v7197_v37 = vunpack.i.h.bf16 %v14486_v39  ;;  %v7211_v4 = vunpack.i.l.bf16 %v7210_v33  ;;  %v5107_v12 = vsel %vm3137_vm13, %v7837_v24, %v6741_v49  ;;  %v14550_v39 = vpop.permute.xlu2 %7214 }
 0x91a   :  { %v5172_v47 = vsel %vm5145_vm14, %v5107_v12, %v6901_v6  ;;  %v7207_v33 = vunpack.i.h.bf16 %v14507_v21  ;;  %v6742_v6 = vunpack.i.h.bf16 %v17152_v59 }
 0x91b   :  { %7599 = vrot.lane.b32.xlu1 %v7598_v52, %s7919_s0  ;;  %7549 = vrot.lane.b32.xlu0 %v7548_v53, %s7919_s0  ;;  %v6341_v42 = vsel %vm5145_vm14, %v6270_v10, 0.0  ;;  %v5365_v15 = vsel %vm5145_vm14, %v5301_v23, %v7197_v37  ;;  %v17154_v52 = vld [vmem:[#allocation54_spill] sm:$0xff]  ;;  %v14554_v10 = vld [vmem:[#allocation2 + $0x318] sm:$0xff]  ;;  %v5237_v23 = vsel %vm5210_vm15, %v5172_v47, %v7212_v7  ;;  %v7220_v37 = vpop.permute.xlu0 %7219 }
 0x91c   :  { %7574 = vrot.lane.b32.xlu2 %v7573_v18, %s7919_s0  ;;  %v6342_v61 = vadd.f32 %v6341_v42, %v6340_v20  ;;  %v5888_v46 = vpop.f32.mrf.mxu2  ;;  %v7563_v20 = vpack.i.bf16 %v17145_v16, %v14554_v10  ;;  %v7613_v18 = vpack.i.bf16 %v17142_v36, %v14546_v63  ;;  %v5429_v49 = vsel %vm5210_vm15, %v5365_v15, %v7211_v4  ;;  %v17155_v15 = vld [vmem:[#allocation264_spill] sm:$0xff] }
 0x91d   :  { %v5889_v30 = vadd.f32 %v5888_v46, %v5680_v22  ;;  %v7839_v22 = vld [vmem:[#allocation2 + $0x340] sm:$0xff]  ;;  %v3825_v36 = vrot.slane %v14524_v29, 1  ;;  %v6902_v16 = vunpack.i.h.bf16 %v17153_v55  ;;  %v14568_v21 = vpop.permute.xlu1 %7224  ;;  %v17156_v59 = vpack.i.bf16 %v17148_v48, %v17155_v15 }
 0x91e   :  { %v5682_v9 = vpop.f32.mrf.mxu1  ;;  %v3827_v46 = vrot.slane %v7839_v22, 1  ;;  %v7222_v4 = vunpack.i.h.bf16 %v7220_v37  ;;  %v7221_v24 = vunpack.i.l.bf16 %v7220_v37  ;;  %v7216_v55 = vunpack.i.l.bf16 %v14550_v39  ;;  %v17158_v48 = vld [vmem:[#allocation266_spill] sm:$0xff]  ;;  %v17159_v22 = vld [vmem:[#allocation67_spill] sm:$0xff] }
 0x91f   :  { %v6098_v53 = vadd.f32 %v17154_v52, %v5889_v30  ;;  %v5683_v30 = vadd.f32 %v14288_v41, %v5682_v9 }
 0x921   :  { %v6271_v42 = vmax.f32 %v6098_v53, 0.0  ;;  %5729 = vmatmul.f32.gmra.mxu1 %v5237_v23  ;;  %5938 = vmatmul.f32.gmra.mxu2 %v5429_v49  ;;  %v5302_v53 = vsel %vm3137_vm13, %v17033_v60, %v7207_v33  ;;  %v7840_v23 = vld [vmem:[#allocation2 + $0x140] sm:$0xff]  ;;  %v14582_v49 = vsel %vm231_vm0, %v3825_v36, %v3827_v46 }
 0x922   :  { %v5108_v9 = vsel %vm3137_vm13, %v7840_v23, %v6742_v6  ;;  %17157 = vst [vmem:[#allocation185_spill] sm:$0xff] %v14582_v49  ;;  %v5366_v37 = vsel %vm5145_vm14, %v5302_v53, %v7216_v55  ;;  %v7230_v6 = vpop.permute.xlu2 %7229  ;;  %v7841_v53 = vld [vmem:[#allocation2 + $0x330] sm:$0xff] }
 0x923   :  { %7614 = vrot.lane.b32.xlu1 %v7613_v18, %s7919_s0  ;;  %7564 = vrot.lane.b32.xlu0 %v7563_v20, %s7919_s0  ;;  %v6343_v7 = vsel %vm5145_vm14, %v6271_v42, 0.0  ;;  %v7226_v20 = vunpack.i.l.bf16 %v14568_v21  ;;  %v5430_v33 = vsel %vm5210_vm15, %v5366_v37, %v7221_v24  ;;  %v17161_v24 = vld [vmem:[#allocation375_spill] sm:$0xff]  ;;  %v3824_v55 = vrot.slane %v7841_v53, 1  ;;  %v3396_v37 = vld [vmem:[#allocation2 + $0x358] sm:$0xff] }
 0x924   :  { %7589 = vrot.lane.b32.xlu2 %v17156_v59, %s7919_s0  ;;  %v6344_v12 = vadd.f32 %v6343_v7, %v6342_v61  ;;  %v5891_v52 = vpop.f32.mrf.mxu2  ;;  %v5173_v61 = vsel %vm5145_vm14, %v5108_v9, %v6902_v16  ;;  %v7578_v7 = vpack.i.bf16 %v14528_v25, %v17159_v22  ;;  %v14592_v59 = vld [vmem:[#allocation2 + $0x350] sm:$0xff]  ;;  %v7603_v16 = vpack.i.bf16 %v14532_v50, %v14582_v49  ;;  %v14610_v49 = vpop.permute.xlu0 %7234 }
 0x925   :  { %v5892_v47 = vadd.f32 %v5891_v52, %v5683_v30  ;;  %v5238_v60 = vsel %vm5210_vm15, %v5173_v61, %v7222_v4  ;;  %v17160_v30 = vld [vmem:[#allocation277_spill] sm:$0xff]  ;;  %v3914_v52 = vrot.slane %v14546_v63, 1  ;;  %v3915_v4 = vrot.slane %v14592_v59, 1  ;;  %v17163_v22 = vld [vmem:[#allocation100_spill] sm:$0xff] }
 0x926   :  { %v5685_v18 = vpop.f32.mrf.mxu1  ;;  %v6746_v15 = vunpack.i.l.bf16 %v17160_v30  ;;  %v5303_v25 = vsel %vm3137_vm13, %v17161_v24, %v7226_v20  ;;  %v7217_v9 = vunpack.i.h.bf16 %v14550_v39  ;;  %v7232_v50 = vunpack.i.h.bf16 %v7230_v6 }
 0x927   :  { %v6101_v42 = vadd.f32 %v17158_v48, %v5892_v47  ;;  %v17162_v47 = vld [vmem:[#allocation174_spill] sm:$0xff]  ;;  %v14608_v20 = vsel %vm231_vm0, %v3824_v55, %v3825_v36  ;;  %v7231_v24 = vunpack.i.l.bf16 %v7230_v6 }
 0x928   :  { %v6906_v23 = vunpack.i.l.bf16 %v17162_v47  ;;  %v7593_v55 = vpack.i.bf16 %v14554_v10, %v14608_v20 }
 0x929   :  { %v6272_v46 = vmax.f32 %v6101_v42, 0.0  ;;  %5732 = vmatmul.f32.gmra.mxu1 %v5238_v60  ;;  %5941 = vmatmul.f32.gmra.mxu2 %v5430_v33  ;;  %v5686_v42 = vadd.f32 %v14288_v41, %v5685_v18  ;;  %v5367_v33 = vsel %vm5145_vm14, %v5303_v25, %v7217_v9  ;;  %v7227_v25 = vunpack.i.h.bf16 %v14568_v21 }
 0x92a   :  { %v5431_v6 = vsel %vm5210_vm15, %v5367_v33, %v7231_v24  ;;  %v6907_v21 = vunpack.i.h.bf16 %v17162_v47  ;;  %v7843_v24 = vld [vmem:[#allocation2 + $0x158] sm:$0xff] }
 0x92b   :  { %7579 = vrot.lane.b32.xlu0 %v7578_v7, %s7920_s16  ;;  %v6345_v48 = vsel %vm5145_vm14, %v6272_v46, 0.0  ;;  %v3917_v7 = vrot.slane %v3396_v37, 1  ;;  %v7842_v46 = vld [vmem:[#allocation2 + $0x150] sm:$0xff] }
 0x92c   :  { %7604 = vrot.lane.b32.xlu2 %v7603_v16, %s7920_s16  ;;  %v6346_v63 = vadd.f32 %v6345_v48, %v6344_v12  ;;  %v5894_v61 = vpop.f32.mrf.mxu2  ;;  %v5109_v18 = vsel %vm3137_vm13, %v7842_v46, %v6746_v15  ;;  %v3916_v16 = vsel %vm231_vm0, %v3914_v52, %v3915_v4  ;;  %v7240_v15 = vpop.permute.xlu1 %7239  ;;  %v7236_v52 = vunpack.i.l.bf16 %v14610_v49 }
 0x92d   :  { %v5895_v60 = vadd.f32 %v5894_v61, %v5686_v42  ;;  %v5174_v48 = vsel %vm5145_vm14, %v5109_v18, %v6906_v23  ;;  %v3918_v42 = vsel %vm231_vm0, %v3915_v4, %v3917_v7  ;;  %v6747_v4 = vunpack.i.h.bf16 %v17160_v30  ;;  %v7245_v46 = vpop.permute.xlu2 %7244  ;;  %v17164_v18 = vld [vmem:[#allocation56_spill] sm:$0xff] }
 0x92e   :  { %v5688_v39 = vpop.f32.mrf.mxu1  ;;  %v5239_v36 = vsel %vm5210_vm15, %v5174_v48, %v7232_v50  ;;  %5015 = vrot.lane.b32.xlu1 %v3918_v42, %s7920_s16  ;;  %v7242_v10 = vunpack.i.h.bf16 %v7240_v15  ;;  %v7241_v30 = vunpack.i.l.bf16 %v7240_v15  ;;  %v7250_v48 = vpop.permute.xlu0 %7249 }
 0x92f   :  { %v6104_v12 = vadd.f32 %v17163_v22, %v5895_v60  ;;  %v7618_v22 = vpack.i.bf16 %v7841_v53, %v3916_v16  ;;  %v5689_v50 = vadd.f32 %v14288_v41, %v5688_v39  ;;  %v5304_v60 = vsel %vm3137_vm13, %v17039_v13, %v7227_v25  ;;  %v17165_v13 = vld [vmem:[#allocation314_spill] sm:$0xff] }
 0x930   :  { %v5368_v53 = vsel %vm5145_vm14, %v5304_v60, %v7236_v52  ;;  %v5110_v47 = vsel %vm3137_vm13, %v7843_v24, %v6747_v4  ;;  %v6751_v25 = vunpack.i.l.bf16 %v17165_v13  ;;  %v17169_v52 = vld [vmem:[#allocation7_spill] sm:$0xff] }
 0x931   :  { %v6273_v9 = vmax.f32 %v6104_v12, 0.0  ;;  %5735 = vmatmul.f32.gmra.mxu1 %v5239_v36  ;;  %5944 = vmatmul.f32.gmra.mxu2 %v5431_v6  ;;  %v5175_v39 = vsel %vm5145_vm14, %v5110_v47, %v6907_v21  ;;  %v7246_v36 = vunpack.i.l.bf16 %v7245_v46  ;;  %v17166_v6 = vld [vmem:[#allocation400_spill] sm:$0xff]  ;;  %v17170_v47 = vld [vmem:[#allocation302_spill] sm:$0xff] }
 0x932   :  { %v5240_v12 = vsel %vm5210_vm15, %v5175_v39, %v7242_v10 }
 0x933   :  { %7594 = vrot.lane.b32.xlu0 %v7593_v55, %s7920_s16  ;;  %v6347_v23 = vsel %vm5145_vm14, %v6273_v9, 0.0  ;;  %v17167_v55 = vld [vmem:[#allocation383_spill] sm:$0xff]  ;;  %v6911_v9 = vunpack.i.l.bf16 %v17169_v52 }
 0x934   :  { %7619 = vrot.lane.b32.xlu2 %v7618_v22, %s7920_s16  ;;  %v6348_v61 = vadd.f32 %v6347_v23, %v6346_v63  ;;  %v5897_v37 = vpop.f32.mrf.mxu2  ;;  %v5432_v63 = vsel %vm5210_vm15, %v5368_v53, %v7241_v30  ;;  %v17168_v15 = vpack.i.bf16 %v17166_v6, %v17167_v55  ;;  %v7237_v22 = vunpack.i.h.bf16 %v14610_v49  ;;  %v7844_v30 = vld [vmem:[#allocation2 + $0x168] sm:$0xff] }
 0x935   :  { %v5898_v33 = vadd.f32 %v5897_v37, %v5689_v50  ;;  %v7252_v23 = vunpack.i.h.bf16 %v7250_v48  ;;  %v7251_v50 = vunpack.i.l.bf16 %v7250_v48  ;;  %v5111_v24 = vsel %vm3137_vm13, %v7844_v30, %v6751_v25 }
 0x936   :  { %v5691_v7 = vpop.f32.mrf.mxu1  ;;  %v5305_v49 = vsel %vm3137_vm13, %v17037_v57, %v7246_v36  ;;  %v6752_v57 = vunpack.i.h.bf16 %v17165_v13  ;;  %v6912_v25 = vunpack.i.h.bf16 %v17169_v52  ;;  %v7265_v36 = vpop.permute.xlu0 %7264 }
 0x937   :  { %v6107_v16 = vadd.f32 %v17164_v18, %v5898_v33  ;;  %v5692_v21 = vadd.f32 %v14288_v41, %v5691_v7  ;;  %v7255_v33 = vpop.permute.xlu1 %7254  ;;  %v5176_v7 = vsel %vm5145_vm14, %v5111_v24, %v6911_v9  ;;  %v7266_v13 = vunpack.i.l.bf16 %v7265_v36 }
 0x938   :  { %v5241_v39 = vsel %vm5210_vm15, %v5176_v7, %v7252_v23  ;;  %v7256_v48 = vunpack.i.l.bf16 %v7255_v33  ;;  %v7845_v23 = vld [vmem:[#allocation2 + $0x170] sm:$0xff]  ;;  %v17174_v7 = vld [vmem:[#allocation330_spill] sm:$0xff] }
 0x939   :  { %v6274_v42 = vmax.f32 %v6107_v16, 0.0  ;;  %5738 = vmatmul.f32.gmra.mxu1 %v5240_v12  ;;  %5947 = vmatmul.f32.gmra.mxu2 %v5432_v63  ;;  %v5369_v16 = vsel %vm5145_vm14, %v5305_v49, %v7237_v22  ;;  %v7260_v63 = vpop.permute.xlu2 %7259  ;;  %v5112_v52 = vsel %vm3137_vm13, %v7845_v23, %v6752_v57 }
 0x93a   :  { %v5433_v12 = vsel %vm5210_vm15, %v5369_v16, %v7251_v50  ;;  %v17171_v50 = vld [vmem:[#allocation177_spill] sm:$0xff]  ;;  %v6916_v16 = vunpack.i.l.bf16 %v17174_v7 }
 0x93b   :  { %7609 = vrot.lane.b32.xlu0 %v17168_v15, %s7918_s11  ;;  %v6349_v4 = vsel %vm5145_vm14, %v6274_v42, 0.0 }
 0x93c   :  { %4439 = vrot.lane.b32.xlu2 %v14524_v29, %s7920_s16  ;;  %v6350_v10 = vadd.f32 %v6349_v4, %v6348_v61  ;;  %v5900_v37 = vpop.f32.mrf.mxu2  ;;  %v7623_v29 = vpack.i.bf16 %v17141_v31, %v14592_v59  ;;  %v7247_v61 = vunpack.i.h.bf16 %v7245_v46  ;;  %v7262_v59 = vunpack.i.h.bf16 %v7260_v63 }
 0x93d   :  { %v5901_v60 = vadd.f32 %v5900_v37, %v5692_v21  ;;  %v7261_v4 = vunpack.i.l.bf16 %v7260_v63 }
 0x93e   :  { %v5694_v53 = vpop.f32.mrf.mxu1  ;;  %v5306_v15 = vsel %vm3137_vm13, %v17035_v45, %v7247_v61  ;;  %v17172_v45 = vld [vmem:[#allocation328_spill] sm:$0xff] }
 0x93f   :  { %v6110_v18 = vadd.f32 %v17170_v47, %v5901_v60  ;;  %v5695_v31 = vadd.f32 %v14288_v41, %v5694_v53  ;;  %v5370_v22 = vsel %vm5145_vm14, %v5306_v15, %v7256_v48  ;;  %v5177_v60 = vsel %vm5145_vm14, %v5112_v52, %v6912_v25  ;;  %v7270_v30 = vpop.permute.xlu1 %7269  ;;  %v17173_v47 = vld [vmem:[#allocation312_spill] sm:$0xff]  ;;  %v17175_v15 = vld [vmem:[#allocation178_spill] sm:$0xff] }
 0x940   :  { %v5242_v53 = vsel %vm5210_vm15, %v5177_v60, %v7262_v59  ;;  %v6756_v49 = vunpack.i.l.bf16 %v17172_v45  ;;  %v7846_v59 = vld [vmem:[#allocation2 + $0x1b0] sm:$0xff]  ;;  %v6757_v52 = vunpack.i.h.bf16 %v17172_v45 }
 0x941   :  { %v6275_v42 = vmax.f32 %v6110_v18, 0.0  ;;  %5741 = vmatmul.f32.gmra.mxu1 %v5241_v39  ;;  %5950 = vmatmul.f32.gmra.mxu2 %v5433_v12  ;;  %v5307_v18 = vsel %vm3137_vm13, %v17173_v47, %v7266_v13  ;;  %v7272_v12 = vunpack.i.h.bf16 %v7270_v30 }
 0x943   :  { %7624 = vrot.lane.b32.xlu0 %v7623_v29, %s7919_s0  ;;  %v6351_v6 = vsel %vm5145_vm14, %v6275_v42, 0.0  ;;  %v7257_v29 = vunpack.i.h.bf16 %v7255_v33  ;;  %v6478_v42 = vld [vmem:[%s15190_s5 + $0x28] sm:$0xff]  ;;  %v5113_v33 = vsel %vm3137_vm13, %v7846_v59, %v6756_v49  ;;  %v17176_v49 = vld [vmem:[#allocation364_spill] sm:$0xff] }
 0x944   :  { %v6352_v46 = vadd.f32 %v6351_v6, %v6350_v10  ;;  %v5903_v55 = vpop.f32.mrf.mxu2  ;;  %v5434_v10 = vsel %vm5210_vm15, %v5370_v22, %v7261_v4  ;;  %6501 = vmatpush.msrb.mxu0 %v6478_v42  ;;  %v7271_v6 = vunpack.i.l.bf16 %v7270_v30  ;;  %v5178_v22 = vsel %vm5145_vm14, %v5113_v33, %v6916_v16 }
 0x945   :  { %v5904_v9 = vadd.f32 %v5903_v55, %v5695_v31  ;;  %v5371_v25 = vsel %vm5145_vm14, %v5307_v18, %v7257_v29  ;;  %v7275_v55 = vpop.permute.xlu2 %7274  ;;  %v5243_v4 = vsel %vm5210_vm15, %v5178_v22, %v7272_v12 }
 0x946   :  { %v5697_v21 = vpop.f32.mrf.mxu1  ;;  %v5435_v13 = vsel %vm5210_vm15, %v5371_v25, %v7271_v6  ;;  %v7276_v18 = vunpack.i.l.bf16 %v7275_v55  ;;  %v7277_v22 = vunpack.i.h.bf16 %v7275_v55 }
 0x947   :  { %v6113_v37 = vadd.f32 %v17171_v50, %v5904_v9  ;;  %v5698_v39 = vadd.f32 %v14288_v41, %v5697_v21  ;;  %v7280_v21 = vpop.permute.xlu0 %7279  ;;  %v6917_v50 = vunpack.i.h.bf16 %v17174_v7  ;;  %v17177_v7 = vld [vmem:[#allocation255_spill] sm:$0xff] }
 0x948   :  { %v7281_v30 = vunpack.i.l.bf16 %v7280_v21 }
 0x949   :  { %v6276_v24 = vmax.f32 %v6113_v37, 0.0  ;;  %5744 = vmatmul.f32.gmra.mxu1 %v5242_v53  ;;  %5953 = vmatmul.f32.gmra.mxu2 %v5434_v10  ;;  %v7285_v37 = vpop.permute.xlu1 %7284  ;;  %v7282_v10 = vunpack.i.h.bf16 %v7280_v21 }
 0x94a   :  { %v7286_v29 = vunpack.i.l.bf16 %v7285_v37 }
 0x94b   :  { %v6353_v61 = vsel %vm5145_vm14, %v6276_v24, 0.0 }
 0x94c   :  { %v6354_v63 = vadd.f32 %v6353_v61, %v6352_v46  ;;  %v5906_v48 = vpop.f32.mrf.mxu2  ;;  %v7267_v46 = vunpack.i.h.bf16 %v7265_v36  ;;  %v5309_v33 = vsel %vm3137_vm13, %v17038_v26, %v7286_v29  ;;  %v17180_v26 = vld [vmem:[#allocation389_spill] sm:$0xff] }
 0x94d   :  { %v5907_v57 = vadd.f32 %v5906_v48, %v5698_v39  ;;  %v7847_v39 = vld [vmem:[#allocation2 + $0x1b8] sm:$0xff]  ;;  %v7290_v25 = vpop.permute.xlu2 %7289 }
 0x94e   :  { %v5700_v31 = vpop.f32.mrf.mxu1  ;;  %v5308_v47 = vsel %vm3137_vm13, %v17176_v49, %v7267_v46  ;;  %v5114_v45 = vsel %vm3137_vm13, %v7847_v39, %v6757_v52 }
 0x94f   :  { %v6116_v9 = vadd.f32 %v17175_v15, %v5907_v57  ;;  %v5701_v53 = vadd.f32 %v14288_v41, %v5700_v31  ;;  %v5179_v48 = vsel %vm5145_vm14, %v5114_v45, %v6917_v50  ;;  %v5372_v42 = vsel %vm5145_vm14, %v5308_v47, %v7276_v18  ;;  %v17178_v31 = vld [vmem:[#allocation412_spill] sm:$0xff]  ;;  %v17179_v15 = vld [vmem:[#allocation189_spill] sm:$0xff] }
 0x950   :  { %v5244_v57 = vsel %vm5210_vm15, %v5179_v48, %v7282_v10  ;;  %v6761_v59 = vunpack.i.l.bf16 %v17178_v31  ;;  %v5373_v50 = vsel %vm5145_vm14, %v5309_v33, %v7277_v22  ;;  %v7287_v47 = vunpack.i.h.bf16 %v7285_v37 }
 0x951   :  { %v6277_v23 = vmax.f32 %v6116_v9, 0.0  ;;  %5747 = vmatmul.f32.gmra.mxu1 %v5243_v4  ;;  %5956 = vmatmul.f32.gmra.mxu2 %v5435_v13  ;;  %v6921_v9 = vunpack.i.l.bf16 %v17179_v15  ;;  %v7292_v13 = vunpack.i.h.bf16 %v7290_v25  ;;  %v6922_v39 = vunpack.i.h.bf16 %v17179_v15 }
 0x953   :  { %v6355_v60 = vsel %vm5145_vm14, %v6277_v23, 0.0 }
 0x954   :  { %v6356_v36 = vadd.f32 %v6355_v60, %v6354_v63  ;;  %v5909_v24 = vpop.f32.mrf.mxu2  ;;  %v5436_v63 = vsel %vm5210_vm15, %v5372_v42, %v7281_v30  ;;  %v7291_v60 = vunpack.i.l.bf16 %v7290_v25  ;;  %v7848_v30 = vld [vmem:[#allocation2 + $0x1c8] sm:$0xff] }
 0x955   :  { %v5910_v16 = vadd.f32 %v5909_v24, %v5701_v53  ;;  %v7295_v53 = vpop.permute.xlu0 %7294  ;;  %v5115_v24 = vsel %vm3137_vm13, %v7848_v30, %v6761_v59  ;;  %v7850_v59 = vld [vmem:[#allocation2 + $0x1d0] sm:$0xff]  ;;  %v7305_v15 = vpop.permute.xlu2 %7304 }
 0x956   :  { %v5703_v61 = vpop.f32.mrf.mxu1  ;;  %v5180_v55 = vsel %vm5145_vm14, %v5115_v24, %v6921_v9  ;;  %v17181_v9 = vld [vmem:[#allocation180_spill] sm:$0xff]  ;;  %v7297_v30 = vunpack.i.h.bf16 %v7295_v53 }
 0x957   :  { %v6119_v12 = vadd.f32 %v17177_v7, %v5910_v16  ;;  %v5704_v4 = vadd.f32 %v14288_v41, %v5703_v61  ;;  %v5245_v18 = vsel %vm5210_vm15, %v5180_v55, %v7292_v13  ;;  %v5437_v41 = vsel %vm5210_vm15, %v5373_v50, %v7291_v60  ;;  %v14717_v7 = vld [vmem:[%s15189_s4] ss:$0 sm:$0xff]  ;;  %v17183_v60 = vld [vmem:[#allocation419_spill] sm:$0xff] }
 0x958   :  { %v7296_v16 = vunpack.i.l.bf16 %v7295_v53  ;;  %v6762_v61 = vunpack.i.h.bf16 %v17178_v31  ;;  %v7306_v50 = vunpack.i.l.bf16 %v7305_v15 }
 0x959   :  { %v6278_v6 = vmax.f32 %v6119_v12, 0.0  ;;  %5750 = vmatmul.f32.gmra.mxu1 %v5244_v57  ;;  %5959 = vmatmul.f32.gmra.mxu2 %v5436_v63  ;;  %v5310_v57 = vsel %vm3137_vm13, %v17054_v62, %v7287_v47  ;;  %v17182_v62 = vld [vmem:[#allocation89_spill] sm:$0xff] }
 0x95a   :  { %v5374_v25 = vsel %vm5145_vm14, %v5310_v57, %v7296_v16  ;;  %v5116_v33 = vsel %vm3137_vm13, %v7850_v59, %v6762_v61 }
 0x95b   :  { %v6357_v46 = vsel %vm5145_vm14, %v6278_v6, 0.0 }
 0x95c   :  { %v6358_v21 = vadd.f32 %v6357_v46, %v6356_v36  ;;  %v5912_v23 = vpop.f32.mrf.mxu2  ;;  %v7300_v36 = vpop.permute.xlu1 %7299  ;;  %v5181_v46 = vsel %vm5145_vm14, %v5116_v33, %v6922_v39  ;;  %v5311_v39 = vsel %vm3137_vm13, %v17052_v51, %v7306_v50  ;;  %v6927_v51 = vunpack.i.h.bf16 %v17183_v60 }
 0x95d   :  { %v5913_v52 = vadd.f32 %v5912_v23, %v5704_v4  ;;  %v7302_v12 = vunpack.i.h.bf16 %v7300_v36  ;;  %v7301_v6 = vunpack.i.l.bf16 %v7300_v36 }
 0x95e   :  { %v5706_v10 = vpop.f32.mrf.mxu1 }
 0x95f   :  { %v6122_v49 = vadd.f32 %v17180_v26, %v5913_v52  ;;  %v5707_v37 = vadd.f32 %v14717_v7, %v5706_v10  ;;  %v5246_v4 = vsel %vm5210_vm15, %v5181_v46, %v7302_v12  ;;  %v5438_v13 = vsel %vm5210_vm15, %v5374_v25, %v7301_v6 }
 0x960   :  { %v6766_v52 = vunpack.i.l.bf16 %v17182_v62  ;;  %v6926_v10 = vunpack.i.l.bf16 %v17183_v60  ;;  %v5375_v12 = vsel %vm5145_vm14, %v5311_v39, %v7297_v30 }
 0x961   :  { %v6279_v29 = vmax.f32 %v6122_v49, 0.0  ;;  %5753 = vmatmul.f32.gmra.mxu1 %v5245_v18  ;;  %5962 = vmatmul.f32.gmra.mxu2 %v5437_v41 }
 0x963   :  { %v6359_v45 = vsel %vm5145_vm14, %v6279_v29, 0.0  ;;  %v7851_v29 = vld [vmem:[#allocation2 + $0x1e0] sm:$0xff] }
 0x964   :  { %v6360_v48 = vadd.f32 %v6359_v45, %v6358_v21  ;;  %v5915_v42 = vpop.f32.mrf.mxu2  ;;  %v7310_v21 = vpop.permute.xlu0 %7309  ;;  %v5117_v61 = vsel %vm3137_vm13, %v7851_v29, %v6766_v52  ;;  %v17184_v45 = vld [vmem:[#allocation315_spill] sm:$0xff] }
 0x965   :  { %v5916_v63 = vadd.f32 %v5915_v42, %v5707_v37  ;;  %v7312_v49 = vunpack.i.h.bf16 %v7310_v21  ;;  %v7311_v55 = vunpack.i.l.bf16 %v7310_v21  ;;  %v7315_v36 = vpop.permute.xlu1 %7314  ;;  %v5182_v53 = vsel %vm5145_vm14, %v5117_v61, %v6926_v10  ;;  %v17185_v10 = vld [vmem:[#allocation367_spill] sm:$0xff] }
 0x966   :  { %v5709_v31 = vpop.f32.mrf.mxu1  ;;  %v7307_v42 = vunpack.i.h.bf16 %v7305_v15  ;;  %v7316_v25 = vunpack.i.l.bf16 %v7315_v36  ;;  %v7317_v61 = vunpack.i.h.bf16 %v7315_v36 }
 0x967   :  { %v6125_v22 = vadd.f32 %v17181_v9, %v5916_v63  ;;  %v5710_v26 = vadd.f32 %v14717_v7, %v5709_v31  ;;  %v5247_v57 = vsel %vm5210_vm15, %v5182_v53, %v7312_v49  ;;  %v7320_v63 = vpop.permute.xlu2 %7319  ;;  %v6767_v31 = vunpack.i.h.bf16 %v17182_v62  ;;  %v7852_v62 = vld [vmem:[#allocation2 + $0x1e8] sm:$0xff] }
 0x969   :  { %v6280_v23 = vmax.f32 %v6125_v22, 0.0  ;;  %5756 = vmatmul.f32.gmra.mxu1 %v5246_v4  ;;  %5965 = vmatmul.f32.gmra.mxu2 %v5438_v13  ;;  %v7322_v22 = vunpack.i.h.bf16 %v7320_v63  ;;  %v5312_v4 = vsel %vm3137_vm13, %v17048_v34, %v7307_v42  ;;  %v5118_v60 = vsel %vm3137_vm13, %v7852_v62, %v6767_v31  ;;  %v17186_v34 = vld [vmem:[#allocation281_spill] sm:$0xff] }
 0x96a   :  { %v5376_v21 = vsel %vm5145_vm14, %v5312_v4, %v7316_v25  ;;  %v6772_v4 = vunpack.i.h.bf16 %v17186_v34 }
 0x96b   :  { %v6361_v24 = vsel %vm5145_vm14, %v6280_v23, 0.0  ;;  %v7321_v23 = vunpack.i.l.bf16 %v7320_v63 }
 0x96c   :  { %v6362_v47 = vadd.f32 %v6361_v24, %v6360_v48  ;;  %v5918_v18 = vpop.f32.mrf.mxu2  ;;  %v5439_v48 = vsel %vm5210_vm15, %v5375_v12, %v7311_v55  ;;  %v7325_v59 = vpop.permute.xlu0 %7324  ;;  %v5183_v24 = vsel %vm5145_vm14, %v5118_v60, %v6927_v51  ;;  %v17188_v51 = vld [vmem:[#allocation305_spill] sm:$0xff] }
 0x96d   :  { %v5919_v41 = vadd.f32 %v5918_v18, %v5710_v26  ;;  %v7326_v52 = vunpack.i.l.bf16 %v7325_v59  ;;  %v7330_v26 = vpop.permute.xlu1 %7329  ;;  %v5248_v49 = vsel %vm5210_vm15, %v5183_v24, %v7322_v22  ;;  %v5440_v55 = vsel %vm5210_vm15, %v5376_v21, %v7321_v23 }
 0x96e   :  { %v5712_v16 = vpop.f32.mrf.mxu1  ;;  %v6771_v18 = vunpack.i.l.bf16 %v17186_v34  ;;  %v7331_v63 = vunpack.i.l.bf16 %v7330_v26 }
 0x96f   :  { %v6128_v37 = vadd.f32 %v17184_v45, %v5919_v41  ;;  %v5713_v9 = vadd.f32 %v14717_v7, %v5712_v16  ;;  %v5313_v41 = vsel %vm3137_vm13, %v17059_v54, %v7326_v52  ;;  %v17187_v16 = vld [vmem:[#allocation115_spill] sm:$0xff]  ;;  %v7335_v42 = vpop.permute.xlu2 %7334 }
 0x970   :  { %v6931_v29 = vunpack.i.l.bf16 %v17187_v16  ;;  %v6932_v21 = vunpack.i.h.bf16 %v17187_v16 }
 0x971   :  { %v6281_v6 = vmax.f32 %v6128_v37, 0.0  ;;  %5759 = vmatmul.f32.gmra.mxu1 %v5247_v57  ;;  %5968 = vmatmul.f32.gmra.mxu2 %v5439_v48  ;;  %v7332_v37 = vunpack.i.h.bf16 %v7330_v26  ;;  %v5377_v48 = vsel %vm5145_vm14, %v5313_v41, %v7317_v61 }
 0x973   :  { %v6363_v33 = vsel %vm5145_vm14, %v6281_v6, 0.0  ;;  %v7853_v6 = vld [vmem:[#allocation2 + $0x1f8] sm:$0xff] }
 0x974   :  { %v6364_v15 = vadd.f32 %v6363_v33, %v6362_v47  ;;  %v5921_v46 = vpop.f32.mrf.mxu2  ;;  %v5119_v31 = vsel %vm3137_vm13, %v7853_v6, %v6771_v18  ;;  %v7340_v54 = vpop.permute.xlu0 %7339  ;;  %v17189_v18 = vld [vmem:[#allocation103_spill] sm:$0xff] }
 0x975   :  { %v5922_v13 = vadd.f32 %v5921_v46, %v5713_v9  ;;  %v5184_v36 = vsel %vm5145_vm14, %v5119_v31, %v6931_v29  ;;  %v7327_v9 = vunpack.i.h.bf16 %v7325_v59  ;;  %v7341_v62 = vunpack.i.l.bf16 %v7340_v54 }
 0x976   :  { %v5715_v50 = vpop.f32.mrf.mxu1  ;;  %v5249_v22 = vsel %vm5210_vm15, %v5184_v36, %v7332_v37  ;;  %v17190_v37 = vld [vmem:[#allocation122_spill] sm:$0xff] }
 0x977   :  { %v6131_v30 = vadd.f32 %v17185_v10, %v5922_v13  ;;  %v5716_v45 = vadd.f32 %v14717_v7, %v5715_v50  ;;  %v14765_v13 = vpop.permute.xlu1 %7344  ;;  %v7342_v50 = vunpack.i.h.bf16 %v7340_v54  ;;  %v5314_v10 = vsel %vm3137_vm13, %v17055_v35, %v7327_v9  ;;  %v7350_v34 = vpop.permute.xlu2 %7349  ;;  %v6477_v36 = vld [vmem:[%s15190_s5 + $0x20] sm:$0xff] }
 0x978   :  { %v7346_v26 = vunpack.i.l.bf16 %v14765_v13  ;;  %v7352_v31 = vunpack.i.h.bf16 %v7350_v34  ;;  %6502 = vmatpush.msrb.mxu0 %v6477_v36 }
 0x979   :  { %v6282_v47 = vmax.f32 %v6131_v30, 0.0  ;;  %5762 = vmatmul.f32.gmra.mxu1 %v5248_v49  ;;  %5971 = vmatmul.f32.gmra.mxu2 %v5440_v55  ;;  %v7336_v30 = vunpack.i.l.bf16 %v7335_v42  ;;  %v7854_v55 = vld [vmem:[#allocation2 + $0x200] sm:$0xff] }
 0x97b   :  { %v6365_v39 = vsel %vm5145_vm14, %v6282_v47, 0.0  ;;  %v5120_v47 = vsel %vm3137_vm13, %v7854_v55, %v6772_v4  ;;  %v5378_v29 = vsel %vm5145_vm14, %v5314_v10, %v7336_v30  ;;  %v17192_v4 = vld [vmem:[#allocation258_spill] sm:$0xff]  ;;  %v6777_v30 = vunpack.i.h.bf16 %v17190_v37 }
 0x97c   :  { %v6366_v53 = vadd.f32 %v6365_v39, %v6364_v15  ;;  %v5924_v12 = vpop.f32.mrf.mxu2  ;;  %v5441_v15 = vsel %vm5210_vm15, %v5377_v48, %v7331_v63  ;;  %v5185_v16 = vsel %vm5145_vm14, %v5120_v47, %v6932_v21  ;;  %v5442_v39 = vsel %vm5210_vm15, %v5378_v29, %v7341_v62  ;;  %v14779_v35 = vpop.permute.xlu0 %7354 }
 0x97d   :  { %v5925_v57 = vadd.f32 %v5924_v12, %v5716_v45  ;;  %v5250_v61 = vsel %vm5210_vm15, %v5185_v16, %v7342_v50  ;;  %v5315_v12 = vsel %vm3137_vm13, %v17053_v43, %v7346_v26  ;;  %v7337_v63 = vunpack.i.h.bf16 %v7335_v42 }
 0x97e   :  { %v5718_v25 = vpop.f32.mrf.mxu1  ;;  %v7351_v43 = vunpack.i.l.bf16 %v7350_v34  ;;  %v7357_v36 = vunpack.i.h.bf16 %v14779_v35 }
 0x97f   :  { %v6134_v33 = vadd.f32 %v17188_v51, %v5925_v57  ;;  %v5719_v52 = vadd.f32 %v14717_v7, %v5718_v25  ;;  %v17191_v57 = vld [vmem:[#allocation320_spill] sm:$0xff]  ;;  %v7360_v54 = vpop.permute.xlu1 %7359 }
 0x980   :  { %v6936_v48 = vunpack.i.l.bf16 %v17191_v57  ;;  %v7362_v55 = vunpack.i.h.bf16 %v7360_v54  ;;  %v7361_v29 = vunpack.i.l.bf16 %v7360_v54  ;;  %v17195_v54 = vld [vmem:[#allocation9_spill] sm:$0xff] }
 0x981   :  { %v6283_v46 = vmax.f32 %v6134_v33, 0.0  ;;  %5765 = vmatmul.f32.gmra.mxu1 %v5249_v22  ;;  %5974 = vmatmul.f32.gmra.mxu2 %v5441_v15  ;;  %v5379_v22 = vsel %vm5145_vm14, %v5315_v12, %v7337_v63 }
 0x982   :  { %v5443_v62 = vsel %vm5210_vm15, %v5379_v22, %v7351_v43 }
 0x983   :  { %v6367_v23 = vsel %vm5145_vm14, %v6283_v46, 0.0  ;;  %v7855_v46 = vld [vmem:[#allocation2 + $0x210] sm:$0xff] }
 0x984   :  { %v6368_v59 = vadd.f32 %v6367_v23, %v6366_v53  ;;  %v5927_v60 = vpop.f32.mrf.mxu2  ;;  %v6776_v53 = vunpack.i.l.bf16 %v17190_v37  ;;  %v7370_v26 = vpop.permute.xlu0 %7369 }
 0x985   :  { %v5928_v24 = vadd.f32 %v5927_v60, %v5719_v52  ;;  %v7347_v52 = vunpack.i.h.bf16 %v14765_v13  ;;  %v7356_v60 = vunpack.i.l.bf16 %v14779_v35  ;;  %v7372_v43 = vunpack.i.h.bf16 %v7370_v26 }
 0x986   :  { %v5721_v49 = vpop.f32.mrf.mxu1  ;;  %v5121_v42 = vsel %vm3137_vm13, %v7855_v46, %v6776_v53  ;;  %v17193_v53 = vld [vmem:[#allocation71_spill] sm:$0xff] }
 0x987   :  { %v6137_v41 = vadd.f32 %v17189_v18, %v5928_v24  ;;  %v5722_v6 = vadd.f32 %v14717_v7, %v5721_v49  ;;  %v5186_v23 = vsel %vm5145_vm14, %v5121_v42, %v6936_v48  ;;  %v6937_v24 = vunpack.i.h.bf16 %v17191_v57 }
 0x988   :  { %v5251_v50 = vsel %vm5210_vm15, %v5186_v23, %v7352_v31  ;;  %v5316_v18 = vsel %vm3137_vm13, %v17065_v28, %v7347_v52  ;;  %v17194_v28 = vld [vmem:[#allocation267_spill] sm:$0xff] }
 0x989   :  { %v6284_v45 = vmax.f32 %v6137_v41, 0.0  ;;  %5768 = vmatmul.f32.gmra.mxu1 %v5250_v61  ;;  %5977 = vmatmul.f32.gmra.mxu2 %v5442_v39  ;;  %v5380_v16 = vsel %vm5145_vm14, %v5316_v18, %v7356_v60  ;;  %v7375_v61 = vpop.permute.xlu1 %7374  ;;  %v7857_v52 = vld [vmem:[#allocation2 + $0x228] sm:$0xff]  ;;  %v17196_v60 = vld [vmem:[#allocation73_spill] sm:$0xff] }
 0x98a   :  { %v5444_v63 = vsel %vm5210_vm15, %v5380_v16, %v7361_v29 }
 0x98b   :  { %v6369_v25 = vsel %vm5145_vm14, %v6284_v45, 0.0  ;;  %v7856_v45 = vld [vmem:[#allocation2 + $0x218] sm:$0xff] }
 0x98c   :  { %v6370_v51 = vadd.f32 %v6369_v25, %v6368_v59  ;;  %v5930_v33 = vpop.f32.mrf.mxu2  ;;  %v14797_v59 = vpop.permute.xlu2 %7364  ;;  %v5122_v37 = vsel %vm3137_vm13, %v7856_v45, %v6777_v30 }
 0x98d   :  { %v5931_v9 = vadd.f32 %v5930_v33, %v5722_v6  ;;  %v5187_v57 = vsel %vm5145_vm14, %v5122_v37, %v6937_v24  ;;  %v6781_v6 = vunpack.i.l.bf16 %v17194_v28  ;;  %v7366_v31 = vunpack.i.l.bf16 %v14797_v59 }
 0x98e   :  { %v5724_v15 = vpop.f32.mrf.mxu1  ;;  %v5252_v48 = vsel %vm5210_vm15, %v5187_v57, %v7362_v55  ;;  %v6782_v24 = vunpack.i.h.bf16 %v17194_v28 }
 0x98f   :  { %v6140_v21 = vadd.f32 %v17192_v4, %v5931_v9  ;;  %v5725_v13 = vadd.f32 %v14717_v7, %v5724_v15  ;;  %v7371_v15 = vunpack.i.l.bf16 %v7370_v26  ;;  %v14818_v4 = vpop.permute.xlu0 %7384  ;;  %v7367_v26 = vunpack.i.h.bf16 %v14797_v59 }
 0x991   :  { %v6285_v10 = vmax.f32 %v6140_v21, 0.0  ;;  %5771 = vmatmul.f32.gmra.mxu1 %v5251_v50  ;;  %5980 = vmatmul.f32.gmra.mxu2 %v5443_v62  ;;  %v5123_v50 = vsel %vm3137_vm13, %v7857_v52, %v6781_v6  ;;  %v5317_v62 = vsel %vm3137_vm13, %v17062_v1, %v7366_v31  ;;  %v5318_v59 = vsel %vm3137_vm13, %v17058_v3, %v7367_v26  ;;  %v17197_v6 = vld [vmem:[#allocation101_spill] sm:$0xff] }
 0x992   :  { %v5381_v30 = vsel %vm5145_vm14, %v5317_v62, %v7357_v36  ;;  %v7859_v52 = vld [vmem:[#allocation2 + $0x240] sm:$0xff] }
 0x993   :  { %v6371_v49 = vsel %vm5145_vm14, %v6285_v10, 0.0  ;;  %v5445_v55 = vsel %vm5210_vm15, %v5381_v30, %v7371_v15 }
 0x994   :  { %v6372_v47 = vadd.f32 %v6371_v49, %v6370_v51  ;;  %v5933_v34 = vpop.f32.mrf.mxu2  ;;  %v6941_v51 = vunpack.i.l.bf16 %v17195_v54  ;;  %v7380_v33 = vpop.permute.xlu2 %7379  ;;  %v17198_v54 = vld [vmem:[#allocation416_spill] sm:$0xff] }
 0x995   :  { %v5934_v41 = vadd.f32 %v5933_v34, %v5725_v13  ;;  %v7390_v49 = vpop.permute.xlu1 %7389  ;;  %v7376_v34 = vunpack.i.l.bf16 %v7375_v61  ;;  %v7382_v57 = vunpack.i.h.bf16 %v7380_v33 }
 0x996   :  { %v5727_v39 = vpop.f32.mrf.mxu1  ;;  %v5188_v10 = vsel %vm5145_vm14, %v5123_v50, %v6941_v51  ;;  %v6786_v51 = vunpack.i.l.bf16 %v17198_v54  ;;  %v7391_v15 = vunpack.i.l.bf16 %v7390_v49 }
 0x997   :  { %v6143_v12 = vadd.f32 %v17193_v53, %v5934_v41  ;;  %v5728_v22 = vadd.f32 %v14717_v7, %v5727_v39  ;;  %v5253_v13 = vsel %vm5210_vm15, %v5188_v10, %v7372_v43  ;;  %v7858_v39 = vld [vmem:[#allocation2 + $0x230] sm:$0xff]  ;;  %v7400_v28 = vpop.permute.xlu0 %7399 }
 0x998   :  { %v5124_v45 = vsel %vm3137_vm13, %v7858_v39, %v6782_v24  ;;  %v5125_v50 = vsel %vm3137_vm13, %v7859_v52, %v6786_v51  ;;  %v7861_v52 = vld [vmem:[#allocation2 + $0x258] sm:$0xff] }
 0x999   :  { %v6286_v25 = vmax.f32 %v6143_v12, 0.0  ;;  %5774 = vmatmul.f32.gmra.mxu1 %v5252_v48  ;;  %5983 = vmatmul.f32.gmra.mxu2 %v5444_v63  ;;  %v7381_v48 = vunpack.i.l.bf16 %v7380_v33  ;;  %v7386_v63 = vunpack.i.l.bf16 %v14818_v4 }
 0x99b   :  { %v6373_v9 = vsel %vm5145_vm14, %v6286_v25, 0.0  ;;  %v5319_v33 = vsel %vm3137_vm13, %v17075_v58, %v7386_v63  ;;  %v17199_v58 = vld [vmem:[#allocation66_spill] sm:$0xff] }
 0x99c   :  { %v6374_v46 = vadd.f32 %v6373_v9, %v6372_v47  ;;  %v5936_v42 = vpop.f32.mrf.mxu2  ;;  %v7377_v47 = vunpack.i.h.bf16 %v7375_v61  ;;  %v7395_v37 = vpop.permute.xlu2 %7394  ;;  %v5382_v61 = vsel %vm5145_vm14, %v5318_v59, %v7376_v34  ;;  %v7392_v9 = vunpack.i.h.bf16 %v7390_v49 }
 0x99d   :  { %v5937_v21 = vadd.f32 %v5936_v42, %v5728_v22  ;;  %v5446_v3 = vsel %vm5210_vm15, %v5382_v61, %v7381_v48  ;;  %v7405_v43 = vpop.permute.xlu1 %7404  ;;  %v7397_v10 = vunpack.i.h.bf16 %v7395_v37  ;;  %v7396_v30 = vunpack.i.l.bf16 %v7395_v37 }
 0x99e   :  { %v5730_v23 = vpop.f32.mrf.mxu1  ;;  %v5189_v12 = vsel %vm5145_vm14, %v5124_v45, %v7377_v47  ;;  %v7407_v63 = vunpack.i.h.bf16 %v7405_v43 }
 0x99f   :  { %v6146_v35 = vadd.f32 %v17196_v60, %v5937_v21  ;;  %v5731_v41 = vadd.f32 %v14717_v7, %v5730_v23  ;;  %v5254_v36 = vsel %vm5210_vm15, %v5189_v12, %v7382_v57  ;;  %v5190_v60 = vsel %vm5145_vm14, %v5125_v50, %v7392_v9 }
 0x9a0   :  { %v5255_v47 = vsel %vm5210_vm15, %v5190_v60, %v7397_v10 }
 0x9a1   :  { %v6287_v18 = vmax.f32 %v6146_v35, 0.0  ;;  %5777 = vmatmul.f32.gmra.mxu1 %v5253_v13  ;;  %5986 = vmatmul.f32.gmra.mxu2 %v5445_v55  ;;  %v5383_v35 = vsel %vm5145_vm14, %v5319_v33, %v7391_v15  ;;  %v6787_v13 = vunpack.i.h.bf16 %v17198_v54  ;;  %v7387_v55 = vunpack.i.h.bf16 %v14818_v4  ;;  %v17201_v54 = vld [vmem:[#allocation386_spill] sm:$0xff] }
 0x9a2   :  { %v5447_v34 = vsel %vm5210_vm15, %v5383_v35, %v7396_v30  ;;  %v6791_v51 = vunpack.i.l.bf16 %v17201_v54 }
 0x9a3   :  { %v6375_v1 = vsel %vm5145_vm14, %v6287_v18, 0.0  ;;  %v7402_v18 = vunpack.i.h.bf16 %v7400_v28  ;;  %v5320_v12 = vsel %vm3137_vm13, %v17071_v5, %v7387_v55 }
 0x9a4   :  { %v6376_v16 = vadd.f32 %v6375_v1, %v6374_v46  ;;  %v5939_v29 = vpop.f32.mrf.mxu2  ;;  %v14849_v26 = vpop.permute.xlu2 %7409  ;;  %v7401_v1 = vunpack.i.l.bf16 %v7400_v28  ;;  %v5127_v50 = vsel %vm3137_vm13, %v7861_v52, %v6791_v51  ;;  %v6476_v52 = vld [vmem:[%s15190_s5 + $0x18] sm:$0xff] }
 0x9a5   :  { %v5940_v53 = vadd.f32 %v5939_v29, %v5731_v41  ;;  %v7415_v41 = vpop.permute.xlu0 %7414  ;;  %v7420_v45 = vpop.permute.xlu1 %7419  ;;  %6503 = vmatpush.msrb.mxu0 %v6476_v52 }
 0x9a6   :  { %v5733_v25 = vpop.f32.mrf.mxu1  ;;  %v5384_v48 = vsel %vm5145_vm14, %v5320_v12, %v7401_v1  ;;  %v7417_v5 = vunpack.i.h.bf16 %v7415_v41  ;;  %v7416_v33 = vunpack.i.l.bf16 %v7415_v41  ;;  %v7422_v30 = vunpack.i.h.bf16 %v7420_v45 }
 0x9a7   :  { %v6149_v31 = vadd.f32 %v17197_v6, %v5940_v53  ;;  %v5734_v42 = vadd.f32 %v14717_v7, %v5733_v25  ;;  %v7860_v53 = vld [vmem:[#allocation2 + $0x248] sm:$0xff]  ;;  %v7406_v25 = vunpack.i.l.bf16 %v7405_v43  ;;  %v17200_v6 = vld [vmem:[#allocation117_spill] sm:$0xff]  ;;  %v7412_v1 = vunpack.i.h.bf16 %v14849_v26 }
 0x9a8   :  { %v5126_v4 = vsel %vm3137_vm13, %v7860_v53, %v6787_v13  ;;  %v5192_v35 = vsel %vm5145_vm14, %v5127_v50, %v7417_v5  ;;  %v17202_v13 = vld [vmem:[#allocation399_spill] sm:$0xff] }
 0x9a9   :  { %v6288_v22 = vmax.f32 %v6149_v31, 0.0  ;;  %5780 = vmatmul.f32.gmra.mxu1 %v5254_v36  ;;  %5989 = vmatmul.f32.gmra.mxu2 %v5446_v3  ;;  %v5191_v57 = vsel %vm5145_vm14, %v5126_v4, %v7402_v18  ;;  %v7411_v36 = vunpack.i.l.bf16 %v14849_v26  ;;  %v5448_v9 = vsel %vm5210_vm15, %v5384_v48, %v7406_v25  ;;  %v7862_v48 = vld [vmem:[#allocation2 + $0x260] sm:$0xff] }
 0x9aa   :  { %v5256_v3 = vsel %vm5210_vm15, %v5191_v57, %v7407_v63  ;;  %v5322_v26 = vsel %vm3137_vm13, %v17070_v2, %v7412_v1  ;;  %v17203_v25 = vld [vmem:[#allocation373_spill] sm:$0xff] }
 0x9ab   :  { %v6377_v46 = vsel %vm5145_vm14, %v6288_v22, 0.0 }
 0x9ac   :  { %v6378_v21 = vadd.f32 %v6377_v46, %v6376_v16  ;;  %v5942_v23 = vpop.f32.mrf.mxu2  ;;  %v7425_v22 = vpop.permute.xlu2 %7424 }
 0x9ad   :  { %v5943_v62 = vadd.f32 %v5942_v23, %v5734_v42  ;;  %v7430_v46 = vpop.permute.xlu0 %7429  ;;  %v7427_v41 = vunpack.i.h.bf16 %v7425_v22 }
 0x9ae   :  { %v5736_v24 = vpop.f32.mrf.mxu1 }
 0x9af   :  { %v6152_v49 = vadd.f32 %v17199_v58, %v5943_v62  ;;  %v5737_v39 = vadd.f32 %v14717_v7, %v5736_v24  ;;  %v5321_v62 = vsel %vm3137_vm13, %v17076_v14, %v7411_v36  ;;  %v7421_v24 = vunpack.i.l.bf16 %v7420_v45  ;;  %v14875_v58 = vpop.permute.xlu1 %7434 }
 0x9b0   :  { %v5385_v10 = vsel %vm5145_vm14, %v5321_v62, %v7416_v33  ;;  %v6792_v14 = vunpack.i.h.bf16 %v17201_v54  ;;  %v7436_v54 = vunpack.i.l.bf16 %v14875_v58 }
 0x9b1   :  { %v6289_v16 = vmax.f32 %v6152_v49, 0.0  ;;  %5783 = vmatmul.f32.gmra.mxu1 %v5255_v47  ;;  %5992 = vmatmul.f32.gmra.mxu2 %v5447_v34  ;;  %v5257_v47 = vsel %vm5210_vm15, %v5192_v35, %v7422_v30  ;;  %v5449_v34 = vsel %vm5210_vm15, %v5385_v10, %v7421_v24  ;;  %v7863_v10 = vld [vmem:[#allocation2 + $0x270] sm:$0xff] }
 0x9b2   :  { %v5128_v63 = vsel %vm3137_vm13, %v7862_v48, %v6792_v14 }
 0x9b3   :  { %v6379_v29 = vsel %vm5145_vm14, %v6289_v16, 0.0  ;;  %v7426_v16 = vunpack.i.l.bf16 %v7425_v22  ;;  %v17204_v22 = vld [vmem:[#allocation402_spill] sm:$0xff] }
 0x9b4   :  { %v6380_v59 = vadd.f32 %v6379_v29, %v6378_v21  ;;  %v5945_v37 = vpop.f32.mrf.mxu2  ;;  %v7440_v29 = vpop.permute.xlu2 %7439  ;;  %v6796_v5 = vunpack.i.l.bf16 %v17204_v22 }
 0x9b5   :  { %v5946_v61 = vadd.f32 %v5945_v37, %v5737_v39  ;;  %v7431_v37 = vunpack.i.l.bf16 %v7430_v46  ;;  %v7445_v12 = vpop.permute.xlu0 %7444  ;;  %v7442_v33 = vunpack.i.h.bf16 %v7440_v29  ;;  %v7441_v50 = vunpack.i.l.bf16 %v7440_v29 }
 0x9b6   :  { %v5739_v28 = vpop.f32.mrf.mxu1  ;;  %v5129_v30 = vsel %vm3137_vm13, %v7863_v10, %v6796_v5  ;;  %v17207_v5 = vld [vmem:[#allocation311_spill] sm:$0xff]  ;;  %v17208_v10 = vld [vmem:[#allocation112_spill] sm:$0xff] }
 0x9b7   :  { %v6155_v31 = vadd.f32 %v17200_v6, %v5946_v61  ;;  %v5740_v42 = vadd.f32 %v14717_v7, %v5739_v28  ;;  %v5193_v6 = vsel %vm5145_vm14, %v5128_v63, %v7427_v41  ;;  %v7450_v51 = vpop.permute.xlu1 %7449 }
 0x9b8   :  { %v7452_v1 = vunpack.i.h.bf16 %v7450_v51  ;;  %v7451_v41 = vunpack.i.l.bf16 %v7450_v51 }
 0x9b9   :  { %v6290_v15 = vmax.f32 %v6155_v31, 0.0  ;;  %5786 = vmatmul.f32.gmra.mxu1 %v5256_v3  ;;  %5995 = vmatmul.f32.gmra.mxu2 %v5448_v9  ;;  %v5386_v31 = vsel %vm5145_vm14, %v5322_v26, %v7426_v16 }
 0x9ba   :  { %v5450_v3 = vsel %vm5210_vm15, %v5386_v31, %v7431_v37  ;;  %v17206_v31 = vld [vmem:[#allocation317_spill] sm:$0xff] }
 0x9bb   :  { %v6381_v43 = vsel %vm5145_vm14, %v6290_v15, 0.0 }
 0x9bc   :  { %v6382_v21 = vadd.f32 %v6381_v43, %v6380_v59  ;;  %v5948_v23 = vpop.f32.mrf.mxu2  ;;  %v7432_v59 = vunpack.i.h.bf16 %v7430_v46  ;;  %v7447_v46 = vunpack.i.h.bf16 %v7445_v12  ;;  %v7446_v43 = vunpack.i.l.bf16 %v7445_v12  ;;  %v7455_v62 = vpop.permute.xlu2 %7454 }
 0x9bd   :  { %v5949_v60 = vadd.f32 %v5948_v23, %v5740_v42  ;;  %v5323_v23 = vsel %vm3137_vm13, %v17074_v0, %v7436_v54  ;;  %v14902_v24 = vpop.permute.xlu0 %7459  ;;  %v7457_v48 = vunpack.i.h.bf16 %v7455_v62  ;;  %v7456_v63 = vunpack.i.l.bf16 %v7455_v62 }
 0x9be   :  { %v5742_v49 = vpop.f32.mrf.mxu1  ;;  %v5258_v36 = vsel %vm5210_vm15, %v5193_v6, %v7432_v59  ;;  %v5387_v0 = vsel %vm5145_vm14, %v5323_v23, %v7441_v50  ;;  %v7461_v26 = vunpack.i.l.bf16 %v14902_v24  ;;  %v6801_v54 = vunpack.i.l.bf16 %v17206_v31 }
 0x9bf   :  { %v6158_v55 = vadd.f32 %v17202_v13, %v5949_v60  ;;  %v5743_v45 = vadd.f32 %v14717_v7, %v5742_v49  ;;  %v17205_v49 = vld [vmem:[#allocation410_spill] sm:$0xff]  ;;  %v5451_v14 = vsel %vm5210_vm15, %v5387_v0, %v7446_v43  ;;  %v7465_v29 = vpop.permute.xlu1 %7464 }
 0x9c0   :  { %v7865_v43 = vld [vmem:[#allocation2 + $0x288] sm:$0xff] }
 0x9c1   :  { %v6291_v18 = vmax.f32 %v6158_v55, 0.0  ;;  %5789 = vmatmul.f32.gmra.mxu1 %v5257_v47  ;;  %5998 = vmatmul.f32.gmra.mxu2 %v5449_v34  ;;  %v5194_v55 = vsel %vm5145_vm14, %v5129_v30, %v7442_v33  ;;  %v6797_v47 = vunpack.i.h.bf16 %v17204_v22  ;;  %v7437_v34 = vunpack.i.h.bf16 %v14875_v58 }
 0x9c2   :  { %v7466_v22 = vunpack.i.l.bf16 %v7465_v29 }
 0x9c3   :  { %v6383_v39 = vsel %vm5145_vm14, %v6291_v18, 0.0  ;;  %v5259_v18 = vsel %vm5210_vm15, %v5194_v55, %v7447_v46 }
 0x9c4   :  { %v6384_v53 = vadd.f32 %v6383_v39, %v6382_v21  ;;  %v5951_v4 = vpop.f32.mrf.mxu2 }
 0x9c5   :  { %v5952_v61 = vadd.f32 %v5951_v4, %v5743_v45  ;;  %v14912_v45 = vpop.f32.mrf.mxu3  ;;  %v5324_v4 = vsel %vm3137_vm13, %v17098_v27, %v7437_v34  ;;  %v7467_v27 = vunpack.i.h.bf16 %v7465_v29 }
 0x9c6   :  { %v5745_v57 = vpop.f32.mrf.mxu1 }
 0x9c7   :  { %v6161_v28 = vadd.f32 %v17203_v25, %v5952_v61  ;;  %v5746_v15 = vadd.f32 %v14717_v7, %v5745_v57  ;;  %v5388_v57 = vsel %vm5145_vm14, %v5324_v4, %v7451_v41 }
 0x9c9   :  { %v6292_v9 = vmax.f32 %v6161_v28, 0.0  ;;  %5792 = vmatmul.f32.gmra.mxu1 %v5258_v36  ;;  %6001 = vmatmul.f32.gmra.mxu2 %v5450_v3  ;;  %v7470_v28 = vpop.permute.xlu2 %7469  ;;  %v5452_v36 = vsel %vm5210_vm15, %v5388_v57, %v7456_v63  ;;  %v7475_v3 = vpop.permute.xlu0 %7474 }
 0x9ca   :  { %v7472_v62 = vunpack.i.h.bf16 %v7470_v28  ;;  %v7477_v34 = vunpack.i.h.bf16 %v7475_v3 }
 0x9cb   :  { %v6385_v2 = vsel %vm5145_vm14, %v6292_v9, 0.0  ;;  %v5325_v9 = vsel %vm3137_vm13, %v17104_v17, %v7461_v26 }
 0x9cc   :  { %v6386_v42 = vadd.f32 %v6385_v2, %v6384_v53  ;;  %v5954_v21 = vpop.f32.mrf.mxu2  ;;  %v7864_v53 = vld [vmem:[#allocation2 + $0x278] sm:$0xff]  ;;  %v5389_v52 = vsel %vm5145_vm14, %v5325_v9, %v7466_v22 }
 0x9cd   :  { %v5955_v60 = vadd.f32 %v5954_v21, %v5746_v15  ;;  %v5130_v58 = vsel %vm3137_vm13, %v7864_v53, %v6797_v47  ;;  %v7480_v15 = vpop.permute.xlu1 %7479  ;;  %v14933_v50 = vpop.f32.mrf.mxu3 }
 0x9ce   :  { %v5748_v35 = vpop.f32.mrf.mxu1  ;;  %v5195_v61 = vsel %vm5145_vm14, %v5130_v58, %v7452_v1  ;;  %v7482_v57 = vunpack.i.h.bf16 %v7480_v15 }
 0x9cf   :  { %v6164_v13 = vadd.f32 %v17205_v49, %v5955_v60  ;;  %v5749_v12 = vadd.f32 %v14717_v7, %v5748_v35  ;;  %v5260_v51 = vsel %vm5210_vm15, %v5195_v61, %v7457_v48  ;;  %v7471_v60 = vunpack.i.l.bf16 %v7470_v28 }
 0x9d0   :  { %v6802_v49 = vunpack.i.h.bf16 %v17206_v31  ;;  %v7481_v48 = vunpack.i.l.bf16 %v7480_v15  ;;  %v17210_v31 = vld [vmem:[#allocation102_spill] sm:$0xff] }
 0x9d1   :  { %v6293_v16 = vmax.f32 %v6164_v13, 0.0  ;;  %5795 = vmatmul.f32.gmra.mxu1 %v5259_v18  ;;  %6004 = vmatmul.f32.gmra.mxu2 %v5451_v14  ;;  %v7462_v13 = vunpack.i.h.bf16 %v14902_v24  ;;  %v5453_v0 = vsel %vm5210_vm15, %v5389_v52, %v7471_v60  ;;  %v14940_v47 = vpop.permute.xlu2 %7484  ;;  %v7476_v18 = vunpack.i.l.bf16 %v7475_v3  ;;  %v7490_v1 = vpop.permute.xlu0 %7489 }
 0x9d2   :  { %v7491_v3 = vunpack.i.l.bf16 %v7490_v1 }
 0x9d3   :  { %v6387_v39 = vsel %vm5145_vm14, %v6293_v16, 0.0  ;;  %v5326_v58 = vsel %vm3137_vm13, %v17099_v11, %v7462_v13 }
 0x9d4   :  { %v14914_v59 = vadd.f32 %v6387_v39, %v6386_v42  ;;  %v5957_v37 = vpop.f32.mrf.mxu2  ;;  %v5131_v42 = vsel %vm3137_vm13, %v7865_v43, %v6801_v54  ;;  %v5390_v61 = vsel %vm5145_vm14, %v5326_v58, %v7476_v18  ;;  %v6806_v54 = vunpack.i.l.bf16 %v17210_v31 }
 0x9d5   :  { %v5958_v6 = vadd.f32 %v5957_v37, %v5749_v12  ;;  %v5196_v23 = vsel %vm5145_vm14, %v5131_v42, %v7467_v27  ;;  %v7866_v37 = vld [vmem:[#allocation2 + $0x290] sm:$0xff]  ;;  %v7495_v63 = vpop.permute.xlu1 %7494  ;;  %v5454_v11 = vsel %vm5210_vm15, %v5390_v61, %v7481_v48  ;;  %v7492_v27 = vunpack.i.h.bf16 %v7490_v1  ;;  %v17212_v48 = vld [vmem:[#allocation278_spill] sm:$0xff] }
 0x9d6   :  { %v5751_v25 = vpop.f32.mrf.mxu1  ;;  %v5261_v55 = vsel %vm5210_vm15, %v5196_v23, %v7472_v62  ;;  %v5132_v53 = vsel %vm3137_vm13, %v7866_v37, %v6802_v49  ;;  %v7497_v60 = vunpack.i.h.bf16 %v7495_v63  ;;  %v7487_v18 = vunpack.i.h.bf16 %v14940_v47 }
 0x9d7   :  { %v6167_v33 = vadd.f32 %v17207_v5, %v5958_v6  ;;  %v5752_v2 = vadd.f32 %v14717_v7, %v5751_v25  ;;  %v5197_v12 = vsel %vm5145_vm14, %v5132_v53, %v7477_v34  ;;  %v17209_v25 = vld [vmem:[#allocation325_spill] sm:$0xff]  ;;  %v14951_v6 = vpop.f32.mrf.mxu3  ;;  %v6807_v34 = vunpack.i.h.bf16 %v17210_v31 }
 0x9d9   :  { %5798 = vmatmul.f32.gmra.mxu1 %v5260_v51  ;;  %6007 = vmatmul.f32.gmra.mxu2 %v5452_v36  ;;  %v6294_v35 = vmax.f32 %v6167_v33, 0.0  ;;  %v7486_v51 = vunpack.i.l.bf16 %v14940_v47  ;;  %v5262_v36 = vsel %vm5210_vm15, %v5197_v12, %v7482_v57  ;;  %v7500_v22 = vpop.permute.xlu2 %7499  ;;  %v7868_v12 = vld [vmem:[#allocation2 + $0x2a8] sm:$0xff]  ;;  %v5328_v57 = vsel %vm3137_vm13, %v17097_v32, %v7487_v18 }
 0x9da   :  { %v7501_v1 = vunpack.i.l.bf16 %v7500_v22  ;;  %v5134_v61 = vsel %vm3137_vm13, %v7868_v12, %v6807_v34 }
 0x9db   :  { %v6395_v41 = vsel %vm5145_vm14, %v6294_v35, 0.0  ;;  %v5327_v42 = vsel %vm3137_vm13, %v17107_v8, %v7486_v51 }
 0x9dc   :  { %v5960_v46 = vpop.f32.mrf.mxu2  ;;  %v5391_v62 = vsel %vm5145_vm14, %v5327_v42, %v7491_v3 }
 0x9dd   :  { %v5961_v21 = vadd.f32 %v5960_v46, %v5752_v2  ;;  %v7867_v46 = vld [vmem:[#allocation2 + $0x2a0] sm:$0xff]  ;;  %v14965_v49 = vpop.permute.xlu1 %7509 }
 0x9de   :  { %v5754_v17 = vpop.f32.mrf.mxu1  ;;  %v5133_v43 = vsel %vm3137_vm13, %v7867_v46, %v6806_v54 }
 0x9df   :  { %v6170_v30 = vadd.f32 %v17208_v10, %v5961_v21  ;;  %v5755_v29 = vadd.f32 %v14717_v7, %v5754_v17  ;;  %v7505_v21 = vpop.permute.xlu0 %7504  ;;  %v5198_v52 = vsel %vm5145_vm14, %v5133_v43, %v7492_v27  ;;  %v7496_v17 = vunpack.i.l.bf16 %v7495_v63  ;;  %v17211_v10 = vld [vmem:[#allocation124_spill] sm:$0xff]  ;;  %v14969_v8 = vpop.f32.mrf.mxu3 }
 0x9e0   :  { %v5263_v13 = vsel %vm5210_vm15, %v5198_v52, %v7497_v60  ;;  %v17214_v60 = vld [vmem:[#allocation413_spill] sm:$0xff] }
 0x9e1   :  { %v6295_v14 = vmax.f32 %v6170_v30, 0.0  ;;  %5801 = vmatmul.f32.gmra.mxu1 %v5261_v55  ;;  %6010 = vmatmul.f32.gmra.mxu2 %v5453_v0  ;;  %v5455_v55 = vsel %vm5210_vm15, %v5391_v62, %v7496_v17  ;;  %v7515_v53 = vpop.permute.xlu2 %7514 }
 0x9e2   :  { %v7517_v32 = vunpack.i.h.bf16 %v7515_v53  ;;  %v7516_v43 = vunpack.i.l.bf16 %v7515_v53 }
 0x9e3   :  { %v6396_v16 = vsel %vm5145_vm14, %v6295_v14, 0.0  ;;  %v7502_v14 = vunpack.i.h.bf16 %v7500_v22 }
 0x9e4   :  { %v6397_v39 = vadd.f32 %v6396_v16, %v6395_v41  ;;  %v5963_v24 = vpop.f32.mrf.mxu2 }
 0x9e5   :  { %v5964_v4 = vadd.f32 %v5963_v24, %v5755_v29  ;;  %v7507_v29 = vunpack.i.h.bf16 %v7505_v21  ;;  %v7525_v27 = vpop.permute.xlu1 %7524 }
 0x9e6   :  { %v5757_v26 = vpop.f32.mrf.mxu1  ;;  %v7526_v34 = vunpack.i.l.bf16 %v7525_v27 }
 0x9e7   :  { %v6173_v28 = vadd.f32 %v17209_v25, %v5964_v4  ;;  %v5758_v33 = vadd.f32 %v14717_v7, %v5757_v26  ;;  %v7520_v47 = vpop.permute.xlu0 %7519  ;;  %v5199_v26 = vsel %vm5145_vm14, %v5134_v61, %v7502_v14  ;;  %v5392_v25 = vsel %vm5145_vm14, %v5328_v57, %v7501_v1  ;;  %v14987_v22 = vpop.f32.mrf.mxu3 }
 0x9e8   :  { %v5264_v31 = vsel %vm5210_vm15, %v5199_v26, %v7507_v29 }
 0x9e9   :  { %v6296_v9 = vmax.f32 %v6173_v28, 0.0  ;;  %5804 = vmatmul.f32.gmra.mxu1 %v5262_v36  ;;  %6013 = vmatmul.f32.gmra.mxu2 %v5454_v11  ;;  %v7511_v28 = vunpack.i.l.bf16 %v14965_v49  ;;  %v17213_v36 = vld [vmem:[#allocation327_spill] sm:$0xff]  ;;  %v7530_v62 = vpop.permute.xlu2 %7529 }
 0x9ea   :  { %v6811_v11 = vunpack.i.l.bf16 %v17213_v36  ;;  %v7532_v61 = vunpack.i.h.bf16 %v7530_v62  ;;  %v7531_v57 = vunpack.i.l.bf16 %v7530_v62 }
 0x9eb   :  { %v6398_v5 = vsel %vm5145_vm14, %v6296_v9, 0.0  ;;  %v5329_v46 = vsel %vm3137_vm13, %v17106_v38, %v7511_v28 }
 0x9ec   :  { %v6399_v2 = vadd.f32 %v6398_v5, %v6397_v39  ;;  %v5966_v15 = vpop.f32.mrf.mxu2  ;;  %v7506_v39 = vunpack.i.l.bf16 %v7505_v21  ;;  %v7522_v5 = vunpack.i.h.bf16 %v7520_v47 }
 0x9ed   :  { %v5967_v23 = vadd.f32 %v5966_v15, %v5758_v33  ;;  %v7521_v33 = vunpack.i.l.bf16 %v7520_v47 }
 0x9ee   :  { %v5760_v35 = vpop.f32.mrf.mxu1  ;;  %v5456_v54 = vsel %vm5210_vm15, %v5392_v25, %v7506_v39 }
 0x9ef   :  { %v6176_v30 = vadd.f32 %v17211_v10, %v5967_v23  ;;  %v5761_v16 = vadd.f32 %v14717_v7, %v5760_v35  ;;  %v7869_v23 = vld [vmem:[#allocation2 + $0x2b8] sm:$0xff]  ;;  %v5393_v10 = vsel %vm5145_vm14, %v5329_v46, %v7516_v43  ;;  %v14999_v18 = vpop.permute.xlu0 %7534  ;;  %v15008_v12 = vpop.f32.mrf.mxu3 }
 0x9f0   :  { %v5135_v52 = vsel %vm3137_vm13, %v7869_v23, %v6811_v11  ;;  %v5457_v38 = vsel %vm5210_vm15, %v5393_v10, %v7521_v33 }
 0x9f1   :  { %v6297_v0 = vmax.f32 %v6176_v30, 0.0  ;;  %5807 = vmatmul.f32.gmra.mxu1 %v5263_v13  ;;  %6016 = vmatmul.f32.gmra.mxu2 %v5455_v55  ;;  %v5200_v35 = vsel %vm5145_vm14, %v5135_v52, %v7517_v32  ;;  %v6812_v30 = vunpack.i.h.bf16 %v17213_v36  ;;  %v7512_v13 = vunpack.i.h.bf16 %v14965_v49  ;;  %v7545_v28 = vpop.permute.xlu2 %7544 }
 0x9f2   :  { %v5265_v55 = vsel %vm5210_vm15, %v5200_v35, %v7522_v5  ;;  %v7872_v5 = vld [vmem:[#allocation2 + $0x2d0] sm:$0xff]  ;;  %v7547_v43 = vunpack.i.h.bf16 %v7545_v28 }
 0x9f3   :  { %v6400_v41 = vsel %vm5145_vm14, %v6297_v0, 0.0  ;;  %v7527_v0 = vunpack.i.h.bf16 %v7525_v27 }
 0x9f4   :  { %v6401_v24 = vadd.f32 %v6400_v41, %v6399_v2  ;;  %v5969_v37 = vpop.f32.mrf.mxu2 }
 0x9f5   :  { %v5970_v58 = vadd.f32 %v5969_v37, %v5761_v16  ;;  %v7540_v16 = vpop.permute.xlu1 %7539  ;;  %v5330_v37 = vsel %vm3137_vm13, %v17129_v19, %v7512_v13 }
 0x9f6   :  { %v5763_v4 = vpop.f32.mrf.mxu1  ;;  %v7541_v36 = vunpack.i.l.bf16 %v7540_v16 }
 0x9f7   :  { %v6179_v63 = vadd.f32 %v17212_v48, %v5970_v58  ;;  %v5764_v9 = vadd.f32 %v14717_v7, %v5763_v4  ;;  %v5394_v4 = vsel %vm5145_vm14, %v5330_v37, %v7526_v34  ;;  %v7550_v11 = vpop.permute.xlu0 %7549  ;;  %v15031_v62 = vpop.f32.mrf.mxu3 }
 0x9f8   :  { %v5458_v19 = vsel %vm5210_vm15, %v5394_v4, %v7531_v57  ;;  %v7551_v13 = vunpack.i.l.bf16 %v7550_v11  ;;  %v17216_v4 = vld [vmem:[#allocation379_spill] sm:$0xff] }
 0x9f9   :  { %v6298_v51 = vmax.f32 %v6179_v63, 0.0  ;;  %5810 = vmatmul.f32.gmra.mxu1 %v5264_v31  ;;  %6019 = vmatmul.f32.gmra.mxu2 %v5456_v54  ;;  %v17215_v63 = vld [vmem:[#allocation391_spill] sm:$0xff]  ;;  %v7542_v31 = vunpack.i.h.bf16 %v7540_v16 }
 0x9fa   :  { %v6816_v26 = vunpack.i.l.bf16 %v17215_v63 }
 0x9fb   :  { %v6402_v3 = vsel %vm5145_vm14, %v6298_v51, 0.0 }
 0x9fc   :  { %v6403_v2 = vadd.f32 %v6402_v3, %v6401_v24  ;;  %v5972_v15 = vpop.f32.mrf.mxu2  ;;  %v7870_v24 = vld [vmem:[#allocation2 + $0x2c0] sm:$0xff]  ;;  %v5137_v33 = vsel %vm3137_vm13, %v7872_v5, %v6816_v26 }
 0x9fd   :  { %v5973_v42 = vadd.f32 %v5972_v15, %v5764_v9  ;;  %v5136_v49 = vsel %vm3137_vm13, %v7870_v24, %v6812_v30  ;;  %v5202_v15 = vsel %vm5145_vm14, %v5137_v33, %v7542_v31  ;;  %v7552_v30 = vunpack.i.h.bf16 %v7550_v11 }
 0x9fe   :  { %v5766_v21 = vpop.f32.mrf.mxu1  ;;  %v5201_v58 = vsel %vm5145_vm14, %v5136_v49, %v7527_v0  ;;  %v5267_v35 = vsel %vm5210_vm15, %v5202_v15, %v7547_v43 }
 0x9ff   :  { %v6182_v17 = vadd.f32 %v17214_v60, %v5973_v42  ;;  %v5767_v41 = vadd.f32 %v14717_v7, %v5766_v21  ;;  %v7536_v7 = vunpack.i.l.bf16 %v14999_v18  ;;  %v5266_v25 = vsel %vm5210_vm15, %v5201_v58, %v7532_v61  ;;  %v7555_v21 = vpop.permute.xlu1 %7554  ;;  %v7565_v16 = vpop.permute.xlu0 %7564 }
 0xa00   :  { %v7546_v42 = vunpack.i.l.bf16 %v7545_v28  ;;  %v6817_v60 = vunpack.i.h.bf16 %v17215_v63  ;;  %v7557_v49 = vunpack.i.h.bf16 %v7555_v21  ;;  %v7556_v37 = vunpack.i.l.bf16 %v7555_v21 }
 0xa01   :  { %v6299_v14 = vmax.f32 %v6182_v17, 0.0  ;;  %5813 = vmatmul.f32.gmra.mxu1 %v5265_v55  ;;  %6022 = vmatmul.f32.gmra.mxu2 %v5457_v38  ;;  %v5331_v51 = vsel %vm3137_vm13, %v17135_v44, %v7536_v7  ;;  %v6475_v44 = vld [vmem:[%s15190_s5 + $0x10] sm:$0xff]  ;;  %v7537_v17 = vunpack.i.h.bf16 %v14999_v18  ;;  %v15037_v38 = vpop.permute.xlu2 %7559  ;;  %v6821_v61 = vunpack.i.l.bf16 %v17216_v4 }
 0xa02   :  { %v5395_v46 = vsel %vm5145_vm14, %v5331_v51, %v7541_v36  ;;  %6504 = vmatpush.msrb.mxu0 %v6475_v44  ;;  %v7561_v57 = vunpack.i.l.bf16 %v15037_v38  ;;  %v7566_v63 = vunpack.i.l.bf16 %v7565_v16 }
 0xa03   :  { %v6404_v1 = vsel %vm5145_vm14, %v6299_v14, 0.0  ;;  %v5459_v10 = vsel %vm5210_vm15, %v5395_v46, %v7546_v42  ;;  %v7562_v42 = vunpack.i.h.bf16 %v15037_v38 }
 0xa04   :  { %v6405_v29 = vadd.f32 %v6404_v1, %v6403_v2  ;;  %v5975_v39 = vpop.f32.mrf.mxu2  ;;  %v7873_v1 = vld [vmem:[#allocation2 + $0x2d8] sm:$0xff]  ;;  %v5333_v36 = vsel %vm3137_vm13, %v17136_v40, %v7561_v57  ;;  %v6822_v40 = vunpack.i.h.bf16 %v17216_v4 }
 0xa05   :  { %v5976_v53 = vadd.f32 %v5975_v39, %v5767_v41  ;;  %v5138_v18 = vsel %vm3137_vm13, %v7873_v1, %v6817_v60  ;;  %v5332_v41 = vsel %vm3137_vm13, %v17131_v56, %v7537_v17  ;;  %v7877_v1 = vld [vmem:[#allocation2 + $0x2f0] sm:$0xff] }
 0xa06   :  { %v5769_v47 = vpop.f32.mrf.mxu1  ;;  %v5203_v39 = vsel %vm5145_vm14, %v5138_v18, %v7552_v30  ;;  %v5396_v24 = vsel %vm5145_vm14, %v5332_v41, %v7551_v13  ;;  %v5140_v18 = vsel %vm3137_vm13, %v7877_v1, %v6822_v40  ;;  %v17217_v41 = vld [vmem:[#allocation176_spill] sm:$0xff] }
 0xa07   :  { %v6185_v48 = vadd.f32 %v14912_v45, %v5976_v53  ;;  %v15021_v45 = vld [vmem:[%s15189_s4] ss:$0 sm:$0xff]  ;;  %v7570_v7 = vpop.permute.xlu1 %7569  ;;  %v5460_v56 = vsel %vm5210_vm15, %v5396_v24, %v7556_v37  ;;  %v7580_v44 = vpop.permute.xlu0 %7579 }
 0xa08   :  { %v5770_v32 = vadd.f32 %v15021_v45, %v5769_v47  ;;  %v5268_v47 = vsel %vm5210_vm15, %v5203_v39, %v7557_v49  ;;  %v7571_v5 = vunpack.i.l.bf16 %v7570_v7  ;;  %v7582_v60 = vunpack.i.h.bf16 %v7580_v44 }
 0xa09   :  { %v6300_v54 = vmax.f32 %v6185_v48, 0.0  ;;  %5816 = vmatmul.f32.gmra.mxu1 %v5266_v25  ;;  %6025 = vmatmul.f32.gmra.mxu2 %v5458_v19  ;;  %v7567_v48 = vunpack.i.h.bf16 %v7565_v16  ;;  %v15051_v25 = vpop.f32.mrf.mxu3  ;;  %v7575_v11 = vpop.permute.xlu2 %7574  ;;  %v5334_v16 = vsel %vm3137_vm13, %v17217_v41, %v7562_v42 }
 0xa0a   :  { %v7577_v21 = vunpack.i.h.bf16 %v7575_v11 }
 0xa0b   :  { %v6406_v27 = vsel %vm5145_vm14, %v6300_v54, 0.0  ;;  %v7874_v54 = vld [vmem:[#allocation2 + $0x2e8] sm:$0xff] }
 0xa0c   :  { %v6407_v3 = vadd.f32 %v6406_v27, %v6405_v29  ;;  %v5978_v9 = vpop.f32.mrf.mxu2  ;;  %v5139_v51 = vsel %vm3137_vm13, %v7874_v54, %v6821_v61  ;;  %v5205_v37 = vsel %vm5145_vm14, %v5140_v18, %v7577_v21 }
 0xa0d   :  { %v5979_v2 = vadd.f32 %v5978_v9, %v5770_v32  ;;  %v5204_v32 = vsel %vm5145_vm14, %v5139_v51, %v7567_v48  ;;  %v7572_v9 = vunpack.i.h.bf16 %v7570_v7  ;;  %v17218_v7 = vld [vmem:[#allocation105_spill] sm:$0xff] }
 0xa0e   :  { %v5772_v23 = vpop.f32.mrf.mxu1  ;;  %v7878_v51 = vld [vmem:[#allocation2 + $0x358] sm:$0xff] }
 0xa0f   :  { %v6188_v52 = vadd.f32 %v14933_v50, %v5979_v2  ;;  %v5773_v50 = vadd.f32 %v15021_v45, %v5772_v23  ;;  %v5269_v15 = vsel %vm5210_vm15, %v5204_v32, %v7572_v9  ;;  %v15065_v23 = vpop.permute.xlu1 %7584  ;;  %v7595_v61 = vpop.permute.xlu0 %7594  ;;  %v7879_v9 = vld [vmem:[#allocation2 + $0x300] sm:$0xff] }
 0xa10   :  { %v7586_v24 = vunpack.i.l.bf16 %v15065_v23 }
 0xa11   :  { %v6301_v55 = vmax.f32 %v6188_v52, 0.0  ;;  %5819 = vmatmul.f32.gmra.mxu1 %v5267_v35  ;;  %6028 = vmatmul.f32.gmra.mxu2 %v5459_v10  ;;  %v7576_v52 = vunpack.i.l.bf16 %v7575_v11  ;;  %v15069_v35 = vpop.f32.mrf.mxu3  ;;  %v7581_v10 = vunpack.i.l.bf16 %v7580_v44  ;;  %v7590_v39 = vpop.permute.xlu2 %7589 }
 0xa12   :  { %v7591_v11 = vunpack.i.l.bf16 %v7590_v39 }
 0xa13   :  { %v6408_v0 = vsel %vm5145_vm14, %v6301_v55, 0.0  ;;  %v7875_v55 = vld [vmem:[#allocation2 + $0x348] sm:$0xff] }
 0xa14   :  { %v6409_v34 = vadd.f32 %v6408_v0, %v6407_v3  ;;  %v5981_v14 = vpop.f32.mrf.mxu2  ;;  %v5397_v3 = vsel %vm5145_vm14, %v5333_v36, %v7566_v63  ;;  %v3924_v0 = vrot.slane %v7875_v55, 2  ;;  %v17219_v63 = vld [vmem:[#allocation409_spill] sm:$0xff]  ;;  %v3927_v36 = vrot.slane %v7878_v51, 2  ;;  %v7880_v55 = vld [vmem:[#allocation2 + $0x308] sm:$0xff] }
 0xa15   :  { %v5982_v29 = vadd.f32 %v5981_v14, %v5773_v50  ;;  %v5461_v46 = vsel %vm5210_vm15, %v5397_v3, %v7571_v5  ;;  %v7876_v50 = vld [vmem:[#allocation2 + $0x350] sm:$0xff] }
 0xa16   :  { %v5775_v53 = vpop.f32.mrf.mxu1 }
 0xa17   :  { %v6191_v58 = vadd.f32 %v14951_v6, %v5982_v29  ;;  %v5776_v6 = vadd.f32 %v15021_v45, %v5775_v53  ;;  %v5398_v53 = vsel %vm5145_vm14, %v5334_v16, %v7576_v52 }
 0xa18   :  { %v5462_v4 = vsel %vm5210_vm15, %v5398_v53, %v7581_v10 }
 0xa19   :  { %v6302_v26 = vmax.f32 %v6191_v58, 0.0  ;;  %5822 = vmatmul.f32.gmra.mxu1 %v5268_v47  ;;  %6031 = vmatmul.f32.gmra.mxu2 %v5460_v56  ;;  %v5270_v58 = vsel %vm5210_vm15, %v5205_v37, %v7582_v60  ;;  %v6826_v47 = vunpack.i.l.bf16 %v17218_v7  ;;  %v7592_v56 = vunpack.i.h.bf16 %v7590_v39  ;;  %v15087_v32 = vpop.f32.mrf.mxu3  ;;  %v7605_v21 = vpop.permute.xlu2 %7604 }
 0xa1a   :  { %v7607_v1 = vunpack.i.h.bf16 %v7605_v21  ;;  %v7606_v18 = vunpack.i.l.bf16 %v7605_v21  ;;  %v17222_v21 = vld [vmem:[#allocation185_spill] sm:$0xff] }
 0xa1b   :  { %v6410_v19 = vsel %vm5145_vm14, %v6302_v26, 0.0  ;;  %v5335_v26 = vsel %vm3137_vm13, %v17219_v63, %v7586_v24  ;;  %v5141_v5 = vsel %vm3137_vm13, %v7879_v9, %v6826_v47  ;;  %v7881_v63 = vld [vmem:[#allocation2 + $0x318] sm:$0xff] }
 0xa1c   :  { %v6411_v28 = vadd.f32 %v6410_v19, %v6409_v34  ;;  %v5984_v31 = vpop.f32.mrf.mxu2  ;;  %v3925_v34 = vrot.slane %v7876_v50, 2  ;;  %v7600_v19 = vpop.permute.xlu1 %7599 }
 0xa1d   :  { %v5985_v27 = vadd.f32 %v5984_v31, %v5776_v6  ;;  %v7597_v6 = vunpack.i.h.bf16 %v7595_v61  ;;  %v7602_v52 = vunpack.i.h.bf16 %v7600_v19  ;;  %v7601_v60 = vunpack.i.l.bf16 %v7600_v19 }
 0xa1e   :  { %v5778_v33 = vpop.f32.mrf.mxu1  ;;  %v3926_v29 = vsel %vm392_vm1, %v3924_v0, %v3925_v34  ;;  %v17220_v0 = vld [vmem:[#allocation67_spill] sm:$0xff] }
 0xa1f   :  { %v6194_v2 = vadd.f32 %v14969_v8, %v5985_v27  ;;  %v5779_v8 = vadd.f32 %v15021_v45, %v5778_v33  ;;  %6656 = vmatmul.msk.f32.gmra.mxu3 %vm3137_vm13, %v3926_v29  ;;  %v3928_v33 = vsel %vm392_vm1, %v3925_v34, %v3927_v36  ;;  %vm6487_vm1 = vcmask 1041409  }
 0xa21   :  { %v6303_v43 = vmax.f32 %v6194_v2, 0.0  ;;  %5825 = vmatmul.f32.gmra.mxu1 %v5269_v15  ;;  %6034 = vmatmul.f32.gmra.mxu2 %v5461_v46  ;;  %v5206_v2 = vsel %vm5145_vm14, %v5141_v5, %v7592_v56  ;;  %v5399_v15 = vsel %vm5145_vm14, %v5335_v26, %v7591_v11  ;;  %v6827_v46 = vunpack.i.h.bf16 %v17218_v7  ;;  %v15107_v24 = vpop.f32.mrf.mxu3  ;;  %v7620_v7 = vpop.permute.xlu2 %7619 }
 0xa22   :  { %v5271_v40 = vsel %vm5210_vm15, %v5206_v2, %v7597_v6 }
 0xa23   :  { %v6412_v17 = vsel %vm5145_vm14, %v6303_v43, 0.0  ;;  %v7587_v43 = vunpack.i.h.bf16 %v15065_v23  ;;  %v5142_v23 = vsel %vm3137_vm13, %v7880_v55, %v6827_v46 }
 0xa24   :  { %v6413_v30 = vadd.f32 %v6412_v17, %v6411_v28  ;;  %v5987_v13 = vpop.f32.mrf.mxu2  ;;  %v7596_v28 = vunpack.i.l.bf16 %v7595_v61  ;;  %v7615_v41 = vpop.permute.xlu1 %7614 }
 0xa25   :  { %v5988_v14 = vadd.f32 %v5987_v13, %v5779_v8  ;;  %v5336_v50 = vsel %vm3137_vm13, %v17220_v0, %v7587_v43  ;;  %v7616_v47 = vunpack.i.l.bf16 %v7615_v41 }
 0xa26   :  { %v5781_v38 = vpop.f32.mrf.mxu1  ;;  %v5463_v42 = vsel %vm5210_vm15, %v5399_v15, %v7596_v28 }
 0xa27   :  { %v6197_v49 = vadd.f32 %v14987_v22, %v5988_v14  ;;  %v5782_v22 = vadd.f32 %v15021_v45, %v5781_v38  ;;  %6657 = vmatmul.msk.f32.gmra.mxu3 %vm3137_vm13, %v3928_v33  ;;  %v5207_v14 = vsel %vm5145_vm14, %v5142_v23, %v7602_v52  ;;  %v5400_v38 = vsel %vm5145_vm14, %v5336_v50, %v7601_v60 }
 0xa28   :  { %v5272_v53 = vsel %vm5210_vm15, %v5207_v14, %v7607_v1 }
 0xa29   :  { %v6304_v57 = vmax.f32 %v6197_v49, 0.0  ;;  %5828 = vmatmul.f32.gmra.mxu1 %v5270_v58  ;;  %6037 = vmatmul.f32.gmra.mxu2 %v5462_v4  ;;  %v17221_v49 = vld [vmem:[#allocation415_spill] sm:$0xff]  ;;  %v5464_v58 = vsel %vm5210_vm15, %v5400_v38, %v7606_v18  ;;  %v7617_v4 = vunpack.i.h.bf16 %v7615_v41  ;;  %v6217_v2 = vpop.f32.mrf.mxu3 }
 0xa2a   :  { %v6831_v37 = vunpack.i.l.bf16 %v17221_v49  ;;  %v6832_v11 = vunpack.i.h.bf16 %v17221_v49  ;;  %v6474_v18 = vld [vmem:[%s15190_s5 + $0x8] sm:$0xff] }
 0xa2b   :  { %v6414_v48 = vsel %vm5145_vm14, %v6304_v57, 0.0  ;;  %6505 = vmatpush.msrb.mxu0 %v6474_v18 }
 0xa2c   :  { %v6415_v31 = vadd.f32 %v6414_v48, %v6413_v30  ;;  %v5990_v54 = vpop.f32.mrf.mxu2  ;;  %v5143_v26 = vsel %vm3137_vm13, %v7881_v63, %v6831_v37  ;;  %v5016_v60 = vpop.permute.xlu1 %5015 }
 0xa2d   :  { %v5991_v27 = vadd.f32 %v5990_v54, %v5782_v22  ;;  %v5208_v6 = vsel %vm5145_vm14, %v5143_v26, %v7617_v4  ;;  %v7621_v54 = vunpack.i.l.bf16 %v7620_v7 }
 0xa2e   :  { %v5784_v3 = vpop.f32.mrf.mxu1 }
 0xa2f   :  { %v6200_v44 = vadd.f32 %v15008_v12, %v5991_v27  ;;  %v7610_v12 = vpop.permute.xlu0 %7609  ;;  %v5785_v10 = vadd.f32 %v15021_v45, %v5784_v3 }
 0xa30   :  { %v7611_v16 = vunpack.i.l.bf16 %v7610_v12  ;;  %v7612_v27 = vunpack.i.h.bf16 %v7610_v12 }
 0xa31   :  { %v6305_v17 = vmax.f32 %v6200_v44, 0.0  ;;  %5831 = vmatmul.f32.gmra.mxu1 %v5271_v40  ;;  %6040 = vmatmul.f32.gmra.mxu2 %v5463_v42  ;;  %v6220_v14 = vpop.f32.mrf.mxu3 }
 0xa32   :  { %v5337_v57 = vsel %vm3137_vm13, %v14608_v20, %v7611_v16  ;;  %v5338_v52 = vsel %vm3137_vm13, %v17222_v21, %v7612_v27 }
 0xa33   :  { %v6416_v8 = vsel %vm5145_vm14, %v6305_v17, 0.0  ;;  %v5401_v28 = vsel %vm5145_vm14, %v5337_v57, %v7616_v47 }
 0xa34   :  { %v6417_v30 = vadd.f32 %v6416_v8, %v6415_v31  ;;  %v5993_v13 = vpop.f32.mrf.mxu2  ;;  %v7622_v31 = vunpack.i.h.bf16 %v7620_v7  ;;  %v5465_v9 = vsel %vm5210_vm15, %v5401_v28, %v7621_v54 }
 0xa35   :  { %v5994_v34 = vadd.f32 %v5993_v13, %v5785_v10 }
 0xa36   :  { %v5787_v29 = vpop.f32.mrf.mxu1  ;;  %v5273_v3 = vsel %vm5210_vm15, %v5208_v6, %v7622_v31 }
 0xa37   :  { %v6203_v39 = vadd.f32 %v15031_v62, %v5994_v34  ;;  %v5788_v62 = vadd.f32 %v15021_v45, %v5787_v29  ;;  %v7625_v51 = vpop.permute.xlu0 %7624 }
 0xa38   :  { %v7627_v5 = vunpack.i.h.bf16 %v7625_v51  ;;  %v7626_v33 = vunpack.i.l.bf16 %v7625_v51 }
 0xa39   :  { %v6306_v61 = vmax.f32 %v6203_v39, 0.0  ;;  %5834 = vmatmul.f32.gmra.mxu1 %v5272_v53  ;;  %6043 = vmatmul.f32.gmra.mxu2 %v5464_v58  ;;  %v6223_v4 = vpop.f32.mrf.mxu3 }
 0xa3a   :  { %v5402_v8 = vsel %vm5145_vm14, %v5338_v52, %v7626_v33 }
 0xa3b   :  { %v6418_v56 = vsel %vm5145_vm14, %v6306_v61, 0.0  ;;  %v5466_v23 = vsel %vm5210_vm15, %v5402_v8, %v5016_v60 }
 0xa3c   :  { %v6419_v48 = vadd.f32 %v6418_v56, %v6417_v30  ;;  %v5996_v22 = vpop.f32.mrf.mxu2  ;;  %v4440_v30 = vpop.permute.xlu2 %4439 }
 0xa3d   :  { %v5997_v19 = vadd.f32 %v5996_v22, %v5788_v62 }
 0xa3e   :  { %v5790_v20 = vpop.f32.mrf.mxu1 }
 0xa3f   :  { %v6206_v36 = vadd.f32 %v15051_v25, %v5997_v19  ;;  %v5791_v46 = vadd.f32 %v15021_v45, %v5790_v20  ;;  %v7882_v25 = vld [vmem:[#allocation2 + $0x320] sm:$0xff] }
 0xa40   :  { %v5144_v42 = vsel %vm3137_vm13, %v7882_v25, %v6832_v11 }
 0xa41   :  { %v6307_v44 = vmax.f32 %v6206_v36, 0.0  ;;  %5837 = vmatmul.f32.gmra.mxu1 %v5273_v3  ;;  %6046 = vmatmul.f32.gmra.mxu2 %v5465_v9  ;;  %v5209_v12 = vsel %vm5145_vm14, %v5144_v42, %v7627_v5  ;;  %v6226_v26 = vpop.f32.mrf.mxu3 }
 0xa42   :  { %v5274_v55 = vsel %vm5210_vm15, %v5209_v12, %v4440_v30 }
 0xa43   :  { %v6420_v15 = vsel %vm5145_vm14, %v6307_v44, 0.0 }
 0xa44   :  { %v6421_v43 = vadd.f32 %v6420_v15, %v6419_v48  ;;  %v5999_v40 = vpop.f32.mrf.mxu2 }
 0xa45   :  { %v6000_v17 = vadd.f32 %v5999_v40, %v5791_v46 }
 0xa46   :  { %v5793_v10 = vpop.f32.mrf.mxu1 }
 0xa47   :  { %v6209_v13 = vadd.f32 %v15069_v35, %v6000_v17  ;;  %v5794_v34 = vadd.f32 %v15021_v45, %v5793_v10 }
 0xa49   :  { %v6308_v0 = vmax.f32 %v6209_v13, 0.0  ;;  %5840 = vmatmul.f32.gmra.mxu1 %v5274_v55  ;;  %6049 = vmatmul.f32.gmra.mxu2 %v5466_v23  ;;  %v6229_v11 = vpop.f32.mrf.mxu3 }
 0xa4b   :  { %v6422_v50 = vsel %vm5145_vm14, %v6308_v0, 0.0 }
 0xa4c   :  { %v6423_v38 = vadd.f32 %v6422_v50, %v6421_v43  ;;  %v6002_v1 = vpop.f32.mrf.mxu2 }
 0xa4d   :  { %v6003_v41 = vadd.f32 %v6002_v1, %v5794_v34  ;;  %v6473_v34 = vld [vmem:[%s15190_s5] sm:$0xff] }
 0xa4e   :  { %v5796_v35 = vpop.f32.mrf.mxu1  ;;  %6506 = vmatpush.msrb.mxu0 %v6473_v34 }
 0xa4f   :  { %v6212_v16 = vadd.f32 %v15087_v32, %v6003_v41  ;;  %v5797_v49 = vadd.f32 %v15021_v45, %v5796_v35 }
 0xa51   :  { %v6309_v29 = vmax.f32 %v6212_v16, 0.0  ;;  %v6232_v40 = vpop.f32.mrf.mxu3 }
 0xa53   :  { %v6424_v39 = vsel %vm5145_vm14, %v6309_v29, 0.0 }
 0xa54   :  { %v6425_v37 = vadd.f32 %v6424_v39, %v6423_v38  ;;  %v6005_v53 = vpop.f32.mrf.mxu2 }
 0xa55   :  { %v6006_v58 = vadd.f32 %v6005_v53, %v5797_v49 }
 0xa56   :  { %v5799_v61 = vpop.f32.mrf.mxu1 }
 0xa57   :  { %v6215_v57 = vadd.f32 %v15107_v24, %v6006_v58  ;;  %v5800_v56 = vadd.f32 %v15021_v45, %v5799_v61 }
 0xa59   :  { %v6310_v7 = vmax.f32 %v6215_v57, 0.0  ;;  %v6235_v30 = vpop.f32.mrf.mxu3 }
 0xa5b   :  { %v6426_v47 = vsel %vm5145_vm14, %v6310_v7, 0.0 }
 0xa5c   :  { %v6427_v62 = vadd.f32 %v6426_v47, %v6425_v37  ;;  %v6008_v48 = vpop.f32.mrf.mxu2 }
 0xa5d   :  { %v6009_v32 = vadd.f32 %v6008_v48, %v5800_v56 }
 0xa5e   :  { %v5802_v22 = vpop.f32.mrf.mxu1 }
 0xa5f   :  { %v6218_v63 = vadd.f32 %v6217_v2, %v6009_v32  ;;  %v5803_v28 = vadd.f32 %v15021_v45, %v5802_v22 }
 0xa61   :  { %v6311_v19 = vmax.f32 %v6218_v63, 0.0  ;;  %v6238_v0 = vpop.f32.mrf.mxu3 }
 0xa63   :  { %v6428_v6 = vsel %vm5145_vm14, %v6311_v19, 0.0 }
 0xa64   :  { %v6429_v31 = vadd.f32 %v6428_v6, %v6427_v62  ;;  %v6011_v54 = vpop.f32.mrf.mxu2 }
 0xa65   :  { %v6012_v51 = vadd.f32 %v6011_v54, %v5803_v28 }
 0xa66   :  { %v5805_v24 = vpop.f32.mrf.mxu1 }
 0xa67   :  { %v6221_v20 = vadd.f32 %v6220_v14, %v6012_v51  ;;  %v5806_v3 = vadd.f32 %v15021_v45, %v5805_v24 }
 0xa69   :  { %v6312_v36 = vmax.f32 %v6221_v20, 0.0  ;;  %v6241_v38 = vpop.f32.mrf.mxu3 }
 0xa6b   :  { %v6430_v27 = vsel %vm5145_vm14, %v6312_v36, 0.0 }
 0xa6c   :  { %v6431_v9 = vadd.f32 %v6430_v27, %v6429_v31  ;;  %v6014_v5 = vpop.f32.mrf.mxu2 }
 0xa6d   :  { %v6015_v33 = vadd.f32 %v6014_v5, %v5806_v3 }
 0xa6e   :  { %v5808_v44 = vpop.f32.mrf.mxu1 }
 0xa6f   :  { %v6224_v2 = vadd.f32 %v6223_v4, %v6015_v33  ;;  %v5809_v43 = vadd.f32 %v15021_v45, %v5808_v44 }
 0xa71   :  { %v6313_v15 = vmax.f32 %v6224_v2, 0.0  ;;  %v6244_v41 = vpop.f32.mrf.mxu3 }
 0xa73   :  { %v6432_v46 = vsel %vm5145_vm14, %v6313_v15, 0.0 }
 0xa74   :  { %v6433_v25 = vadd.f32 %v6432_v46, %v6431_v9  ;;  %v6017_v42 = vpop.f32.mrf.mxu2 }
 0xa75   :  { %v6018_v21 = vadd.f32 %v6017_v42, %v5809_v43 }
 0xa76   :  { %v5811_v52 = vpop.f32.mrf.mxu1 }
 0xa77   :  { %v6227_v60 = vadd.f32 %v6226_v26, %v6018_v21  ;;  %v5812_v53 = vadd.f32 %v15021_v45, %v5811_v52 }
 0xa79   :  { %v6314_v17 = vmax.f32 %v6227_v60, 0.0  ;;  %v6247_v39 = vpop.f32.mrf.mxu3 }
 0xa7b   :  { %v6434_v12 = vsel %vm5145_vm14, %v6314_v17, 0.0 }
 0xa7c   :  { %v6435_v8 = vadd.f32 %v6434_v12, %v6433_v25  ;;  %v6020_v10 = vpop.f32.mrf.mxu2 }
 0xa7d   :  { %v6021_v61 = vadd.f32 %v6020_v10, %v5812_v53  ;;  %v6389_v53 = vrot.slane %v14914_v59, 4 }
 0xa7e   :  { %v5814_v13 = vpop.f32.mrf.mxu1 }
 0xa7f   :  { %v5815_v57 = vadd.f32 %v15021_v45, %v5814_v13  ;;  %v6230_v56 = vadd.f32 %v6229_v11, %v6021_v61 }
 0xa81   :  { %v6250_v4 = vpop.f32.mrf.mxu3  ;;  %v6315_v6 = vmax.f32 %v6230_v56, 0.0 }
 0xa83   :  { %v6436_v27 = vsel %vm5145_vm14, %v6315_v6, 0.0 }
 0xa84   :  { %v6023_v55 = vpop.f32.mrf.mxu2  ;;  %v6437_v42 = vadd.f32 %v6436_v27, %v6435_v8 }
 0xa85   :  { %v6024_v7 = vadd.f32 %v6023_v55, %v5815_v57 }
 0xa86   :  { %v5817_v23 = vpop.f32.mrf.mxu1 }
 0xa87   :  { %v5818_v47 = vadd.f32 %v15021_v45, %v5817_v23  ;;  %v6233_v22 = vadd.f32 %v6232_v40, %v6024_v7 }
 0xa89   :  { %v6253_v51 = vpop.f32.mrf.mxu3  ;;  %v6316_v24 = vmax.f32 %v6233_v22, 0.0  ;;  %v6390_v22 = vadd.f32 %v6389_v53, %v14914_v59 }
 0xa8b   :  { %v6438_v2 = vsel %vm5145_vm14, %v6316_v24, 0.0 }
 0xa8c   :  { %v6026_v50 = vpop.f32.mrf.mxu2  ;;  %v6439_v12 = vadd.f32 %v6438_v2, %v6437_v42  ;;  %v7630_v42 = vld [vmem:[%s15191_s6] ss:$0 sm:$0xff] }
 0xa8d   :  { %v6027_v48 = vadd.f32 %v6026_v50, %v5818_v47 }
 0xa8e   :  { %v5820_v14 = vpop.f32.mrf.mxu1 }
 0xa8f   :  { %v5821_v32 = vadd.f32 %v15021_v45, %v5820_v14  ;;  %v6236_v28 = vadd.f32 %v6235_v30, %v6027_v48 }
 0xa91   :  { %v6317_v9 = vmax.f32 %v6236_v28, 0.0 }
 0xa93   :  { %v6440_v21 = vsel %vm5145_vm14, %v6317_v9, 0.0 }
 0xa94   :  { %v6029_v1 = vpop.f32.mrf.mxu2 }
 0xa95   :  { %v6030_v26 = vadd.f32 %v6029_v1, %v5821_v32 }
 0xa96   :  { %v5823_v18 = vpop.f32.mrf.mxu1 }
 0xa97   :  { %v5824_v19 = vadd.f32 %v15021_v45, %v5823_v18  ;;  %v6239_v20 = vadd.f32 %v6238_v0, %v6030_v26  ;;  %v6441_v0 = vadd.f32 %v6440_v21, %v6439_v12  ;;  %v7921_v18 = vmov 256.0  }
 0xa98   :  { %7631 = vrcp.f32 %v7921_v18 }
 0xa99   :  { %v6318_v46 = vmax.f32 %v6239_v20, 0.0 }
 0xa9b   :  { %v6442_v30 = vsel %vm5145_vm14, %v6318_v46, 0.0 }
 0xa9c   :  { %v6032_v35 = vpop.f32.mrf.mxu2  ;;  %v6443_v1 = vadd.f32 %v6442_v30, %v6441_v0 }
 0xa9d   :  { %v6033_v31 = vadd.f32 %v6032_v35, %v5824_v19 }
 0xa9e   :  { %v5826_v16 = vpop.f32.mrf.mxu1  ;;  %v7632_v7 = vpop.eup %7631 }
 0xa9f   :  { %v5827_v54 = vadd.f32 %v15021_v45, %v5826_v16  ;;  %v6242_v5 = vadd.f32 %v6241_v38, %v6033_v31  ;;  %v6465_v6 = vmul.f32 256.0, %v7632_v7  ;;  %vm6469_vm0 = vweird.f32 %v7632_v7 }
 0xaa1   :  { %v6319_v52 = vmax.f32 %v6242_v5, 0.0  ;;  %v6466_v24 = vsub.f32 1.0, %v6465_v6 }
 0xaa2   :  { %v6256_v10 = vpop.f32.mrf.mxu3 }
 0xaa3   :  { %v6444_v34 = vsel %vm5145_vm14, %v6319_v52, 0.0  ;;  %v6467_v27 = vmul.f32 %v7632_v7, %v6466_v24 }
 0xaa4   :  { %v6035_v29 = vpop.f32.mrf.mxu2 }
 0xaa5   :  { %v6036_v36 = vadd.f32 %v6035_v29, %v5827_v54  ;;  %v6445_v29 = vadd.f32 %v6444_v34, %v6443_v1  ;;  %v6391_v54 = vrot.slane %v6390_v22, 2  ;;  %v6468_v59 = vadd.f32 %v7632_v7, %v6467_v27 }
 0xaa6   :  { %v5829_v49 = vpop.f32.mrf.mxu1 }
 0xaa7   :  { %v5830_v11 = vadd.f32 %v15021_v45, %v5829_v49  ;;  %v6245_v43 = vadd.f32 %v6244_v41, %v6036_v36  ;;  %v6392_v36 = vadd.f32 %v6391_v54, %v6390_v22 }
 0xaa9   :  { %v6320_v13 = vmax.f32 %v6245_v43, 0.0  ;;  %v6393_v9 = vrot.slane %v6392_v36, 1 }
 0xaab   :  { %v6446_v41 = vsel %vm5145_vm14, %v6320_v13, 0.0  ;;  %v6394_v2 = vadd.f32 %v6393_v9, %v6392_v36 }
 0xaac   :  { %v6038_v37 = vpop.f32.mrf.mxu2 }
 0xaad   :  { %v6039_v33 = vadd.f32 %v6038_v37, %v5830_v11 }
 0xaae   :  { %v5832_v58 = vpop.f32.mrf.mxu1 }
 0xaaf   :  { %v5833_v44 = vadd.f32 %v15021_v45, %v5832_v58  ;;  %v6248_v60 = vadd.f32 %v6247_v39, %v6039_v33  ;;  %v6447_v58 = vadd.f32 %v6446_v41, %v6445_v29 }
 0xab1   :  { %v6321_v14 = vmax.f32 %v6248_v60, 0.0 }
 0xab3   :  { %v6448_v49 = vsel %vm5145_vm14, %v6321_v14, 0.0 }
 0xab4   :  { %v6041_v62 = vpop.f32.mrf.mxu2  ;;  %v6449_v47 = vadd.f32 %v6448_v49, %v6447_v58 }
 0xab5   :  { %v6042_v40 = vadd.f32 %v6041_v62, %v5833_v44  ;;  %v6259_v62 = vpop.f32.mrf.mxu3 }
 0xab6   :  { %v5835_v63 = vpop.f32.mrf.mxu1 }
 0xab7   :  { %v5836_v25 = vadd.f32 %v15021_v45, %v5835_v63  ;;  %v6251_v55 = vadd.f32 %v6250_v4, %v6042_v40 }
 0xab9   :  { %v6322_v35 = vmax.f32 %v6251_v55, 0.0 }
 0xabb   :  { %v6450_v4 = vsel %vm5145_vm14, %v6322_v35, 0.0 }
 0xabc   :  { %v6044_v3 = vpop.f32.mrf.mxu2  ;;  %v6451_v63 = vadd.f32 %v6450_v4, %v6449_v47 }
 0xabd   :  { %v6045_v17 = vadd.f32 %v6044_v3, %v5836_v25 }
 0xabe   :  { %v5838_v15 = vpop.f32.mrf.mxu1 }
 0xabf   :  { %v5839_v23 = vadd.f32 %v15021_v45, %v5838_v15  ;;  %v6254_v38 = vadd.f32 %v6253_v51, %v6045_v17  ;;  %v6470_v15 = vsel %vm6469_vm0, %v7632_v7, %v6468_v59 }
 0xac0   :  { %v6471_v43 = vmul.f32 %v6470_v15, %v6394_v2 }
 0xac1   :  { %v6323_v37 = vmax.f32 %v6254_v38, 0.0 }
 0xac3   :  { %v6452_v48 = vsel %vm5145_vm14, %v6323_v37, 0.0 }
 0xac4   :  { %v6047_v50 = vpop.f32.mrf.mxu2  ;;  %v6453_v28 = vadd.f32 %v6452_v48, %v6451_v63 }
 0xac5   :  { %v6048_v8 = vadd.f32 %v6047_v50, %v5839_v23 }
 0xac6   :  { %v5841_v39 = vpop.f32.mrf.mxu1 }
 0xac7   :  { %v6257_v16 = vadd.f32 %v6256_v10, %v6048_v8  ;;  %v5842_v61 = vadd.f32 %v15021_v45, %v5841_v39 }
 0xac9   :  { %v6324_v57 = vmax.f32 %v6257_v16, 0.0 }
 0xacb   :  { %v6454_v26 = vsel %vm5145_vm14, %v6324_v57, 0.0 }
 0xacc   :  { %v6050_v56 = vpop.f32.mrf.mxu2  ;;  %v6455_v51 = vadd.f32 %v6454_v26, %v6453_v28 }
 0xacd   :  { %v6051_v32 = vadd.f32 %v6050_v56, %v5842_v61 }
 0xacf   :  { %v6260_v19 = vadd.f32 %v6259_v62, %v6051_v32 }
 0xad1   :  { %v6325_v31 = vmax.f32 %v6260_v19, 0.0 }
 0xad3   :  { %v6456_v45 = vsel %vm5145_vm14, %v6325_v31, 0.0 }
 0xad4   :  { %v6457_v20 = vadd.f32 %v6456_v45, %v6455_v51 }
 0xad6   :  { %v6458_v11 = vrot.slane %v6457_v20, 4 }
 0xad8   :  { %v6459_v3 = vadd.f32 %v6458_v11, %v6457_v20 }
 0xada   :  { %v6460_v5 = vrot.slane %v6459_v3, 2 }
 0xadc   :  { %v6461_v33 = vadd.f32 %v6460_v5, %v6459_v3 }
 0xade   :  { %v6462_v44 = vrot.slane %v6461_v33, 1 }
 0xae0   :  { %v6463_v46 = vadd.f32 %v6462_v44, %v6461_v33 }
 0xae2   :  { %v6472_v40 = vmul.f32 %v6470_v15, %v6463_v46 }
 0xae4   :  { %v6488_v25 = vsel %vm6487_vm1, %v6472_v40, %v6471_v43 }
 0xae5   :  { %6658 = vmatmul.msk.f32.vlgmr.msrb.gmra.mxu0 %vm5145_vm14, %v6488_v25 }
 0xb62   :  { %v6508_v21 = vpop.f32.mrf.mxu0 }
 0xb63   :  { %v6509_v52 = vadd.f32 %v7630_v42, %v6508_v21 }
 0xb65   :  { %6512 = vst.msk [vmem:[#allocation3] sm:$0x3] %vm6511_vm2, %v6509_v52 }
 0xb66   :  { %6523 = dma.vmem_to_hbm [thread:$0]  %s6519_s30, 32, %s6521_s10, [#allocation4]  }
 0xb67   :  { %7907 = dma.done.wait [#allocation4], 32  }
 0xb68   :  { %7908 = vsyncadd [#allocation4], 4294967264 }
 0xb69   :  { %6528 = vsyncpa [#allocation4], 1 }

</bundles_post_ra>
